<compile_context>
chip_gen: v5e
topology: v5e:2x2
jax: 0.10.0
libtpu: 0.0.40
codegen_flags: <defaults>
</compile_context>

<pallas_src>
import functools
import math

import jax
import jax.numpy as jnp
from jax.experimental import pallas as pl
from jax.experimental.pallas import tpu as pltpu

# -------------------- small synthetic config --------------------
IMG = 32          # input image size
IN_CH = 3
PATCH = 4
EMBED = 32        # embed dim of stage 0
DEPTHS = (2, 2)
HEADS = (2, 4)
WINDOW = 4
MLP_RATIO = 2.0
CPB_HIDDEN = 64   # hidden size of the continuous-position-bias MLP
NUM_FEATURES = EMBED * (2 ** (len(DEPTHS) - 1))


# ============================ in-kernel helpers ============================

def _ln_rows(x, g, b, eps=1e-5):
    """LayerNorm over the last dim of a (rows, D) f32 value; g/b are (1, D)."""
    mu = jnp.mean(x, axis=-1, keepdims=True)
    var = jnp.mean(jnp.square(x - mu), axis=-1, keepdims=True)
    return (x - mu) * jax.lax.rsqrt(var + eps) * g + b


def _row_tile(m, cap=1024):
    """Largest multiple-of-8 divisor of m <= cap, keeping >=2 grid steps."""
    target = min(cap, m)
    if m >= 16:
        target = min(target, m // 2)   # >=2 parallel steps (v7x has 2 TCs)
    best = None
    t = 8
    while t <= target:
        if m % t == 0:
            best = t
        t += 8
    return best if best is not None else m


def _pick_group(batch):
    """Images per Swin-block grid step: maximize work while keeping >=2 steps."""
    g = max(1, batch // 2)
    while g > 1 and batch % g != 0:
        g -= 1
    return g


# ============================ Pallas kernels ============================

def _linear_ln_kernel(x_ref, w_ref, b_ref, g_ref, bt_ref, o_ref):
    """o = LN(x @ w + b).  bf16 operands, f32 accumulate, bf16 store."""
    y = jnp.dot(x_ref[...], w_ref[...],
                preferred_element_type=jnp.float32) + b_ref[...]
    o_ref[...] = _ln_rows(y, g_ref[...], bt_ref[...]).astype(o_ref.dtype)


def pallas_linear_ln(x, w, b, g, bt):
    """Row-tiled fused linear + LayerNorm.  x/w bf16; b/g/bt are (1, N) f32."""
    M, K = x.shape
    N = w.shape[1]
    tm = _row_tile(M)
    return pl.pallas_call(
        _linear_ln_kernel,
        out_shape=jax.ShapeDtypeStruct((M, N), jnp.bfloat16),
        grid=(M // tm,),
        in_specs=[
            pl.BlockSpec((tm, K), lambda i: (i, 0)),
            pl.BlockSpec((K, N), lambda i: (0, 0)),
            pl.BlockSpec((1, N), lambda i: (0, 0)),
            pl.BlockSpec((1, N), lambda i: (0, 0)),
            pl.BlockSpec((1, N), lambda i: (0, 0)),
        ],
        out_specs=pl.BlockSpec((tm, N), lambda i: (i, 0)),
        compiler_params=pltpu.CompilerParams(dimension_semantics=("parallel",)),
    )(x, w, b, g, bt)


def _swin_block_kernel(x_ref, wqkv_ref, bqkv_ref, ls_ref, relb_ref, mask_ref,
                       wproj_ref, bproj_ref, g1_ref, bt1_ref,
                       wfc1_ref, bfc1_ref, wfc2_ref, bfc2_ref, g2_ref, bt2_ref,
                       o_ref, *, num_heads, H, W, ws, shift, G):
    """One whole SwinV2 block for G images; shift/partition/reverse in VMEM.

    y   = x + LN1(proj(cos_attn(qkv(x))))
    out = y + LN2(fc2(gelu(fc1(y))))        all intermediates stay in VMEM.
    """
    C = x_ref.shape[-1]
    N = ws * ws
    nWh, nWw = H // ws, W // ws
    nW = nWh * nWw
    WB = G * nW
    rows = WB * N
    Dh = C // num_heads

    # ---- in-VMEM cyclic shift + window partition (no HBM layout passes) ----
    xs = x_ref[...].reshape(G, H, W, C)                       # bf16
    if shift > 0:
        xs = jnp.concatenate([xs[:, shift:], xs[:, :shift]], axis=1)
        xs = jnp.concatenate([xs[:, :, shift:], xs[:, :, :shift]], axis=2)
    wins = []
    for g in range(G):
        for wi in range(nWh):
            for wj in range(nWw):
                wins.append(xs[g, wi * ws:(wi + 1) * ws,
                               wj * ws:(wj + 1) * ws, :].reshape(N, C))
    xp = jnp.concatenate(wins, axis=0)                        # (rows, C) window order
    xpf = xp.astype(jnp.float32)

    # ---- fused QKV projection (bf16 MXU, f32 accumulate) ----
    qkv = jnp.dot(xp, wqkv_ref[...],
                  preferred_element_type=jnp.float32) + bqkv_ref[...]

    ls = ls_ref[...]                                          # (1, C) exp'd logit scale
    relb = relb_ref[...].astype(jnp.float32)                  # (heads, N, N)
    mask = mask_ref[...].astype(jnp.float32)                  # (WB, N, N)
    wproj = wproj_ref[...]                                    # (C, C) bf16

    # ---- per-head cosine attention; accumulate into the output projection ----
    acc = jnp.zeros((rows, C), jnp.float32)
    for h in range(num_heads):
        q = qkv[:, h * Dh:(h + 1) * Dh]
        k = qkv[:, C + h * Dh:C + (h + 1) * Dh]
        v = qkv[:, 2 * C + h * Dh:2 * C + (h + 1) * Dh]
        qn = q * jax.lax.rsqrt(jnp.sum(q * q, axis=-1, keepdims=True) + 1e-12)
        kn = k * jax.lax.rsqrt(jnp.sum(k * k, axis=-1, keepdims=True) + 1e-12)
        qn = qn * ls[:, h * Dh:(h + 1) * Dh]                  # fold logit scale into q
        qw = qn.reshape(WB, N, Dh).astype(jnp.bfloat16)
        kw = kn.reshape(WB, N, Dh).astype(jnp.bfloat16)
        vw = v.reshape(WB, N, Dh).astype(jnp.bfloat16)

        attn = jnp.einsum("wnd,wmd->wnm", qw, kw,
                          preferred_element_type=jnp.float32)
        attn = attn + relb[h] + mask
        attn = attn - jnp.max(attn, axis=-1, keepdims=True)
        p = jnp.exp(attn)
        p = p * pl.reciprocal(jnp.sum(p, axis=-1, keepdims=True), approx=True)

        o = jnp.einsum("wnm,wmd->wnd", p.astype(jnp.bfloat16), vw,
                       preferred_element_type=jnp.float32)
        acc = acc + jnp.dot(o.reshape(rows, Dh).astype(jnp.bfloat16),
                            wproj[h * Dh:(h + 1) * Dh, :],
                            preferred_element_type=jnp.float32)
    proj = acc + bproj_ref[...]

    # ---- SwinV2 res-post-norm + residual ----
    y = xpf + _ln_rows(proj, g1_ref[...], bt1_ref[...])

    # ---- fused MLP (fc1 + GELU + fc2) + post-norm + residual ----
    # TODO(synk): timm SwinV2 uses exact-erf GELU; tanh approximation used for
    # Mosaic-safe lowering (numerical difference is tiny).
    h1 = jnp.dot(y.astype(jnp.bfloat16), wfc1_ref[...],
                 preferred_element_type=jnp.float32) + bfc1_ref[...]
    h1 = jax.nn.gelu(h1, approximate=True)
    h2 = jnp.dot(h1.astype(jnp.bfloat16), wfc2_ref[...],
                 preferred_element_type=jnp.float32) + bfc2_ref[...]
    out = (y + _ln_rows(h2, g2_ref[...], bt2_ref[...])).astype(jnp.bfloat16)

    # ---- in-VMEM window reverse + un-shift; bf16 lane-minor store ----
    ow = out.reshape(WB, N, C)
    imgs = []
    for g in range(G):
        hrows = []
        for wi in range(nWh):
            blocks = [ow[g * nW + wi * nWw + wj].reshape(ws, ws, C)
                      for wj in range(nWw)]
            hrows.append(jnp.concatenate(blocks, axis=1) if nWw > 1 else blocks[0])
        imgs.append(jnp.concatenate(hrows, axis=0) if nWh > 1 else hrows[0])
    ys = jnp.stack(imgs, axis=0)                              # (G, H, W, C)
    if shift > 0:
        ys = jnp.concatenate([ys[:, H - shift:], ys[:, :H - shift]], axis=1)
        ys = jnp.concatenate([ys[:, :, W - shift:], ys[:, :, :W - shift]], axis=2)
    o_ref[...] = ys.reshape(G * H * W, C)


def pallas_swin_block(x2, p, num_heads, H, W, ws, shift, G):
    """x2: (B*H*W, C) bf16 token slab -> fused Swin block, grid over image groups."""
    BHW, C = x2.shape
    B = BHW // (H * W)
    steps = B // G
    rows = G * H * W
    nW = (H // ws) * (W // ws)
    N = ws * ws
    WB = G * nW
    hidden = p["w_fc1"].shape[1]
    mask = p["mask"]
    if G > 1:
        mask = jnp.tile(mask, (G, 1, 1))
    kern = functools.partial(_swin_block_kernel, num_heads=num_heads,
                             H=H, W=W, ws=ws, shift=shift, G=G)
    return pl.pallas_call(
        kern,
        out_shape=jax.ShapeDtypeStruct((BHW, C), jnp.bfloat16),
        grid=(steps,),
        in_specs=[
            pl.BlockSpec((rows, C), lambda i: (i, 0)),                # x slab
            pl.BlockSpec((C, 3 * C), lambda i: (0, 0)),               # w_qkv (bf16)
            pl.BlockSpec((1, 3 * C), lambda i: (0, 0)),               # b_qkv
            pl.BlockSpec((1, C), lambda i: (0, 0)),                   # logit scale (lane-rep)
            pl.BlockSpec((num_heads, N, N), lambda i: (0, 0, 0)),     # rel-pos bias (bf16)
            pl.BlockSpec((WB, N, N), lambda i: (0, 0, 0)),            # shift mask (bf16)
            pl.BlockSpec((C, C), lambda i: (0, 0)),                   # w_proj (bf16)
            pl.BlockSpec((1, C), lambda i: (0, 0)),                   # b_proj
            pl.BlockSpec((1, C), lambda i: (0, 0)),                   # g1
            pl.BlockSpec((1, C), lambda i: (0, 0)),                   # bt1
            pl.BlockSpec((C, hidden), lambda i: (0, 0)),              # w_fc1 (bf16)
            pl.BlockSpec((1, hidden), lambda i: (0, 0)),              # b_fc1
            pl.BlockSpec((hidden, C), lambda i: (0, 0)),              # w_fc2 (bf16)
            pl.BlockSpec((1, C), lambda i: (0, 0)),                   # b_fc2
            pl.BlockSpec((1, C), lambda i: (0, 0)),                   # g2
            pl.BlockSpec((1, C), lambda i: (0, 0)),                   # bt2
        ],
        out_specs=pl.BlockSpec((rows, C), lambda i: (i, 0)),
        compiler_params=pltpu.CompilerParams(
            dimension_semantics=("parallel",),
            vmem_limit_bytes=32 * 1024 * 1024),
    )(x2, p["w_qkv"], p["b_qkv"], p["ls_lane"], p["rel_bias"], mask,
      p["w_proj"], p["b_proj"], p["g1"], p["bt1"],
      p["w_fc1"], p["b_fc1"], p["w_fc2"], p["b_fc2"], p["g2"], p["bt2"])


def _norm_pool_kernel(x_ref, g_ref, b_ref, o_ref):
    """Final LayerNorm + global average pool for one image."""
    x = x_ref[0].astype(jnp.float32)                 # (L, C)
    xn = _ln_rows(x, g_ref[...], b_ref[...])
    o_ref[0] = jnp.mean(xn, axis=0, keepdims=True)   # (1, C)


def pallas_norm_pool(x, g, b):
    B, L, C = x.shape
    y = pl.pallas_call(
        _norm_pool_kernel,
        out_shape=jax.ShapeDtypeStruct((B, 1, C), jnp.float32),
        grid=(B,),
        in_specs=[
            pl.BlockSpec((1, L, C), lambda i: (i, 0, 0)),
            pl.BlockSpec((1, C), lambda i: (0, 0)),
            pl.BlockSpec((1, C), lambda i: (0, 0)),
        ],
        out_specs=pl.BlockSpec((1, 1, C), lambda i: (i, 0, 0)),
        compiler_params=pltpu.CompilerParams(dimension_semantics=("parallel",)),
    )(x, g, b)
    return y.reshape(B, C)


# ============================ init-time helpers (plain JAX) ============================

def window_partition(x, ws):
    B, H, W, C = x.shape
    x = x.reshape(B, H // ws, ws, W // ws, ws, C)
    return x.transpose(0, 1, 3, 2, 4, 5).reshape(-1, ws * ws, C)


def make_cpb_inputs(ws):
    # relative coords table (SwinV2 log-spaced), and relative position index.
    r = jnp.arange(-(ws - 1), ws, dtype=jnp.float32)
    table = jnp.stack(jnp.meshgrid(r, r, indexing="ij"), axis=-1)  # (2w-1,2w-1,2)
    table = table / float(ws - 1)
    table = table * 8.0
    table = jnp.sign(table) * jnp.log2(jnp.abs(table) + 1.0) / math.log2(8.0)
    table = table.reshape(-1, 2)

    coords = jnp.stack(jnp.meshgrid(jnp.arange(ws), jnp.arange(ws), indexing="ij"))
    cf = coords.reshape(2, -1)
    rel = (cf[:, :, None] - cf[:, None, :]).transpose(1, 2, 0)  # (N,N,2)
    rel = rel.at[:, :, 0].add(ws - 1)
    rel = rel.at[:, :, 1].add(ws - 1)
    rel = rel.at[:, :, 0].multiply(2 * ws - 1)
    idx = rel.sum(-1)  # (N, N)
    return table, idx


def make_attn_mask(H, W, ws, shift):
    nW = (H // ws) * (W // ws)
    N = ws * ws
    if shift == 0:
        return jnp.zeros((nW, N, N), jnp.float32)
    img_mask = jnp.zeros((1, H, W, 1), jnp.float32)
    cnt = 0
    for hs in (slice(0, -ws), slice(-ws, -shift), slice(-shift, None)):
        for wsl in (slice(0, -ws), slice(-ws, -shift), slice(-shift, None)):
            img_mask = img_mask.at[:, hs, wsl, :].set(float(cnt))
            cnt += 1
    mw = window_partition(img_mask, ws).reshape(-1, N)
    am = mw[:, None, :] - mw[:, :, None]
    return jnp.where(am != 0, -100.0, 0.0)


# ============================ model forward ============================

def patch_embed(x, p):
    # x: (B, C, H, W) NCHW -> non-overlapping PATCHxPATCH patches -> linear + LN.
    # TODO(synk): the patchify transpose stays as XLA glue (tiny one-time pass);
    # it could be folded into the kernel's index_map for the full-size model.
    B, C, Hc, Wc = x.shape
    Hp, Wp = Hc // PATCH, Wc // PATCH
    patches = x.reshape(B, C, Hp, PATCH, Wp, PATCH)
    patches = patches.transpose(0, 2, 4, 1, 3, 5).reshape(B * Hp * Wp, C * PATCH * PATCH)
    y = pallas_linear_ln(patches.astype(jnp.bfloat16), p["w"], p["b"], p["g"], p["bt"])
    return y, Hp, Wp                                  # (B*Hp*Wp, EMBED) bf16


def patch_merging(x2, B, H, W, p):
    # TODO(synk): the 2x2 strided gather stays as (bf16) XLA glue; it could be
    # expressed as in-kernel slicing on a (1,H,W,C) block for the real model.
    C = x2.shape[-1]
    x = x2.reshape(B, H, W, C)
    x0 = x[:, 0::2, 0::2, :]
    x1 = x[:, 1::2, 0::2, :]
    xa = x[:, 0::2, 1::2, :]
    xb = x[:, 1::2, 1::2, :]
    xc = jnp.concatenate([x0, x1, xa, xb], axis=-1).reshape(-1, 4 * C)
    y = pallas_linear_ln(xc, p["w_red"], p["b0"], p["g"], p["b"])
    return y, H // 2, W // 2                          # (B*H*W/4, 2C) bf16


def swin_extractor_forward(x, params):
    """x: (B, 3, IMG, IMG) float32 NCHW -> (B, num_features)."""
    B = x.shape[0]
    G = _pick_group(B)
    x2, H, W = patch_embed(x, params["patch_embed"])
    for s in range(len(DEPTHS)):
        if s > 0:
            x2, H, W = patch_merging(x2, B, H, W, params["merge"][s - 1])
        ws = min(WINDOW, H)
        for d in range(DEPTHS[s]):
            shift = 0 if (d % 2 == 0 or ws >= H) else ws // 2
            x2 = pallas_swin_block(x2, params["stages"][s][d], HEADS[s],
                                   H, W, ws, shift, G)
    C = x2.shape[-1]
    return pallas_norm_pool(x2.reshape(B, H * W, C),
                            params["norm_g"], params["norm_b"])


# ============================ param init ============================

def init_params(key):
    keys = iter(jax.random.split(key, 512))

    def nrm(shape, std=0.02):
        return jax.random.normal(next(keys), shape, jnp.float32) * std

    def bf16w(shape, std=0.02):
        return nrm(shape, std).astype(jnp.bfloat16)

    params = {}
    params["patch_embed"] = dict(
        w=bf16w((IN_CH * PATCH * PATCH, EMBED)),
        b=jnp.zeros((1, EMBED), jnp.float32),
        g=jnp.ones((1, EMBED), jnp.float32),
        bt=jnp.zeros((1, EMBED), jnp.float32),
    )

    dims = [EMBED * (2 ** s) for s in range(len(DEPTHS))]
    reso = [(IMG // PATCH) // (2 ** s) for s in range(len(DEPTHS))]
    stages, merges = [], []
    for s in range(len(DEPTHS)):
        C, nh, H = dims[s], HEADS[s], reso[s]
        ws = min(WINDOW, H)
        N = ws * ws
        Dh = C // nh
        if s > 0:
            Cp = dims[s - 1]
            merges.append(dict(
                w_red=bf16w((4 * Cp, 2 * Cp)),
                b0=jnp.zeros((1, 2 * Cp), jnp.float32),   # SwinV2 reduction has no bias
                g=jnp.ones((1, 2 * Cp), jnp.float32),
                b=jnp.zeros((1, 2 * Cp), jnp.float32),
            ))
        table, idx = make_cpb_inputs(ws)
        hidden = int(C * MLP_RATIO)
        blocks = []
        for d in range(DEPTHS[s]):
            shift = 0 if (d % 2 == 0 or ws >= H) else ws // 2
            # qkv bias: q & v learned (zero-init); K slot kept but zero (SwinV2 has no K bias).
            b_qkv = jnp.zeros((1, 3 * C), jnp.float32)
            # continuous position bias MLP (2 -> hidden -> heads); precomputed (frozen inference)
            cpb_w1 = nrm((2, CPB_HIDDEN))
            cpb_b1 = jnp.zeros((CPB_HIDDEN,), jnp.float32)
            cpb_w2 = nrm((CPB_HIDDEN, nh))
            hcp = jnp.maximum(table @ cpb_w1 + cpb_b1, 0.0) @ cpb_w2
            rel_bias = 16.0 * jax.nn.sigmoid(
                hcp[idx.reshape(-1)].reshape(N, N, nh).transpose(2, 0, 1))   # (nh, N, N)
            mask = make_attn_mask(H, H, ws, shift)                           # (nW, N, N)
            # clamped + exp'd logit scale, repeated per head over its Dh lanes -> (1, C)
            logit_scale = jnp.full((nh,), math.log(10.0), jnp.float32)
            ls_lane = jnp.repeat(jnp.exp(jnp.minimum(logit_scale, math.log(1.0 / 0.01))),
                                 Dh).reshape(1, C)
            blocks.append(dict(
                w_qkv=bf16w((C, 3 * C)), b_qkv=b_qkv,
                w_proj=bf16w((C, C)), b_proj=jnp.zeros((1, C), jnp.float32),
                ls_lane=ls_lane,
                rel_bias=rel_bias.astype(jnp.bfloat16),
                mask=mask.astype(jnp.bfloat16),
                g1=jnp.ones((1, C), jnp.float32), bt1=jnp.zeros((1, C), jnp.float32),
                w_fc1=bf16w((C, hidden)), b_fc1=jnp.zeros((1, hidden), jnp.float32),
                w_fc2=bf16w((hidden, C)), b_fc2=jnp.zeros((1, C), jnp.float32),
                g2=jnp.ones((1, C), jnp.float32), bt2=jnp.zeros((1, C), jnp.float32),
            ))
        stages.append(blocks)
    params["stages"] = stages
    params["merge"] = merges
    params["norm_g"] = jnp.ones((1, dims[-1]), jnp.float32)
    params["norm_b"] = jnp.zeros((1, dims[-1]), jnp.float32)
    return params


# ============================ main ============================

if __name__ == "__main__":
    key = jax.random.PRNGKey(0)
    pkey, xkey = jax.random.split(key)
    params = init_params(pkey)
    x = jax.random.normal(xkey, (2, IN_CH, IMG, IMG), jnp.float32)  # NCHW, like PyTorch

    fwd = jax.jit(swin_extractor_forward)
    out = fwd(x, params)
    jax.block_until_ready(out)

    assert out.shape == (2, NUM_FEATURES), out.shape
    assert bool(jnp.all(jnp.isfinite(out)))
    print("KERNEL_OK")
</pallas_src>

<mosaic_0001>
module attributes {stable_mosaic.version = 11 : i64} {
  func.func @_linear_ln_kernel(%arg0: i32, %arg1: memref<64x48xbf16, #tpu.memory_space<vmem>>, %arg2: memref<48x32xbf16, #tpu.memory_space<vmem>>, %arg3: memref<1x32xf32, #tpu.memory_space<vmem>>, %arg4: memref<1x32xf32, #tpu.memory_space<vmem>>, %arg5: memref<1x32xf32, #tpu.memory_space<vmem>>, %arg6: memref<64x32xbf16, #tpu.memory_space<vmem>>) attributes {dimension_semantics = [#tpu.dimension_semantics<parallel>], iteration_bounds = array<i64: 2>, scalar_prefetch = 0 : i64, scratch_operands = 0 : i64, tpu.core_type = #tpu.core_type<tc>, window_params = [{transform_indices = @transform_0, window_bounds = array<i64: 64, 48>}, {pipeline_mode = #tpu.pipeline_mode<synchronous>, transform_indices = @transform_1, window_bounds = array<i64: 48, 32>}, {pipeline_mode = #tpu.pipeline_mode<synchronous>, transform_indices = @transform_2, window_bounds = array<i64: 1, 32>}, {pipeline_mode = #tpu.pipeline_mode<synchronous>, transform_indices = @transform_3, window_bounds = array<i64: 1, 32>}, {pipeline_mode = #tpu.pipeline_mode<synchronous>, transform_indices = @transform_4, window_bounds = array<i64: 1, 32>}, {transform_indices = @transform_5, window_bounds = array<i64: 64, 32>}]} {
    %c0 = arith.constant 0 : index
    %c0_0 = arith.constant 0 : index
    %0 = vector.load %arg1[%c0, %c0_0] : memref<64x48xbf16, #tpu.memory_space<vmem>>, vector<64x48xbf16>
    %c0_1 = arith.constant 0 : index
    %c0_2 = arith.constant 0 : index
    %1 = vector.load %arg2[%c0_1, %c0_2] : memref<48x32xbf16, #tpu.memory_space<vmem>>, vector<48x32xbf16>
    %cst = arith.constant dense<0.000000e+00> : vector<64x32xf32>
    %2 = tpu.matmul %0, %1, %cst {dimension_numbers = #tpu.dot_dimension_numbers<[1], [0], [0], [1], [0, 0, 1, 1], [], []>} : vector<64x48xbf16>, vector<48x32xbf16>, vector<64x32xf32> -> vector<64x32xf32>
    %c0_3 = arith.constant 0 : index
    %c0_4 = arith.constant 0 : index
    %3 = vector.load %arg3[%c0_3, %c0_4] : memref<1x32xf32, #tpu.memory_space<vmem>>, vector<1x32xf32>
    %4 = vector.broadcast %3 : vector<1x32xf32> to vector<64x32xf32>
    %5 = arith.addf %2, %4 : vector<64x32xf32>
    %c0_5 = arith.constant 0 : index
    %c0_6 = arith.constant 0 : index
    %6 = vector.load %arg4[%c0_5, %c0_6] : memref<1x32xf32, #tpu.memory_space<vmem>>, vector<1x32xf32>
    %c0_7 = arith.constant 0 : index
    %c0_8 = arith.constant 0 : index
    %7 = vector.load %arg5[%c0_7, %c0_8] : memref<1x32xf32, #tpu.memory_space<vmem>>, vector<1x32xf32>
    %cst_9 = arith.constant dense<0.000000e+00> : vector<64xf32>
    %8 = vector.multi_reduction <add>, %5, %cst_9 [1] : vector<64x32xf32> to vector<64xf32>
    %9 = vector.shape_cast %8 : vector<64xf32> to vector<64x1xf32>
    %cst_10 = arith.constant 3.200000e+01 : f32
    %10 = vector.broadcast %cst_10 : f32 to vector<64x1xf32>
    %11 = arith.divf %9, %10 : vector<64x1xf32>
    %12 = vector.broadcast %11 : vector<64x1xf32> to vector<64x32xf32>
    %13 = arith.subf %5, %12 : vector<64x32xf32>
    %14 = arith.mulf %13, %13 : vector<64x32xf32>
    %cst_11 = arith.constant dense<0.000000e+00> : vector<64xf32>
    %15 = vector.multi_reduction <add>, %14, %cst_11 [1] : vector<64x32xf32> to vector<64xf32>
    %16 = vector.shape_cast %15 : vector<64xf32> to vector<64x1xf32>
    %cst_12 = arith.constant 3.200000e+01 : f32
    %17 = vector.broadcast %cst_12 : f32 to vector<64x1xf32>
    %18 = arith.divf %16, %17 : vector<64x1xf32>
    %19 = vector.broadcast %11 : vector<64x1xf32> to vector<64x32xf32>
    %20 = arith.subf %5, %19 : vector<64x32xf32>
    %cst_13 = arith.constant 9.99999974E-6 : f32
    %21 = vector.broadcast %cst_13 : f32 to vector<64x1xf32>
    %22 = arith.addf %18, %21 : vector<64x1xf32>
    %23 = math.rsqrt %22 : vector<64x1xf32>
    %24 = vector.broadcast %23 : vector<64x1xf32> to vector<64x32xf32>
    %25 = arith.mulf %20, %24 : vector<64x32xf32>
    %26 = vector.broadcast %6 : vector<1x32xf32> to vector<64x32xf32>
    %27 = arith.mulf %25, %26 : vector<64x32xf32>
    %28 = vector.broadcast %7 : vector<1x32xf32> to vector<64x32xf32>
    %29 = arith.addf %27, %28 : vector<64x32xf32>
    %30 = arith.truncf %29 : vector<64x32xf32> to vector<64x32xbf16>
    %c0_14 = arith.constant 0 : index
    %c0_15 = arith.constant 0 : index
    %31 = vector.load %arg6[%c0_14, %c0_15] : memref<64x32xbf16, #tpu.memory_space<vmem>>, vector<64x32xbf16>
    tpu.vector_store %arg6[%c0_14, %c0_15], %30 {strides = array<i32>} : memref<64x32xbf16, #tpu.memory_space<vmem>>, vector<64x32xbf16>,
    return
  }
  func.func @transform_0(%arg0: i32) -> (i32, i32) {
    %c0_i32 = arith.constant 0 : i32
    %c0_i32_0 = arith.constant 0 : i32
    return %arg0, %c0_i32 : i32, i32
  }
  func.func @transform_1(%arg0: i32) -> (i32, i32) {
    %c0_i32 = arith.constant 0 : i32
    %c0_i32_0 = arith.constant 0 : i32
    %c0_i32_1 = arith.constant 0 : i32
    return %c0_i32, %c0_i32_0 : i32, i32
  }
  func.func @transform_2(%arg0: i32) -> (i32, i32) {
    %c0_i32 = arith.constant 0 : i32
    %c0_i32_0 = arith.constant 0 : i32
    %c0_i32_1 = arith.constant 0 : i32
    return %c0_i32, %c0_i32_0 : i32, i32
  }
  func.func @transform_3(%arg0: i32) -> (i32, i32) {
    %c0_i32 = arith.constant 0 : i32
    %c0_i32_0 = arith.constant 0 : i32
    %c0_i32_1 = arith.constant 0 : i32
    return %c0_i32, %c0_i32_0 : i32, i32
  }
  func.func @transform_4(%arg0: i32) -> (i32, i32) {
    %c0_i32 = arith.constant 0 : i32
    %c0_i32_0 = arith.constant 0 : i32
    %c0_i32_1 = arith.constant 0 : i32
    return %c0_i32, %c0_i32_0 : i32, i32
  }
  func.func @transform_5(%arg0: i32) -> (i32, i32) {
    %c0_i32 = arith.constant 0 : i32
    %c0_i32_0 = arith.constant 0 : i32
    return %arg0, %c0_i32 : i32, i32
  }
}

module attributes {stable_mosaic.version = 11 : i64} {
  func.func @_swin_block_kernel(%arg0: i32, %arg1: memref<64x32xbf16, #tpu.memory_space<vmem>>, %arg2: memref<32x96xbf16, #tpu.memory_space<vmem>>, %arg3: memref<1x96xf32, #tpu.memory_space<vmem>>, %arg4: memref<1x32xf32, #tpu.memory_space<vmem>>, %arg5: memref<2x16x16xbf16, #tpu.memory_space<vmem>>, %arg6: memref<4x16x16xbf16, #tpu.memory_space<vmem>>, %arg7: memref<32x32xbf16, #tpu.memory_space<vmem>>, %arg8: memref<1x32xf32, #tpu.memory_space<vmem>>, %arg9: memref<1x32xf32, #tpu.memory_space<vmem>>, %arg10: memref<1x32xf32, #tpu.memory_space<vmem>>, %arg11: memref<32x64xbf16, #tpu.memory_space<vmem>>, %arg12: memref<1x64xf32, #tpu.memory_space<vmem>>, %arg13: memref<64x32xbf16, #tpu.memory_space<vmem>>, %arg14: memref<1x32xf32, #tpu.memory_space<vmem>>, %arg15: memref<1x32xf32, #tpu.memory_space<vmem>>, %arg16: memref<1x32xf32, #tpu.memory_space<vmem>>, %arg17: memref<64x32xbf16, #tpu.memory_space<vmem>>) attributes {dimension_semantics = [#tpu.dimension_semantics<parallel>], iteration_bounds = array<i64: 2>, scalar_prefetch = 0 : i64, scratch_operands = 0 : i64, tpu.core_type = #tpu.core_type<tc>, window_params = [{transform_indices = @transform_0, window_bounds = array<i64: 64, 32>}, {pipeline_mode = #tpu.pipeline_mode<synchronous>, transform_indices = @transform_1, window_bounds = array<i64: 32, 96>}, {pipeline_mode = #tpu.pipeline_mode<synchronous>, transform_indices = @transform_2, window_bounds = array<i64: 1, 96>}, {pipeline_mode = #tpu.pipeline_mode<synchronous>, transform_indices = @transform_3, window_bounds = array<i64: 1, 32>}, {pipeline_mode = #tpu.pipeline_mode<synchronous>, transform_indices = @transform_4, window_bounds = array<i64: 2, 16, 16>}, {pipeline_mode = #tpu.pipeline_mode<synchronous>, transform_indices = @transform_5, window_bounds = array<i64: 4, 16, 16>}, {pipeline_mode = #tpu.pipeline_mode<synchronous>, transform_indices = @transform_6, window_bounds = array<i64: 32, 32>}, {pipeline_mode = #tpu.pipeline_mode<synchronous>, transform_indices = @transform_7, window_bounds = array<i64: 1, 32>}, {pipeline_mode = #tpu.pipeline_mode<synchronous>, transform_indices = @transform_8, window_bounds = array<i64: 1, 32>}, {pipeline_mode = #tpu.pipeline_mode<synchronous>, transform_indices = @transform_9, window_bounds = array<i64: 1, 32>}, {pipeline_mode = #tpu.pipeline_mode<synchronous>, transform_indices = @transform_10, window_bounds = array<i64: 32, 64>}, {pipeline_mode = #tpu.pipeline_mode<synchronous>, transform_indices = @transform_11, window_bounds = array<i64: 1, 64>}, {pipeline_mode = #tpu.pipeline_mode<synchronous>, transform_indices = @transform_12, window_bounds = array<i64: 64, 32>}, {pipeline_mode = #tpu.pipeline_mode<synchronous>, transform_indices = @transform_13, window_bounds = array<i64: 1, 32>}, {pipeline_mode = #tpu.pipeline_mode<synchronous>, transform_indices = @transform_14, window_bounds = array<i64: 1, 32>}, {pipeline_mode = #tpu.pipeline_mode<synchronous>, transform_indices = @transform_15, window_bounds = array<i64: 1, 32>}, {transform_indices = @transform_16, window_bounds = array<i64: 64, 32>}]} {
    %c0 = arith.constant 0 : index
    %c0_0 = arith.constant 0 : index
    %0 = vector.load %arg1[%c0, %c0_0] : memref<64x32xbf16, #tpu.memory_space<vmem>>, vector<64x32xbf16>
    %1 = vector.shape_cast %0 : vector<64x32xbf16> to vector<1x8x8x32xbf16>
    %2 = vector.extract_strided_slice %1 {offsets = [0, 0, 0, 0], sizes = [1, 4, 4, 32], strides = [1, 1, 1, 1]} : vector<1x8x8x32xbf16> to vector<1x4x4x32xbf16>
    %3 = vector.shape_cast %2 : vector<1x4x4x32xbf16> to vector<4x4x32xbf16>
    %4 = vector.shape_cast %3 : vector<4x4x32xbf16> to vector<16x32xbf16>
    %5 = vector.extract_strided_slice %1 {offsets = [0, 0, 4, 0], sizes = [1, 4, 4, 32], strides = [1, 1, 1, 1]} : vector<1x8x8x32xbf16> to vector<1x4x4x32xbf16>
    %6 = vector.shape_cast %5 : vector<1x4x4x32xbf16> to vector<4x4x32xbf16>
    %7 = vector.shape_cast %6 : vector<4x4x32xbf16> to vector<16x32xbf16>
    %8 = vector.extract_strided_slice %1 {offsets = [0, 4, 0, 0], sizes = [1, 4, 4, 32], strides = [1, 1, 1, 1]} : vector<1x8x8x32xbf16> to vector<1x4x4x32xbf16>
    %9 = vector.shape_cast %8 : vector<1x4x4x32xbf16> to vector<4x4x32xbf16>
    %10 = vector.shape_cast %9 : vector<4x4x32xbf16> to vector<16x32xbf16>
    %11 = vector.extract_strided_slice %1 {offsets = [0, 4, 4, 0], sizes = [1, 4, 4, 32], strides = [1, 1, 1, 1]} : vector<1x8x8x32xbf16> to vector<1x4x4x32xbf16>
    %12 = vector.shape_cast %11 : vector<1x4x4x32xbf16> to vector<4x4x32xbf16>
    %13 = vector.shape_cast %12 : vector<4x4x32xbf16> to vector<16x32xbf16>
    %14 = tpu.concatenate %4, %7, %10, %13 in 0 : vector<16x32xbf16>, vector<16x32xbf16>, vector<16x32xbf16>, vector<16x32xbf16> -> vector<64x32xbf16>
    %15 = arith.extf %14 : vector<64x32xbf16> to vector<64x32xf32>
    %c0_1 = arith.constant 0 : index
    %c0_2 = arith.constant 0 : index
    %16 = vector.load %arg2[%c0_1, %c0_2] : memref<32x96xbf16, #tpu.memory_space<vmem>>, vector<32x96xbf16>
    %cst = arith.constant dense<0.000000e+00> : vector<64x96xf32>
    %17 = tpu.matmul %14, %16, %cst {dimension_numbers = #tpu.dot_dimension_numbers<[1], [0], [0], [1], [0, 0, 1, 1], [], []>} : vector<64x32xbf16>, vector<32x96xbf16>, vector<64x96xf32> -> vector<64x96xf32>
    %c0_3 = arith.constant 0 : index
    %c0_4 = arith.constant 0 : index
    %18 = vector.load %arg3[%c0_3, %c0_4] : memref<1x96xf32, #tpu.memory_space<vmem>>, vector<1x96xf32>
    %19 = vector.broadcast %18 : vector<1x96xf32> to vector<64x96xf32>
    %20 = arith.addf %17, %19 : vector<64x96xf32>
    %c0_5 = arith.constant 0 : index
    %c0_6 = arith.constant 0 : index
    %21 = vector.load %arg4[%c0_5, %c0_6] : memref<1x32xf32, #tpu.memory_space<vmem>>, vector<1x32xf32>
    %c0_7 = arith.constant 0 : index
    %c0_8 = arith.constant 0 : index
    %c0_9 = arith.constant 0 : index
    %22 = vector.load %arg5[%c0_7, %c0_8, %c0_9] : memref<2x16x16xbf16, #tpu.memory_space<vmem>>, vector<2x16x16xbf16>
    %23 = arith.extf %22 : vector<2x16x16xbf16> to vector<2x16x16xf32>
    %c0_10 = arith.constant 0 : index
    %c0_11 = arith.constant 0 : index
    %c0_12 = arith.constant 0 : index
    %24 = vector.load %arg6[%c0_10, %c0_11, %c0_12] : memref<4x16x16xbf16, #tpu.memory_space<vmem>>, vector<4x16x16xbf16>
    %25 = arith.extf %24 : vector<4x16x16xbf16> to vector<4x16x16xf32>
    %c0_13 = arith.constant 0 : index
    %c0_14 = arith.constant 0 : index
    %26 = vector.load %arg7[%c0_13, %c0_14] : memref<32x32xbf16, #tpu.memory_space<vmem>>, vector<32x32xbf16>
    %cst_15 = arith.constant 0.000000e+00 : f32
    %27 = vector.broadcast %cst_15 : f32 to vector<64x32xf32>
    %28 = vector.extract_strided_slice %20 {offsets = [0, 0], sizes = [64, 16], strides = [1, 1]} : vector<64x96xf32> to vector<64x16xf32>
    %29 = vector.extract_strided_slice %20 {offsets = [0, 32], sizes = [64, 16], strides = [1, 1]} : vector<64x96xf32> to vector<64x16xf32>
    %30 = vector.extract_strided_slice %20 {offsets = [0, 64], sizes = [64, 16], strides = [1, 1]} : vector<64x96xf32> to vector<64x16xf32>
    %31 = arith.mulf %28, %28 : vector<64x16xf32>
    %cst_16 = arith.constant dense<0.000000e+00> : vector<64xf32>
    %32 = vector.multi_reduction <add>, %31, %cst_16 [1] : vector<64x16xf32> to vector<64xf32>
    %33 = vector.shape_cast %32 : vector<64xf32> to vector<64x1xf32>
    %cst_17 = arith.constant 9.99999996E-13 : f32
    %34 = vector.broadcast %cst_17 : f32 to vector<64x1xf32>
    %35 = arith.addf %33, %34 : vector<64x1xf32>
    %36 = math.rsqrt %35 : vector<64x1xf32>
    %37 = vector.broadcast %36 : vector<64x1xf32> to vector<64x16xf32>
    %38 = arith.mulf %28, %37 : vector<64x16xf32>
    %39 = arith.mulf %29, %29 : vector<64x16xf32>
    %cst_18 = arith.constant dense<0.000000e+00> : vector<64xf32>
    %40 = vector.multi_reduction <add>, %39, %cst_18 [1] : vector<64x16xf32> to vector<64xf32>
    %41 = vector.shape_cast %40 : vector<64xf32> to vector<64x1xf32>
    %cst_19 = arith.constant 9.99999996E-13 : f32
    %42 = vector.broadcast %cst_19 : f32 to vector<64x1xf32>
    %43 = arith.addf %41, %42 : vector<64x1xf32>
    %44 = math.rsqrt %43 : vector<64x1xf32>
    %45 = vector.broadcast %44 : vector<64x1xf32> to vector<64x16xf32>
    %46 = arith.mulf %29, %45 : vector<64x16xf32>
    %47 = vector.extract_strided_slice %21 {offsets = [0, 0], sizes = [1, 16], strides = [1, 1]} : vector<1x32xf32> to vector<1x16xf32>
    %48 = vector.broadcast %47 : vector<1x16xf32> to vector<64x16xf32>
    %49 = arith.mulf %38, %48 : vector<64x16xf32>
    %50 = vector.shape_cast %49 : vector<64x16xf32> to vector<4x16x16xf32>
    %51 = arith.truncf %50 : vector<4x16x16xf32> to vector<4x16x16xbf16>
    %52 = vector.shape_cast %46 : vector<64x16xf32> to vector<4x16x16xf32>
    %53 = arith.truncf %52 : vector<4x16x16xf32> to vector<4x16x16xbf16>
    %54 = vector.shape_cast %30 : vector<64x16xf32> to vector<4x16x16xf32>
    %55 = arith.truncf %54 : vector<4x16x16xf32> to vector<4x16x16xbf16>
    "tpu.trace_start"() <{level = 10 : i32, message = "wnd,wmd->wnm"}> : () -> ()
    %cst_20 = arith.constant dense<0.000000e+00> : vector<4x16x16xf32>
    %56 = tpu.matmul %51, %53, %cst_20 {dimension_numbers = #tpu.dot_dimension_numbers<[2], [2], [1], [1], [0, 0, 0, 1, 1, 1], [0], [0]>} : vector<4x16x16xbf16>, vector<4x16x16xbf16>, vector<4x16x16xf32> -> vector<4x16x16xf32>
    "tpu.trace_stop"() : () -> ()
    %57 = vector.extract_strided_slice %23 {offsets = [0, 0, 0], sizes = [1, 16, 16], strides = [1, 1, 1]} : vector<2x16x16xf32> to vector<1x16x16xf32>
    %58 = vector.shape_cast %57 : vector<1x16x16xf32> to vector<16x16xf32>
    %59 = vector.shape_cast %58 : vector<16x16xf32> to vector<1x16x16xf32>
    %60 = vector.broadcast %59 : vector<1x16x16xf32> to vector<4x16x16xf32>
    %61 = arith.addf %56, %60 : vector<4x16x16xf32>
    %62 = arith.addf %61, %25 : vector<4x16x16xf32>
    %cst_21 = arith.constant dense<0xFF800000> : vector<4x16xf32>
    %63 = vector.multi_reduction <maximumf>, %62, %cst_21 [2] : vector<4x16x16xf32> to vector<4x16xf32>
    %64 = vector.shape_cast %63 : vector<4x16xf32> to vector<4x16x1xf32>
    %65 = vector.broadcast %64 : vector<4x16x1xf32> to vector<4x16x16xf32>
    %66 = arith.subf %62, %65 : vector<4x16x16xf32>
    %67 = math.exp %66 : vector<4x16x16xf32>
    %cst_22 = arith.constant dense<0.000000e+00> : vector<4x16xf32>
    %68 = vector.multi_reduction <add>, %67, %cst_22 [2] : vector<4x16x16xf32> to vector<4x16xf32>
    %69 = vector.shape_cast %68 : vector<4x16xf32> to vector<4x16x1xf32>
    %70 = tpu.reciprocal %69 {approx = true} : vector<4x16x1xf32> -> vector<4x16x1xf32>
    %71 = vector.broadcast %70 : vector<4x16x1xf32> to vector<4x16x16xf32>
    %72 = arith.mulf %67, %71 : vector<4x16x16xf32>
    %73 = arith.truncf %72 : vector<4x16x16xf32> to vector<4x16x16xbf16>
    "tpu.trace_start"() <{level = 10 : i32, message = "wnm,wmd->wnd"}> : () -> ()
    %cst_23 = arith.constant dense<0.000000e+00> : vector<4x16x16xf32>
    %74 = tpu.matmul %73, %55, %cst_23 {dimension_numbers = #tpu.dot_dimension_numbers<[2], [1], [1], [2], [0, 0, 0, 1, 1, 2], [0], [0]>} : vector<4x16x16xbf16>, vector<4x16x16xbf16>, vector<4x16x16xf32> -> vector<4x16x16xf32>
    "tpu.trace_stop"() : () -> ()
    %75 = vector.shape_cast %74 : vector<4x16x16xf32> to vector<64x16xf32>
    %76 = arith.truncf %75 : vector<64x16xf32> to vector<64x16xbf16>
    %77 = vector.extract_strided_slice %26 {offsets = [0, 0], sizes = [16, 32], strides = [1, 1]} : vector<32x32xbf16> to vector<16x32xbf16>
    %cst_24 = arith.constant dense<0.000000e+00> : vector<64x32xf32>
    %78 = tpu.matmul %76, %77, %cst_24 {dimension_numbers = #tpu.dot_dimension_numbers<[1], [0], [0], [1], [0, 0, 1, 1], [], []>} : vector<64x16xbf16>, vector<16x32xbf16>, vector<64x32xf32> -> vector<64x32xf32>
    %79 = arith.addf %27, %78 : vector<64x32xf32>
    %80 = vector.extract_strided_slice %20 {offsets = [0, 16], sizes = [64, 16], strides = [1, 1]} : vector<64x96xf32> to vector<64x16xf32>
    %81 = vector.extract_strided_slice %20 {offsets = [0, 48], sizes = [64, 16], strides = [1, 1]} : vector<64x96xf32> to vector<64x16xf32>
    %82 = vector.extract_strided_slice %20 {offsets = [0, 80], sizes = [64, 16], strides = [1, 1]} : vector<64x96xf32> to vector<64x16xf32>
    %83 = arith.mulf %80, %80 : vector<64x16xf32>
    %cst_25 = arith.constant dense<0.000000e+00> : vector<64xf32>
    %84 = vector.multi_reduction <add>, %83, %cst_25 [1] : vector<64x16xf32> to vector<64xf32>
    %85 = vector.shape_cast %84 : vector<64xf32> to vector<64x1xf32>
    %cst_26 = arith.constant 9.99999996E-13 : f32
    %86 = vector.broadcast %cst_26 : f32 to vector<64x1xf32>
    %87 = arith.addf %85, %86 : vector<64x1xf32>
    %88 = math.rsqrt %87 : vector<64x1xf32>
    %89 = vector.broadcast %88 : vector<64x1xf32> to vector<64x16xf32>
    %90 = arith.mulf %80, %89 : vector<64x16xf32>
    %91 = arith.mulf %81, %81 : vector<64x16xf32>
    %cst_27 = arith.constant dense<0.000000e+00> : vector<64xf32>
    %92 = vector.multi_reduction <add>, %91, %cst_27 [1] : vector<64x16xf32> to vector<64xf32>
    %93 = vector.shape_cast %92 : vector<64xf32> to vector<64x1xf32>
    %cst_28 = arith.constant 9.99999996E-13 : f32
    %94 = vector.broadcast %cst_28 : f32 to vector<64x1xf32>
    %95 = arith.addf %93, %94 : vector<64x1xf32>
    %96 = math.rsqrt %95 : vector<64x1xf32>
    %97 = vector.broadcast %96 : vector<64x1xf32> to vector<64x16xf32>
    %98 = arith.mulf %81, %97 : vector<64x16xf32>
    %99 = vector.extract_strided_slice %21 {offsets = [0, 16], sizes = [1, 16], strides = [1, 1]} : vector<1x32xf32> to vector<1x16xf32>
    %100 = vector.broadcast %99 : vector<1x16xf32> to vector<64x16xf32>
    %101 = arith.mulf %90, %100 : vector<64x16xf32>
    %102 = vector.shape_cast %101 : vector<64x16xf32> to vector<4x16x16xf32>
    %103 = arith.truncf %102 : vector<4x16x16xf32> to vector<4x16x16xbf16>
    %104 = vector.shape_cast %98 : vector<64x16xf32> to vector<4x16x16xf32>
    %105 = arith.truncf %104 : vector<4x16x16xf32> to vector<4x16x16xbf16>
    %106 = vector.shape_cast %82 : vector<64x16xf32> to vector<4x16x16xf32>
    %107 = arith.truncf %106 : vector<4x16x16xf32> to vector<4x16x16xbf16>
    "tpu.trace_start"() <{level = 10 : i32, message = "wnd,wmd->wnm"}> : () -> ()
    %cst_29 = arith.constant dense<0.000000e+00> : vector<4x16x16xf32>
    %108 = tpu.matmul %103, %105, %cst_29 {dimension_numbers = #tpu.dot_dimension_numbers<[2], [2], [1], [1], [0, 0, 0, 1, 1, 1], [0], [0]>} : vector<4x16x16xbf16>, vector<4x16x16xbf16>, vector<4x16x16xf32> -> vector<4x16x16xf32>
    "tpu.trace_stop"() : () -> ()
    %109 = vector.extract_strided_slice %23 {offsets = [1, 0, 0], sizes = [1, 16, 16], strides = [1, 1, 1]} : vector<2x16x16xf32> to vector<1x16x16xf32>
    %110 = vector.shape_cast %109 : vector<1x16x16xf32> to vector<16x16xf32>
    %111 = vector.shape_cast %110 : vector<16x16xf32> to vector<1x16x16xf32>
    %112 = vector.broadcast %111 : vector<1x16x16xf32> to vector<4x16x16xf32>
    %113 = arith.addf %108, %112 : vector<4x16x16xf32>
    %114 = arith.addf %113, %25 : vector<4x16x16xf32>
    %cst_30 = arith.constant dense<0xFF800000> : vector<4x16xf32>
    %115 = vector.multi_reduction <maximumf>, %114, %cst_30 [2] : vector<4x16x16xf32> to vector<4x16xf32>
    %116 = vector.shape_cast %115 : vector<4x16xf32> to vector<4x16x1xf32>
    %117 = vector.broadcast %116 : vector<4x16x1xf32> to vector<4x16x16xf32>
    %118 = arith.subf %114, %117 : vector<4x16x16xf32>
    %119 = math.exp %118 : vector<4x16x16xf32>
    %cst_31 = arith.constant dense<0.000000e+00> : vector<4x16xf32>
    %120 = vector.multi_reduction <add>, %119, %cst_31 [2] : vector<4x16x16xf32> to vector<4x16xf32>
    %121 = vector.shape_cast %120 : vector<4x16xf32> to vector<4x16x1xf32>
    %122 = tpu.reciprocal %121 {approx = true} : vector<4x16x1xf32> -> vector<4x16x1xf32>
    %123 = vector.broadcast %122 : vector<4x16x1xf32> to vector<4x16x16xf32>
    %124 = arith.mulf %119, %123 : vector<4x16x16xf32>
    %125 = arith.truncf %124 : vector<4x16x16xf32> to vector<4x16x16xbf16>
    "tpu.trace_start"() <{level = 10 : i32, message = "wnm,wmd->wnd"}> : () -> ()
    %cst_32 = arith.constant dense<0.000000e+00> : vector<4x16x16xf32>
    %126 = tpu.matmul %125, %107, %cst_32 {dimension_numbers = #tpu.dot_dimension_numbers<[2], [1], [1], [2], [0, 0, 0, 1, 1, 2], [0], [0]>} : vector<4x16x16xbf16>, vector<4x16x16xbf16>, vector<4x16x16xf32> -> vector<4x16x16xf32>
    "tpu.trace_stop"() : () -> ()
    %127 = vector.shape_cast %126 : vector<4x16x16xf32> to vector<64x16xf32>
    %128 = arith.truncf %127 : vector<64x16xf32> to vector<64x16xbf16>
    %129 = vector.extract_strided_slice %26 {offsets = [16, 0], sizes = [16, 32], strides = [1, 1]} : vector<32x32xbf16> to vector<16x32xbf16>
    %cst_33 = arith.constant dense<0.000000e+00> : vector<64x32xf32>
    %130 = tpu.matmul %128, %129, %cst_33 {dimension_numbers = #tpu.dot_dimension_numbers<[1], [0], [0], [1], [0, 0, 1, 1], [], []>} : vector<64x16xbf16>, vector<16x32xbf16>, vector<64x32xf32> -> vector<64x32xf32>
    %131 = arith.addf %79, %130 : vector<64x32xf32>
    %c0_34 = arith.constant 0 : index
    %c0_35 = arith.constant 0 : index
    %132 = vector.load %arg8[%c0_34, %c0_35] : memref<1x32xf32, #tpu.memory_space<vmem>>, vector<1x32xf32>
    %133 = vector.broadcast %132 : vector<1x32xf32> to vector<64x32xf32>
    %134 = arith.addf %131, %133 : vector<64x32xf32>
    %c0_36 = arith.constant 0 : index
    %c0_37 = arith.constant 0 : index
    %135 = vector.load %arg9[%c0_36, %c0_37] : memref<1x32xf32, #tpu.memory_space<vmem>>, vector<1x32xf32>
    %c0_38 = arith.constant 0 : index
    %c0_39 = arith.constant 0 : index
    %136 = vector.load %arg10[%c0_38, %c0_39] : memref<1x32xf32, #tpu.memory_space<vmem>>, vector<1x32xf32>
    %cst_40 = arith.constant dense<0.000000e+00> : vector<64xf32>
    %137 = vector.multi_reduction <add>, %134, %cst_40 [1] : vector<64x32xf32> to vector<64xf32>
    %138 = vector.shape_cast %137 : vector<64xf32> to vector<64x1xf32>
    %cst_41 = arith.constant 3.200000e+01 : f32
    %139 = vector.broadcast %cst_41 : f32 to vector<64x1xf32>
    %140 = arith.divf %138, %139 : vector<64x1xf32>
    %141 = vector.broadcast %140 : vector<64x1xf32> to vector<64x32xf32>
    %142 = arith.subf %134, %141 : vector<64x32xf32>
    %143 = arith.mulf %142, %142 : vector<64x32xf32>
    %cst_42 = arith.constant dense<0.000000e+00> : vector<64xf32>
    %144 = vector.multi_reduction <add>, %143, %cst_42 [1] : vector<64x32xf32> to vector<64xf32>
    %145 = vector.shape_cast %144 : vector<64xf32> to vector<64x1xf32>
    %cst_43 = arith.constant 3.200000e+01 : f32
    %146 = vector.broadcast %cst_43 : f32 to vector<64x1xf32>
    %147 = arith.divf %145, %146 : vector<64x1xf32>
    %148 = vector.broadcast %140 : vector<64x1xf32> to vector<64x32xf32>
    %149 = arith.subf %134, %148 : vector<64x32xf32>
    %cst_44 = arith.constant 9.99999974E-6 : f32
    %150 = vector.broadcast %cst_44 : f32 to vector<64x1xf32>
    %151 = arith.addf %147, %150 : vector<64x1xf32>
    %152 = math.rsqrt %151 : vector<64x1xf32>
    %153 = vector.broadcast %152 : vector<64x1xf32> to vector<64x32xf32>
    %154 = arith.mulf %149, %153 : vector<64x32xf32>
    %155 = vector.broadcast %135 : vector<1x32xf32> to vector<64x32xf32>
    %156 = arith.mulf %154, %155 : vector<64x32xf32>
    %157 = vector.broadcast %136 : vector<1x32xf32> to vector<64x32xf32>
    %158 = arith.addf %156, %157 : vector<64x32xf32>
    %159 = arith.addf %15, %158 : vector<64x32xf32>
    %160 = arith.truncf %159 : vector<64x32xf32> to vector<64x32xbf16>
    %c0_45 = arith.constant 0 : index
    %c0_46 = arith.constant 0 : index
    %161 = vector.load %arg11[%c0_45, %c0_46] : memref<32x64xbf16, #tpu.memory_space<vmem>>, vector<32x64xbf16>
    %cst_47 = arith.constant dense<0.000000e+00> : vector<64x64xf32>
    %162 = tpu.matmul %160, %161, %cst_47 {dimension_numbers = #tpu.dot_dimension_numbers<[1], [0], [0], [1], [0, 0, 1, 1], [], []>} : vector<64x32xbf16>, vector<32x64xbf16>, vector<64x64xf32> -> vector<64x64xf32>
    %c0_48 = arith.constant 0 : index
    %c0_49 = arith.constant 0 : index
    %163 = vector.load %arg12[%c0_48, %c0_49] : memref<1x64xf32, #tpu.memory_space<vmem>>, vector<1x64xf32>
    %164 = vector.broadcast %163 : vector<1x64xf32> to vector<64x64xf32>
    %165 = arith.addf %162, %164 : vector<64x64xf32>
    %166 = arith.mulf %165, %165 : vector<64x64xf32>
    %167 = arith.mulf %165, %166 : vector<64x64xf32>
    %cst_50 = arith.constant 4.471500e-02 : f32
    %168 = vector.broadcast %cst_50 : f32 to vector<64x64xf32>
    %169 = arith.mulf %168, %167 : vector<64x64xf32>
    %170 = arith.addf %165, %169 : vector<64x64xf32>
    %cst_51 = arith.constant 0.797884583 : f32
    %171 = vector.broadcast %cst_51 : f32 to vector<64x64xf32>
    %172 = arith.mulf %171, %170 : vector<64x64xf32>
    %173 = math.tanh %172 : vector<64x64xf32>
    %cst_52 = arith.constant 1.000000e+00 : f32
    %174 = vector.broadcast %cst_52 : f32 to vector<64x64xf32>
    %175 = arith.addf %174, %173 : vector<64x64xf32>
    %cst_53 = arith.constant 5.000000e-01 : f32
    %176 = vector.broadcast %cst_53 : f32 to vector<64x64xf32>
    %177 = arith.mulf %176, %175 : vector<64x64xf32>
    %178 = arith.mulf %165, %177 : vector<64x64xf32>
    %179 = arith.truncf %178 : vector<64x64xf32> to vector<64x64xbf16>
    %c0_54 = arith.constant 0 : index
    %c0_55 = arith.constant 0 : index
    %180 = vector.load %arg13[%c0_54, %c0_55] : memref<64x32xbf16, #tpu.memory_space<vmem>>, vector<64x32xbf16>
    %cst_56 = arith.constant dense<0.000000e+00> : vector<64x32xf32>
    %181 = tpu.matmul %179, %180, %cst_56 {dimension_numbers = #tpu.dot_dimension_numbers<[1], [0], [0], [1], [0, 0, 1, 1], [], []>} : vector<64x64xbf16>, vector<64x32xbf16>, vector<64x32xf32> -> vector<64x32xf32>
    %c0_57 = arith.constant 0 : index
    %c0_58 = arith.constant 0 : index
    %182 = vector.load %arg14[%c0_57, %c0_58] : memref<1x32xf32, #tpu.memory_space<vmem>>, vector<1x32xf32>
    %183 = vector.broadcast %182 : vector<1x32xf32> to vector<64x32xf32>
    %184 = arith.addf %181, %183 : vector<64x32xf32>
    %c0_59 = arith.constant 0 : index
    %c0_60 = arith.constant 0 : index
    %185 = vector.load %arg15[%c0_59, %c0_60] : memref<1x32xf32, #tpu.memory_space<vmem>>, vector<1x32xf32>
    %c0_61 = arith.constant 0 : index
    %c0_62 = arith.constant 0 : index
    %186 = vector.load %arg16[%c0_61, %c0_62] : memref<1x32xf32, #tpu.memory_space<vmem>>, vector<1x32xf32>
    %cst_63 = arith.constant dense<0.000000e+00> : vector<64xf32>
    %187 = vector.multi_reduction <add>, %184, %cst_63 [1] : vector<64x32xf32> to vector<64xf32>
    %188 = vector.shape_cast %187 : vector<64xf32> to vector<64x1xf32>
    %cst_64 = arith.constant 3.200000e+01 : f32
    %189 = vector.broadcast %cst_64 : f32 to vector<64x1xf32>
    %190 = arith.divf %188, %189 : vector<64x1xf32>
    %191 = vector.broadcast %190 : vector<64x1xf32> to vector<64x32xf32>
    %192 = arith.subf %184, %191 : vector<64x32xf32>
    %193 = arith.mulf %192, %192 : vector<64x32xf32>
    %cst_65 = arith.constant dense<0.000000e+00> : vector<64xf32>
    %194 = vector.multi_reduction <add>, %193, %cst_65 [1] : vector<64x32xf32> to vector<64xf32>
    %195 = vector.shape_cast %194 : vector<64xf32> to vector<64x1xf32>
    %cst_66 = arith.constant 3.200000e+01 : f32
    %196 = vector.broadcast %cst_66 : f32 to vector<64x1xf32>
    %197 = arith.divf %195, %196 : vector<64x1xf32>
    %198 = vector.broadcast %190 : vector<64x1xf32> to vector<64x32xf32>
    %199 = arith.subf %184, %198 : vector<64x32xf32>
    %cst_67 = arith.constant 9.99999974E-6 : f32
    %200 = vector.broadcast %cst_67 : f32 to vector<64x1xf32>
    %201 = arith.addf %197, %200 : vector<64x1xf32>
    %202 = math.rsqrt %201 : vector<64x1xf32>
    %203 = vector.broadcast %202 : vector<64x1xf32> to vector<64x32xf32>
    %204 = arith.mulf %199, %203 : vector<64x32xf32>
    %205 = vector.broadcast %185 : vector<1x32xf32> to vector<64x32xf32>
    %206 = arith.mulf %204, %205 : vector<64x32xf32>
    %207 = vector.broadcast %186 : vector<1x32xf32> to vector<64x32xf32>
    %208 = arith.addf %206, %207 : vector<64x32xf32>
    %209 = arith.addf %159, %208 : vector<64x32xf32>
    %210 = arith.truncf %209 : vector<64x32xf32> to vector<64x32xbf16>
    %211 = vector.shape_cast %210 : vector<64x32xbf16> to vector<4x16x32xbf16>
    %212 = vector.extract_strided_slice %211 {offsets = [0, 0, 0], sizes = [1, 16, 32], strides = [1, 1, 1]} : vector<4x16x32xbf16> to vector<1x16x32xbf16>
    %213 = vector.shape_cast %212 : vector<1x16x32xbf16> to vector<16x32xbf16>
    %214 = vector.shape_cast %213 : vector<16x32xbf16> to vector<4x4x32xbf16>
    %215 = vector.extract_strided_slice %211 {offsets = [1, 0, 0], sizes = [1, 16, 32], strides = [1, 1, 1]} : vector<4x16x32xbf16> to vector<1x16x32xbf16>
    %216 = vector.shape_cast %215 : vector<1x16x32xbf16> to vector<16x32xbf16>
    %217 = vector.shape_cast %216 : vector<16x32xbf16> to vector<4x4x32xbf16>
    %218 = tpu.concatenate %214, %217 in 1 : vector<4x4x32xbf16>, vector<4x4x32xbf16> -> vector<4x8x32xbf16>
    %219 = vector.extract_strided_slice %211 {offsets = [2, 0, 0], sizes = [1, 16, 32], strides = [1, 1, 1]} : vector<4x16x32xbf16> to vector<1x16x32xbf16>
    %220 = vector.shape_cast %219 : vector<1x16x32xbf16> to vector<16x32xbf16>
    %221 = vector.shape_cast %220 : vector<16x32xbf16> to vector<4x4x32xbf16>
    %222 = vector.extract_strided_slice %211 {offsets = [3, 0, 0], sizes = [1, 16, 32], strides = [1, 1, 1]} : vector<4x16x32xbf16> to vector<1x16x32xbf16>
    %223 = vector.shape_cast %222 : vector<1x16x32xbf16> to vector<16x32xbf16>
    %224 = vector.shape_cast %223 : vector<16x32xbf16> to vector<4x4x32xbf16>
    %225 = tpu.concatenate %221, %224 in 1 : vector<4x4x32xbf16>, vector<4x4x32xbf16> -> vector<4x8x32xbf16>
    %226 = tpu.concatenate %218, %225 in 0 : vector<4x8x32xbf16>, vector<4x8x32xbf16> -> vector<8x8x32xbf16>
    %227 = vector.shape_cast %226 : vector<8x8x32xbf16> to vector<1x8x8x32xbf16>
    %228 = vector.shape_cast %227 : vector<1x8x8x32xbf16> to vector<64x32xbf16>
    %c0_68 = arith.constant 0 : index
    %c0_69 = arith.constant 0 : index
    %229 = vector.load %arg17[%c0_68, %c0_69] : memref<64x32xbf16, #tpu.memory_space<vmem>>, vector<64x32xbf16>
    tpu.vector_store %arg17[%c0_68, %c0_69], %228 {strides = array<i32>} : memref<64x32xbf16, #tpu.memory_space<vmem>>, vector<64x32xbf16>,
    return
  }
  func.func @transform_0(%arg0: i32) -> (i32, i32) {
    %c0_i32 = arith.constant 0 : i32
    %c0_i32_0 = arith.constant 0 : i32
    return %arg0, %c0_i32 : i32, i32
  }
  func.func @transform_1(%arg0: i32) -> (i32, i32) {
    %c0_i32 = arith.constant 0 : i32
    %c0_i32_0 = arith.constant 0 : i32
    %c0_i32_1 = arith.constant 0 : i32
    return %c0_i32, %c0_i32_0 : i32, i32
  }
  func.func @transform_2(%arg0: i32) -> (i32, i32) {
    %c0_i32 = arith.constant 0 : i32
    %c0_i32_0 = arith.constant 0 : i32
    %c0_i32_1 = arith.constant 0 : i32
    return %c0_i32, %c0_i32_0 : i32, i32
  }
  func.func @transform_3(%arg0: i32) -> (i32, i32) {
    %c0_i32 = arith.constant 0 : i32
    %c0_i32_0 = arith.constant 0 : i32
    %c0_i32_1 = arith.constant 0 : i32
    return %c0_i32, %c0_i32_0 : i32, i32
  }
  func.func @transform_4(%arg0: i32) -> (i32, i32, i32) {
    %c0_i32 = arith.constant 0 : i32
    %c0_i32_0 = arith.constant 0 : i32
    %c0_i32_1 = arith.constant 0 : i32
    %c0_i32_2 = arith.constant 0 : i32
    return %c0_i32, %c0_i32_0, %c0_i32_1 : i32, i32, i32
  }
  func.func @transform_5(%arg0: i32) -> (i32, i32, i32) {
    %c0_i32 = arith.constant 0 : i32
    %c0_i32_0 = arith.constant 0 : i32
    %c0_i32_1 = arith.constant 0 : i32
    %c0_i32_2 = arith.constant 0 : i32
    return %c0_i32, %c0_i32_0, %c0_i32_1 : i32, i32, i32
  }
  func.func @transform_6(%arg0: i32) -> (i32, i32) {
    %c0_i32 = arith.constant 0 : i32
    %c0_i32_0 = arith.constant 0 : i32
    %c0_i32_1 = arith.constant 0 : i32
    return %c0_i32, %c0_i32_0 : i32, i32
  }
  func.func @transform_7(%arg0: i32) -> (i32, i32) {
    %c0_i32 = arith.constant 0 : i32
    %c0_i32_0 = arith.constant 0 : i32
    %c0_i32_1 = arith.constant 0 : i32
    return %c0_i32, %c0_i32_0 : i32, i32
  }
  func.func @transform_8(%arg0: i32) -> (i32, i32) {
    %c0_i32 = arith.constant 0 : i32
    %c0_i32_0 = arith.constant 0 : i32
    %c0_i32_1 = arith.constant 0 : i32
    return %c0_i32, %c0_i32_0 : i32, i32
  }
  func.func @transform_9(%arg0: i32) -> (i32, i32) {
    %c0_i32 = arith.constant 0 : i32
    %c0_i32_0 = arith.constant 0 : i32
    %c0_i32_1 = arith.constant 0 : i32
    return %c0_i32, %c0_i32_0 : i32, i32
  }
  func.func @transform_10(%arg0: i32) -> (i32, i32) {
    %c0_i32 = arith.constant 0 : i32
    %c0_i32_0 = arith.constant 0 : i32
    %c0_i32_1 = arith.constant 0 : i32
    return %c0_i32, %c0_i32_0 : i32, i32
  }
  func.func @transform_11(%arg0: i32) -> (i32, i32) {
    %c0_i32 = arith.constant 0 : i32
    %c0_i32_0 = arith.constant 0 : i32
    %c0_i32_1 = arith.constant 0 : i32
    return %c0_i32, %c0_i32_0 : i32, i32
  }
  func.func @transform_12(%arg0: i32) -> (i32, i32) {
    %c0_i32 = arith.constant 0 : i32
    %c0_i32_0 = arith.constant 0 : i32
    %c0_i32_1 = arith.constant 0 : i32
    return %c0_i32, %c0_i32_0 : i32, i32
  }
  func.func @transform_13(%arg0: i32) -> (i32, i32) {
    %c0_i32 = arith.constant 0 : i32
    %c0_i32_0 = arith.constant 0 : i32
    %c0_i32_1 = arith.constant 0 : i32
    return %c0_i32, %c0_i32_0 : i32, i32
  }
  func.func @transform_14(%arg0: i32) -> (i32, i32) {
    %c0_i32 = arith.constant 0 : i32
    %c0_i32_0 = arith.constant 0 : i32
    %c0_i32_1 = arith.constant 0 : i32
    return %c0_i32, %c0_i32_0 : i32, i32
  }
  func.func @transform_15(%arg0: i32) -> (i32, i32) {
    %c0_i32 = arith.constant 0 : i32
    %c0_i32_0 = arith.constant 0 : i32
    %c0_i32_1 = arith.constant 0 : i32
    return %c0_i32, %c0_i32_0 : i32, i32
  }
  func.func @transform_16(%arg0: i32) -> (i32, i32) {
    %c0_i32 = arith.constant 0 : i32
    %c0_i32_0 = arith.constant 0 : i32
    return %arg0, %c0_i32 : i32, i32
  }
}

module attributes {stable_mosaic.version = 11 : i64} {
  func.func @_swin_block_kernel(%arg0: i32, %arg1: memref<64x32xbf16, #tpu.memory_space<vmem>>, %arg2: memref<32x96xbf16, #tpu.memory_space<vmem>>, %arg3: memref<1x96xf32, #tpu.memory_space<vmem>>, %arg4: memref<1x32xf32, #tpu.memory_space<vmem>>, %arg5: memref<2x16x16xbf16, #tpu.memory_space<vmem>>, %arg6: memref<4x16x16xbf16, #tpu.memory_space<vmem>>, %arg7: memref<32x32xbf16, #tpu.memory_space<vmem>>, %arg8: memref<1x32xf32, #tpu.memory_space<vmem>>, %arg9: memref<1x32xf32, #tpu.memory_space<vmem>>, %arg10: memref<1x32xf32, #tpu.memory_space<vmem>>, %arg11: memref<32x64xbf16, #tpu.memory_space<vmem>>, %arg12: memref<1x64xf32, #tpu.memory_space<vmem>>, %arg13: memref<64x32xbf16, #tpu.memory_space<vmem>>, %arg14: memref<1x32xf32, #tpu.memory_space<vmem>>, %arg15: memref<1x32xf32, #tpu.memory_space<vmem>>, %arg16: memref<1x32xf32, #tpu.memory_space<vmem>>, %arg17: memref<64x32xbf16, #tpu.memory_space<vmem>>) attributes {dimension_semantics = [#tpu.dimension_semantics<parallel>], iteration_bounds = array<i64: 2>, scalar_prefetch = 0 : i64, scratch_operands = 0 : i64, tpu.core_type = #tpu.core_type<tc>, window_params = [{transform_indices = @transform_0, window_bounds = array<i64: 64, 32>}, {pipeline_mode = #tpu.pipeline_mode<synchronous>, transform_indices = @transform_1, window_bounds = array<i64: 32, 96>}, {pipeline_mode = #tpu.pipeline_mode<synchronous>, transform_indices = @transform_2, window_bounds = array<i64: 1, 96>}, {pipeline_mode = #tpu.pipeline_mode<synchronous>, transform_indices = @transform_3, window_bounds = array<i64: 1, 32>}, {pipeline_mode = #tpu.pipeline_mode<synchronous>, transform_indices = @transform_4, window_bounds = array<i64: 2, 16, 16>}, {pipeline_mode = #tpu.pipeline_mode<synchronous>, transform_indices = @transform_5, window_bounds = array<i64: 4, 16, 16>}, {pipeline_mode = #tpu.pipeline_mode<synchronous>, transform_indices = @transform_6, window_bounds = array<i64: 32, 32>}, {pipeline_mode = #tpu.pipeline_mode<synchronous>, transform_indices = @transform_7, window_bounds = array<i64: 1, 32>}, {pipeline_mode = #tpu.pipeline_mode<synchronous>, transform_indices = @transform_8, window_bounds = array<i64: 1, 32>}, {pipeline_mode = #tpu.pipeline_mode<synchronous>, transform_indices = @transform_9, window_bounds = array<i64: 1, 32>}, {pipeline_mode = #tpu.pipeline_mode<synchronous>, transform_indices = @transform_10, window_bounds = array<i64: 32, 64>}, {pipeline_mode = #tpu.pipeline_mode<synchronous>, transform_indices = @transform_11, window_bounds = array<i64: 1, 64>}, {pipeline_mode = #tpu.pipeline_mode<synchronous>, transform_indices = @transform_12, window_bounds = array<i64: 64, 32>}, {pipeline_mode = #tpu.pipeline_mode<synchronous>, transform_indices = @transform_13, window_bounds = array<i64: 1, 32>}, {pipeline_mode = #tpu.pipeline_mode<synchronous>, transform_indices = @transform_14, window_bounds = array<i64: 1, 32>}, {pipeline_mode = #tpu.pipeline_mode<synchronous>, transform_indices = @transform_15, window_bounds = array<i64: 1, 32>}, {transform_indices = @transform_16, window_bounds = array<i64: 64, 32>}]} {
    %c0 = arith.constant 0 : index
    %c0_0 = arith.constant 0 : index
    %0 = vector.load %arg1[%c0, %c0_0] : memref<64x32xbf16, #tpu.memory_space<vmem>>, vector<64x32xbf16>
    %1 = vector.shape_cast %0 : vector<64x32xbf16> to vector<1x8x8x32xbf16>
    %2 = vector.extract_strided_slice %1 {offsets = [0, 2, 0, 0], sizes = [1, 6, 8, 32], strides = [1, 1, 1, 1]} : vector<1x8x8x32xbf16> to vector<1x6x8x32xbf16>
    %3 = vector.extract_strided_slice %1 {offsets = [0, 0, 0, 0], sizes = [1, 2, 8, 32], strides = [1, 1, 1, 1]} : vector<1x8x8x32xbf16> to vector<1x2x8x32xbf16>
    %4 = tpu.concatenate %2, %3 in 1 : vector<1x6x8x32xbf16>, vector<1x2x8x32xbf16> -> vector<1x8x8x32xbf16>
    %5 = vector.extract_strided_slice %4 {offsets = [0, 0, 2, 0], sizes = [1, 8, 6, 32], strides = [1, 1, 1, 1]} : vector<1x8x8x32xbf16> to vector<1x8x6x32xbf16>
    %6 = vector.extract_strided_slice %4 {offsets = [0, 0, 0, 0], sizes = [1, 8, 2, 32], strides = [1, 1, 1, 1]} : vector<1x8x8x32xbf16> to vector<1x8x2x32xbf16>
    %7 = tpu.concatenate %5, %6 in 2 : vector<1x8x6x32xbf16>, vector<1x8x2x32xbf16> -> vector<1x8x8x32xbf16>
    %8 = vector.extract_strided_slice %7 {offsets = [0, 0, 0, 0], sizes = [1, 4, 4, 32], strides = [1, 1, 1, 1]} : vector<1x8x8x32xbf16> to vector<1x4x4x32xbf16>
    %9 = vector.shape_cast %8 : vector<1x4x4x32xbf16> to vector<4x4x32xbf16>
    %10 = vector.shape_cast %9 : vector<4x4x32xbf16> to vector<16x32xbf16>
    %11 = vector.extract_strided_slice %7 {offsets = [0, 0, 4, 0], sizes = [1, 4, 4, 32], strides = [1, 1, 1, 1]} : vector<1x8x8x32xbf16> to vector<1x4x4x32xbf16>
    %12 = vector.shape_cast %11 : vector<1x4x4x32xbf16> to vector<4x4x32xbf16>
    %13 = vector.shape_cast %12 : vector<4x4x32xbf16> to vector<16x32xbf16>
    %14 = vector.extract_strided_slice %7 {offsets = [0, 4, 0, 0], sizes = [1, 4, 4, 32], strides = [1, 1, 1, 1]} : vector<1x8x8x32xbf16> to vector<1x4x4x32xbf16>
    %15 = vector.shape_cast %14 : vector<1x4x4x32xbf16> to vector<4x4x32xbf16>
    %16 = vector.shape_cast %15 : vector<4x4x32xbf16> to vector<16x32xbf16>
    %17 = vector.extract_strided_slice %7 {offsets = [0, 4, 4, 0], sizes = [1, 4, 4, 32], strides = [1, 1, 1, 1]} : vector<1x8x8x32xbf16> to vector<1x4x4x32xbf16>
    %18 = vector.shape_cast %17 : vector<1x4x4x32xbf16> to vector<4x4x32xbf16>
    %19 = vector.shape_cast %18 : vector<4x4x32xbf16> to vector<16x32xbf16>
    %20 = tpu.concatenate %10, %13, %16, %19 in 0 : vector<16x32xbf16>, vector<16x32xbf16>, vector<16x32xbf16>, vector<16x32xbf16> -> vector<64x32xbf16>
    %21 = arith.extf %20 : vector<64x32xbf16> to vector<64x32xf32>
    %c0_1 = arith.constant 0 : index
    %c0_2 = arith.constant 0 : index
    %22 = vector.load %arg2[%c0_1, %c0_2] : memref<32x96xbf16, #tpu.memory_space<vmem>>, vector<32x96xbf16>
    %cst = arith.constant dense<0.000000e+00> : vector<64x96xf32>
    %23 = tpu.matmul %20, %22, %cst {dimension_numbers = #tpu.dot_dimension_numbers<[1], [0], [0], [1], [0, 0, 1, 1], [], []>} : vector<64x32xbf16>, vector<32x96xbf16>, vector<64x96xf32> -> vector<64x96xf32>
    %c0_3 = arith.constant 0 : index
    %c0_4 = arith.constant 0 : index
    %24 = vector.load %arg3[%c0_3, %c0_4] : memref<1x96xf32, #tpu.memory_space<vmem>>, vector<1x96xf32>
    %25 = vector.broadcast %24 : vector<1x96xf32> to vector<64x96xf32>
    %26 = arith.addf %23, %25 : vector<64x96xf32>
    %c0_5 = arith.constant 0 : index
    %c0_6 = arith.constant 0 : index
    %27 = vector.load %arg4[%c0_5, %c0_6] : memref<1x32xf32, #tpu.memory_space<vmem>>, vector<1x32xf32>
    %c0_7 = arith.constant 0 : index
    %c0_8 = arith.constant 0 : index
    %c0_9 = arith.constant 0 : index
    %28 = vector.load %arg5[%c0_7, %c0_8, %c0_9] : memref<2x16x16xbf16, #tpu.memory_space<vmem>>, vector<2x16x16xbf16>
    %29 = arith.extf %28 : vector<2x16x16xbf16> to vector<2x16x16xf32>
    %c0_10 = arith.constant 0 : index
    %c0_11 = arith.constant 0 : index
    %c0_12 = arith.constant 0 : index
    %30 = vector.load %arg6[%c0_10, %c0_11, %c0_12] : memref<4x16x16xbf16, #tpu.memory_space<vmem>>, vector<4x16x16xbf16>
    %31 = arith.extf %30 : vector<4x16x16xbf16> to vector<4x16x16xf32>
    %c0_13 = arith.constant 0 : index
    %c0_14 = arith.constant 0 : index
    %32 = vector.load %arg7[%c0_13, %c0_14] : memref<32x32xbf16, #tpu.memory_space<vmem>>, vector<32x32xbf16>
    %cst_15 = arith.constant 0.000000e+00 : f32
    %33 = vector.broadcast %cst_15 : f32 to vector<64x32xf32>
    %34 = vector.extract_strided_slice %26 {offsets = [0, 0], sizes = [64, 16], strides = [1, 1]} : vector<64x96xf32> to vector<64x16xf32>
    %35 = vector.extract_strided_slice %26 {offsets = [0, 32], sizes = [64, 16], strides = [1, 1]} : vector<64x96xf32> to vector<64x16xf32>
    %36 = vector.extract_strided_slice %26 {offsets = [0, 64], sizes = [64, 16], strides = [1, 1]} : vector<64x96xf32> to vector<64x16xf32>
    %37 = arith.mulf %34, %34 : vector<64x16xf32>
    %cst_16 = arith.constant dense<0.000000e+00> : vector<64xf32>
    %38 = vector.multi_reduction <add>, %37, %cst_16 [1] : vector<64x16xf32> to vector<64xf32>
    %39 = vector.shape_cast %38 : vector<64xf32> to vector<64x1xf32>
    %cst_17 = arith.constant 9.99999996E-13 : f32
    %40 = vector.broadcast %cst_17 : f32 to vector<64x1xf32>
    %41 = arith.addf %39, %40 : vector<64x1xf32>
    %42 = math.rsqrt %41 : vector<64x1xf32>
    %43 = vector.broadcast %42 : vector<64x1xf32> to vector<64x16xf32>
    %44 = arith.mulf %34, %43 : vector<64x16xf32>
    %45 = arith.mulf %35, %35 : vector<64x16xf32>
    %cst_18 = arith.constant dense<0.000000e+00> : vector<64xf32>
    %46 = vector.multi_reduction <add>, %45, %cst_18 [1] : vector<64x16xf32> to vector<64xf32>
    %47 = vector.shape_cast %46 : vector<64xf32> to vector<64x1xf32>
    %cst_19 = arith.constant 9.99999996E-13 : f32
    %48 = vector.broadcast %cst_19 : f32 to vector<64x1xf32>
    %49 = arith.addf %47, %48 : vector<64x1xf32>
    %50 = math.rsqrt %49 : vector<64x1xf32>
    %51 = vector.broadcast %50 : vector<64x1xf32> to vector<64x16xf32>
    %52 = arith.mulf %35, %51 : vector<64x16xf32>
    %53 = vector.extract_strided_slice %27 {offsets = [0, 0], sizes = [1, 16], strides = [1, 1]} : vector<1x32xf32> to vector<1x16xf32>
    %54 = vector.broadcast %53 : vector<1x16xf32> to vector<64x16xf32>
    %55 = arith.mulf %44, %54 : vector<64x16xf32>
    %56 = vector.shape_cast %55 : vector<64x16xf32> to vector<4x16x16xf32>
    %57 = arith.truncf %56 : vector<4x16x16xf32> to vector<4x16x16xbf16>
    %58 = vector.shape_cast %52 : vector<64x16xf32> to vector<4x16x16xf32>
    %59 = arith.truncf %58 : vector<4x16x16xf32> to vector<4x16x16xbf16>
    %60 = vector.shape_cast %36 : vector<64x16xf32> to vector<4x16x16xf32>
    %61 = arith.truncf %60 : vector<4x16x16xf32> to vector<4x16x16xbf16>
    "tpu.trace_start"() <{level = 10 : i32, message = "wnd,wmd->wnm"}> : () -> ()
    %cst_20 = arith.constant dense<0.000000e+00> : vector<4x16x16xf32>
    %62 = tpu.matmul %57, %59, %cst_20 {dimension_numbers = #tpu.dot_dimension_numbers<[2], [2], [1], [1], [0, 0, 0, 1, 1, 1], [0], [0]>} : vector<4x16x16xbf16>, vector<4x16x16xbf16>, vector<4x16x16xf32> -> vector<4x16x16xf32>
    "tpu.trace_stop"() : () -> ()
    %63 = vector.extract_strided_slice %29 {offsets = [0, 0, 0], sizes = [1, 16, 16], strides = [1, 1, 1]} : vector<2x16x16xf32> to vector<1x16x16xf32>
    %64 = vector.shape_cast %63 : vector<1x16x16xf32> to vector<16x16xf32>
    %65 = vector.shape_cast %64 : vector<16x16xf32> to vector<1x16x16xf32>
    %66 = vector.broadcast %65 : vector<1x16x16xf32> to vector<4x16x16xf32>
    %67 = arith.addf %62, %66 : vector<4x16x16xf32>
    %68 = arith.addf %67, %31 : vector<4x16x16xf32>
    %cst_21 = arith.constant dense<0xFF800000> : vector<4x16xf32>
    %69 = vector.multi_reduction <maximumf>, %68, %cst_21 [2] : vector<4x16x16xf32> to vector<4x16xf32>
    %70 = vector.shape_cast %69 : vector<4x16xf32> to vector<4x16x1xf32>
    %71 = vector.broadcast %70 : vector<4x16x1xf32> to vector<4x16x16xf32>
    %72 = arith.subf %68, %71 : vector<4x16x16xf32>
    %73 = math.exp %72 : vector<4x16x16xf32>
    %cst_22 = arith.constant dense<0.000000e+00> : vector<4x16xf32>
    %74 = vector.multi_reduction <add>, %73, %cst_22 [2] : vector<4x16x16xf32> to vector<4x16xf32>
    %75 = vector.shape_cast %74 : vector<4x16xf32> to vector<4x16x1xf32>
    %76 = tpu.reciprocal %75 {approx = true} : vector<4x16x1xf32> -> vector<4x16x1xf32>
    %77 = vector.broadcast %76 : vector<4x16x1xf32> to vector<4x16x16xf32>
    %78 = arith.mulf %73, %77 : vector<4x16x16xf32>
    %79 = arith.truncf %78 : vector<4x16x16xf32> to vector<4x16x16xbf16>
    "tpu.trace_start"() <{level = 10 : i32, message = "wnm,wmd->wnd"}> : () -> ()
    %cst_23 = arith.constant dense<0.000000e+00> : vector<4x16x16xf32>
    %80 = tpu.matmul %79, %61, %cst_23 {dimension_numbers = #tpu.dot_dimension_numbers<[2], [1], [1], [2], [0, 0, 0, 1, 1, 2], [0], [0]>} : vector<4x16x16xbf16>, vector<4x16x16xbf16>, vector<4x16x16xf32> -> vector<4x16x16xf32>
    "tpu.trace_stop"() : () -> ()
    %81 = vector.shape_cast %80 : vector<4x16x16xf32> to vector<64x16xf32>
    %82 = arith.truncf %81 : vector<64x16xf32> to vector<64x16xbf16>
    %83 = vector.extract_strided_slice %32 {offsets = [0, 0], sizes = [16, 32], strides = [1, 1]} : vector<32x32xbf16> to vector<16x32xbf16>
    %cst_24 = arith.constant dense<0.000000e+00> : vector<64x32xf32>
    %84 = tpu.matmul %82, %83, %cst_24 {dimension_numbers = #tpu.dot_dimension_numbers<[1], [0], [0], [1], [0, 0, 1, 1], [], []>} : vector<64x16xbf16>, vector<16x32xbf16>, vector<64x32xf32> -> vector<64x32xf32>
    %85 = arith.addf %33, %84 : vector<64x32xf32>
    %86 = vector.extract_strided_slice %26 {offsets = [0, 16], sizes = [64, 16], strides = [1, 1]} : vector<64x96xf32> to vector<64x16xf32>
    %87 = vector.extract_strided_slice %26 {offsets = [0, 48], sizes = [64, 16], strides = [1, 1]} : vector<64x96xf32> to vector<64x16xf32>
    %88 = vector.extract_strided_slice %26 {offsets = [0, 80], sizes = [64, 16], strides = [1, 1]} : vector<64x96xf32> to vector<64x16xf32>
    %89 = arith.mulf %86, %86 : vector<64x16xf32>
    %cst_25 = arith.constant dense<0.000000e+00> : vector<64xf32>
    %90 = vector.multi_reduction <add>, %89, %cst_25 [1] : vector<64x16xf32> to vector<64xf32>
    %91 = vector.shape_cast %90 : vector<64xf32> to vector<64x1xf32>
    %cst_26 = arith.constant 9.99999996E-13 : f32
    %92 = vector.broadcast %cst_26 : f32 to vector<64x1xf32>
    %93 = arith.addf %91, %92 : vector<64x1xf32>
    %94 = math.rsqrt %93 : vector<64x1xf32>
    %95 = vector.broadcast %94 : vector<64x1xf32> to vector<64x16xf32>
    %96 = arith.mulf %86, %95 : vector<64x16xf32>
    %97 = arith.mulf %87, %87 : vector<64x16xf32>
    %cst_27 = arith.constant dense<0.000000e+00> : vector<64xf32>
    %98 = vector.multi_reduction <add>, %97, %cst_27 [1] : vector<64x16xf32> to vector<64xf32>
    %99 = vector.shape_cast %98 : vector<64xf32> to vector<64x1xf32>
    %cst_28 = arith.constant 9.99999996E-13 : f32
    %100 = vector.broadcast %cst_28 : f32 to vector<64x1xf32>
    %101 = arith.addf %99, %100 : vector<64x1xf32>
    %102 = math.rsqrt %101 : vector<64x1xf32>
    %103 = vector.broadcast %102 : vector<64x1xf32> to vector<64x16xf32>
    %104 = arith.mulf %87, %103 : vector<64x16xf32>
    %105 = vector.extract_strided_slice %27 {offsets = [0, 16], sizes = [1, 16], strides = [1, 1]} : vector<1x32xf32> to vector<1x16xf32>
    %106 = vector.broadcast %105 : vector<1x16xf32> to vector<64x16xf32>
    %107 = arith.mulf %96, %106 : vector<64x16xf32>
    %108 = vector.shape_cast %107 : vector<64x16xf32> to vector<4x16x16xf32>
    %109 = arith.truncf %108 : vector<4x16x16xf32> to vector<4x16x16xbf16>
    %110 = vector.shape_cast %104 : vector<64x16xf32> to vector<4x16x16xf32>
    %111 = arith.truncf %110 : vector<4x16x16xf32> to vector<4x16x16xbf16>
    %112 = vector.shape_cast %88 : vector<64x16xf32> to vector<4x16x16xf32>
    %113 = arith.truncf %112 : vector<4x16x16xf32> to vector<4x16x16xbf16>
    "tpu.trace_start"() <{level = 10 : i32, message = "wnd,wmd->wnm"}> : () -> ()
    %cst_29 = arith.constant dense<0.000000e+00> : vector<4x16x16xf32>
    %114 = tpu.matmul %109, %111, %cst_29 {dimension_numbers = #tpu.dot_dimension_numbers<[2], [2], [1], [1], [0, 0, 0, 1, 1, 1], [0], [0]>} : vector<4x16x16xbf16>, vector<4x16x16xbf16>, vector<4x16x16xf32> -> vector<4x16x16xf32>
    "tpu.trace_stop"() : () -> ()
    %115 = vector.extract_strided_slice %29 {offsets = [1, 0, 0], sizes = [1, 16, 16], strides = [1, 1, 1]} : vector<2x16x16xf32> to vector<1x16x16xf32>
    %116 = vector.shape_cast %115 : vector<1x16x16xf32> to vector<16x16xf32>
    %117 = vector.shape_cast %116 : vector<16x16xf32> to vector<1x16x16xf32>
    %118 = vector.broadcast %117 : vector<1x16x16xf32> to vector<4x16x16xf32>
    %119 = arith.addf %114, %118 : vector<4x16x16xf32>
    %120 = arith.addf %119, %31 : vector<4x16x16xf32>
    %cst_30 = arith.constant dense<0xFF800000> : vector<4x16xf32>
    %121 = vector.multi_reduction <maximumf>, %120, %cst_30 [2] : vector<4x16x16xf32> to vector<4x16xf32>
    %122 = vector.shape_cast %121 : vector<4x16xf32> to vector<4x16x1xf32>
    %123 = vector.broadcast %122 : vector<4x16x1xf32> to vector<4x16x16xf32>
    %124 = arith.subf %120, %123 : vector<4x16x16xf32>
    %125 = math.exp %124 : vector<4x16x16xf32>
    %cst_31 = arith.constant dense<0.000000e+00> : vector<4x16xf32>
    %126 = vector.multi_reduction <add>, %125, %cst_31 [2] : vector<4x16x16xf32> to vector<4x16xf32>
    %127 = vector.shape_cast %126 : vector<4x16xf32> to vector<4x16x1xf32>
    %128 = tpu.reciprocal %127 {approx = true} : vector<4x16x1xf32> -> vector<4x16x1xf32>
    %129 = vector.broadcast %128 : vector<4x16x1xf32> to vector<4x16x16xf32>
    %130 = arith.mulf %125, %129 : vector<4x16x16xf32>
    %131 = arith.truncf %130 : vector<4x16x16xf32> to vector<4x16x16xbf16>
    "tpu.trace_start"() <{level = 10 : i32, message = "wnm,wmd->wnd"}> : () -> ()
    %cst_32 = arith.constant dense<0.000000e+00> : vector<4x16x16xf32>
    %132 = tpu.matmul %131, %113, %cst_32 {dimension_numbers = #tpu.dot_dimension_numbers<[2], [1], [1], [2], [0, 0, 0, 1, 1, 2], [0], [0]>} : vector<4x16x16xbf16>, vector<4x16x16xbf16>, vector<4x16x16xf32> -> vector<4x16x16xf32>
    "tpu.trace_stop"() : () -> ()
    %133 = vector.shape_cast %132 : vector<4x16x16xf32> to vector<64x16xf32>
    %134 = arith.truncf %133 : vector<64x16xf32> to vector<64x16xbf16>
    %135 = vector.extract_strided_slice %32 {offsets = [16, 0], sizes = [16, 32], strides = [1, 1]} : vector<32x32xbf16> to vector<16x32xbf16>
    %cst_33 = arith.constant dense<0.000000e+00> : vector<64x32xf32>
    %136 = tpu.matmul %134, %135, %cst_33 {dimension_numbers = #tpu.dot_dimension_numbers<[1], [0], [0], [1], [0, 0, 1, 1], [], []>} : vector<64x16xbf16>, vector<16x32xbf16>, vector<64x32xf32> -> vector<64x32xf32>
    %137 = arith.addf %85, %136 : vector<64x32xf32>
    %c0_34 = arith.constant 0 : index
    %c0_35 = arith.constant 0 : index
    %138 = vector.load %arg8[%c0_34, %c0_35] : memref<1x32xf32, #tpu.memory_space<vmem>>, vector<1x32xf32>
    %139 = vector.broadcast %138 : vector<1x32xf32> to vector<64x32xf32>
    %140 = arith.addf %137, %139 : vector<64x32xf32>
    %c0_36 = arith.constant 0 : index
    %c0_37 = arith.constant 0 : index
    %141 = vector.load %arg9[%c0_36, %c0_37] : memref<1x32xf32, #tpu.memory_space<vmem>>, vector<1x32xf32>
    %c0_38 = arith.constant 0 : index
    %c0_39 = arith.constant 0 : index
    %142 = vector.load %arg10[%c0_38, %c0_39] : memref<1x32xf32, #tpu.memory_space<vmem>>, vector<1x32xf32>
    %cst_40 = arith.constant dense<0.000000e+00> : vector<64xf32>
    %143 = vector.multi_reduction <add>, %140, %cst_40 [1] : vector<64x32xf32> to vector<64xf32>
    %144 = vector.shape_cast %143 : vector<64xf32> to vector<64x1xf32>
    %cst_41 = arith.constant 3.200000e+01 : f32
    %145 = vector.broadcast %cst_41 : f32 to vector<64x1xf32>
    %146 = arith.divf %144, %145 : vector<64x1xf32>
    %147 = vector.broadcast %146 : vector<64x1xf32> to vector<64x32xf32>
    %148 = arith.subf %140, %147 : vector<64x32xf32>
    %149 = arith.mulf %148, %148 : vector<64x32xf32>
    %cst_42 = arith.constant dense<0.000000e+00> : vector<64xf32>
    %150 = vector.multi_reduction <add>, %149, %cst_42 [1] : vector<64x32xf32> to vector<64xf32>
    %151 = vector.shape_cast %150 : vector<64xf32> to vector<64x1xf32>
    %cst_43 = arith.constant 3.200000e+01 : f32
    %152 = vector.broadcast %cst_43 : f32 to vector<64x1xf32>
    %153 = arith.divf %151, %152 : vector<64x1xf32>
    %154 = vector.broadcast %146 : vector<64x1xf32> to vector<64x32xf32>
    %155 = arith.subf %140, %154 : vector<64x32xf32>
    %cst_44 = arith.constant 9.99999974E-6 : f32
    %156 = vector.broadcast %cst_44 : f32 to vector<64x1xf32>
    %157 = arith.addf %153, %156 : vector<64x1xf32>
    %158 = math.rsqrt %157 : vector<64x1xf32>
    %159 = vector.broadcast %158 : vector<64x1xf32> to vector<64x32xf32>
    %160 = arith.mulf %155, %159 : vector<64x32xf32>
    %161 = vector.broadcast %141 : vector<1x32xf32> to vector<64x32xf32>
    %162 = arith.mulf %160, %161 : vector<64x32xf32>
    %163 = vector.broadcast %142 : vector<1x32xf32> to vector<64x32xf32>
    %164 = arith.addf %162, %163 : vector<64x32xf32>
    %165 = arith.addf %21, %164 : vector<64x32xf32>
    %166 = arith.truncf %165 : vector<64x32xf32> to vector<64x32xbf16>
    %c0_45 = arith.constant 0 : index
    %c0_46 = arith.constant 0 : index
    %167 = vector.load %arg11[%c0_45, %c0_46] : memref<32x64xbf16, #tpu.memory_space<vmem>>, vector<32x64xbf16>
    %cst_47 = arith.constant dense<0.000000e+00> : vector<64x64xf32>
    %168 = tpu.matmul %166, %167, %cst_47 {dimension_numbers = #tpu.dot_dimension_numbers<[1], [0], [0], [1], [0, 0, 1, 1], [], []>} : vector<64x32xbf16>, vector<32x64xbf16>, vector<64x64xf32> -> vector<64x64xf32>
    %c0_48 = arith.constant 0 : index
    %c0_49 = arith.constant 0 : index
    %169 = vector.load %arg12[%c0_48, %c0_49] : memref<1x64xf32, #tpu.memory_space<vmem>>, vector<1x64xf32>
    %170 = vector.broadcast %169 : vector<1x64xf32> to vector<64x64xf32>
    %171 = arith.addf %168, %170 : vector<64x64xf32>
    %172 = arith.mulf %171, %171 : vector<64x64xf32>
    %173 = arith.mulf %171, %172 : vector<64x64xf32>
    %cst_50 = arith.constant 4.471500e-02 : f32
    %174 = vector.broadcast %cst_50 : f32 to vector<64x64xf32>
    %175 = arith.mulf %174, %173 : vector<64x64xf32>
    %176 = arith.addf %171, %175 : vector<64x64xf32>
    %cst_51 = arith.constant 0.797884583 : f32
    %177 = vector.broadcast %cst_51 : f32 to vector<64x64xf32>
    %178 = arith.mulf %177, %176 : vector<64x64xf32>
    %179 = math.tanh %178 : vector<64x64xf32>
    %cst_52 = arith.constant 1.000000e+00 : f32
    %180 = vector.broadcast %cst_52 : f32 to vector<64x64xf32>
    %181 = arith.addf %180, %179 : vector<64x64xf32>
    %cst_53 = arith.constant 5.000000e-01 : f32
    %182 = vector.broadcast %cst_53 : f32 to vector<64x64xf32>
    %183 = arith.mulf %182, %181 : vector<64x64xf32>
    %184 = arith.mulf %171, %183 : vector<64x64xf32>
    %185 = arith.truncf %184 : vector<64x64xf32> to vector<64x64xbf16>
    %c0_54 = arith.constant 0 : index
    %c0_55 = arith.constant 0 : index
    %186 = vector.load %arg13[%c0_54, %c0_55] : memref<64x32xbf16, #tpu.memory_space<vmem>>, vector<64x32xbf16>
    %cst_56 = arith.constant dense<0.000000e+00> : vector<64x32xf32>
    %187 = tpu.matmul %185, %186, %cst_56 {dimension_numbers = #tpu.dot_dimension_numbers<[1], [0], [0], [1], [0, 0, 1, 1], [], []>} : vector<64x64xbf16>, vector<64x32xbf16>, vector<64x32xf32> -> vector<64x32xf32>
    %c0_57 = arith.constant 0 : index
    %c0_58 = arith.constant 0 : index
    %188 = vector.load %arg14[%c0_57, %c0_58] : memref<1x32xf32, #tpu.memory_space<vmem>>, vector<1x32xf32>
    %189 = vector.broadcast %188 : vector<1x32xf32> to vector<64x32xf32>
    %190 = arith.addf %187, %189 : vector<64x32xf32>
    %c0_59 = arith.constant 0 : index
    %c0_60 = arith.constant 0 : index
    %191 = vector.load %arg15[%c0_59, %c0_60] : memref<1x32xf32, #tpu.memory_space<vmem>>, vector<1x32xf32>
    %c0_61 = arith.constant 0 : index
    %c0_62 = arith.constant 0 : index
    %192 = vector.load %arg16[%c0_61, %c0_62] : memref<1x32xf32, #tpu.memory_space<vmem>>, vector<1x32xf32>
    %cst_63 = arith.constant dense<0.000000e+00> : vector<64xf32>
    %193 = vector.multi_reduction <add>, %190, %cst_63 [1] : vector<64x32xf32> to vector<64xf32>
    %194 = vector.shape_cast %193 : vector<64xf32> to vector<64x1xf32>
    %cst_64 = arith.constant 3.200000e+01 : f32
    %195 = vector.broadcast %cst_64 : f32 to vector<64x1xf32>
    %196 = arith.divf %194, %195 : vector<64x1xf32>
    %197 = vector.broadcast %196 : vector<64x1xf32> to vector<64x32xf32>
    %198 = arith.subf %190, %197 : vector<64x32xf32>
    %199 = arith.mulf %198, %198 : vector<64x32xf32>
    %cst_65 = arith.constant dense<0.000000e+00> : vector<64xf32>
    %200 = vector.multi_reduction <add>, %199, %cst_65 [1] : vector<64x32xf32> to vector<64xf32>
    %201 = vector.shape_cast %200 : vector<64xf32> to vector<64x1xf32>
    %cst_66 = arith.constant 3.200000e+01 : f32
    %202 = vector.broadcast %cst_66 : f32 to vector<64x1xf32>
    %203 = arith.divf %201, %202 : vector<64x1xf32>
    %204 = vector.broadcast %196 : vector<64x1xf32> to vector<64x32xf32>
    %205 = arith.subf %190, %204 : vector<64x32xf32>
    %cst_67 = arith.constant 9.99999974E-6 : f32
    %206 = vector.broadcast %cst_67 : f32 to vector<64x1xf32>
    %207 = arith.addf %203, %206 : vector<64x1xf32>
    %208 = math.rsqrt %207 : vector<64x1xf32>
    %209 = vector.broadcast %208 : vector<64x1xf32> to vector<64x32xf32>
    %210 = arith.mulf %205, %209 : vector<64x32xf32>
    %211 = vector.broadcast %191 : vector<1x32xf32> to vector<64x32xf32>
    %212 = arith.mulf %210, %211 : vector<64x32xf32>
    %213 = vector.broadcast %192 : vector<1x32xf32> to vector<64x32xf32>
    %214 = arith.addf %212, %213 : vector<64x32xf32>
    %215 = arith.addf %165, %214 : vector<64x32xf32>
    %216 = arith.truncf %215 : vector<64x32xf32> to vector<64x32xbf16>
    %217 = vector.shape_cast %216 : vector<64x32xbf16> to vector<4x16x32xbf16>
    %218 = vector.extract_strided_slice %217 {offsets = [0, 0, 0], sizes = [1, 16, 32], strides = [1, 1, 1]} : vector<4x16x32xbf16> to vector<1x16x32xbf16>
    %219 = vector.shape_cast %218 : vector<1x16x32xbf16> to vector<16x32xbf16>
    %220 = vector.shape_cast %219 : vector<16x32xbf16> to vector<4x4x32xbf16>
    %221 = vector.extract_strided_slice %217 {offsets = [1, 0, 0], sizes = [1, 16, 32], strides = [1, 1, 1]} : vector<4x16x32xbf16> to vector<1x16x32xbf16>
    %222 = vector.shape_cast %221 : vector<1x16x32xbf16> to vector<16x32xbf16>
    %223 = vector.shape_cast %222 : vector<16x32xbf16> to vector<4x4x32xbf16>
    %224 = tpu.concatenate %220, %223 in 1 : vector<4x4x32xbf16>, vector<4x4x32xbf16> -> vector<4x8x32xbf16>
    %225 = vector.extract_strided_slice %217 {offsets = [2, 0, 0], sizes = [1, 16, 32], strides = [1, 1, 1]} : vector<4x16x32xbf16> to vector<1x16x32xbf16>
    %226 = vector.shape_cast %225 : vector<1x16x32xbf16> to vector<16x32xbf16>
    %227 = vector.shape_cast %226 : vector<16x32xbf16> to vector<4x4x32xbf16>
    %228 = vector.extract_strided_slice %217 {offsets = [3, 0, 0], sizes = [1, 16, 32], strides = [1, 1, 1]} : vector<4x16x32xbf16> to vector<1x16x32xbf16>
    %229 = vector.shape_cast %228 : vector<1x16x32xbf16> to vector<16x32xbf16>
    %230 = vector.shape_cast %229 : vector<16x32xbf16> to vector<4x4x32xbf16>
    %231 = tpu.concatenate %227, %230 in 1 : vector<4x4x32xbf16>, vector<4x4x32xbf16> -> vector<4x8x32xbf16>
    %232 = tpu.concatenate %224, %231 in 0 : vector<4x8x32xbf16>, vector<4x8x32xbf16> -> vector<8x8x32xbf16>
    %233 = vector.shape_cast %232 : vector<8x8x32xbf16> to vector<1x8x8x32xbf16>
    %234 = vector.extract_strided_slice %233 {offsets = [0, 6, 0, 0], sizes = [1, 2, 8, 32], strides = [1, 1, 1, 1]} : vector<1x8x8x32xbf16> to vector<1x2x8x32xbf16>
    %235 = vector.extract_strided_slice %233 {offsets = [0, 0, 0, 0], sizes = [1, 6, 8, 32], strides = [1, 1, 1, 1]} : vector<1x8x8x32xbf16> to vector<1x6x8x32xbf16>
    %236 = tpu.concatenate %234, %235 in 1 : vector<1x2x8x32xbf16>, vector<1x6x8x32xbf16> -> vector<1x8x8x32xbf16>
    %237 = vector.extract_strided_slice %236 {offsets = [0, 0, 6, 0], sizes = [1, 8, 2, 32], strides = [1, 1, 1, 1]} : vector<1x8x8x32xbf16> to vector<1x8x2x32xbf16>
    %238 = vector.extract_strided_slice %236 {offsets = [0, 0, 0, 0], sizes = [1, 8, 6, 32], strides = [1, 1, 1, 1]} : vector<1x8x8x32xbf16> to vector<1x8x6x32xbf16>
    %239 = tpu.concatenate %237, %238 in 2 : vector<1x8x2x32xbf16>, vector<1x8x6x32xbf16> -> vector<1x8x8x32xbf16>
    %240 = vector.shape_cast %239 : vector<1x8x8x32xbf16> to vector<64x32xbf16>
    %c0_68 = arith.constant 0 : index
    %c0_69 = arith.constant 0 : index
    %241 = vector.load %arg17[%c0_68, %c0_69] : memref<64x32xbf16, #tpu.memory_space<vmem>>, vector<64x32xbf16>
    tpu.vector_store %arg17[%c0_68, %c0_69], %240 {strides = array<i32>} : memref<64x32xbf16, #tpu.memory_space<vmem>>, vector<64x32xbf16>,
    return
  }
  func.func @transform_0(%arg0: i32) -> (i32, i32) {
    %c0_i32 = arith.constant 0 : i32
    %c0_i32_0 = arith.constant 0 : i32
    return %arg0, %c0_i32 : i32, i32
  }
  func.func @transform_1(%arg0: i32) -> (i32, i32) {
    %c0_i32 = arith.constant 0 : i32
    %c0_i32_0 = arith.constant 0 : i32
    %c0_i32_1 = arith.constant 0 : i32
    return %c0_i32, %c0_i32_0 : i32, i32
  }
  func.func @transform_2(%arg0: i32) -> (i32, i32) {
    %c0_i32 = arith.constant 0 : i32
    %c0_i32_0 = arith.constant 0 : i32
    %c0_i32_1 = arith.constant 0 : i32
    return %c0_i32, %c0_i32_0 : i32, i32
  }
  func.func @transform_3(%arg0: i32) -> (i32, i32) {
    %c0_i32 = arith.constant 0 : i32
    %c0_i32_0 = arith.constant 0 : i32
    %c0_i32_1 = arith.constant 0 : i32
    return %c0_i32, %c0_i32_0 : i32, i32
  }
  func.func @transform_4(%arg0: i32) -> (i32, i32, i32) {
    %c0_i32 = arith.constant 0 : i32
    %c0_i32_0 = arith.constant 0 : i32
    %c0_i32_1 = arith.constant 0 : i32
    %c0_i32_2 = arith.constant 0 : i32
    return %c0_i32, %c0_i32_0, %c0_i32_1 : i32, i32, i32
  }
  func.func @transform_5(%arg0: i32) -> (i32, i32, i32) {
    %c0_i32 = arith.constant 0 : i32
    %c0_i32_0 = arith.constant 0 : i32
    %c0_i32_1 = arith.constant 0 : i32
    %c0_i32_2 = arith.constant 0 : i32
    return %c0_i32, %c0_i32_0, %c0_i32_1 : i32, i32, i32
  }
  func.func @transform_6(%arg0: i32) -> (i32, i32) {
    %c0_i32 = arith.constant 0 : i32
    %c0_i32_0 = arith.constant 0 : i32
    %c0_i32_1 = arith.constant 0 : i32
    return %c0_i32, %c0_i32_0 : i32, i32
  }
  func.func @transform_7(%arg0: i32) -> (i32, i32) {
    %c0_i32 = arith.constant 0 : i32
    %c0_i32_0 = arith.constant 0 : i32
    %c0_i32_1 = arith.constant 0 : i32
    return %c0_i32, %c0_i32_0 : i32, i32
  }
  func.func @transform_8(%arg0: i32) -> (i32, i32) {
    %c0_i32 = arith.constant 0 : i32
    %c0_i32_0 = arith.constant 0 : i32
    %c0_i32_1 = arith.constant 0 : i32
    return %c0_i32, %c0_i32_0 : i32, i32
  }
  func.func @transform_9(%arg0: i32) -> (i32, i32) {
    %c0_i32 = arith.constant 0 : i32
    %c0_i32_0 = arith.constant 0 : i32
    %c0_i32_1 = arith.constant 0 : i32
    return %c0_i32, %c0_i32_0 : i32, i32
  }
  func.func @transform_10(%arg0: i32) -> (i32, i32) {
    %c0_i32 = arith.constant 0 : i32
    %c0_i32_0 = arith.constant 0 : i32
    %c0_i32_1 = arith.constant 0 : i32
    return %c0_i32, %c0_i32_0 : i32, i32
  }
  func.func @transform_11(%arg0: i32) -> (i32, i32) {
    %c0_i32 = arith.constant 0 : i32
    %c0_i32_0 = arith.constant 0 : i32
    %c0_i32_1 = arith.constant 0 : i32
    return %c0_i32, %c0_i32_0 : i32, i32
  }
  func.func @transform_12(%arg0: i32) -> (i32, i32) {
    %c0_i32 = arith.constant 0 : i32
    %c0_i32_0 = arith.constant 0 : i32
    %c0_i32_1 = arith.constant 0 : i32
    return %c0_i32, %c0_i32_0 : i32, i32
  }
  func.func @transform_13(%arg0: i32) -> (i32, i32) {
    %c0_i32 = arith.constant 0 : i32
    %c0_i32_0 = arith.constant 0 : i32
    %c0_i32_1 = arith.constant 0 : i32
    return %c0_i32, %c0_i32_0 : i32, i32
  }
  func.func @transform_14(%arg0: i32) -> (i32, i32) {
    %c0_i32 = arith.constant 0 : i32
    %c0_i32_0 = arith.constant 0 : i32
    %c0_i32_1 = arith.constant 0 : i32
    return %c0_i32, %c0_i32_0 : i32, i32
  }
  func.func @transform_15(%arg0: i32) -> (i32, i32) {
    %c0_i32 = arith.constant 0 : i32
    %c0_i32_0 = arith.constant 0 : i32
    %c0_i32_1 = arith.constant 0 : i32
    return %c0_i32, %c0_i32_0 : i32, i32
  }
  func.func @transform_16(%arg0: i32) -> (i32, i32) {
    %c0_i32 = arith.constant 0 : i32
    %c0_i32_0 = arith.constant 0 : i32
    return %arg0, %c0_i32 : i32, i32
  }
}

module attributes {stable_mosaic.version = 11 : i64} {
  func.func @_linear_ln_kernel(%arg0: i32, %arg1: memref<16x128xbf16, #tpu.memory_space<vmem>>, %arg2: memref<128x64xbf16, #tpu.memory_space<vmem>>, %arg3: memref<1x64xf32, #tpu.memory_space<vmem>>, %arg4: memref<1x64xf32, #tpu.memory_space<vmem>>, %arg5: memref<1x64xf32, #tpu.memory_space<vmem>>, %arg6: memref<16x64xbf16, #tpu.memory_space<vmem>>) attributes {dimension_semantics = [#tpu.dimension_semantics<parallel>], iteration_bounds = array<i64: 2>, scalar_prefetch = 0 : i64, scratch_operands = 0 : i64, tpu.core_type = #tpu.core_type<tc>, window_params = [{transform_indices = @transform_0, window_bounds = array<i64: 16, 128>}, {pipeline_mode = #tpu.pipeline_mode<synchronous>, transform_indices = @transform_1, window_bounds = array<i64: 128, 64>}, {pipeline_mode = #tpu.pipeline_mode<synchronous>, transform_indices = @transform_2, window_bounds = array<i64: 1, 64>}, {pipeline_mode = #tpu.pipeline_mode<synchronous>, transform_indices = @transform_3, window_bounds = array<i64: 1, 64>}, {pipeline_mode = #tpu.pipeline_mode<synchronous>, transform_indices = @transform_4, window_bounds = array<i64: 1, 64>}, {transform_indices = @transform_5, window_bounds = array<i64: 16, 64>}]} {
    %c0 = arith.constant 0 : index
    %c0_0 = arith.constant 0 : index
    %0 = vector.load %arg1[%c0, %c0_0] : memref<16x128xbf16, #tpu.memory_space<vmem>>, vector<16x128xbf16>
    %c0_1 = arith.constant 0 : index
    %c0_2 = arith.constant 0 : index
    %1 = vector.load %arg2[%c0_1, %c0_2] : memref<128x64xbf16, #tpu.memory_space<vmem>>, vector<128x64xbf16>
    %cst = arith.constant dense<0.000000e+00> : vector<16x64xf32>
    %2 = tpu.matmul %0, %1, %cst {dimension_numbers = #tpu.dot_dimension_numbers<[1], [0], [0], [1], [0, 0, 1, 1], [], []>} : vector<16x128xbf16>, vector<128x64xbf16>, vector<16x64xf32> -> vector<16x64xf32>
    %c0_3 = arith.constant 0 : index
    %c0_4 = arith.constant 0 : index
    %3 = vector.load %arg3[%c0_3, %c0_4] : memref<1x64xf32, #tpu.memory_space<vmem>>, vector<1x64xf32>
    %4 = vector.broadcast %3 : vector<1x64xf32> to vector<16x64xf32>
    %5 = arith.addf %2, %4 : vector<16x64xf32>
    %c0_5 = arith.constant 0 : index
    %c0_6 = arith.constant 0 : index
    %6 = vector.load %arg4[%c0_5, %c0_6] : memref<1x64xf32, #tpu.memory_space<vmem>>, vector<1x64xf32>
    %c0_7 = arith.constant 0 : index
    %c0_8 = arith.constant 0 : index
    %7 = vector.load %arg5[%c0_7, %c0_8] : memref<1x64xf32, #tpu.memory_space<vmem>>, vector<1x64xf32>
    %cst_9 = arith.constant dense<0.000000e+00> : vector<16xf32>
    %8 = vector.multi_reduction <add>, %5, %cst_9 [1] : vector<16x64xf32> to vector<16xf32>
    %9 = vector.shape_cast %8 : vector<16xf32> to vector<16x1xf32>
    %cst_10 = arith.constant 6.400000e+01 : f32
    %10 = vector.broadcast %cst_10 : f32 to vector<16x1xf32>
    %11 = arith.divf %9, %10 : vector<16x1xf32>
    %12 = vector.broadcast %11 : vector<16x1xf32> to vector<16x64xf32>
    %13 = arith.subf %5, %12 : vector<16x64xf32>
    %14 = arith.mulf %13, %13 : vector<16x64xf32>
    %cst_11 = arith.constant dense<0.000000e+00> : vector<16xf32>
    %15 = vector.multi_reduction <add>, %14, %cst_11 [1] : vector<16x64xf32> to vector<16xf32>
    %16 = vector.shape_cast %15 : vector<16xf32> to vector<16x1xf32>
    %cst_12 = arith.constant 6.400000e+01 : f32
    %17 = vector.broadcast %cst_12 : f32 to vector<16x1xf32>
    %18 = arith.divf %16, %17 : vector<16x1xf32>
    %19 = vector.broadcast %11 : vector<16x1xf32> to vector<16x64xf32>
    %20 = arith.subf %5, %19 : vector<16x64xf32>
    %cst_13 = arith.constant 9.99999974E-6 : f32
    %21 = vector.broadcast %cst_13 : f32 to vector<16x1xf32>
    %22 = arith.addf %18, %21 : vector<16x1xf32>
    %23 = math.rsqrt %22 : vector<16x1xf32>
    %24 = vector.broadcast %23 : vector<16x1xf32> to vector<16x64xf32>
    %25 = arith.mulf %20, %24 : vector<16x64xf32>
    %26 = vector.broadcast %6 : vector<1x64xf32> to vector<16x64xf32>
    %27 = arith.mulf %25, %26 : vector<16x64xf32>
    %28 = vector.broadcast %7 : vector<1x64xf32> to vector<16x64xf32>
    %29 = arith.addf %27, %28 : vector<16x64xf32>
    %30 = arith.truncf %29 : vector<16x64xf32> to vector<16x64xbf16>
    %c0_14 = arith.constant 0 : index
    %c0_15 = arith.constant 0 : index
    %31 = vector.load %arg6[%c0_14, %c0_15] : memref<16x64xbf16, #tpu.memory_space<vmem>>, vector<16x64xbf16>
    tpu.vector_store %arg6[%c0_14, %c0_15], %30 {strides = array<i32>} : memref<16x64xbf16, #tpu.memory_space<vmem>>, vector<16x64xbf16>,
    return
  }
  func.func @transform_0(%arg0: i32) -> (i32, i32) {
    %c0_i32 = arith.constant 0 : i32
    %c0_i32_0 = arith.constant 0 : i32
    return %arg0, %c0_i32 : i32, i32
  }
  func.func @transform_1(%arg0: i32) -> (i32, i32) {
    %c0_i32 = arith.constant 0 : i32
    %c0_i32_0 = arith.constant 0 : i32
    %c0_i32_1 = arith.constant 0 : i32
    return %c0_i32, %c0_i32_0 : i32, i32
  }
  func.func @transform_2(%arg0: i32) -> (i32, i32) {
    %c0_i32 = arith.constant 0 : i32
    %c0_i32_0 = arith.constant 0 : i32
    %c0_i32_1 = arith.constant 0 : i32
    return %c0_i32, %c0_i32_0 : i32, i32
  }
  func.func @transform_3(%arg0: i32) -> (i32, i32) {
    %c0_i32 = arith.constant 0 : i32
    %c0_i32_0 = arith.constant 0 : i32
    %c0_i32_1 = arith.constant 0 : i32
    return %c0_i32, %c0_i32_0 : i32, i32
  }
  func.func @transform_4(%arg0: i32) -> (i32, i32) {
    %c0_i32 = arith.constant 0 : i32
    %c0_i32_0 = arith.constant 0 : i32
    %c0_i32_1 = arith.constant 0 : i32
    return %c0_i32, %c0_i32_0 : i32, i32
  }
  func.func @transform_5(%arg0: i32) -> (i32, i32) {
    %c0_i32 = arith.constant 0 : i32
    %c0_i32_0 = arith.constant 0 : i32
    return %arg0, %c0_i32 : i32, i32
  }
}

module attributes {stable_mosaic.version = 11 : i64} {
  func.func @_swin_block_kernel(%arg0: i32, %arg1: memref<16x64xbf16, #tpu.memory_space<vmem>>, %arg2: memref<64x192xbf16, #tpu.memory_space<vmem>>, %arg3: memref<1x192xf32, #tpu.memory_space<vmem>>, %arg4: memref<1x64xf32, #tpu.memory_space<vmem>>, %arg5: memref<4x16x16xbf16, #tpu.memory_space<vmem>>, %arg6: memref<1x16x16xbf16, #tpu.memory_space<vmem>>, %arg7: memref<64x64xbf16, #tpu.memory_space<vmem>>, %arg8: memref<1x64xf32, #tpu.memory_space<vmem>>, %arg9: memref<1x64xf32, #tpu.memory_space<vmem>>, %arg10: memref<1x64xf32, #tpu.memory_space<vmem>>, %arg11: memref<64x128xbf16, #tpu.memory_space<vmem>>, %arg12: memref<1x128xf32, #tpu.memory_space<vmem>>, %arg13: memref<128x64xbf16, #tpu.memory_space<vmem>>, %arg14: memref<1x64xf32, #tpu.memory_space<vmem>>, %arg15: memref<1x64xf32, #tpu.memory_space<vmem>>, %arg16: memref<1x64xf32, #tpu.memory_space<vmem>>, %arg17: memref<16x64xbf16, #tpu.memory_space<vmem>>) attributes {dimension_semantics = [#tpu.dimension_semantics<parallel>], iteration_bounds = array<i64: 2>, scalar_prefetch = 0 : i64, scratch_operands = 0 : i64, tpu.core_type = #tpu.core_type<tc>, window_params = [{transform_indices = @transform_0, window_bounds = array<i64: 16, 64>}, {pipeline_mode = #tpu.pipeline_mode<synchronous>, transform_indices = @transform_1, window_bounds = array<i64: 64, 192>}, {pipeline_mode = #tpu.pipeline_mode<synchronous>, transform_indices = @transform_2, window_bounds = array<i64: 1, 192>}, {pipeline_mode = #tpu.pipeline_mode<synchronous>, transform_indices = @transform_3, window_bounds = array<i64: 1, 64>}, {pipeline_mode = #tpu.pipeline_mode<synchronous>, transform_indices = @transform_4, window_bounds = array<i64: 4, 16, 16>}, {pipeline_mode = #tpu.pipeline_mode<synchronous>, transform_indices = @transform_5, window_bounds = array<i64: 1, 16, 16>}, {pipeline_mode = #tpu.pipeline_mode<synchronous>, transform_indices = @transform_6, window_bounds = array<i64: 64, 64>}, {pipeline_mode = #tpu.pipeline_mode<synchronous>, transform_indices = @transform_7, window_bounds = array<i64: 1, 64>}, {pipeline_mode = #tpu.pipeline_mode<synchronous>, transform_indices = @transform_8, window_bounds = array<i64: 1, 64>}, {pipeline_mode = #tpu.pipeline_mode<synchronous>, transform_indices = @transform_9, window_bounds = array<i64: 1, 64>}, {pipeline_mode = #tpu.pipeline_mode<synchronous>, transform_indices = @transform_10, window_bounds = array<i64: 64, 128>}, {pipeline_mode = #tpu.pipeline_mode<synchronous>, transform_indices = @transform_11, window_bounds = array<i64: 1, 128>}, {pipeline_mode = #tpu.pipeline_mode<synchronous>, transform_indices = @transform_12, window_bounds = array<i64: 128, 64>}, {pipeline_mode = #tpu.pipeline_mode<synchronous>, transform_indices = @transform_13, window_bounds = array<i64: 1, 64>}, {pipeline_mode = #tpu.pipeline_mode<synchronous>, transform_indices = @transform_14, window_bounds = array<i64: 1, 64>}, {pipeline_mode = #tpu.pipeline_mode<synchronous>, transform_indices = @transform_15, window_bounds = array<i64: 1, 64>}, {transform_indices = @transform_16, window_bounds = array<i64: 16, 64>}]} {
    %c0 = arith.constant 0 : index
    %c0_0 = arith.constant 0 : index
    %0 = vector.load %arg1[%c0, %c0_0] : memref<16x64xbf16, #tpu.memory_space<vmem>>, vector<16x64xbf16>
    %1 = vector.shape_cast %0 : vector<16x64xbf16> to vector<1x4x4x64xbf16>
    %2 = vector.shape_cast %1 : vector<1x4x4x64xbf16> to vector<4x4x64xbf16>
    %3 = vector.shape_cast %2 : vector<4x4x64xbf16> to vector<16x64xbf16>
    %4 = arith.extf %3 : vector<16x64xbf16> to vector<16x64xf32>
    %c0_1 = arith.constant 0 : index
    %c0_2 = arith.constant 0 : index
    %5 = vector.load %arg2[%c0_1, %c0_2] : memref<64x192xbf16, #tpu.memory_space<vmem>>, vector<64x192xbf16>
    %cst = arith.constant dense<0.000000e+00> : vector<16x192xf32>
    %6 = tpu.matmul %3, %5, %cst {dimension_numbers = #tpu.dot_dimension_numbers<[1], [0], [0], [1], [0, 0, 1, 1], [], []>} : vector<16x64xbf16>, vector<64x192xbf16>, vector<16x192xf32> -> vector<16x192xf32>
    %c0_3 = arith.constant 0 : index
    %c0_4 = arith.constant 0 : index
    %7 = vector.load %arg3[%c0_3, %c0_4] : memref<1x192xf32, #tpu.memory_space<vmem>>, vector<1x192xf32>
    %8 = vector.broadcast %7 : vector<1x192xf32> to vector<16x192xf32>
    %9 = arith.addf %6, %8 : vector<16x192xf32>
    %c0_5 = arith.constant 0 : index
    %c0_6 = arith.constant 0 : index
    %10 = vector.load %arg4[%c0_5, %c0_6] : memref<1x64xf32, #tpu.memory_space<vmem>>, vector<1x64xf32>
    %c0_7 = arith.constant 0 : index
    %c0_8 = arith.constant 0 : index
    %c0_9 = arith.constant 0 : index
    %11 = vector.load %arg5[%c0_7, %c0_8, %c0_9] : memref<4x16x16xbf16, #tpu.memory_space<vmem>>, vector<4x16x16xbf16>
    %12 = arith.extf %11 : vector<4x16x16xbf16> to vector<4x16x16xf32>
    %c0_10 = arith.constant 0 : index
    %c0_11 = arith.constant 0 : index
    %c0_12 = arith.constant 0 : index
    %13 = vector.load %arg6[%c0_10, %c0_11, %c0_12] : memref<1x16x16xbf16, #tpu.memory_space<vmem>>, vector<1x16x16xbf16>
    %14 = arith.extf %13 : vector<1x16x16xbf16> to vector<1x16x16xf32>
    %c0_13 = arith.constant 0 : index
    %c0_14 = arith.constant 0 : index
    %15 = vector.load %arg7[%c0_13, %c0_14] : memref<64x64xbf16, #tpu.memory_space<vmem>>, vector<64x64xbf16>
    %cst_15 = arith.constant 0.000000e+00 : f32
    %16 = vector.broadcast %cst_15 : f32 to vector<16x64xf32>
    %17 = vector.extract_strided_slice %9 {offsets = [0, 0], sizes = [16, 16], strides = [1, 1]} : vector<16x192xf32> to vector<16x16xf32>
    %18 = vector.extract_strided_slice %9 {offsets = [0, 64], sizes = [16, 16], strides = [1, 1]} : vector<16x192xf32> to vector<16x16xf32>
    %19 = vector.extract_strided_slice %9 {offsets = [0, 128], sizes = [16, 16], strides = [1, 1]} : vector<16x192xf32> to vector<16x16xf32>
    %20 = arith.mulf %17, %17 : vector<16x16xf32>
    %cst_16 = arith.constant dense<0.000000e+00> : vector<16xf32>
    %21 = vector.multi_reduction <add>, %20, %cst_16 [1] : vector<16x16xf32> to vector<16xf32>
    %22 = vector.shape_cast %21 : vector<16xf32> to vector<16x1xf32>
    %cst_17 = arith.constant 9.99999996E-13 : f32
    %23 = vector.broadcast %cst_17 : f32 to vector<16x1xf32>
    %24 = arith.addf %22, %23 : vector<16x1xf32>
    %25 = math.rsqrt %24 : vector<16x1xf32>
    %26 = vector.broadcast %25 : vector<16x1xf32> to vector<16x16xf32>
    %27 = arith.mulf %17, %26 : vector<16x16xf32>
    %28 = arith.mulf %18, %18 : vector<16x16xf32>
    %cst_18 = arith.constant dense<0.000000e+00> : vector<16xf32>
    %29 = vector.multi_reduction <add>, %28, %cst_18 [1] : vector<16x16xf32> to vector<16xf32>
    %30 = vector.shape_cast %29 : vector<16xf32> to vector<16x1xf32>
    %cst_19 = arith.constant 9.99999996E-13 : f32
    %31 = vector.broadcast %cst_19 : f32 to vector<16x1xf32>
    %32 = arith.addf %30, %31 : vector<16x1xf32>
    %33 = math.rsqrt %32 : vector<16x1xf32>
    %34 = vector.broadcast %33 : vector<16x1xf32> to vector<16x16xf32>
    %35 = arith.mulf %18, %34 : vector<16x16xf32>
    %36 = vector.extract_strided_slice %10 {offsets = [0, 0], sizes = [1, 16], strides = [1, 1]} : vector<1x64xf32> to vector<1x16xf32>
    %37 = vector.broadcast %36 : vector<1x16xf32> to vector<16x16xf32>
    %38 = arith.mulf %27, %37 : vector<16x16xf32>
    %39 = vector.shape_cast %38 : vector<16x16xf32> to vector<1x16x16xf32>
    %40 = arith.truncf %39 : vector<1x16x16xf32> to vector<1x16x16xbf16>
    %41 = vector.shape_cast %35 : vector<16x16xf32> to vector<1x16x16xf32>
    %42 = arith.truncf %41 : vector<1x16x16xf32> to vector<1x16x16xbf16>
    %43 = vector.shape_cast %19 : vector<16x16xf32> to vector<1x16x16xf32>
    %44 = arith.truncf %43 : vector<1x16x16xf32> to vector<1x16x16xbf16>
    "tpu.trace_start"() <{level = 10 : i32, message = "wnd,wmd->wnm"}> : () -> ()
    %cst_20 = arith.constant dense<0.000000e+00> : vector<1x16x16xf32>
    %45 = tpu.matmul %40, %42, %cst_20 {dimension_numbers = #tpu.dot_dimension_numbers<[2], [2], [1], [1], [0, 0, 0, 1, 1, 1], [0], [0]>} : vector<1x16x16xbf16>, vector<1x16x16xbf16>, vector<1x16x16xf32> -> vector<1x16x16xf32>
    "tpu.trace_stop"() : () -> ()
    %46 = vector.extract_strided_slice %12 {offsets = [0, 0, 0], sizes = [1, 16, 16], strides = [1, 1, 1]} : vector<4x16x16xf32> to vector<1x16x16xf32>
    %47 = vector.shape_cast %46 : vector<1x16x16xf32> to vector<16x16xf32>
    %48 = vector.shape_cast %47 : vector<16x16xf32> to vector<1x16x16xf32>
    %49 = arith.addf %45, %48 : vector<1x16x16xf32>
    %50 = arith.addf %49, %14 : vector<1x16x16xf32>
    %cst_21 = arith.constant dense<0xFF800000> : vector<1x16xf32>
    %51 = vector.multi_reduction <maximumf>, %50, %cst_21 [2] : vector<1x16x16xf32> to vector<1x16xf32>
    %52 = vector.shape_cast %51 : vector<1x16xf32> to vector<1x16x1xf32>
    %53 = vector.broadcast %52 : vector<1x16x1xf32> to vector<1x16x16xf32>
    %54 = arith.subf %50, %53 : vector<1x16x16xf32>
    %55 = math.exp %54 : vector<1x16x16xf32>
    %cst_22 = arith.constant dense<0.000000e+00> : vector<1x16xf32>
    %56 = vector.multi_reduction <add>, %55, %cst_22 [2] : vector<1x16x16xf32> to vector<1x16xf32>
    %57 = vector.shape_cast %56 : vector<1x16xf32> to vector<1x16x1xf32>
    %58 = tpu.reciprocal %57 {approx = true} : vector<1x16x1xf32> -> vector<1x16x1xf32>
    %59 = vector.broadcast %58 : vector<1x16x1xf32> to vector<1x16x16xf32>
    %60 = arith.mulf %55, %59 : vector<1x16x16xf32>
    %61 = arith.truncf %60 : vector<1x16x16xf32> to vector<1x16x16xbf16>
    "tpu.trace_start"() <{level = 10 : i32, message = "wnm,wmd->wnd"}> : () -> ()
    %cst_23 = arith.constant dense<0.000000e+00> : vector<1x16x16xf32>
    %62 = tpu.matmul %61, %44, %cst_23 {dimension_numbers = #tpu.dot_dimension_numbers<[2], [1], [1], [2], [0, 0, 0, 1, 1, 2], [0], [0]>} : vector<1x16x16xbf16>, vector<1x16x16xbf16>, vector<1x16x16xf32> -> vector<1x16x16xf32>
    "tpu.trace_stop"() : () -> ()
    %63 = vector.shape_cast %62 : vector<1x16x16xf32> to vector<16x16xf32>
    %64 = arith.truncf %63 : vector<16x16xf32> to vector<16x16xbf16>
    %65 = vector.extract_strided_slice %15 {offsets = [0, 0], sizes = [16, 64], strides = [1, 1]} : vector<64x64xbf16> to vector<16x64xbf16>
    %cst_24 = arith.constant dense<0.000000e+00> : vector<16x64xf32>
    %66 = tpu.matmul %64, %65, %cst_24 {dimension_numbers = #tpu.dot_dimension_numbers<[1], [0], [0], [1], [0, 0, 1, 1], [], []>} : vector<16x16xbf16>, vector<16x64xbf16>, vector<16x64xf32> -> vector<16x64xf32>
    %67 = arith.addf %16, %66 : vector<16x64xf32>
    %68 = vector.extract_strided_slice %9 {offsets = [0, 16], sizes = [16, 16], strides = [1, 1]} : vector<16x192xf32> to vector<16x16xf32>
    %69 = vector.extract_strided_slice %9 {offsets = [0, 80], sizes = [16, 16], strides = [1, 1]} : vector<16x192xf32> to vector<16x16xf32>
    %70 = vector.extract_strided_slice %9 {offsets = [0, 144], sizes = [16, 16], strides = [1, 1]} : vector<16x192xf32> to vector<16x16xf32>
    %71 = arith.mulf %68, %68 : vector<16x16xf32>
    %cst_25 = arith.constant dense<0.000000e+00> : vector<16xf32>
    %72 = vector.multi_reduction <add>, %71, %cst_25 [1] : vector<16x16xf32> to vector<16xf32>
    %73 = vector.shape_cast %72 : vector<16xf32> to vector<16x1xf32>
    %cst_26 = arith.constant 9.99999996E-13 : f32
    %74 = vector.broadcast %cst_26 : f32 to vector<16x1xf32>
    %75 = arith.addf %73, %74 : vector<16x1xf32>
    %76 = math.rsqrt %75 : vector<16x1xf32>
    %77 = vector.broadcast %76 : vector<16x1xf32> to vector<16x16xf32>
    %78 = arith.mulf %68, %77 : vector<16x16xf32>
    %79 = arith.mulf %69, %69 : vector<16x16xf32>
    %cst_27 = arith.constant dense<0.000000e+00> : vector<16xf32>
    %80 = vector.multi_reduction <add>, %79, %cst_27 [1] : vector<16x16xf32> to vector<16xf32>
    %81 = vector.shape_cast %80 : vector<16xf32> to vector<16x1xf32>
    %cst_28 = arith.constant 9.99999996E-13 : f32
    %82 = vector.broadcast %cst_28 : f32 to vector<16x1xf32>
    %83 = arith.addf %81, %82 : vector<16x1xf32>
    %84 = math.rsqrt %83 : vector<16x1xf32>
    %85 = vector.broadcast %84 : vector<16x1xf32> to vector<16x16xf32>
    %86 = arith.mulf %69, %85 : vector<16x16xf32>
    %87 = vector.extract_strided_slice %10 {offsets = [0, 16], sizes = [1, 16], strides = [1, 1]} : vector<1x64xf32> to vector<1x16xf32>
    %88 = vector.broadcast %87 : vector<1x16xf32> to vector<16x16xf32>
    %89 = arith.mulf %78, %88 : vector<16x16xf32>
    %90 = vector.shape_cast %89 : vector<16x16xf32> to vector<1x16x16xf32>
    %91 = arith.truncf %90 : vector<1x16x16xf32> to vector<1x16x16xbf16>
    %92 = vector.shape_cast %86 : vector<16x16xf32> to vector<1x16x16xf32>
    %93 = arith.truncf %92 : vector<1x16x16xf32> to vector<1x16x16xbf16>
    %94 = vector.shape_cast %70 : vector<16x16xf32> to vector<1x16x16xf32>
    %95 = arith.truncf %94 : vector<1x16x16xf32> to vector<1x16x16xbf16>
    "tpu.trace_start"() <{level = 10 : i32, message = "wnd,wmd->wnm"}> : () -> ()
    %cst_29 = arith.constant dense<0.000000e+00> : vector<1x16x16xf32>
    %96 = tpu.matmul %91, %93, %cst_29 {dimension_numbers = #tpu.dot_dimension_numbers<[2], [2], [1], [1], [0, 0, 0, 1, 1, 1], [0], [0]>} : vector<1x16x16xbf16>, vector<1x16x16xbf16>, vector<1x16x16xf32> -> vector<1x16x16xf32>
    "tpu.trace_stop"() : () -> ()
    %97 = vector.extract_strided_slice %12 {offsets = [1, 0, 0], sizes = [1, 16, 16], strides = [1, 1, 1]} : vector<4x16x16xf32> to vector<1x16x16xf32>
    %98 = vector.shape_cast %97 : vector<1x16x16xf32> to vector<16x16xf32>
    %99 = vector.shape_cast %98 : vector<16x16xf32> to vector<1x16x16xf32>
    %100 = arith.addf %96, %99 : vector<1x16x16xf32>
    %101 = arith.addf %100, %14 : vector<1x16x16xf32>
    %cst_30 = arith.constant dense<0xFF800000> : vector<1x16xf32>
    %102 = vector.multi_reduction <maximumf>, %101, %cst_30 [2] : vector<1x16x16xf32> to vector<1x16xf32>
    %103 = vector.shape_cast %102 : vector<1x16xf32> to vector<1x16x1xf32>
    %104 = vector.broadcast %103 : vector<1x16x1xf32> to vector<1x16x16xf32>
    %105 = arith.subf %101, %104 : vector<1x16x16xf32>
    %106 = math.exp %105 : vector<1x16x16xf32>
    %cst_31 = arith.constant dense<0.000000e+00> : vector<1x16xf32>
    %107 = vector.multi_reduction <add>, %106, %cst_31 [2] : vector<1x16x16xf32> to vector<1x16xf32>
    %108 = vector.shape_cast %107 : vector<1x16xf32> to vector<1x16x1xf32>
    %109 = tpu.reciprocal %108 {approx = true} : vector<1x16x1xf32> -> vector<1x16x1xf32>
    %110 = vector.broadcast %109 : vector<1x16x1xf32> to vector<1x16x16xf32>
    %111 = arith.mulf %106, %110 : vector<1x16x16xf32>
    %112 = arith.truncf %111 : vector<1x16x16xf32> to vector<1x16x16xbf16>
    "tpu.trace_start"() <{level = 10 : i32, message = "wnm,wmd->wnd"}> : () -> ()
    %cst_32 = arith.constant dense<0.000000e+00> : vector<1x16x16xf32>
    %113 = tpu.matmul %112, %95, %cst_32 {dimension_numbers = #tpu.dot_dimension_numbers<[2], [1], [1], [2], [0, 0, 0, 1, 1, 2], [0], [0]>} : vector<1x16x16xbf16>, vector<1x16x16xbf16>, vector<1x16x16xf32> -> vector<1x16x16xf32>
    "tpu.trace_stop"() : () -> ()
    %114 = vector.shape_cast %113 : vector<1x16x16xf32> to vector<16x16xf32>
    %115 = arith.truncf %114 : vector<16x16xf32> to vector<16x16xbf16>
    %116 = vector.extract_strided_slice %15 {offsets = [16, 0], sizes = [16, 64], strides = [1, 1]} : vector<64x64xbf16> to vector<16x64xbf16>
    %cst_33 = arith.constant dense<0.000000e+00> : vector<16x64xf32>
    %117 = tpu.matmul %115, %116, %cst_33 {dimension_numbers = #tpu.dot_dimension_numbers<[1], [0], [0], [1], [0, 0, 1, 1], [], []>} : vector<16x16xbf16>, vector<16x64xbf16>, vector<16x64xf32> -> vector<16x64xf32>
    %118 = arith.addf %67, %117 : vector<16x64xf32>
    %119 = vector.extract_strided_slice %9 {offsets = [0, 32], sizes = [16, 16], strides = [1, 1]} : vector<16x192xf32> to vector<16x16xf32>
    %120 = vector.extract_strided_slice %9 {offsets = [0, 96], sizes = [16, 16], strides = [1, 1]} : vector<16x192xf32> to vector<16x16xf32>
    %121 = vector.extract_strided_slice %9 {offsets = [0, 160], sizes = [16, 16], strides = [1, 1]} : vector<16x192xf32> to vector<16x16xf32>
    %122 = arith.mulf %119, %119 : vector<16x16xf32>
    %cst_34 = arith.constant dense<0.000000e+00> : vector<16xf32>
    %123 = vector.multi_reduction <add>, %122, %cst_34 [1] : vector<16x16xf32> to vector<16xf32>
    %124 = vector.shape_cast %123 : vector<16xf32> to vector<16x1xf32>
    %cst_35 = arith.constant 9.99999996E-13 : f32
    %125 = vector.broadcast %cst_35 : f32 to vector<16x1xf32>
    %126 = arith.addf %124, %125 : vector<16x1xf32>
    %127 = math.rsqrt %126 : vector<16x1xf32>
    %128 = vector.broadcast %127 : vector<16x1xf32> to vector<16x16xf32>
    %129 = arith.mulf %119, %128 : vector<16x16xf32>
    %130 = arith.mulf %120, %120 : vector<16x16xf32>
    %cst_36 = arith.constant dense<0.000000e+00> : vector<16xf32>
    %131 = vector.multi_reduction <add>, %130, %cst_36 [1] : vector<16x16xf32> to vector<16xf32>
    %132 = vector.shape_cast %131 : vector<16xf32> to vector<16x1xf32>
    %cst_37 = arith.constant 9.99999996E-13 : f32
    %133 = vector.broadcast %cst_37 : f32 to vector<16x1xf32>
    %134 = arith.addf %132, %133 : vector<16x1xf32>
    %135 = math.rsqrt %134 : vector<16x1xf32>
    %136 = vector.broadcast %135 : vector<16x1xf32> to vector<16x16xf32>
    %137 = arith.mulf %120, %136 : vector<16x16xf32>
    %138 = vector.extract_strided_slice %10 {offsets = [0, 32], sizes = [1, 16], strides = [1, 1]} : vector<1x64xf32> to vector<1x16xf32>
    %139 = vector.broadcast %138 : vector<1x16xf32> to vector<16x16xf32>
    %140 = arith.mulf %129, %139 : vector<16x16xf32>
    %141 = vector.shape_cast %140 : vector<16x16xf32> to vector<1x16x16xf32>
    %142 = arith.truncf %141 : vector<1x16x16xf32> to vector<1x16x16xbf16>
    %143 = vector.shape_cast %137 : vector<16x16xf32> to vector<1x16x16xf32>
    %144 = arith.truncf %143 : vector<1x16x16xf32> to vector<1x16x16xbf16>
    %145 = vector.shape_cast %121 : vector<16x16xf32> to vector<1x16x16xf32>
    %146 = arith.truncf %145 : vector<1x16x16xf32> to vector<1x16x16xbf16>
    "tpu.trace_start"() <{level = 10 : i32, message = "wnd,wmd->wnm"}> : () -> ()
    %cst_38 = arith.constant dense<0.000000e+00> : vector<1x16x16xf32>
    %147 = tpu.matmul %142, %144, %cst_38 {dimension_numbers = #tpu.dot_dimension_numbers<[2], [2], [1], [1], [0, 0, 0, 1, 1, 1], [0], [0]>} : vector<1x16x16xbf16>, vector<1x16x16xbf16>, vector<1x16x16xf32> -> vector<1x16x16xf32>
    "tpu.trace_stop"() : () -> ()
    %148 = vector.extract_strided_slice %12 {offsets = [2, 0, 0], sizes = [1, 16, 16], strides = [1, 1, 1]} : vector<4x16x16xf32> to vector<1x16x16xf32>
    %149 = vector.shape_cast %148 : vector<1x16x16xf32> to vector<16x16xf32>
    %150 = vector.shape_cast %149 : vector<16x16xf32> to vector<1x16x16xf32>
    %151 = arith.addf %147, %150 : vector<1x16x16xf32>
    %152 = arith.addf %151, %14 : vector<1x16x16xf32>
    %cst_39 = arith.constant dense<0xFF800000> : vector<1x16xf32>
    %153 = vector.multi_reduction <maximumf>, %152, %cst_39 [2] : vector<1x16x16xf32> to vector<1x16xf32>
    %154 = vector.shape_cast %153 : vector<1x16xf32> to vector<1x16x1xf32>
    %155 = vector.broadcast %154 : vector<1x16x1xf32> to vector<1x16x16xf32>
    %156 = arith.subf %152, %155 : vector<1x16x16xf32>
    %157 = math.exp %156 : vector<1x16x16xf32>
    %cst_40 = arith.constant dense<0.000000e+00> : vector<1x16xf32>
    %158 = vector.multi_reduction <add>, %157, %cst_40 [2] : vector<1x16x16xf32> to vector<1x16xf32>
    %159 = vector.shape_cast %158 : vector<1x16xf32> to vector<1x16x1xf32>
    %160 = tpu.reciprocal %159 {approx = true} : vector<1x16x1xf32> -> vector<1x16x1xf32>
    %161 = vector.broadcast %160 : vector<1x16x1xf32> to vector<1x16x16xf32>
    %162 = arith.mulf %157, %161 : vector<1x16x16xf32>
    %163 = arith.truncf %162 : vector<1x16x16xf32> to vector<1x16x16xbf16>
    "tpu.trace_start"() <{level = 10 : i32, message = "wnm,wmd->wnd"}> : () -> ()
    %cst_41 = arith.constant dense<0.000000e+00> : vector<1x16x16xf32>
    %164 = tpu.matmul %163, %146, %cst_41 {dimension_numbers = #tpu.dot_dimension_numbers<[2], [1], [1], [2], [0, 0, 0, 1, 1, 2], [0], [0]>} : vector<1x16x16xbf16>, vector<1x16x16xbf16>, vector<1x16x16xf32> -> vector<1x16x16xf32>
    "tpu.trace_stop"() : () -> ()
    %165 = vector.shape_cast %164 : vector<1x16x16xf32> to vector<16x16xf32>
    %166 = arith.truncf %165 : vector<16x16xf32> to vector<16x16xbf16>
    %167 = vector.extract_strided_slice %15 {offsets = [32, 0], sizes = [16, 64], strides = [1, 1]} : vector<64x64xbf16> to vector<16x64xbf16>
    %cst_42 = arith.constant dense<0.000000e+00> : vector<16x64xf32>
    %168 = tpu.matmul %166, %167, %cst_42 {dimension_numbers = #tpu.dot_dimension_numbers<[1], [0], [0], [1], [0, 0, 1, 1], [], []>} : vector<16x16xbf16>, vector<16x64xbf16>, vector<16x64xf32> -> vector<16x64xf32>
    %169 = arith.addf %118, %168 : vector<16x64xf32>
    %170 = vector.extract_strided_slice %9 {offsets = [0, 48], sizes = [16, 16], strides = [1, 1]} : vector<16x192xf32> to vector<16x16xf32>
    %171 = vector.extract_strided_slice %9 {offsets = [0, 112], sizes = [16, 16], strides = [1, 1]} : vector<16x192xf32> to vector<16x16xf32>
    %172 = vector.extract_strided_slice %9 {offsets = [0, 176], sizes = [16, 16], strides = [1, 1]} : vector<16x192xf32> to vector<16x16xf32>
    %173 = arith.mulf %170, %170 : vector<16x16xf32>
    %cst_43 = arith.constant dense<0.000000e+00> : vector<16xf32>
    %174 = vector.multi_reduction <add>, %173, %cst_43 [1] : vector<16x16xf32> to vector<16xf32>
    %175 = vector.shape_cast %174 : vector<16xf32> to vector<16x1xf32>
    %cst_44 = arith.constant 9.99999996E-13 : f32
    %176 = vector.broadcast %cst_44 : f32 to vector<16x1xf32>
    %177 = arith.addf %175, %176 : vector<16x1xf32>
    %178 = math.rsqrt %177 : vector<16x1xf32>
    %179 = vector.broadcast %178 : vector<16x1xf32> to vector<16x16xf32>
    %180 = arith.mulf %170, %179 : vector<16x16xf32>
    %181 = arith.mulf %171, %171 : vector<16x16xf32>
    %cst_45 = arith.constant dense<0.000000e+00> : vector<16xf32>
    %182 = vector.multi_reduction <add>, %181, %cst_45 [1] : vector<16x16xf32> to vector<16xf32>
    %183 = vector.shape_cast %182 : vector<16xf32> to vector<16x1xf32>
    %cst_46 = arith.constant 9.99999996E-13 : f32
    %184 = vector.broadcast %cst_46 : f32 to vector<16x1xf32>
    %185 = arith.addf %183, %184 : vector<16x1xf32>
    %186 = math.rsqrt %185 : vector<16x1xf32>
    %187 = vector.broadcast %186 : vector<16x1xf32> to vector<16x16xf32>
    %188 = arith.mulf %171, %187 : vector<16x16xf32>
    %189 = vector.extract_strided_slice %10 {offsets = [0, 48], sizes = [1, 16], strides = [1, 1]} : vector<1x64xf32> to vector<1x16xf32>
    %190 = vector.broadcast %189 : vector<1x16xf32> to vector<16x16xf32>
    %191 = arith.mulf %180, %190 : vector<16x16xf32>
    %192 = vector.shape_cast %191 : vector<16x16xf32> to vector<1x16x16xf32>
    %193 = arith.truncf %192 : vector<1x16x16xf32> to vector<1x16x16xbf16>
    %194 = vector.shape_cast %188 : vector<16x16xf32> to vector<1x16x16xf32>
    %195 = arith.truncf %194 : vector<1x16x16xf32> to vector<1x16x16xbf16>
    %196 = vector.shape_cast %172 : vector<16x16xf32> to vector<1x16x16xf32>
    %197 = arith.truncf %196 : vector<1x16x16xf32> to vector<1x16x16xbf16>
    "tpu.trace_start"() <{level = 10 : i32, message = "wnd,wmd->wnm"}> : () -> ()
    %cst_47 = arith.constant dense<0.000000e+00> : vector<1x16x16xf32>
    %198 = tpu.matmul %193, %195, %cst_47 {dimension_numbers = #tpu.dot_dimension_numbers<[2], [2], [1], [1], [0, 0, 0, 1, 1, 1], [0], [0]>} : vector<1x16x16xbf16>, vector<1x16x16xbf16>, vector<1x16x16xf32> -> vector<1x16x16xf32>
    "tpu.trace_stop"() : () -> ()
    %199 = vector.extract_strided_slice %12 {offsets = [3, 0, 0], sizes = [1, 16, 16], strides = [1, 1, 1]} : vector<4x16x16xf32> to vector<1x16x16xf32>
    %200 = vector.shape_cast %199 : vector<1x16x16xf32> to vector<16x16xf32>
    %201 = vector.shape_cast %200 : vector<16x16xf32> to vector<1x16x16xf32>
    %202 = arith.addf %198, %201 : vector<1x16x16xf32>
    %203 = arith.addf %202, %14 : vector<1x16x16xf32>
    %cst_48 = arith.constant dense<0xFF800000> : vector<1x16xf32>
    %204 = vector.multi_reduction <maximumf>, %203, %cst_48 [2] : vector<1x16x16xf32> to vector<1x16xf32>
    %205 = vector.shape_cast %204 : vector<1x16xf32> to vector<1x16x1xf32>
    %206 = vector.broadcast %205 : vector<1x16x1xf32> to vector<1x16x16xf32>
    %207 = arith.subf %203, %206 : vector<1x16x16xf32>
    %208 = math.exp %207 : vector<1x16x16xf32>
    %cst_49 = arith.constant dense<0.000000e+00> : vector<1x16xf32>
    %209 = vector.multi_reduction <add>, %208, %cst_49 [2] : vector<1x16x16xf32> to vector<1x16xf32>
    %210 = vector.shape_cast %209 : vector<1x16xf32> to vector<1x16x1xf32>
    %211 = tpu.reciprocal %210 {approx = true} : vector<1x16x1xf32> -> vector<1x16x1xf32>
    %212 = vector.broadcast %211 : vector<1x16x1xf32> to vector<1x16x16xf32>
    %213 = arith.mulf %208, %212 : vector<1x16x16xf32>
    %214 = arith.truncf %213 : vector<1x16x16xf32> to vector<1x16x16xbf16>
    "tpu.trace_start"() <{level = 10 : i32, message = "wnm,wmd->wnd"}> : () -> ()
    %cst_50 = arith.constant dense<0.000000e+00> : vector<1x16x16xf32>
    %215 = tpu.matmul %214, %197, %cst_50 {dimension_numbers = #tpu.dot_dimension_numbers<[2], [1], [1], [2], [0, 0, 0, 1, 1, 2], [0], [0]>} : vector<1x16x16xbf16>, vector<1x16x16xbf16>, vector<1x16x16xf32> -> vector<1x16x16xf32>
    "tpu.trace_stop"() : () -> ()
    %216 = vector.shape_cast %215 : vector<1x16x16xf32> to vector<16x16xf32>
    %217 = arith.truncf %216 : vector<16x16xf32> to vector<16x16xbf16>
    %218 = vector.extract_strided_slice %15 {offsets = [48, 0], sizes = [16, 64], strides = [1, 1]} : vector<64x64xbf16> to vector<16x64xbf16>
    %cst_51 = arith.constant dense<0.000000e+00> : vector<16x64xf32>
    %219 = tpu.matmul %217, %218, %cst_51 {dimension_numbers = #tpu.dot_dimension_numbers<[1], [0], [0], [1], [0, 0, 1, 1], [], []>} : vector<16x16xbf16>, vector<16x64xbf16>, vector<16x64xf32> -> vector<16x64xf32>
    %220 = arith.addf %169, %219 : vector<16x64xf32>
    %c0_52 = arith.constant 0 : index
    %c0_53 = arith.constant 0 : index
    %221 = vector.load %arg8[%c0_52, %c0_53] : memref<1x64xf32, #tpu.memory_space<vmem>>, vector<1x64xf32>
    %222 = vector.broadcast %221 : vector<1x64xf32> to vector<16x64xf32>
    %223 = arith.addf %220, %222 : vector<16x64xf32>
    %c0_54 = arith.constant 0 : index
    %c0_55 = arith.constant 0 : index
    %224 = vector.load %arg9[%c0_54, %c0_55] : memref<1x64xf32, #tpu.memory_space<vmem>>, vector<1x64xf32>
    %c0_56 = arith.constant 0 : index
    %c0_57 = arith.constant 0 : index
    %225 = vector.load %arg10[%c0_56, %c0_57] : memref<1x64xf32, #tpu.memory_space<vmem>>, vector<1x64xf32>
    %cst_58 = arith.constant dense<0.000000e+00> : vector<16xf32>
    %226 = vector.multi_reduction <add>, %223, %cst_58 [1] : vector<16x64xf32> to vector<16xf32>
    %227 = vector.shape_cast %226 : vector<16xf32> to vector<16x1xf32>
    %cst_59 = arith.constant 6.400000e+01 : f32
    %228 = vector.broadcast %cst_59 : f32 to vector<16x1xf32>
    %229 = arith.divf %227, %228 : vector<16x1xf32>
    %230 = vector.broadcast %229 : vector<16x1xf32> to vector<16x64xf32>
    %231 = arith.subf %223, %230 : vector<16x64xf32>
    %232 = arith.mulf %231, %231 : vector<16x64xf32>
    %cst_60 = arith.constant dense<0.000000e+00> : vector<16xf32>
    %233 = vector.multi_reduction <add>, %232, %cst_60 [1] : vector<16x64xf32> to vector<16xf32>
    %234 = vector.shape_cast %233 : vector<16xf32> to vector<16x1xf32>
    %cst_61 = arith.constant 6.400000e+01 : f32
    %235 = vector.broadcast %cst_61 : f32 to vector<16x1xf32>
    %236 = arith.divf %234, %235 : vector<16x1xf32>
    %237 = vector.broadcast %229 : vector<16x1xf32> to vector<16x64xf32>
    %238 = arith.subf %223, %237 : vector<16x64xf32>
    %cst_62 = arith.constant 9.99999974E-6 : f32
    %239 = vector.broadcast %cst_62 : f32 to vector<16x1xf32>
    %240 = arith.addf %236, %239 : vector<16x1xf32>
    %241 = math.rsqrt %240 : vector<16x1xf32>
    %242 = vector.broadcast %241 : vector<16x1xf32> to vector<16x64xf32>
    %243 = arith.mulf %238, %242 : vector<16x64xf32>
    %244 = vector.broadcast %224 : vector<1x64xf32> to vector<16x64xf32>
    %245 = arith.mulf %243, %244 : vector<16x64xf32>
    %246 = vector.broadcast %225 : vector<1x64xf32> to vector<16x64xf32>
    %247 = arith.addf %245, %246 : vector<16x64xf32>
    %248 = arith.addf %4, %247 : vector<16x64xf32>
    %249 = arith.truncf %248 : vector<16x64xf32> to vector<16x64xbf16>
    %c0_63 = arith.constant 0 : index
    %c0_64 = arith.constant 0 : index
    %250 = vector.load %arg11[%c0_63, %c0_64] : memref<64x128xbf16, #tpu.memory_space<vmem>>, vector<64x128xbf16>
    %cst_65 = arith.constant dense<0.000000e+00> : vector<16x128xf32>
    %251 = tpu.matmul %249, %250, %cst_65 {dimension_numbers = #tpu.dot_dimension_numbers<[1], [0], [0], [1], [0, 0, 1, 1], [], []>} : vector<16x64xbf16>, vector<64x128xbf16>, vector<16x128xf32> -> vector<16x128xf32>
    %c0_66 = arith.constant 0 : index
    %c0_67 = arith.constant 0 : index
    %252 = vector.load %arg12[%c0_66, %c0_67] : memref<1x128xf32, #tpu.memory_space<vmem>>, vector<1x128xf32>
    %253 = vector.broadcast %252 : vector<1x128xf32> to vector<16x128xf32>
    %254 = arith.addf %251, %253 : vector<16x128xf32>
    %255 = arith.mulf %254, %254 : vector<16x128xf32>
    %256 = arith.mulf %254, %255 : vector<16x128xf32>
    %cst_68 = arith.constant 4.471500e-02 : f32
    %257 = vector.broadcast %cst_68 : f32 to vector<16x128xf32>
    %258 = arith.mulf %257, %256 : vector<16x128xf32>
    %259 = arith.addf %254, %258 : vector<16x128xf32>
    %cst_69 = arith.constant 0.797884583 : f32
    %260 = vector.broadcast %cst_69 : f32 to vector<16x128xf32>
    %261 = arith.mulf %260, %259 : vector<16x128xf32>
    %262 = math.tanh %261 : vector<16x128xf32>
    %cst_70 = arith.constant 1.000000e+00 : f32
    %263 = vector.broadcast %cst_70 : f32 to vector<16x128xf32>
    %264 = arith.addf %263, %262 : vector<16x128xf32>
    %cst_71 = arith.constant 5.000000e-01 : f32
    %265 = vector.broadcast %cst_71 : f32 to vector<16x128xf32>
    %266 = arith.mulf %265, %264 : vector<16x128xf32>
    %267 = arith.mulf %254, %266 : vector<16x128xf32>
    %268 = arith.truncf %267 : vector<16x128xf32> to vector<16x128xbf16>
    %c0_72 = arith.constant 0 : index
    %c0_73 = arith.constant 0 : index
    %269 = vector.load %arg13[%c0_72, %c0_73] : memref<128x64xbf16, #tpu.memory_space<vmem>>, vector<128x64xbf16>
    %cst_74 = arith.constant dense<0.000000e+00> : vector<16x64xf32>
    %270 = tpu.matmul %268, %269, %cst_74 {dimension_numbers = #tpu.dot_dimension_numbers<[1], [0], [0], [1], [0, 0, 1, 1], [], []>} : vector<16x128xbf16>, vector<128x64xbf16>, vector<16x64xf32> -> vector<16x64xf32>
    %c0_75 = arith.constant 0 : index
    %c0_76 = arith.constant 0 : index
    %271 = vector.load %arg14[%c0_75, %c0_76] : memref<1x64xf32, #tpu.memory_space<vmem>>, vector<1x64xf32>
    %272 = vector.broadcast %271 : vector<1x64xf32> to vector<16x64xf32>
    %273 = arith.addf %270, %272 : vector<16x64xf32>
    %c0_77 = arith.constant 0 : index
    %c0_78 = arith.constant 0 : index
    %274 = vector.load %arg15[%c0_77, %c0_78] : memref<1x64xf32, #tpu.memory_space<vmem>>, vector<1x64xf32>
    %c0_79 = arith.constant 0 : index
    %c0_80 = arith.constant 0 : index
    %275 = vector.load %arg16[%c0_79, %c0_80] : memref<1x64xf32, #tpu.memory_space<vmem>>, vector<1x64xf32>
    %cst_81 = arith.constant dense<0.000000e+00> : vector<16xf32>
    %276 = vector.multi_reduction <add>, %273, %cst_81 [1] : vector<16x64xf32> to vector<16xf32>
    %277 = vector.shape_cast %276 : vector<16xf32> to vector<16x1xf32>
    %cst_82 = arith.constant 6.400000e+01 : f32
    %278 = vector.broadcast %cst_82 : f32 to vector<16x1xf32>
    %279 = arith.divf %277, %278 : vector<16x1xf32>
    %280 = vector.broadcast %279 : vector<16x1xf32> to vector<16x64xf32>
    %281 = arith.subf %273, %280 : vector<16x64xf32>
    %282 = arith.mulf %281, %281 : vector<16x64xf32>
    %cst_83 = arith.constant dense<0.000000e+00> : vector<16xf32>
    %283 = vector.multi_reduction <add>, %282, %cst_83 [1] : vector<16x64xf32> to vector<16xf32>
    %284 = vector.shape_cast %283 : vector<16xf32> to vector<16x1xf32>
    %cst_84 = arith.constant 6.400000e+01 : f32
    %285 = vector.broadcast %cst_84 : f32 to vector<16x1xf32>
    %286 = arith.divf %284, %285 : vector<16x1xf32>
    %287 = vector.broadcast %279 : vector<16x1xf32> to vector<16x64xf32>
    %288 = arith.subf %273, %287 : vector<16x64xf32>
    %cst_85 = arith.constant 9.99999974E-6 : f32
    %289 = vector.broadcast %cst_85 : f32 to vector<16x1xf32>
    %290 = arith.addf %286, %289 : vector<16x1xf32>
    %291 = math.rsqrt %290 : vector<16x1xf32>
    %292 = vector.broadcast %291 : vector<16x1xf32> to vector<16x64xf32>
    %293 = arith.mulf %288, %292 : vector<16x64xf32>
    %294 = vector.broadcast %274 : vector<1x64xf32> to vector<16x64xf32>
    %295 = arith.mulf %293, %294 : vector<16x64xf32>
    %296 = vector.broadcast %275 : vector<1x64xf32> to vector<16x64xf32>
    %297 = arith.addf %295, %296 : vector<16x64xf32>
    %298 = arith.addf %248, %297 : vector<16x64xf32>
    %299 = arith.truncf %298 : vector<16x64xf32> to vector<16x64xbf16>
    %300 = vector.shape_cast %299 : vector<16x64xbf16> to vector<1x16x64xbf16>
    %301 = vector.shape_cast %300 : vector<1x16x64xbf16> to vector<16x64xbf16>
    %302 = vector.shape_cast %301 : vector<16x64xbf16> to vector<4x4x64xbf16>
    %303 = vector.shape_cast %302 : vector<4x4x64xbf16> to vector<1x4x4x64xbf16>
    %304 = vector.shape_cast %303 : vector<1x4x4x64xbf16> to vector<16x64xbf16>
    %c0_86 = arith.constant 0 : index
    %c0_87 = arith.constant 0 : index
    %305 = vector.load %arg17[%c0_86, %c0_87] : memref<16x64xbf16, #tpu.memory_space<vmem>>, vector<16x64xbf16>
    tpu.vector_store %arg17[%c0_86, %c0_87], %304 {strides = array<i32>} : memref<16x64xbf16, #tpu.memory_space<vmem>>, vector<16x64xbf16>,
    return
  }
  func.func @transform_0(%arg0: i32) -> (i32, i32) {
    %c0_i32 = arith.constant 0 : i32
    %c0_i32_0 = arith.constant 0 : i32
    return %arg0, %c0_i32 : i32, i32
  }
  func.func @transform_1(%arg0: i32) -> (i32, i32) {
    %c0_i32 = arith.constant 0 : i32
    %c0_i32_0 = arith.constant 0 : i32
    %c0_i32_1 = arith.constant 0 : i32
    return %c0_i32, %c0_i32_0 : i32, i32
  }
  func.func @transform_2(%arg0: i32) -> (i32, i32) {
    %c0_i32 = arith.constant 0 : i32
    %c0_i32_0 = arith.constant 0 : i32
    %c0_i32_1 = arith.constant 0 : i32
    return %c0_i32, %c0_i32_0 : i32, i32
  }
  func.func @transform_3(%arg0: i32) -> (i32, i32) {
    %c0_i32 = arith.constant 0 : i32
    %c0_i32_0 = arith.constant 0 : i32
    %c0_i32_1 = arith.constant 0 : i32
    return %c0_i32, %c0_i32_0 : i32, i32
  }
  func.func @transform_4(%arg0: i32) -> (i32, i32, i32) {
    %c0_i32 = arith.constant 0 : i32
    %c0_i32_0 = arith.constant 0 : i32
    %c0_i32_1 = arith.constant 0 : i32
    %c0_i32_2 = arith.constant 0 : i32
    return %c0_i32, %c0_i32_0, %c0_i32_1 : i32, i32, i32
  }
  func.func @transform_5(%arg0: i32) -> (i32, i32, i32) {
    %c0_i32 = arith.constant 0 : i32
    %c0_i32_0 = arith.constant 0 : i32
    %c0_i32_1 = arith.constant 0 : i32
    %c0_i32_2 = arith.constant 0 : i32
    return %c0_i32, %c0_i32_0, %c0_i32_1 : i32, i32, i32
  }
  func.func @transform_6(%arg0: i32) -> (i32, i32) {
    %c0_i32 = arith.constant 0 : i32
    %c0_i32_0 = arith.constant 0 : i32
    %c0_i32_1 = arith.constant 0 : i32
    return %c0_i32, %c0_i32_0 : i32, i32
  }
  func.func @transform_7(%arg0: i32) -> (i32, i32) {
    %c0_i32 = arith.constant 0 : i32
    %c0_i32_0 = arith.constant 0 : i32
    %c0_i32_1 = arith.constant 0 : i32
    return %c0_i32, %c0_i32_0 : i32, i32
  }
  func.func @transform_8(%arg0: i32) -> (i32, i32) {
    %c0_i32 = arith.constant 0 : i32
    %c0_i32_0 = arith.constant 0 : i32
    %c0_i32_1 = arith.constant 0 : i32
    return %c0_i32, %c0_i32_0 : i32, i32
  }
  func.func @transform_9(%arg0: i32) -> (i32, i32) {
    %c0_i32 = arith.constant 0 : i32
    %c0_i32_0 = arith.constant 0 : i32
    %c0_i32_1 = arith.constant 0 : i32
    return %c0_i32, %c0_i32_0 : i32, i32
  }
  func.func @transform_10(%arg0: i32) -> (i32, i32) {
    %c0_i32 = arith.constant 0 : i32
    %c0_i32_0 = arith.constant 0 : i32
    %c0_i32_1 = arith.constant 0 : i32
    return %c0_i32, %c0_i32_0 : i32, i32
  }
  func.func @transform_11(%arg0: i32) -> (i32, i32) {
    %c0_i32 = arith.constant 0 : i32
    %c0_i32_0 = arith.constant 0 : i32
    %c0_i32_1 = arith.constant 0 : i32
    return %c0_i32, %c0_i32_0 : i32, i32
  }
  func.func @transform_12(%arg0: i32) -> (i32, i32) {
    %c0_i32 = arith.constant 0 : i32
    %c0_i32_0 = arith.constant 0 : i32
    %c0_i32_1 = arith.constant 0 : i32
    return %c0_i32, %c0_i32_0 : i32, i32
  }
  func.func @transform_13(%arg0: i32) -> (i32, i32) {
    %c0_i32 = arith.constant 0 : i32
    %c0_i32_0 = arith.constant 0 : i32
    %c0_i32_1 = arith.constant 0 : i32
    return %c0_i32, %c0_i32_0 : i32, i32
  }
  func.func @transform_14(%arg0: i32) -> (i32, i32) {
    %c0_i32 = arith.constant 0 : i32
    %c0_i32_0 = arith.constant 0 : i32
    %c0_i32_1 = arith.constant 0 : i32
    return %c0_i32, %c0_i32_0 : i32, i32
  }
  func.func @transform_15(%arg0: i32) -> (i32, i32) {
    %c0_i32 = arith.constant 0 : i32
    %c0_i32_0 = arith.constant 0 : i32
    %c0_i32_1 = arith.constant 0 : i32
    return %c0_i32, %c0_i32_0 : i32, i32
  }
  func.func @transform_16(%arg0: i32) -> (i32, i32) {
    %c0_i32 = arith.constant 0 : i32
    %c0_i32_0 = arith.constant 0 : i32
    return %arg0, %c0_i32 : i32, i32
  }
}

module attributes {stable_mosaic.version = 11 : i64} {
  func.func @_norm_pool_kernel(%arg0: i32, %arg1: memref<1x16x64xbf16, #tpu.memory_space<vmem>>, %arg2: memref<1x64xf32, #tpu.memory_space<vmem>>, %arg3: memref<1x64xf32, #tpu.memory_space<vmem>>, %arg4: memref<1x1x64xf32, #tpu.memory_space<vmem>>) attributes {dimension_semantics = [#tpu.dimension_semantics<parallel>], iteration_bounds = array<i64: 2>, scalar_prefetch = 0 : i64, scratch_operands = 0 : i64, tpu.core_type = #tpu.core_type<tc>, window_params = [{transform_indices = @transform_0, window_bounds = array<i64: 1, 16, 64>}, {pipeline_mode = #tpu.pipeline_mode<synchronous>, transform_indices = @transform_1, window_bounds = array<i64: 1, 64>}, {pipeline_mode = #tpu.pipeline_mode<synchronous>, transform_indices = @transform_2, window_bounds = array<i64: 1, 64>}, {transform_indices = @transform_3, window_bounds = array<i64: 1, 1, 64>}]} {
    %c0 = arith.constant 0 : index
    %c0_0 = arith.constant 0 : index
    %c0_1 = arith.constant 0 : index
    %0 = vector.load %arg1[%c0, %c0_0, %c0_1] : memref<1x16x64xbf16, #tpu.memory_space<vmem>>, vector<1x16x64xbf16>
    %1 = vector.shape_cast %0 : vector<1x16x64xbf16> to vector<16x64xbf16>
    %2 = arith.extf %1 : vector<16x64xbf16> to vector<16x64xf32>
    %c0_2 = arith.constant 0 : index
    %c0_3 = arith.constant 0 : index
    %3 = vector.load %arg2[%c0_2, %c0_3] : memref<1x64xf32, #tpu.memory_space<vmem>>, vector<1x64xf32>
    %c0_4 = arith.constant 0 : index
    %c0_5 = arith.constant 0 : index
    %4 = vector.load %arg3[%c0_4, %c0_5] : memref<1x64xf32, #tpu.memory_space<vmem>>, vector<1x64xf32>
    %cst = arith.constant dense<0.000000e+00> : vector<16xf32>
    %5 = vector.multi_reduction <add>, %2, %cst [1] : vector<16x64xf32> to vector<16xf32>
    %6 = vector.shape_cast %5 : vector<16xf32> to vector<16x1xf32>
    %cst_6 = arith.constant 6.400000e+01 : f32
    %7 = vector.broadcast %cst_6 : f32 to vector<16x1xf32>
    %8 = arith.divf %6, %7 : vector<16x1xf32>
    %9 = vector.broadcast %8 : vector<16x1xf32> to vector<16x64xf32>
    %10 = arith.subf %2, %9 : vector<16x64xf32>
    %11 = arith.mulf %10, %10 : vector<16x64xf32>
    %cst_7 = arith.constant dense<0.000000e+00> : vector<16xf32>
    %12 = vector.multi_reduction <add>, %11, %cst_7 [1] : vector<16x64xf32> to vector<16xf32>
    %13 = vector.shape_cast %12 : vector<16xf32> to vector<16x1xf32>
    %cst_8 = arith.constant 6.400000e+01 : f32
    %14 = vector.broadcast %cst_8 : f32 to vector<16x1xf32>
    %15 = arith.divf %13, %14 : vector<16x1xf32>
    %16 = vector.broadcast %8 : vector<16x1xf32> to vector<16x64xf32>
    %17 = arith.subf %2, %16 : vector<16x64xf32>
    %cst_9 = arith.constant 9.99999974E-6 : f32
    %18 = vector.broadcast %cst_9 : f32 to vector<16x1xf32>
    %19 = arith.addf %15, %18 : vector<16x1xf32>
    %20 = math.rsqrt %19 : vector<16x1xf32>
    %21 = vector.broadcast %20 : vector<16x1xf32> to vector<16x64xf32>
    %22 = arith.mulf %17, %21 : vector<16x64xf32>
    %23 = vector.broadcast %3 : vector<1x64xf32> to vector<16x64xf32>
    %24 = arith.mulf %22, %23 : vector<16x64xf32>
    %25 = vector.broadcast %4 : vector<1x64xf32> to vector<16x64xf32>
    %26 = arith.addf %24, %25 : vector<16x64xf32>
    %cst_10 = arith.constant dense<0.000000e+00> : vector<64xf32>
    %27 = vector.multi_reduction <add>, %26, %cst_10 [0] : vector<16x64xf32> to vector<64xf32>
    %28 = vector.shape_cast %27 : vector<64xf32> to vector<1x64xf32>
    %cst_11 = arith.constant 1.600000e+01 : f32
    %29 = vector.broadcast %cst_11 : f32 to vector<1x64xf32>
    %30 = arith.divf %28, %29 : vector<1x64xf32>
    %c0_12 = arith.constant 0 : index
    %c0_13 = arith.constant 0 : index
    %c0_14 = arith.constant 0 : index
    %31 = vector.load %arg4[%c0_12, %c0_13, %c0_14] : memref<1x1x64xf32, #tpu.memory_space<vmem>>, vector<1x1x64xf32>
    %32 = vector.shape_cast %31 : vector<1x1x64xf32> to vector<1x64xf32>
    %33 = vector.shape_cast %30 : vector<1x64xf32> to vector<1x1x64xf32>
    tpu.vector_store %arg4[%c0_12, %c0_13, %c0_14], %33 {strides = array<i32>} : memref<1x1x64xf32, #tpu.memory_space<vmem>>, vector<1x1x64xf32>,
    return
  }
  func.func @transform_0(%arg0: i32) -> (i32, i32, i32) {
    %c0_i32 = arith.constant 0 : i32
    %c0_i32_0 = arith.constant 0 : i32
    %c0_i32_1 = arith.constant 0 : i32
    return %arg0, %c0_i32, %c0_i32_0 : i32, i32, i32
  }
  func.func @transform_1(%arg0: i32) -> (i32, i32) {
    %c0_i32 = arith.constant 0 : i32
    %c0_i32_0 = arith.constant 0 : i32
    %c0_i32_1 = arith.constant 0 : i32
    return %c0_i32, %c0_i32_0 : i32, i32
  }
  func.func @transform_2(%arg0: i32) -> (i32, i32) {
    %c0_i32 = arith.constant 0 : i32
    %c0_i32_0 = arith.constant 0 : i32
    %c0_i32_1 = arith.constant 0 : i32
    return %c0_i32, %c0_i32_0 : i32, i32
  }
  func.func @transform_3(%arg0: i32) -> (i32, i32, i32) {
    %c0_i32 = arith.constant 0 : i32
    %c0_i32_0 = arith.constant 0 : i32
    %c0_i32_1 = arith.constant 0 : i32
    return %arg0, %c0_i32, %c0_i32_0 : i32, i32, i32
  }
}

</mosaic_0001>

<bundles_post_ra>
// kernel: swin_extractor_forward.7
= control target key start
LH: loop header
LB: loop body
LE: loop exit
PB: predicated region body
PF: predicated region fallthrough
CT: control target
= control target key end

     0   :  { %s736_s18 = smov 0   ;;  %s921_s0 = inlined_call_operand.vmem [shape: bf16[128,48], index: 0, kind: input, shape index: {}]   ;;  %s922_s1 = inlined_call_operand.vmem [shape: bf16[48,32], index: 1, kind: input, shape index: {}]   ;;  %s923_s2 = inlined_call_operand.vmem [shape: f32[1,32], index: 2, kind: input, shape index: {}]   ;;  %s924_s3 = inlined_call_operand.vmem [shape: f32[1,32], index: 3, kind: input, shape index: {}]   ;;  %s925_s4 = inlined_call_operand.vmem [shape: f32[1,32], index: 4, kind: input, shape index: {}]   ;;  %s926_s5 = inlined_call_operand.vmem [shape: bf16[128,32], index: 5, kind: output, shape index: {}]  }
   0x1 LB: > { %s608_s19 = sadd.s32 4294967295, %s703_s18   ;;  %p612_p0 = scmp.ge.s32.totalorder %s703_s18, 1  ;;  %s703_s18 = sphi %s736_s18, %s15_s18  }
   0x2   : > { %p188_p1 = scmp.lt.s32.totalorder %s703_s18, 3 }
   0x4   : > { %p189_p2 = pnand %p612_p0, %p188_p1 }
   0x5   : > { %s613_s22 = sshll.u32 (!%p189_p2), %s608_s19, 3 }
   0x6   : > { %192 = sbr.rel (%p189_p2) target bundleno = 445 (0x1bd), region = 40  ;;  %p217_p3 = scmp.lt.s32.totalorder (!%p189_p2), %s613_s22, 15 }
   0xb   : > { %v657_v0 = vld [vmem:[%s922_s1 + $0x10] sm:$0xff]  ;;  %v656_v1 = vld [vmem:[%s922_s1 + $0x8] sm:$0xff]  ;;  %s928_s22 = smov (!%p217_p3, %s613_s22), 15  ;;  %v655_v2 = vld [vmem:[%s922_s1] sm:$0xff]  ;;  %vm285_vm0 = vcmask 392192   ;;  %vm329_vm1 = vcmask 261120  }
   0xc   : > { %303 = vmatpush.bf16.msra.mxu0 %v657_v0  ;;  %658 = vmatpush.bf16.msra.mxu1 %v657_v0  ;;  %s614_s25 = sshll.u32 %s928_s22, 2  ;;  %v676_v7 = vld [vmem:[%s923_s2] ss:$0 sm:$0xff]  ;;  %v705_v32 = vmov 32.0   ;;  %vm543_vm9 = vcmask 257024  }
   0xd   : > { %659 = vmatpush.bf16.msra.mxu2 %v657_v0  ;;  %660 = vmatpush.bf16.msra.mxu3 %v657_v0  ;;  %s220_s30 = scalar_lea.vmem %s921_s0, %s614_s25  ;;  %679 = vrcp.f32 %v705_v32  ;;  %s870_s14 = scalar_lea.vmem %s926_s5, %s614_s25 }
   0xe   : > { %v651_v3 = vld [vmem:[%s220_s30] sm:$0xff]  ;;  %v652_v4 = vld [vmem:[%s220_s30 + $0x8] sm:$0xff]  ;;  %v653_v5 = vld [vmem:[%s220_s30 + $0x10] sm:$0xff] }
   0xf   : > { %v654_v6 = vld [vmem:[%s220_s30 + $0x18] sm:$0xff] }
  0x10   : > { %304 = vmatpush.bf16.msra.mxu0 %v656_v1  ;;  %661 = vmatpush.bf16.msra.mxu1 %v656_v1 }
  0x11   : > { %662 = vmatpush.bf16.msra.mxu2 %v656_v1  ;;  %663 = vmatpush.bf16.msra.mxu3 %v656_v1 }
  0x13   : > { %v680_v33 = vpop.eup %679 }
  0x14   : > { %305 = vmatpush.bf16.msra.mxu0 %v655_v2  ;;  %664 = vmatpush.bf16.msra.mxu1 %v655_v2  ;;  %v355_v34 = vmul.f32 32.0, %v680_v33  ;;  %vm359_vm2 = vweird.f32 %v680_v33 }
  0x15   : > { %665 = vmatpush.bf16.msra.mxu2 %v655_v2  ;;  %666 = vmatpush.bf16.msra.mxu3 %v655_v2 }
  0x16   : > { %v356_v35 = vsub.f32 1.0, %v355_v34 }
  0x17   : > { %645 = vmatmul.msk.bf16.vlgmr.msra.gmra.mxu0 %vm285_vm0, %v651_v3  ;;  %646 = vmatmul.msk.bf16.vlgmr.msra.gmra.mxu1 %vm285_vm0, %v652_v4 }
  0x18   : > { %647 = vmatmul.msk.bf16.vlgmr.msra.gmra.mxu2 %vm285_vm0, %v653_v5  ;;  %648 = vmatmul.msk.bf16.vlgmr.msra.gmra.mxu3 %vm285_vm0, %v654_v6  ;;  %v357_v36 = vmul.f32 %v680_v33, %v356_v35 }
  0x1a   : > { %v358_v37 = vadd.f32 %v680_v33, %v357_v36 }
  0x1c   : > { %v772_v38 = vsel %vm359_vm2, %v680_v33, %v358_v37 }
  0x94   : > { %v307_v8 = vpop.f32.mrf.mxu0  ;;  %v312_v9 = vpop.f32.mrf.mxu1 }
  0x95   : > { %v308_v10 = vadd.f32 %v676_v7, %v307_v8  ;;  %v313_v11 = vadd.f32 %v676_v7, %v312_v9 }
  0x97   : > { %v336_v12 = vsel %vm329_vm1, %v313_v11, 0.0  ;;  %v330_v13 = vsel %vm329_vm1, %v308_v10, 0.0 }
  0x98   : > { %337 = vadd.xlane.f32.xlu1 %v336_v12  ;;  %331 = vadd.xlane.f32.xlu0 %v330_v13 }
  0x9b   : > { %v317_v14 = vpop.f32.mrf.mxu2  ;;  %v322_v15 = vpop.f32.mrf.mxu3 }
  0x9c   : > { %v318_v16 = vadd.f32 %v676_v7, %v317_v14  ;;  %v309_v17 = vpop.f32.mrf.mxu0  ;;  %v314_v18 = vpop.f32.mrf.mxu1  ;;  %v323_v24 = vadd.f32 %v676_v7, %v322_v15 }
  0x9d   : > { %v310_v19 = vadd.f32 %v676_v7, %v309_v17  ;;  %v315_v20 = vadd.f32 %v676_v7, %v314_v18 }
  0x9e   : > { %v342_v21 = vsel %vm329_vm1, %v318_v16, 0.0  ;;  %v348_v31 = vsel %vm329_vm1, %v323_v24, 0.0 }
  0x9f   : > { %343 = vadd.xlane.f32.xlu2 %v342_v21  ;;  %v339_v22 = vsel %vm329_vm1, %v315_v20, 0.0  ;;  %v333_v23 = vsel %vm329_vm1, %v310_v19, 0.0 }
  0xa0   : > { %340 = vadd.xlane.f32.xlu1 %v339_v22  ;;  %334 = vadd.xlane.f32.xlu0 %v333_v23 }
  0xa3   : > { %v319_v25 = vpop.f32.mrf.mxu2  ;;  %v324_v26 = vpop.f32.mrf.mxu3 }
  0xa4   : > { %v320_v27 = vadd.f32 %v676_v7, %v319_v25  ;;  %v325_v28 = vadd.f32 %v676_v7, %v324_v26 }
  0xa6   : > { %v345_v29 = vsel %vm329_vm1, %v320_v27, 0.0  ;;  %v351_v30 = vsel %vm329_vm1, %v325_v28, 0.0 }
  0xa7   : > { %346 = vadd.xlane.f32.xlu2 %v345_v29 }
  0xa8   : > { %352 = vadd.xlane.f32.xlu1 %v351_v30  ;;  %349 = vadd.xlane.f32.xlu0 %v348_v31 }
 0x10b   : > { %v338_v39 = vpop.xlane.xlu1 %337  ;;  %v332_v40 = vpop.xlane.xlu0 %331 }
 0x10c   : > { %v363_v41 = vmul.f32 %v772_v38, %v338_v39  ;;  %v361_v42 = vmul.f32 %v772_v38, %v332_v40 }
 0x10e   : > { %v776_v43 = vsub.f32 %v313_v11, %v363_v41  ;;  %v778_v44 = vsub.f32 %v308_v10, %v361_v42 }
 0x110   : > { %v379_v45 = vmul.f32 %v776_v43, %v776_v43  ;;  %v377_v46 = vmul.f32 %v778_v44, %v778_v44 }
 0x112   : > { %v344_v47 = vpop.xlane.xlu2 %343  ;;  %v391_v48 = vsel %vm329_vm1, %v379_v45, 0.0  ;;  %v385_v49 = vsel %vm329_vm1, %v377_v46, 0.0 }
 0x113   : > { %v365_v50 = vmul.f32 %v772_v38, %v344_v47  ;;  %392 = vadd.xlane.f32.xlu1 %v391_v48  ;;  %v341_v51 = vpop.xlane.xlu1 %340  ;;  %386 = vadd.xlane.f32.xlu2 %v385_v49  ;;  %v335_v52 = vpop.xlane.xlu0 %334 }
 0x114   : > { %v364_v53 = vmul.f32 %v772_v38, %v341_v51  ;;  %v362_v55 = vmul.f32 %v772_v38, %v335_v52 }
 0x115   : > { %v788_v54 = vsub.f32 %v318_v16, %v365_v50 }
 0x116   : > { %v791_v56 = vsub.f32 %v315_v20, %v364_v53  ;;  %v797_v59 = vsub.f32 %v310_v19, %v362_v55  ;;  %v847_v55 = vld [vmem:[%s924_s3] ss:$0 sm:$0xff] }
 0x117   : > { %v381_v57 = vmul.f32 %v788_v54, %v788_v54 }
 0x118   : > { %v380_v58 = vmul.f32 %v791_v56, %v791_v56  ;;  %v378_v5 = vmul.f32 %v797_v59, %v797_v59 }
 0x119   : > { %v397_v60 = vsel %vm329_vm1, %v381_v57, 0.0 }
 0x11a   : > { %v347_v61 = vpop.xlane.xlu2 %346  ;;  %398 = vadd.xlane.f32.xlu0 %v397_v60  ;;  %v394_v62 = vsel %vm329_vm1, %v380_v58, 0.0  ;;  %v388_v11 = vsel %vm329_vm1, %v378_v5, 0.0 }
 0x11b   : > { %v366_v63 = vmul.f32 %v772_v38, %v347_v61  ;;  %v353_v0 = vpop.xlane.xlu1 %352  ;;  %395 = vadd.xlane.f32.xlu2 %v394_v62  ;;  %v350_v1 = vpop.xlane.xlu0 %349  ;;  %v854_v62 = vld [vmem:[%s925_s4] ss:$0 sm:$0xff] }
 0x11c   : > { %v367_v2 = vmul.f32 %v772_v38, %v350_v1  ;;  %v368_v4 = vmul.f32 %v772_v38, %v353_v0 }
 0x11d   : > { %v803_v3 = vsub.f32 %v320_v27, %v366_v63 }
 0x11e   : > { %v808_v6 = vsub.f32 %v323_v24, %v367_v2  ;;  %v814_v9 = vsub.f32 %v325_v28, %v368_v4 }
 0x11f   : > { %v382_v7 = vmul.f32 %v803_v3, %v803_v3 }
 0x120   : > { %v383_v8 = vmul.f32 %v808_v6, %v808_v6  ;;  %v384_v13 = vmul.f32 %v814_v9, %v814_v9 }
 0x121   : > { %v400_v10 = vsel %vm329_vm1, %v382_v7, 0.0 }
 0x122   : > { %401 = vadd.xlane.f32.xlu1 %v400_v10  ;;  %389 = vadd.xlane.f32.xlu0 %v388_v11  ;;  %v403_v12 = vsel %vm329_vm1, %v383_v8, 0.0  ;;  %v406_v14 = vsel %vm329_vm1, %v384_v13, 0.0 }
 0x123   : > { %404 = vadd.xlane.f32.xlu2 %v403_v12 }
 0x12a   : > { %407 = vadd.xlane.f32.xlu0 %v406_v14 }
 0x186   : > { %v393_v15 = vpop.xlane.xlu1 %392  ;;  %v387_v16 = vpop.xlane.xlu2 %386 }
 0x187   : > { %v411_v17 = vmul.f32 %v393_v15, %v772_v38  ;;  %v409_v18 = vmul.f32 %v387_v16, %v772_v38 }
 0x189   : > { %v419_v19 = vadd.f32 1e-05, %v411_v17  ;;  %v417_v20 = vadd.f32 1e-05, %v409_v18 }
 0x18b   : > { %681 = vrsqrt.f32 %v419_v19  ;;  %vm451_vm5 = vweird.f32 %v419_v19  ;;  %vm431_vm7 = vweird.f32 %v417_v20 }
 0x18c   : > { %683 = vrsqrt.f32 %v417_v20 }
 0x18d   : > { %v399_v21 = vpop.xlane.xlu0 %398 }
 0x18e   : > { %v413_v22 = vmul.f32 %v399_v21, %v772_v38  ;;  %v396_v23 = vpop.xlane.xlu2 %395 }
 0x18f   : > { %v412_v24 = vmul.f32 %v396_v23, %v772_v38 }
 0x190   : > { %v826_v25 = vadd.f32 1e-05, %v413_v22 }
 0x191   : > { %v682_v26 = vpop.eup %681  ;;  %v828_v27 = vadd.f32 1e-05, %v412_v24 }
 0x192   : > { %v684_v28 = vpop.eup %683  ;;  %v446_v29 = vmul.f32 %v682_v26, %v419_v19  ;;  %685 = vrsqrt.f32 %v826_v25  ;;  %vm452_vm3 = vweird.f32 %v682_v26  ;;  %vm471_vm11 = vweird.f32 %v826_v25 }
 0x193   : > { %v426_v30 = vmul.f32 %v684_v28, %v417_v20  ;;  %687 = vrsqrt.f32 %v828_v27  ;;  %vm432_vm4 = vweird.f32 %v684_v28  ;;  %vm453_vm6 = vmor %vm451_vm5, %vm452_vm3  ;;  %vm461_vm13 = vweird.f32 %v828_v27 }
 0x194   : > { %v447_v31 = vmul.f32 %v682_v26, %v446_v29  ;;  %vm433_vm8 = vmor %vm431_vm7, %vm432_vm4 }
 0x195   : > { %v427_v32 = vmul.f32 %v684_v28, %v426_v30  ;;  %v402_v33 = vpop.xlane.xlu1 %401  ;;  %v390_v34 = vpop.xlane.xlu0 %389 }
 0x196   : > { %v448_v35 = vmul.f32 0.5, %v447_v31  ;;  %v414_v36 = vmul.f32 %v402_v33, %v772_v38  ;;  %v410_v37 = vmul.f32 %v390_v34, %v772_v38  ;;  %v405_v39 = vpop.xlane.xlu2 %404 }
 0x197   : > { %v428_v40 = vmul.f32 0.5, %v427_v32  ;;  %v415_v41 = vmul.f32 %v405_v39, %v772_v38 }
 0x198   : > { %v686_v42 = vpop.eup %685  ;;  %v449_v45 = vsub.f32 1.5, %v448_v35  ;;  %v835_v46 = vadd.f32 1e-05, %v414_v36  ;;  %v837_v47 = vadd.f32 1e-05, %v410_v37 }
 0x199   : > { %v688_v48 = vpop.eup %687  ;;  %v429_v49 = vsub.f32 1.5, %v428_v40  ;;  %v466_v50 = vmul.f32 %v686_v42, %v826_v25  ;;  %v840_v51 = vadd.f32 1e-05, %v415_v41  ;;  %vm472_vm10 = vweird.f32 %v686_v42 }
 0x19a   : > { %v450_v52 = vmul.f32 %v682_v26, %v449_v45  ;;  %v456_v53 = vmul.f32 %v688_v48, %v828_v27  ;;  %689 = vrsqrt.f32 %v835_v46  ;;  %vm462_vm12 = vweird.f32 %v688_v48  ;;  %vm473_vm14 = vmor %vm471_vm11, %vm472_vm10 }
 0x19b   : > { %v430_v57 = vmul.f32 %v684_v28, %v429_v49  ;;  %v467_v58 = vmul.f32 %v686_v42, %v466_v50  ;;  %691 = vrsqrt.f32 %v837_v47  ;;  %vm463_vm15 = vmor %vm461_vm13, %vm462_vm12  ;;  %vm481_vm1 = vweird.f32 %v835_v46 }
 0x19c   : > { %v454_v60 = vsel %vm453_vm6, %v682_v26, %v450_v52  ;;  %v457_v61 = vmul.f32 %v688_v48, %v456_v53  ;;  %693 = vrsqrt.f32 %v840_v51  ;;  %vm441_vm5 = vweird.f32 %v837_v47 }
 0x19d   : > { %v507_v63 = vmul.f32 %v454_v60, %v776_v43  ;;  %v434_v0 = vsel %vm433_vm8, %v684_v28, %v430_v57  ;;  %v468_v1 = vmul.f32 0.5, %v467_v58  ;;  %v408_v2 = vpop.xlane.xlu0 %407  ;;  %vm491_vm7 = vweird.f32 %v840_v51 }
 0x19e   : > { %v505_v4 = vmul.f32 %v434_v0, %v778_v44  ;;  %v458_v5 = vmul.f32 0.5, %v457_v61  ;;  %v416_v7 = vmul.f32 %v408_v2, %v772_v38 }
 0x19f   : > { %v518_v8 = vmul.f32 %v847_v55, %v507_v63  ;;  %v469_v10 = vsub.f32 1.5, %v468_v1 }
 0x1a0   : > { %v690_v11 = vpop.eup %689  ;;  %v516_v12 = vmul.f32 %v847_v55, %v505_v4  ;;  %v459_v43 = vsub.f32 1.5, %v458_v5  ;;  %v874_v19 = vadd.f32 1e-05, %v416_v7 }
 0x1a1   : > { %v692_v13 = vpop.eup %691  ;;  %v529_v14 = vadd.f32 %v854_v62, %v518_v8  ;;  %v470_v44 = vmul.f32 %v686_v42, %v469_v10  ;;  %v476_v38 = vmul.f32 %v690_v11, %v835_v46  ;;  %vm482_vm0 = vweird.f32 %v690_v11 }
 0x1a2   : > { %v694_v15 = vpop.eup %693  ;;  %v527_v16 = vadd.f32 %v854_v62, %v516_v12  ;;  %v460_v17 = vmul.f32 %v688_v48, %v459_v43  ;;  %v436_v18 = vmul.f32 %v692_v13, %v837_v47  ;;  %695 = vrsqrt.f32 %v874_v19  ;;  %vm483_vm4 = vmor %vm481_vm1, %vm482_vm0 }
 0x1a3   : > { %v537_v20 = vpack.c.bf16 %v529_v14, %v529_v14  ;;  %v474_v21 = vsel %vm473_vm14, %v686_v42, %v470_v44  ;;  %v477_v22 = vmul.f32 %v690_v11, %v476_v38  ;;  %v486_v23 = vmul.f32 %v694_v15, %v840_v51 }
 0x1a4   : > { %v535_v24 = vpack.c.bf16 %v527_v16, %v527_v16  ;;  %v509_v25 = vmul.f32 %v474_v21, %v788_v54  ;;  %v464_v26 = vsel %vm463_vm15, %v688_v48, %v460_v17  ;;  %v437_v27 = vmul.f32 %v692_v13, %v436_v18 }
 0x1a5   : > { %546 = vst.msk [vmem:[%s870_s14 + $0x8] sm:$0xf] %vm543_vm9, %v537_v20  ;;  %v508_v28 = vmul.f32 %v464_v26, %v791_v56  ;;  %v478_v29 = vmul.f32 0.5, %v477_v22  ;;  %v487_v30 = vmul.f32 %v694_v15, %v486_v23  ;;  %vm442_vm2 = vweird.f32 %v692_v13 }
 0x1a6   : > { %544 = vst.msk [vmem:[%s870_s14] sm:$0xf] %vm543_vm9, %v535_v24  ;;  %v520_v31 = vmul.f32 %v847_v55, %v509_v25  ;;  %v438_v32 = vmul.f32 0.5, %v437_v27  ;;  %vm492_vm3 = vweird.f32 %v694_v15  ;;  %vm443_vm6 = vmor %vm441_vm5, %vm442_vm2  ;;  %vm501_vm11 = vweird.f32 %v874_v19 }
 0x1a7   : > { %v519_v33 = vmul.f32 %v847_v55, %v508_v28  ;;  %v479_v34 = vsub.f32 1.5, %v478_v29  ;;  %v488_v54 = vmul.f32 0.5, %v487_v30  ;;  %vm493_vm8 = vmor %vm491_vm7, %vm492_vm3 }
 0x1a8   : > { %v531_v35 = vadd.f32 %v854_v62, %v520_v31  ;;  %v439_v36 = vsub.f32 1.5, %v438_v32  ;;  %v696_v46 = vpop.eup %695 }
 0x1a9   : > { %v530_v56 = vadd.f32 %v854_v62, %v519_v33  ;;  %v480_v37 = vmul.f32 %v690_v11, %v479_v34  ;;  %v489_v39 = vsub.f32 1.5, %v488_v54  ;;  %v496_v47 = vmul.f32 %v696_v46, %v874_v19 }
 0x1aa   : > { %v539_v40 = vpack.c.bf16 %v531_v35, %v531_v35  ;;  %v440_v41 = vmul.f32 %v692_v13, %v439_v36  ;;  %vm502_vm10 = vweird.f32 %v696_v46 }
 0x1ab   : > { %v538_v42 = vpack.c.bf16 %v530_v56, %v530_v56  ;;  %v484_v45 = vsel %vm483_vm4, %v690_v11, %v480_v37  ;;  %v490_v48 = vmul.f32 %v694_v15, %v489_v39  ;;  %v497_v60 = vmul.f32 %v696_v46, %v496_v47  ;;  %vm503_vm12 = vmor %vm501_vm11, %vm502_vm10 }
 0x1ac   : > { %548 = vst.msk [vmem:[%s870_s14 + $0x10] sm:$0xf] %vm543_vm9, %v539_v40  ;;  %v510_v49 = vmul.f32 %v484_v45, %v803_v3  ;;  %v444_v50 = vsel %vm443_vm6, %v692_v13, %v440_v41 }
 0x1ad   : > { %547 = vst.msk [vmem:[%s870_s14 + $0xc] sm:$0xf] %vm543_vm9, %v538_v42  ;;  %v506_v52 = vmul.f32 %v444_v50, %v797_v59  ;;  %v494_v53 = vsel %vm493_vm8, %v694_v15, %v490_v48  ;;  %v498_v59 = vmul.f32 0.5, %v497_v60 }
 0x1ae   : > { %v521_v57 = vmul.f32 %v847_v55, %v510_v49  ;;  %v511_v51 = vmul.f32 %v494_v53, %v808_v6 }
 0x1af   : > { %v517_v58 = vmul.f32 %v847_v55, %v506_v52  ;;  %v499_v4 = vsub.f32 1.5, %v498_v59 }
 0x1b0   : > { %v532_v3 = vadd.f32 %v854_v62, %v521_v57  ;;  %v522_v61 = vmul.f32 %v847_v55, %v511_v51 }
 0x1b1   : > { %v528_v63 = vadd.f32 %v854_v62, %v517_v58  ;;  %v500_v5 = vmul.f32 %v696_v46, %v499_v4 }
 0x1b2   : > { %v540_v0 = vpack.c.bf16 %v532_v3, %v532_v3  ;;  %v533_v1 = vadd.f32 %v854_v62, %v522_v61 }
 0x1b3   : > { %v536_v2 = vpack.c.bf16 %v528_v63, %v528_v63  ;;  %v504_v7 = vsel %vm503_vm12, %v696_v46, %v500_v5 }
 0x1b4   : > { %549 = vst.msk [vmem:[%s870_s14 + $0x14] sm:$0xf] %vm543_vm9, %v540_v0  ;;  %v541_v6 = vpack.c.bf16 %v533_v1, %v533_v1  ;;  %v512_v8 = vmul.f32 %v504_v7, %v814_v9 }
 0x1b5   : > { %545 = vst.msk [vmem:[%s870_s14 + $0x4] sm:$0xf] %vm543_vm9, %v536_v2 }
 0x1b6   : > { %550 = vst.msk [vmem:[%s870_s14 + $0x18] sm:$0xf] %vm543_vm9, %v541_v6  ;;  %v523_v10 = vmul.f32 %v847_v55, %v512_v8 }
 0x1b8   : > { %v534_v11 = vadd.f32 %v854_v62, %v523_v10 }
 0x1ba   : > { %v542_v12 = vpack.c.bf16 %v534_v11, %v534_v11 }
 0x1bc   : > { %551 = vst.msk [vmem:[%s870_s14 + $0x1c] sm:$0xf] %vm543_vm9, %v542_v12 }
 0x1bd PF: > { %s15_s18 = sadd.s32 1, %s703_s18  }
 0x1be   : > { %p12_p4 = scmp.ge.s32.totalorder %s15_s18, 4  }
 0x1c0   :  { %14 = sbr.rel (!%p12_p4) target bundleno = 1 (0x1), region = 70 }

// kernel: swin_extractor_forward.10
= control target key start
LH: loop header
LB: loop body
LE: loop exit
PB: predicated region body
PF: predicated region fallthrough
CT: control target
= control target key end

     0   :  { %s556_s18 = smov 0   ;;  %s617_s0 = inlined_call_operand.vmem [shape: bf16[32,128], index: 0, kind: input, shape index: {}]   ;;  %s618_s1 = inlined_call_operand.vmem [shape: bf16[128,64], index: 1, kind: input, shape index: {}]   ;;  %s619_s2 = inlined_call_operand.vmem [shape: f32[1,64], index: 2, kind: input, shape index: {}]   ;;  %s620_s3 = inlined_call_operand.vmem [shape: f32[1,64], index: 3, kind: input, shape index: {}]   ;;  %s621_s4 = inlined_call_operand.vmem [shape: f32[1,64], index: 4, kind: input, shape index: {}]   ;;  %s622_s5 = inlined_call_operand.vmem [shape: bf16[32,64], index: 5, kind: output, shape index: {}]  }
   0x1 LB: > { %s443_s19 = sadd.s32 4294967295, %s523_s18   ;;  %p447_p0 = scmp.ge.s32.totalorder %s523_s18, 1  ;;  %s523_s18 = sphi %s556_s18, %s15_s18  }
   0x2   : > { %p188_p1 = scmp.lt.s32.totalorder %s523_s18, 3 }
   0x4   : > { %p189_p2 = pnand %p447_p0, %p188_p1 }
   0x5   : > { %s448_s28 = sshll.u32 (!%p189_p2), %s443_s19, 1 }
   0x6   : > { %192 = sbr.rel (%p189_p2) target bundleno = 450 (0x1c2), region = 40  ;;  %p217_p3 = scmp.lt.s32.totalorder (!%p189_p2), %s448_s28, 3 }
   0xb   : > { %v498_v0 = vld [vmem:[%s618_s1 + $0x38] sm:$0xff]  ;;  %v497_v1 = vld [vmem:[%s618_s1 + $0x30] sm:$0xff]  ;;  %v496_v2 = vld [vmem:[%s618_s1 + $0x28] sm:$0xff]  ;;  %s624_s28 = smov (!%p217_p3, %s448_s28), 3  ;;  %vm320_vm0 = vcmask 523264   ;;  %v525_v16 = vmov 64.0  }
   0xc   : > { %304 = vmatpush.bf16.msra.mxu0 %v498_v0  ;;  %v495_v3 = vld [vmem:[%s618_s1 + $0x20] sm:$0xff]  ;;  %v494_v4 = vld [vmem:[%s618_s1 + $0x18] sm:$0xff]  ;;  %v493_v5 = vld [vmem:[%s618_s1 + $0x10] sm:$0xff]  ;;  %s449_s10 = sshll.u32 %s624_s28, 2  ;;  %511 = vrcp.f32 %v525_v16  ;;  %vm384_vm6 = vcmask 519168  }
   0xd   : > { %v492_v6 = vld [vmem:[%s618_s1 + $0x8] sm:$0xff]  ;;  %v491_v7 = vld [vmem:[%s618_s1] sm:$0xff]  ;;  %s220_s15 = scalar_lea.vmem %s617_s0, %s449_s10  ;;  %s226_s25 = scalar_lea.vmem %s622_s5, %s449_s10 }
   0xe   : > { %v490_v8 = vld [vmem:[%s220_s15] sm:$0xff] }
   0xf   : > { %v508_v9 = vld [vmem:[%s619_s2] ss:$0 sm:$0xff] }
  0x10   : > { %305 = vmatpush.bf16.msra.mxu0 %v497_v1  ;;  %v509_v47 = vld [vmem:[%s620_s3] ss:$0 sm:$0xff] }
  0x11   : > { %v510_v50 = vld [vmem:[%s621_s4] ss:$0 sm:$0xff] }
  0x12   : > { %v512_v17 = vpop.eup %511 }
  0x13   : > { %v328_v18 = vmul.f32 64.0, %v512_v17  ;;  %vm332_vm1 = vweird.f32 %v512_v17 }
  0x14   : > { %306 = vmatpush.bf16.msra.mxu0 %v496_v2 }
  0x15   : > { %v329_v19 = vsub.f32 1.0, %v328_v18 }
  0x17   : > { %v330_v20 = vmul.f32 %v512_v17, %v329_v19 }
  0x18   : > { %307 = vmatpush.bf16.msra.mxu0 %v495_v3 }
  0x19   : > { %v331_v21 = vadd.f32 %v512_v17, %v330_v20 }
  0x1b   : > { %v333_v22 = vsel %vm332_vm1, %v512_v17, %v331_v21 }
  0x1c   : > { %308 = vmatpush.bf16.msra.mxu0 %v494_v4 }
  0x20   : > { %309 = vmatpush.bf16.msra.mxu0 %v493_v5 }
  0x24   : > { %310 = vmatpush.bf16.msra.mxu0 %v492_v6 }
  0x28   : > { %311 = vmatpush.bf16.msra.mxu0 %v491_v7 }
  0x2b   : > { %312 = vmatmul.bf16.vlgmr.msra.gmra.mxu0 %v490_v8 }
  0xa8   : > { %v313_v10 = vpop.f32.mrf.mxu0 }
  0xa9   : > { %v314_v11 = vadd.f32 %v508_v9, %v313_v10 }
  0xab   : > { %v321_v12 = vsel %vm320_vm0, %v314_v11, 0.0 }
  0xac   : > { %322 = vadd.xlane.f32.xlu0 %v321_v12 }
  0xb0   : > { %v315_v13 = vpop.f32.mrf.mxu0 }
  0xb1   : > { %v316_v14 = vadd.f32 %v508_v9, %v315_v13 }
  0xb3   : > { %v324_v15 = vsel %vm320_vm0, %v316_v14, 0.0 }
  0xb4   : > { %325 = vadd.xlane.f32.xlu0 %v324_v15 }
 0x11f   : > { %v323_v23 = vpop.xlane.xlu0 %322 }
 0x120   : > { %v334_v24 = vmul.f32 %v333_v22, %v323_v23 }
 0x122   : > { %v336_v25 = vsub.f32 %v314_v11, %v334_v24 }
 0x124   : > { %v338_v26 = vmul.f32 %v336_v25, %v336_v25 }
 0x126   : > { %v340_v27 = vsel %vm320_vm0, %v338_v26, 0.0 }
 0x127   : > { %341 = vadd.xlane.f32.xlu1 %v340_v27  ;;  %v326_v28 = vpop.xlane.xlu0 %325 }
 0x128   : > { %v335_v29 = vmul.f32 %v333_v22, %v326_v28 }
 0x12a   : > { %v337_v30 = vsub.f32 %v316_v14, %v335_v29 }
 0x12c   : > { %v339_v31 = vmul.f32 %v337_v30, %v337_v30 }
 0x12e   : > { %v343_v32 = vsel %vm320_vm0, %v339_v31, 0.0 }
 0x12f   : > { %344 = vadd.xlane.f32.xlu1 %v343_v32 }
 0x19a   : > { %v342_v33 = vpop.xlane.xlu1 %341 }
 0x19b   : > { %v346_v34 = vmul.f32 %v342_v33, %v333_v22 }
 0x19d   : > { %v348_v35 = vadd.f32 1e-05, %v346_v34 }
 0x19f   : > { %513 = vrsqrt.f32 %v348_v35  ;;  %vm356_vm3 = vweird.f32 %v348_v35 }
 0x1a2   : > { %v345_v36 = vpop.xlane.xlu1 %344 }
 0x1a3   : > { %v347_v37 = vmul.f32 %v345_v36, %v333_v22 }
 0x1a5   : > { %v514_v38 = vpop.eup %513  ;;  %v349_v39 = vadd.f32 1e-05, %v347_v37 }
 0x1a6   : > { %v351_v40 = vmul.f32 %v514_v38, %v348_v35  ;;  %vm357_vm2 = vweird.f32 %v514_v38 }
 0x1a7   : > { %515 = vrsqrt.f32 %v349_v39  ;;  %vm358_vm4 = vmor %vm356_vm3, %vm357_vm2  ;;  %vm366_vm7 = vweird.f32 %v349_v39 }
 0x1a8   : > { %v352_v41 = vmul.f32 %v514_v38, %v351_v40 }
 0x1aa   : > { %v353_v42 = vmul.f32 0.5, %v352_v41 }
 0x1ac   : > { %v354_v43 = vsub.f32 1.5, %v353_v42 }
 0x1ad   : > { %v516_v44 = vpop.eup %515 }
 0x1ae   : > { %v355_v45 = vmul.f32 %v514_v38, %v354_v43  ;;  %v361_v46 = vmul.f32 %v516_v44, %v349_v39  ;;  %vm367_vm5 = vweird.f32 %v516_v44 }
 0x1af   : > { %vm368_vm8 = vmor %vm366_vm7, %vm367_vm5 }
 0x1b0   : > { %v359_v48 = vsel %vm358_vm4, %v514_v38, %v355_v45  ;;  %v362_v49 = vmul.f32 %v516_v44, %v361_v46 }
 0x1b1   : > { %v370_v51 = vmul.f32 %v359_v48, %v336_v25 }
 0x1b2   : > { %v363_v52 = vmul.f32 0.5, %v362_v49 }
 0x1b3   : > { %v375_v53 = vmul.f32 %v509_v47, %v370_v51 }
 0x1b4   : > { %v364_v54 = vsub.f32 1.5, %v363_v52 }
 0x1b5   : > { %v380_v55 = vadd.f32 %v510_v50, %v375_v53 }
 0x1b6   : > { %v365_v56 = vmul.f32 %v516_v44, %v364_v54 }
 0x1b7   : > { %v382_v57 = vpack.c.bf16 %v380_v55, %v380_v55 }
 0x1b8   : > { %v369_v58 = vsel %vm368_vm8, %v516_v44, %v365_v56 }
 0x1b9   : > { %385 = vst.msk [vmem:[%s226_s25] sm:$0xf] %vm384_vm6, %v382_v57  ;;  %v371_v59 = vmul.f32 %v369_v58, %v337_v30 }
 0x1bb   : > { %v376_v60 = vmul.f32 %v509_v47, %v371_v59 }
 0x1bd   : > { %v381_v61 = vadd.f32 %v510_v50, %v376_v60 }
 0x1bf   : > { %v383_v62 = vpack.c.bf16 %v381_v61, %v381_v61 }
 0x1c1   : > { %386 = vst.msk [vmem:[%s226_s25 + $0x4] sm:$0xf] %vm384_vm6, %v383_v62 }
 0x1c2 PF: > { %s15_s18 = sadd.s32 1, %s523_s18  }
 0x1c3   : > { %p12_p4 = scmp.ge.s32.totalorder %s15_s18, 4  }
 0x1c5   :  { %14 = sbr.rel (!%p12_p4) target bundleno = 1 (0x1), region = 70 }

// kernel: swin_extractor_forward.8
= control target key start
LH: loop header
LB: loop body
LE: loop exit
PB: predicated region body
PF: predicated region fallthrough
CT: control target
= control target key end

     0   :  { %s3383_s21 = smov 0   ;;  %s4614_s0 = inlined_call_operand.vmem [shape: bf16[128,32], index: 0, kind: input, shape index: {}]   ;;  %s4615_s1 = inlined_call_operand.vmem [shape: bf16[32,96], index: 1, kind: input, shape index: {}]   ;;  %s4616_s2 = inlined_call_operand.vmem [shape: f32[1,96], index: 2, kind: input, shape index: {}]   ;;  %s4617_s3 = inlined_call_operand.vmem [shape: f32[1,32], index: 3, kind: input, shape index: {}]   ;;  %s4618_s4 = inlined_call_operand.vmem [shape: bf16[2,16,16], index: 4, kind: input, shape index: {}]   ;;  %s4619_s5 = inlined_call_operand.vmem [shape: bf16[4,16,16], index: 5, kind: input, shape index: {}]   ;;  %s4620_s6 = inlined_call_operand.vmem [shape: bf16[32,32], index: 6, kind: input, shape index: {}]   ;;  %s4621_s7 = inlined_call_operand.vmem [shape: f32[1,32], index: 7, kind: input, shape index: {}]   ;;  %s4622_s8 = inlined_call_operand.vmem [shape: f32[1,32], index: 8, kind: input, shape index: {}]   ;;  %s4623_s9 = inlined_call_operand.vmem [shape: f32[1,32], index: 9, kind: input, shape index: {}]   ;;  %s4624_s10 = inlined_call_operand.vmem [shape: bf16[32,64], index: 10, kind: input, shape index: {}]   ;;  %s4625_s11 = inlined_call_operand.vmem [shape: f32[1,64], index: 11, kind: input, shape index: {}]   ;;  %s4626_s12 = inlined_call_operand.vmem [shape: bf16[64,32], index: 12, kind: input, shape index: {}]   ;;  %s4627_s13 = inlined_call_operand.vmem [shape: f32[1,32], index: 13, kind: input, shape index: {}]   ;;  %s4628_s14 = inlined_call_operand.vmem [shape: f32[1,32], index: 14, kind: input, shape index: {}]   ;;  %s4629_s15 = inlined_call_operand.vmem [shape: f32[1,32], index: 15, kind: input, shape index: {}]   ;;  %s4630_s16 = inlined_call_operand.vmem [shape: bf16[128,32], index: 16, kind: output, shape index: {}]  }
   0x1   :  { %4633 = sst [smem:[#allocation2_spill]] %s4614_s0 }
   0x2 LB: > { %s2956_s22 = sadd.s32 4294967295, %s3290_s21   ;;  %p2960_p0 = scmp.ge.s32.totalorder %s3290_s21, 1  ;;  %s3290_s21 = sphi %s3383_s21, %s26_s21  }
   0x3   : > { %p463_p1 = scmp.lt.s32.totalorder %s3290_s21, 3 }
   0x5   : > { %p464_p2 = pnand %p2960_p0, %p463_p1 }
   0x6   : > { %s2961_s25 = sshll.u32 (!%p464_p2), %s2956_s22, 3  ;;  %s4634_s0 = sld [smem:[#allocation2_spill]] (!%p464_p2) }
   0x7   : > { %467 = sbr.rel (%p464_p2) target bundleno = 2715 (0xa9b), region = 84  ;;  %p514_p3 = scmp.lt.s32.totalorder (!%p464_p2), %s2961_s25, 15 }
   0x8   : > { %s3292_s20 = smov (!%p464_p2), 96   ;;  %s3293_s24 = smov (!%p464_p2), 80  }
   0x9   : > { %s3294_s26 = smov (!%p464_p2), 112   ;;  %s3295_s27 = smov (!%p464_p2), 64  }
   0xc   : > { %v3044_v0 = vld [vmem:[%s4615_s1 + $0x8] sm:$0xff]  ;;  %v3043_v1 = vld [vmem:[%s4615_s1] sm:$0xff]  ;;  %s4656_s25 = smov (!%p514_p3, %s2961_s25), 15  ;;  %vm630_vm0 = vcmask 261120   ;;  %vm705_vm1 = vcmask 130048  }
   0xd   : > { %645 = vmatpush.bf16.msra.mxu0 %v3044_v0  ;;  %s2962_s28 = sshll.u32 %s4656_s25, 2  ;;  %v3095_v22 = vld [vmem:[%s4616_s2] ss:$0 sm:$0xff] }
   0xe   : > { %s517_s17 = scalar_lea.vmem %s4634_s0, %s2962_s28  ;;  %s3296_s0 = smov 48  }
   0xf   : > { %v526_v2 = vld [vmem:[%s517_s17] sm:$0xf]  ;;  %v527_v3 = vld [vmem:[%s517_s17 + $0x4] sm:$0xf]  ;;  %v528_v4 = vld [vmem:[%s517_s17 + $0x8] sm:$0xf]  ;;  %s4548_s30 = scalar_lea.vmem %s4630_s16, %s2962_s28 }
  0x10   : > { %535 = vst.sshfl [vmem:[#allocation1] sm:$0xff pattern:$0x75643120] %v526_v2  ;;  %v529_v5 = vld [vmem:[%s517_s17 + $0xc] sm:$0xf] }
  0x11   : > { %646 = vmatpush.bf16.msra.mxu0 %v3043_v1  ;;  %539 = vst.sshfl [vmem:[#allocation1 + $0x10] sm:$0xff pattern:$0x75643120] %v527_v3  ;;  %v530_v6 = vld [vmem:[%s517_s17 + $0x10] sm:$0xf] }
  0x12   : > { %543 = vst.sshfl [vmem:[#allocation1 + $0x20] sm:$0xff pattern:$0x75643120] %v528_v4  ;;  %v531_v7 = vld [vmem:[%s517_s17 + $0x14] sm:$0xf] }
  0x13   : > { %547 = vst.sshfl [vmem:[#allocation1 + $0x30] sm:$0xff pattern:$0x75643120] %v529_v5  ;;  %v532_v12 = vld [vmem:[%s517_s17 + $0x18] sm:$0xf] }
  0x14   : > { %v533_v13 = vld [vmem:[%s517_s17 + $0x1c] sm:$0xf] }
  0x17   : > { %v537_v8 = vld [vmem:[#allocation1 + $0x1] ss:$2 sm:$0xff] }
  0x18   : > { %v541_v9 = vld [vmem:[#allocation1 + $0x11] ss:$2 sm:$0xff]  ;;  %551 = vst.sshfl [vmem:[#allocation1] sm:$0xff pattern:$0x75643120] %v530_v6 }
  0x19   : > { %555 = vst.sshfl [vmem:[#allocation1 + $0x10] sm:$0xff pattern:$0x75643120] %v531_v7  ;;  %v545_v10 = vld [vmem:[#allocation1 + $0x21] ss:$2 sm:$0xff] }
  0x1a   : > { %566 = vst [vmem:[#allocation1] ss:$4 sm:$0xff] %v526_v2  ;;  %v549_v11 = vld [vmem:[#allocation1 + $0x31] ss:$2 sm:$0xff] }
  0x1b   : > { %570 = vst [vmem:[#allocation1 + $0x2] ss:$4 sm:$0xff] %v528_v4 }
  0x1c   : > { %559 = vst.sshfl [vmem:[#allocation1 + $0x20] sm:$0xff pattern:$0x75643120] %v532_v12 }
  0x1d   : > { %563 = vst.sshfl [vmem:[#allocation1 + $0x30] sm:$0xff pattern:$0x75643120] %v533_v13 }
  0x1f   : > { %v553_v14 = vld [vmem:[#allocation1 + $0x1] ss:$2 sm:$0xff] }
  0x20   : > { %v557_v15 = vld [vmem:[#allocation1 + $0x11] ss:$2 sm:$0xff] }
  0x21   : > { %568 = vst [vmem:[#allocation1 + $0x1] ss:$4 sm:$0xff] %v527_v3 }
  0x22   : > { %572 = vst [vmem:[#allocation1 + $0x3] ss:$4 sm:$0xff] %v529_v5 }
  0x23   : > { %v561_v19 = vld [vmem:[#allocation1 + $0x21] ss:$2 sm:$0xff] }
  0x24   : > { %v565_v20 = vld [vmem:[#allocation1 + $0x31] ss:$2 sm:$0xff] }
  0x29   : > { %v3405_v16 = vld.sshfl [vmem:[#allocation1] sm:$0xff pattern:$0x73625140] }
  0x2a   : > { %2973 = vmatmul.msk.bf16.vlgmr.msra.gmra.mxu0 %vm630_vm0, %v3405_v16  ;;  %575 = vst [vmem:[#allocation1] ss:$4 sm:$0xff] %v537_v8 }
  0x2b   : > { %577 = vst [vmem:[#allocation1 + $0x1] ss:$4 sm:$0xff] %v541_v9 }
  0x2c   : > { %579 = vst [vmem:[#allocation1 + $0x2] ss:$4 sm:$0xff] %v545_v10 }
  0x2d   : > { %581 = vst [vmem:[#allocation1 + $0x3] ss:$4 sm:$0xff] %v549_v11 }
  0x34   : > { %v3409_v17 = vld.sshfl [vmem:[#allocation1] sm:$0xff pattern:$0x73625140] }
  0x35   : > { %584 = vst [vmem:[#allocation1] ss:$4 sm:$0xff] %v530_v6 }
  0x36   : > { %586 = vst [vmem:[#allocation1 + $0x1] ss:$4 sm:$0xff] %v531_v7 }
  0x37   : > { %588 = vst [vmem:[#allocation1 + $0x2] ss:$4 sm:$0xff] %v532_v12 }
  0x38   : > { %590 = vst [vmem:[#allocation1 + $0x3] ss:$4 sm:$0xff] %v533_v13 }
  0x3a   : > { %2974 = vmatmul.msk.bf16.gmra.mxu0 %vm630_vm0, %v3409_v17 }
  0x3f   : > { %v3413_v18 = vld.sshfl [vmem:[#allocation1] sm:$0xff pattern:$0x73625140] }
  0x40   : > { %593 = vst [vmem:[#allocation1] ss:$4 sm:$0xff] %v553_v14 }
  0x41   : > { %595 = vst [vmem:[#allocation1 + $0x1] ss:$4 sm:$0xff] %v557_v15 }
  0x42   : > { %597 = vst [vmem:[#allocation1 + $0x2] ss:$4 sm:$0xff] %v561_v19 }
  0x43   : > { %599 = vst [vmem:[#allocation1 + $0x3] ss:$4 sm:$0xff] %v565_v20 }
  0x4a   : > { %2975 = vmatmul.msk.bf16.gmra.mxu0 %vm630_vm0, %v3413_v18  ;;  %v600_v21 = vld.sshfl [vmem:[#allocation1] sm:$0xff pattern:$0x73625140] }
  0x5a   : > { %2976 = vmatmul.msk.bf16.gmra.mxu0 %vm630_vm0, %v600_v21 }
  0xa7   : > { %v648_v23 = vpop.f32.mrf.mxu0 }
  0xa8   : > { %v3421_v24 = vadd.f32 %v3095_v22, %v648_v23 }
  0xaa   : > { %v3425_v25 = vmul.f32 %v3421_v24, %v3421_v24 }
  0xac   : > { %834 = vrot.lane.b32.xlu1 %v3425_v25, %s3292_s20  ;;  %v706_v58 = vsel %vm705_vm1, %v3425_v25, 0.0 }
  0xaf   : > { %v650_v26 = vpop.f32.mrf.mxu0 }
  0xb0   : > { %v3429_v27 = vadd.f32 %v3095_v22, %v650_v26 }
  0xb2   : > { %v3433_v28 = vmul.f32 %v3429_v27, %v3429_v27 }
  0xb4   : > { %836 = vrot.lane.b32.xlu1 %v3433_v28, %s3292_s20  ;;  %v709_v1 = vsel %vm705_vm1, %v3433_v28, 0.0 }
  0xb7   : > { %v653_v29 = vpop.f32.mrf.mxu0 }
  0xb8   : > { %v3437_v30 = vadd.f32 %v3095_v22, %v653_v29 }
  0xba   : > { %v3441_v31 = vmul.f32 %v3437_v30, %v3437_v30 }
  0xbc   : > { %838 = vrot.lane.b32.xlu0 %v3441_v31, %s3292_s20  ;;  %v712_v59 = vsel %vm705_vm1, %v3441_v31, 0.0 }
  0xbf   : > { %v655_v32 = vpop.f32.mrf.mxu0 }
  0xc0   : > { %v3445_v33 = vadd.f32 %v3095_v22, %v655_v32 }
  0xc2   : > { %v3449_v34 = vmul.f32 %v3445_v33, %v3445_v33 }
  0xc4   : > { %840 = vrot.lane.b32.xlu0 %v3449_v34, %s3292_s20  ;;  %v715_v49 = vsel %vm705_vm1, %v3449_v34, 0.0 }
  0xc7   : > { %v658_v35 = vpop.f32.mrf.mxu0 }
  0xc8   : > { %v3453_v36 = vadd.f32 %v3095_v22, %v658_v35 }
  0xca   : > { %v3457_v37 = vmul.f32 %v3453_v36, %v3453_v36 }
  0xcc   : > { %842 = vrot.lane.b32.xlu2 %v3457_v37, %s3292_s20  ;;  %v718_v52 = vsel %vm705_vm1, %v3457_v37, 0.0 }
  0xcf   : > { %v660_v38 = vpop.f32.mrf.mxu0 }
  0xd0   : > { %v3461_v39 = vadd.f32 %v3095_v22, %v660_v38 }
  0xd2   : > { %v3465_v40 = vmul.f32 %v3461_v39, %v3461_v39 }
  0xd4   : > { %844 = vrot.lane.b32.xlu2 %v3465_v40, %s3292_s20  ;;  %v721_v0 = vsel %vm705_vm1, %v3465_v40, 0.0 }
  0xd7   : > { %v663_v41 = vpop.f32.mrf.mxu0 }
  0xd8   : > { %v3469_v42 = vadd.f32 %v3095_v22, %v663_v41 }
  0xda   : > { %v3473_v43 = vmul.f32 %v3469_v42, %v3469_v42 }
  0xdc   : > { %846 = vrot.lane.b32.xlu0 %v3473_v43, %s3292_s20  ;;  %v724_v5 = vsel %vm705_vm1, %v3473_v43, 0.0 }
  0xdf   : > { %v665_v44 = vpop.f32.mrf.mxu0 }
  0xe0   : > { %v3477_v45 = vadd.f32 %v3095_v22, %v665_v44 }
  0xe2   : > { %v3481_v46 = vmul.f32 %v3477_v45, %v3477_v45 }
  0xe4   : > { %848 = vrot.lane.b32.xlu1 %v3481_v46, %s3292_s20  ;;  %v727_v6 = vsel %vm705_vm1, %v3481_v46, 0.0 }
 0x11e   : > { %v835_v47 = vpop.permute.xlu1 %834 }
 0x11f   : > { %v858_v48 = vsel %vm705_vm1, %v835_v47, 0.0 }
 0x120   : > { %859 = vadd.xlane.f32.xlu1 %v858_v48 }
 0x126   : > { %v837_v53 = vpop.permute.xlu1 %836  ;;  %v843_v57 = vpop.permute.xlu2 %842 }
 0x127   : > { %v861_v55 = vsel %vm705_vm1, %v837_v53, 0.0  ;;  %v870_v61 = vsel %vm705_vm1, %v843_v57, 0.0 }
 0x128   : > { %716 = vadd.xlane.f32.xlu1 %v715_v49 }
 0x12e   : > { %v839_v50 = vpop.permute.xlu0 %838  ;;  %v845_v60 = vpop.permute.xlu2 %844 }
 0x12f   : > { %v864_v51 = vsel %vm705_vm1, %v839_v50, 0.0  ;;  %v873_v62 = vsel %vm705_vm1, %v845_v60, 0.0 }
 0x130   : > { %865 = vadd.xlane.f32.xlu2 %v864_v51  ;;  %719 = vadd.xlane.f32.xlu1 %v718_v52 }
 0x136   : > { %v841_v54 = vpop.permute.xlu0 %840 }
 0x137   : > { %v867_v56 = vsel %vm705_vm1, %v841_v54, 0.0 }
 0x138   : > { %862 = vadd.xlane.f32.xlu2 %v861_v55  ;;  %868 = vadd.xlane.f32.xlu0 %v867_v56 }
 0x140   : > { %707 = vadd.xlane.f32.xlu2 %v706_v58  ;;  %713 = vadd.xlane.f32.xlu0 %v712_v59 }
 0x148   : > { %871 = vadd.xlane.f32.xlu2 %v870_v61  ;;  %874 = vadd.xlane.f32.xlu0 %v873_v62 }
 0x14e   : > { %v847_v63 = vpop.permute.xlu0 %846 }
 0x14f   : > { %v876_v2 = vsel %vm705_vm1, %v847_v63, 0.0 }
 0x150   : > { %722 = vadd.xlane.f32.xlu2 %v721_v0  ;;  %710 = vadd.xlane.f32.xlu0 %v709_v1 }
 0x151   : > { %877 = vadd.xlane.f32.xlu1 %v876_v2 }
 0x156   : > { %v849_v3 = vpop.permute.xlu1 %848 }
 0x157   : > { %v879_v4 = vsel %vm705_vm1, %v849_v3, 0.0 }
 0x158   : > { %880 = vadd.xlane.f32.xlu2 %v879_v4 }
 0x159   : > { %725 = vadd.xlane.f32.xlu1 %v724_v5 }
 0x160   : > { %728 = vadd.xlane.f32.xlu2 %v727_v6 }
 0x193   : > { %v860_v7 = vpop.xlane.xlu1 %859 }
 0x194   : > { %v882_v8 = vadd.f32 1e-12, %v860_v7 }
 0x196   : > { %3104 = vrsqrt.f32 %v882_v8  ;;  %vm896_vm3 = vweird.f32 %v882_v8 }
 0x19b   : > { %v717_v9 = vpop.xlane.xlu1 %716 }
 0x19c   : > { %v3509_v11 = vpop.eup %3104  ;;  %v3511_v13 = vadd.f32 1e-12, %v717_v9 }
 0x19d   : > { %v891_v14 = vmul.f32 %v3509_v11, %v882_v8  ;;  %vm897_vm2 = vweird.f32 %v3509_v11 }
 0x19e   : > { %vm3539_vm5 = vmor %vm896_vm3, %vm897_vm2  ;;  %vm774_vm15 = vweird.f32 %v3511_v13 }
 0x19f   : > { %v892_v19 = vmul.f32 %v3509_v11, %v891_v14 }
 0x1a1   : > { %v893_v35 = vmul.f32 0.5, %v892_v19 }
 0x1a3   : > { %v866_v10 = vpop.xlane.xlu2 %865  ;;  %v720_v15 = vpop.xlane.xlu1 %719  ;;  %v894_v47 = vsub.f32 1.5, %v893_v35 }
 0x1a4   : > { %v884_v12 = vadd.f32 1e-12, %v866_v10  ;;  %v3519_v32 = vadd.f32 1e-12, %v720_v15 }
 0x1a5   : > { %v895_v58 = vmul.f32 %v3509_v11, %v894_v47 }
 0x1a6   : > { %3106 = vrsqrt.f32 %v884_v12  ;;  %vm916_vm6 = vweird.f32 %v884_v12 }
 0x1a7   : > { %3108 = vrsqrt.f32 %v3511_v13  ;;  %v899_v7 = vsel %vm3539_vm5, %v3509_v11, %v895_v58  ;;  %vm784_vm5 = vweird.f32 %v3519_v32 }
 0x1ab   : > { %v863_v20 = vpop.xlane.xlu2 %862  ;;  %v869_v21 = vpop.xlane.xlu0 %868 }
 0x1ac   : > { %v3516_v22 = vpop.eup %3106  ;;  %v883_v23 = vadd.f32 1e-12, %v863_v20  ;;  %v885_v26 = vadd.f32 1e-12, %v869_v21 }
 0x1ad   : > { %v911_v29 = vmul.f32 %v3516_v22, %v884_v12  ;;  %v3522_v41 = vpop.eup %3108  ;;  %vm917_vm4 = vweird.f32 %v3516_v22 }
 0x1ae   : > { %3110 = vrsqrt.f32 %v883_v23  ;;  %v769_v48 = vmul.f32 %v3522_v41, %v3511_v13  ;;  %vm3548_vm8 = vmor %vm916_vm6, %vm917_vm4  ;;  %vm906_vm10 = vweird.f32 %v883_v23  ;;  %vm926_vm11 = vweird.f32 %v885_v26 }
 0x1af   : > { %v912_v38 = vmul.f32 %v3516_v22, %v911_v29  ;;  %3112 = vrsqrt.f32 %v885_v26  ;;  %vm775_vm14 = vweird.f32 %v3522_v41 }
 0x1b0   : > { %3114 = vrsqrt.f32 %v3519_v32  ;;  %v770_v59 = vmul.f32 %v3522_v41, %v769_v48  ;;  %vm3590_vm2 = vmor %vm774_vm15, %vm775_vm14 }
 0x1b1   : > { %v913_v44 = vmul.f32 0.5, %v912_v38 }
 0x1b2   : > { %v771_v3 = vmul.f32 0.5, %v770_v59 }
 0x1b3   : > { %v3527_v49 = vpop.xlane.xlu2 %707  ;;  %v714_v50 = vpop.xlane.xlu0 %713  ;;  %v914_v54 = vsub.f32 1.5, %v913_v44 }
 0x1b4   : > { %v3111_v51 = vpop.eup %3110  ;;  %v3529_v52 = vadd.f32 1e-12, %v714_v50  ;;  %v772_v29 = vsub.f32 1.5, %v771_v3 }
 0x1b5   : > { %v3113_v53 = vpop.eup %3112  ;;  %v901_v55 = vmul.f32 %v3111_v51, %v883_v23  ;;  %v915_v62 = vmul.f32 %v3516_v22, %v914_v54  ;;  %vm907_vm7 = vweird.f32 %v3111_v51  ;;  %v970_v23 = vmul.f32 %v899_v7, %v3421_v24 }
 0x1b6   : > { %v921_v56 = vmul.f32 %v3113_v53, %v885_v26  ;;  %v3532_v57 = vpop.eup %3114  ;;  %3116 = vrsqrt.f32 %v3529_v52  ;;  %vm927_vm9 = vweird.f32 %v3113_v53  ;;  %vm908_vm12 = vmor %vm906_vm10, %vm907_vm7  ;;  %v773_v58 = vmul.f32 %v3522_v41, %v772_v29 }
 0x1b7   : > { %v902_v60 = vmul.f32 %v3111_v51, %v901_v55  ;;  %v779_v1 = vmul.f32 %v3532_v57, %v3519_v32  ;;  %v919_v19 = vsel %vm3548_vm8, %v3516_v22, %v915_v62  ;;  %vm928_vm13 = vmor %vm926_vm11, %vm927_vm9  ;;  %v997_v55 = vpack.c.bf16 %v970_v23, %v970_v23 }
 0x1b8   : > { %v922_v61 = vmul.f32 %v3113_v53, %v921_v56  ;;  %v972_v22 = vmul.f32 %v919_v19, %v3437_v30  ;;  %v777_v13 = vsel %vm3590_vm2, %v3522_v41, %v773_v58  ;;  %vm764_vm4 = vweird.f32 %v3529_v52 }
 0x1b9   : > { %v903_v63 = vmul.f32 0.5, %v902_v60  ;;  %v780_v11 = vmul.f32 %v3532_v57, %v779_v1  ;;  %v1020_v8 = vunpack.c.l.b16 %v997_v55  ;;  %vm785_vm6 = vweird.f32 %v3532_v57 }
 0x1ba   : > { %v923_v2 = vmul.f32 0.5, %v922_v61  ;;  %v999_v61 = vpack.c.bf16 %v972_v22, %v972_v22  ;;  %vm3632_vm11 = vmor %vm784_vm5, %vm785_vm6 }
 0x1bb   : > { %v904_v4 = vsub.f32 1.5, %v903_v63  ;;  %v872_v5 = vpop.xlane.xlu2 %871  ;;  %v875_v6 = vpop.xlane.xlu0 %874  ;;  %v781_v48 = vmul.f32 0.5, %v780_v11 }
 0x1bc   : > { %v924_v9 = vsub.f32 1.5, %v923_v2  ;;  %v3552_v10 = vadd.f32 1e-12, %v872_v5  ;;  %v3554_v12 = vadd.f32 1e-12, %v875_v6  ;;  %v3556_v14 = vpop.eup %3116 }
 0x1bd   : > { %v905_v15 = vmul.f32 %v3111_v51, %v904_v4  ;;  %v759_v21 = vmul.f32 %v3556_v14, %v3529_v52  ;;  %v782_v2 = vsub.f32 1.5, %v781_v48  ;;  %vm765_vm3 = vweird.f32 %v3556_v14 }
 0x1be   : > { %v925_v20 = vmul.f32 %v3113_v53, %v924_v9  ;;  %3118 = vrsqrt.f32 %v3552_v10  ;;  %vm3606_vm7 = vmor %vm764_vm4, %vm765_vm3  ;;  %v821_v48 = vmul.f32 %v777_v13, %v3445_v33  ;;  %vm936_vm9 = vweird.f32 %v3552_v10 }
 0x1bf   : > { %3120 = vrsqrt.f32 %v3554_v12  ;;  %v760_v26 = vmul.f32 %v3556_v14, %v759_v21  ;;  %v909_v38 = vsel %vm908_vm12, %v3111_v51, %v905_v15  ;;  %v1052_v15 = vunpack.c.l.b16 %v999_v61 }
 0x1c0   : > { %v929_v35 = vsel %vm928_vm13, %v3113_v53, %v925_v20  ;;  %v971_v47 = vmul.f32 %v909_v38, %v3429_v27  ;;  %v783_v20 = vmul.f32 %v3532_v57, %v782_v2  ;;  %vm946_vm13 = vweird.f32 %v3554_v12 }
 0x1c1   : > { %v973_v44 = vmul.f32 %v929_v35, %v3445_v33  ;;  %v761_v50 = vmul.f32 0.5, %v760_v26 }
 0x1c2   : > { %v998_v1 = vpack.c.bf16 %v971_v47, %v971_v47  ;;  %v3619_v47 = vld [vmem:[%s4617_s3] ss:$0 sm:$0xff] }
 0x1c3   : > { %v723_v54 = vpop.xlane.xlu2 %722  ;;  %v762_v59 = vsub.f32 1.5, %v761_v50  ;;  %v1000_v0 = vpack.c.bf16 %v973_v44, %v973_v44 }
 0x1c4   : > { %v3573_v56 = vpop.eup %3118  ;;  %v3576_v60 = vadd.f32 1e-12, %v723_v54  ;;  %v878_v53 = vpop.xlane.xlu1 %877  ;;  %v1021_v11 = vunpack.c.l.b16 %v998_v1 }
 0x1c5   : > { %v3578_v51 = vpop.eup %3120  ;;  %v931_v62 = vmul.f32 %v3573_v56, %v3552_v10  ;;  %v3582_v63 = vadd.f32 1e-12, %v878_v53  ;;  %v763_v5 = vmul.f32 %v3556_v14, %v762_v59  ;;  %v1053_v19 = vunpack.c.l.b16 %v1000_v0 }
 0x1c6   : > { %v941_v3 = vmul.f32 %v3578_v51, %v3554_v12  ;;  %3122 = vrsqrt.f32 %v3576_v60  ;;  %v1022_v26 = vpack.c.b16 %v1021_v11, %v1020_v8  ;;  %vm937_vm8 = vweird.f32 %v3573_v56 }
 0x1c7   : > { %v932_v6 = vmul.f32 %v3573_v56, %v931_v62  ;;  %3124 = vrsqrt.f32 %v3582_v63  ;;  %v767_v52 = vsel %vm3606_vm7, %v3556_v14, %v763_v5  ;;  %v1054_v23 = vpack.c.b16 %v1053_v19, %v1052_v15  ;;  %vm938_vm12 = vmor %vm936_vm9, %vm937_vm8 }
 0x1c8   : > { %v942_v7 = vmul.f32 %v3578_v51, %v941_v3  ;;  %vm947_vm10 = vweird.f32 %v3578_v51  ;;  %1023 = vrot.lane.b32.xlu1 %v1022_v26, %s3292_s20  ;;  %v820_v59 = vmul.f32 %v767_v52, %v3437_v30  ;;  %v787_v53 = vsel %vm3632_vm11, %v3532_v57, %v783_v20 }
 0x1c9   : > { %v933_v9 = vmul.f32 0.5, %v932_v6  ;;  %1055 = vrot.lane.b32.xlu0 %v1054_v23, %s3292_s20  ;;  %vm948_vm14 = vmor %vm946_vm13, %vm947_vm10  ;;  %v984_v0 = vmul.f32 %v3619_v47, %v821_v48  ;;  %v822_v5 = vmul.f32 %v787_v53, %v3453_v36  ;;  %vm794_vm2 = vweird.f32 %v3576_v60 }
 0x1ca   : > { %v943_v41 = vmul.f32 0.5, %v942_v7  ;;  %v983_v6 = vmul.f32 %v3619_v47, %v820_v59  ;;  %vm956_vm5 = vweird.f32 %v3582_v63 }
 0x1cb   : > { %v934_v29 = vsub.f32 1.5, %v933_v9  ;;  %v881_v35 = vpop.xlane.xlu2 %880  ;;  %v992_v9 = vpack.c.bf16 %v984_v0, %v984_v0  ;;  %v985_v20 = vmul.f32 %v3619_v47, %v822_v5 }
 0x1cc   : > { %v3123_v22 = vpop.eup %3122  ;;  %v944_v38 = vsub.f32 1.5, %v943_v41  ;;  %v3614_v44 = vadd.f32 1e-12, %v881_v35  ;;  %v991_v21 = vpack.c.bf16 %v983_v6, %v983_v6 }
 0x1cd   : > { %v3125_v50 = vpop.eup %3124  ;;  %v935_v14 = vmul.f32 %v3573_v56, %v934_v29  ;;  %v789_v54 = vmul.f32 %v3123_v22, %v3576_v60  ;;  %vm795_vm15 = vweird.f32 %v3123_v22  ;;  %v3660_v35 = vunpack.c.l.b16 %v992_v9 }
 0x1ce   : > { %v945_v58 = vmul.f32 %v3578_v51, %v944_v38  ;;  %v951_v10 = vmul.f32 %v3125_v50, %v3582_v63  ;;  %3126 = vrsqrt.f32 %v3614_v44  ;;  %vm957_vm3 = vweird.f32 %v3125_v50  ;;  %vm796_vm4 = vmor %vm794_vm2, %vm795_vm15 }
 0x1cf   : > { %v790_v32 = vmul.f32 %v3123_v22, %v789_v54  ;;  %v939_v62 = vsel %vm938_vm12, %v3573_v56, %v935_v14  ;;  %vm958_vm6 = vmor %vm956_vm5, %vm957_vm3  ;;  %v993_v14 = vpack.c.bf16 %v985_v20, %v985_v20  ;;  %v3663_v54 = vunpack.c.l.b16 %v991_v21 }
 0x1d0   : > { %v952_v61 = vmul.f32 %v3125_v50, %v951_v10  ;;  %v949_v2 = vsel %vm948_vm14, %v3578_v51, %v945_v58  ;;  %v974_v3 = vmul.f32 %v939_v62, %v3453_v36  ;;  %1515 = vrot.lane.b32.xlu1 %v3433_v28, %s3293_s24  ;;  %vm966_vm8 = vweird.f32 %v3614_v44 }
 0x1d1   : > { %v791_v1 = vmul.f32 0.5, %v790_v32  ;;  %v975_v57 = vmul.f32 %v949_v2, %v3461_v39  ;;  %v1049_v58 = vpack.c.b16 %v3660_v35, %v3663_v54 }
 0x1d2   : > { %v953_v4 = vmul.f32 0.5, %v952_v61  ;;  %v1001_v13 = vpack.c.bf16 %v974_v3, %v974_v3 }
 0x1d3   : > { %v792_v12 = vsub.f32 1.5, %v791_v1  ;;  %v1002_v56 = vpack.c.bf16 %v975_v57, %v975_v57 }
 0x1d4   : > { %v3127_v7 = vpop.eup %3126  ;;  %v954_v8 = vsub.f32 1.5, %v953_v4  ;;  %v1084_v11 = vunpack.c.l.b16 %v1001_v13  ;;  %v730_v4 = vadd.f32 1e-12, %v3527_v49 }
 0x1d5   : > { %v793_v15 = vmul.f32 %v3123_v22, %v792_v12  ;;  %v961_v51 = vmul.f32 %v3127_v7, %v3614_v44  ;;  %v1085_v29 = vunpack.c.l.b16 %v1002_v56  ;;  %vm967_vm7 = vweird.f32 %v3127_v7  ;;  %v729_v12 = vpop.xlane.xlu2 %728 }
 0x1d6   : > { %v955_v19 = vmul.f32 %v3125_v50, %v954_v8  ;;  %vm968_vm9 = vmor %vm966_vm8, %vm967_vm7  ;;  %v737_v56 = vadd.f32 1e-12, %v729_v12  ;;  %vm744_vm14 = vweird.f32 %v730_v4 }
 0x1d7   : > { %v797_v41 = vsel %vm796_vm4, %v3123_v22, %v793_v15  ;;  %v962_v52 = vmul.f32 %v3127_v7, %v961_v51  ;;  %v1086_v38 = vpack.c.b16 %v1085_v29, %v1084_v11 }
 0x1d8   : > { %v823_v60 = vmul.f32 %v797_v41, %v3461_v39  ;;  %v959_v26 = vsel %vm958_vm6, %v3125_v50, %v955_v19  ;;  %1517 = vrot.lane.b32.xlu1 %v3441_v31, %s3293_s24  ;;  %v3672_v50 = vunpack.c.l.b16 %v993_v14  ;;  %vm814_vm4 = vweird.f32 %v737_v56 }
 0x1d9   : > { %v963_v23 = vmul.f32 0.5, %v962_v52  ;;  %1087 = vrot.lane.b32.xlu2 %v1086_v38, %s3292_s20  ;;  %v976_v63 = vmul.f32 %v959_v26, %v3469_v42 }
 0x1da   : > { %v986_v48 = vmul.f32 %v3619_v47, %v823_v60 }
 0x1db   : > { %v964_v55 = vsub.f32 1.5, %v963_v23  ;;  %v1003_v61 = vpack.c.bf16 %v976_v63, %v976_v63 }
 0x1dc   : > { %v994_v22 = vpack.c.bf16 %v986_v48, %v986_v48 }
 0x1dd   : > { %v965_v10 = vmul.f32 %v3127_v7, %v964_v55  ;;  %v1116_v44 = vunpack.c.l.b16 %v1003_v61 }
 0x1de   : > { %v3674_v59 = vunpack.c.l.b16 %v994_v22 }
 0x1df   : > { %v969_v53 = vsel %vm968_vm9, %v3127_v7, %v965_v10  ;;  %v726_v7 = vpop.xlane.xlu1 %725 }
 0x1e0   : > { %v977_v32 = vmul.f32 %v969_v53, %v3477_v45  ;;  %v1081_v62 = vpack.c.b16 %v3674_v59, %v3672_v50  ;;  %1523 = vrot.lane.b32.xlu1 %v3465_v40, %s3293_s24  ;;  %v736_v49 = vadd.f32 1e-12, %v726_v7 }
 0x1e1   : > { %1371 = vrot.lane.b32.xlu2 %v3433_v28, %s3294_s26  ;;  %v711_v28 = vpop.xlane.xlu0 %710 }
 0x1e2   : > { %v1004_v0 = vpack.c.bf16 %v977_v32, %v977_v32  ;;  %v731_v3 = vadd.f32 1e-12, %v711_v28  ;;  %vm804_vm6 = vweird.f32 %v736_v49 }
 0x1e4   : > { %v1117_v1 = vunpack.c.l.b16 %v1004_v0  ;;  %3128 = vrsqrt.f32 %v731_v3  ;;  %vm754_vm12 = vweird.f32 %v731_v3 }
 0x1e5   : > { %3130 = vrsqrt.f32 %v730_v4 }
 0x1e6   : > { %v1118_v2 = vpack.c.b16 %v1117_v1, %v1116_v44  ;;  %3132 = vrsqrt.f32 %v737_v56 }
 0x1e7   : > { %3134 = vrsqrt.f32 %v736_v49 }
 0x1e8   : > { %1119 = vrot.lane.b32.xlu0 %v1118_v2, %s3292_s20 }
 0x1e9   : > { %1521 = vrot.lane.b32.xlu2 %v3457_v37, %s3293_s24 }
 0x1f0   : > { %1513 = vrot.lane.b32.xlu0 %v3425_v25, %s3293_s24 }
 0x1f1   : > { %1375 = vrot.lane.b32.xlu2 %v3449_v34, %s3294_s26 }
 0x1f8   : > { %1369 = vrot.lane.b32.xlu0 %v3425_v25, %s3294_s26  ;;  %v3129_v25 = vpop.eup %3128 }
 0x1f9   : > { %1377 = vrot.lane.b32.xlu2 %v3457_v37, %s3294_s26  ;;  %v749_v37 = vmul.f32 %v3129_v25, %v731_v3  ;;  %vm755_vm10 = vweird.f32 %v3129_v25 }
 0x1fa   : > { %vm756_vm13 = vmor %vm754_vm12, %vm755_vm10 }
 0x200   : > { %1519 = vrot.lane.b32.xlu0 %v3449_v34, %s3293_s24  ;;  %v3131_v34 = vpop.eup %3130 }
 0x201   : > { %1379 = vrot.lane.b32.xlu2 %v3465_v40, %s3294_s26  ;;  %v739_v57 = vmul.f32 %v3131_v34, %v730_v4  ;;  %v750_v40 = vmul.f32 %v3129_v25, %v749_v37  ;;  %vm745_vm11 = vweird.f32 %v3131_v34  ;;  %v3133_v20 = vpop.eup %3132 }
 0x202   : > { %vm746_vm15 = vmor %vm744_vm14, %vm745_vm11  ;;  %v3135_v52 = vpop.eup %3134  ;;  %v809_v29 = vmul.f32 %v3133_v20, %v737_v56  ;;  %vm815_vm2 = vweird.f32 %v3133_v20 }
 0x203   : > { %v740_v5 = vmul.f32 %v3131_v34, %v739_v57  ;;  %v751_v6 = vmul.f32 0.5, %v750_v40  ;;  %v799_v23 = vmul.f32 %v3135_v52, %v736_v49  ;;  %vm805_vm3 = vweird.f32 %v3135_v52  ;;  %vm816_vm5 = vmor %vm814_vm4, %vm815_vm2 }
 0x204   : > { %v810_v38 = vmul.f32 %v3133_v20, %v809_v29  ;;  %vm806_vm7 = vmor %vm804_vm6, %vm805_vm3 }
 0x205   : > { %v752_v13 = vsub.f32 1.5, %v751_v6  ;;  %v800_v63 = vmul.f32 %v3135_v52, %v799_v23 }
 0x206   : > { %v811_v32 = vmul.f32 0.5, %v810_v38 }
 0x207   : > { %v753_v9 = vmul.f32 %v3129_v25, %v752_v13  ;;  %v801_v0 = vmul.f32 0.5, %v800_v63 }
 0x208   : > { %1373 = vrot.lane.b32.xlu0 %v3441_v31, %s3294_s26  ;;  %v741_v31 = vmul.f32 0.5, %v740_v5  ;;  %v812_v1 = vsub.f32 1.5, %v811_v32 }
 0x209   : > { %v802_v3 = vsub.f32 1.5, %v801_v0 }
 0x20a   : > { %v742_v8 = vsub.f32 1.5, %v741_v31  ;;  %v813_v59 = vmul.f32 %v3133_v20, %v812_v1 }
 0x20c   : > { %v743_v15 = vmul.f32 %v3131_v34, %v742_v8  ;;  %v817_v4 = vsel %vm816_vm5, %v3133_v20, %v813_v59  ;;  %v3761_v59 = vld [vmem:[%s4619_s5] sm:$0xff]  }
 0x20e   : > { %v747_v51 = vsel %vm746_vm15, %v3131_v34, %v743_v15  ;;  %v825_v34 = vmul.f32 %v817_v4, %v3477_v45 }
 0x20f   : > { %v818_v41 = vmul.f32 %v747_v51, %v3421_v24 }
 0x210   : > { %1525 = vrot.lane.b32.xlu0 %v3473_v43, %s3293_s24  ;;  %v988_v35 = vmul.f32 %v3619_v47, %v825_v34  ;;  %v3063_v34 = vunpack.c.l.bf16 %v3761_v59 }
 0x211   : > { %v981_v26 = vmul.f32 %v3619_v47, %v818_v41 }
 0x213   : > { %v989_v53 = vpack.c.bf16 %v981_v26, %v981_v26 }
 0x215   : > { %v1015_v44 = vunpack.c.l.b16 %v989_v53 }
 0x218   : > { %1381 = vrot.lane.b32.xlu0 %v3473_v43, %s3294_s26  ;;  %v757_v43 = vsel %vm756_vm13, %v3129_v25, %v753_v9 }
 0x219   : > { %v819_v11 = vmul.f32 %v757_v43, %v3429_v27 }
 0x21b   : > { %v982_v60 = vmul.f32 %v3619_v47, %v819_v11 }
 0x21d   : > { %v990_v48 = vpack.c.bf16 %v982_v60, %v982_v60 }
 0x21f   : > { %v1016_v61 = vunpack.c.l.b16 %v990_v48 }
 0x221   : > { %v1017_v2 = vpack.c.b16 %v1016_v61, %v1015_v44 }
 0x233   : > { %v1088_v19 = vpop.permute.xlu2 %1087 }
 0x234   : > { %v1093_v21 = vsel %vm705_vm1, %v1088_v19, 0 }
 0x235   : > { %1102 = vmatpush.bf16.xpose.msra.mxu3 %v1093_v21 }
 0x23a   : > { %v1024_v55 = vpop.permute.xlu1 %1023 }
 0x23b   : > { %v1056_v14 = vpop.permute.xlu0 %1055  ;;  %v1029_v22 = vsel %vm705_vm1, %v1024_v55, 0  ;;  %v1372_v13 = vpop.permute.xlu2 %1371 }
 0x23c   : > { %2979 = vmatmul.msk.bf16.vlgmr.msra.gmra.mxu3 %vm705_vm1, %v1081_v62  ;;  %v1061_v10 = vsel %vm705_vm1, %v1056_v14, 0  ;;  %1038 = vmatpush.bf16.xpose.msra.mxu1 %v1029_v22  ;;  %v803_v62 = vmul.f32 %v3135_v52, %v802_v3  ;;  %v1396_v51 = vsel %vm705_vm1, %v1372_v13, 0.0 }
 0x23d   : > { %1070 = vmatpush.bf16.xpose.msra.mxu2 %v1061_v10  ;;  %v1005_v10 = vpack.c.bf16 %v3421_v24, %v3421_v24 }
 0x23e   : > { %v807_v25 = vsel %vm806_vm7, %v3135_v52, %v803_v62 }
 0x23f   : > { %v824_v37 = vmul.f32 %v807_v25, %v3469_v42  ;;  %v1252_v32 = vunpack.c.l.b16 %v1005_v10 }
 0x241   : > { %v987_v54 = vmul.f32 %v3619_v47, %v824_v37 }
 0x242   : > { %v1516_v28 = vpop.permute.xlu1 %1515 }
 0x243   : > { %2977 = vmatmul.msk.bf16.vlgmr.msra.gmra.mxu1 %vm705_vm1, %v1017_v2  ;;  %v1540_v50 = vsel %vm705_vm1, %v1516_v28, 0.0  ;;  %v995_v5 = vpack.c.bf16 %v987_v54, %v987_v54  ;;  %v1522_v49 = vpop.permute.xlu2 %1521  ;;  %v3054_v28 = vld [vmem:[%s4618_s4] sm:$0xff]  }
 0x244   : > { %2978 = vmatmul.msk.bf16.vlgmr.msra.gmra.mxu2 %vm705_vm1, %v1049_v58  ;;  %1541 = vadd.xlane.f32.xlu1 %v1540_v50  ;;  %v996_v58 = vpack.c.bf16 %v988_v35, %v988_v35  ;;  %v1549_v60 = vsel %vm705_vm1, %v1522_v49, 0.0  ;;  %v3763_v62 = vunpack.c.l.bf16 %v3054_v28 }
 0x245   : > { %v1111_v31 = vunpack.c.l.b16 %v995_v5 }
 0x246   : > { %v1112_v6 = vunpack.c.l.b16 %v996_v58 }
 0x248   : > { %v1113_v12 = vpack.c.b16 %v1112_v6, %v1111_v31  ;;  %v3778_v6 = vunpack.c.h.bf16 %v3054_v28  ;;  %v3784_v31 = vld [vmem:[%s4619_s5 + $0x8] sm:$0xff]  }
 0x24a   : > { %v1518_v15 = vpop.permute.xlu1 %1517 }
 0x24b   : > { %v1376_v11 = vpop.permute.xlu2 %1375  ;;  %v1543_v29 = vsel %vm705_vm1, %v1518_v15, 0.0 }
 0x24c   : > { %v1402_v14 = vsel %vm705_vm1, %v1376_v11, 0.0 }
 0x252   : > { %v1524_v20 = vpop.permute.xlu1 %1523 }
 0x253   : > { %v1552_v21 = vsel %vm705_vm1, %v1524_v20, 0.0  ;;  %v1378_v41 = vpop.permute.xlu2 %1377 }
 0x254   : > { %v1405_v52 = vsel %vm705_vm1, %v1378_v41, 0.0 }
 0x25a   : > { %v1120_v57 = vpop.permute.xlu0 %1119 }
 0x25b   : > { %v1125_v40 = vsel %vm705_vm1, %v1120_v57, 0  ;;  %v1380_v38 = vpop.permute.xlu2 %1379 }
 0x25c   : > { %1134 = vmatpush.bf16.xpose.msrb.mxu1 %v1125_v40  ;;  %v1408_v48 = vsel %vm705_vm1, %v1380_v38, 0.0 }
 0x25d   : > { %1527 = vrot.lane.b32.xlu1 %v3481_v46, %s3293_s24 }
 0x262   : > { %v1514_v7 = vpop.permute.xlu0 %1513 }
 0x263   : > { %2980 = vmatmul.msk.bf16.vlgmr.msrb.gmra.mxu1 %vm705_vm1, %v1113_v12  ;;  %v1537_v8 = vsel %vm705_vm1, %v1514_v7, 0.0  ;;  %v4632_v7 = vunpack.c.h.bf16 %v3784_v31 }
 0x264   : > { %1538 = vadd.xlane.f32.xlu2 %v1537_v8 }
 0x26a   : > { %v1370_v56 = vpop.permute.xlu0 %1369 }
 0x26b   : > { %v1393_v9 = vsel %vm705_vm1, %v1370_v56, 0.0 }
 0x26c   : > { %1394 = vadd.xlane.f32.xlu2 %v1393_v9 }
 0x272   : > { %v1520_v43 = vpop.permute.xlu0 %1519 }
 0x273   : > { %v1546_v19 = vsel %vm705_vm1, %v1520_v43, 0.0  ;;  %v3801_v43 = vld [vmem:[%s4619_s5 + $0x10] sm:$0xff]  }
 0x274   : > { %1397 = vadd.xlane.f32.xlu2 %v1396_v51  ;;  %1547 = vadd.xlane.f32.xlu0 %v1546_v19 }
 0x27a   : > { %v1374_v23 = vpop.permute.xlu0 %1373 }
 0x27b   : > { %v1399_v26 = vsel %vm705_vm1, %v1374_v23, 0.0 }
 0x27c   : > { %1553 = vadd.xlane.f32.xlu0 %v1552_v21  ;;  %v4631_v21 = vunpack.c.l.bf16 %v3801_v43 }
 0x282   : > { %v1526_v55 = vpop.permute.xlu0 %1525 }
 0x283   : > { %v1555_v63 = vsel %vm705_vm1, %v1526_v55, 0.0  ;;  %v3064_v55 = vunpack.c.h.bf16 %v3761_v59 }
 0x284   : > { %1406 = vadd.xlane.f32.xlu0 %v1405_v52 }
 0x287   : > { %1544 = vadd.xlane.f32.xlu1 %v1543_v29 }
 0x28a   : > { %v1382_v50 = vpop.permute.xlu0 %1381 }
 0x28b   : > { %v1411_v25 = vsel %vm705_vm1, %v1382_v50, 0.0 }
 0x28c   : > { %1383 = vrot.lane.b32.xlu2 %v3481_v46, %s3294_s26  ;;  %v1006_v46 = vpack.c.bf16 %v3429_v27, %v3429_v27 }
 0x28e   : > { %v1253_v53 = vunpack.c.l.b16 %v1006_v46 }
 0x28f   : > { %1550 = vadd.xlane.f32.xlu1 %v1549_v60 }
 0x290   : > { %v3748_v61 = vpack.c.b16 %v1253_v53, %v1252_v32 }
 0x297   : > { %1400 = vadd.xlane.f32.xlu1 %v1399_v26 }
 0x29f   : > { %1409 = vadd.xlane.f32.xlu1 %v1408_v48 }
 0x2b5   : > { %1403 = vadd.xlane.f32.xlu2 %v1402_v14 }
 0x2b7   : > { %v1542_v22 = vpop.xlane.xlu1 %1541 }
 0x2b8   : > { %v3770_v58 = vadd.f32 1e-12, %v1542_v22  ;;  %v3835_v22 = vld [vmem:[%s4619_s5 + $0x18] sm:$0xff]  }
 0x2b9   : > { %v3075_v28 = vunpack.c.l.bf16 %v3835_v22 }
 0x2ba   : > { %vm1585_vm15 = vweird.f32 %v3770_v58 }
 0x2bd   : > { %1556 = vadd.xlane.f32.xlu2 %v1555_v63 }
 0x2bf   : > { %v1104_v49 = vpop.f32.mrf.mxu3 }
 0x2c0   : > { %v1040_v1 = vpop.f32.mrf.mxu1  ;;  %v1105_v20 = vadd.f32 %v3763_v62, %v1104_v49 }
 0x2c1   : > { %v1041_v4 = vadd.f32 %v3763_v62, %v1040_v1 }
 0x2c2   : > { %v3826_v14 = vadd.f32 %v4631_v21, %v1105_v20 }
 0x2c3   : > { %v3774_v57 = vadd.f32 %v3063_v34, %v1041_v4 }
 0x2c4   : > { %v1161_v1 = vsel %vm705_vm1, %v3826_v14, -inf }
 0x2c5   : > { %v1149_v13 = vsel %vm705_vm1, %v3774_v57, -inf }
 0x2c7   : > { %v3756_v3 = vpop.f32.mrf.mxu2 }
 0x2c8   : > { %v1042_v35 = vpop.f32.mrf.mxu1 }
 0x2c9   : > { %v1043_v38 = vadd.f32 %v3778_v6, %v1042_v35 }
 0x2cf   : > { %v1528_v0 = vpop.permute.xlu1 %1527  ;;  %v1074_v40 = vpop.f32.mrf.mxu2 }
 0x2d0   : > { %v1558_v44 = vsel %vm705_vm1, %v1528_v0, 0.0  ;;  %v1075_v12 = vadd.f32 %v3778_v6, %v1074_v40 }
 0x2d1   : > { %1559 = vadd.xlane.f32.xlu0 %v1558_v44 }
 0x2d2   : > { %v3796_v15 = vadd.f32 %v4632_v7, %v1075_v12  ;;  %v1073_v12 = vadd.f32 %v3763_v62, %v3756_v3 }
 0x2d4   : > { %v1158_v52 = vsel %vm705_vm1, %v3796_v15, -inf }
 0x2d5   : > { %1255 = vrot.lane.b32.xlu2 %v3748_v61, %s3295_s27 }
 0x2d7   : > { %v1539_v2 = vpop.xlane.xlu2 %1538 }
 0x2d8   : > { %v3768_v54 = vadd.f32 1e-12, %v1539_v2  ;;  %v3845_v2 = vadd.f32 %v3064_v55, %v1043_v38 }
 0x2d9   : > { %1412 = vadd.xlane.f32.xlu0 %v1411_v25 }
 0x2da   : > { %3136 = vrsqrt.f32 %v3768_v54  ;;  %vm1575_vm11 = vweird.f32 %v3768_v54 }
 0x2db   : > { %3138 = vrsqrt.f32 %v3770_v58 }
 0x2df   : > { %v1395_v37 = vpop.xlane.xlu2 %1394 }
 0x2e0   : > { %v3776_v5 = vadd.f32 1e-12, %v1395_v37  ;;  %v1136_v56 = vpop.f32.mrf.mxu1  ;;  %v3803_v51 = vpop.eup %3136  ;;  %v3076_v37 = vunpack.c.h.bf16 %v3835_v22 }
 0x2e1   : > { %1150 = vmax.xlane.f32.xlu0 %v1149_v13  ;;  %v3806_v19 = vpop.eup %3138  ;;  %v1570_v41 = vmul.f32 %v3803_v51, %v3768_v54  ;;  %v1137_v44 = vadd.f32 %v3763_v62, %v1136_v56  ;;  %v1152_v13 = vsel %vm705_vm1, %v3845_v2, -inf  ;;  %v3067_v56 = vunpack.c.l.bf16 %v3784_v31 }
 0x2e2   : > { %3140 = vrsqrt.f32 %v3776_v5  ;;  %v1580_v29 = vmul.f32 %v3806_v19, %v3770_v58  ;;  %vm1576_vm8 = vweird.f32 %v3803_v51  ;;  %vm1586_vm10 = vweird.f32 %v3806_v19 }
 0x2e3   : > { %v1571_v63 = vmul.f32 %v3803_v51, %v1570_v41  ;;  %v3868_v62 = vadd.f32 %v3067_v56, %v1073_v12  ;;  %vm3878_vm12 = vmor %vm1575_vm11, %vm1576_vm8  ;;  %vm1431_vm4 = vweird.f32 %v3776_v5 }
 0x2e4   : > { %v1581_v53 = vmul.f32 %v3806_v19, %v1580_v29  ;;  %vm1587_vm3 = vmor %vm1585_vm15, %vm1586_vm10 }
 0x2e5   : > { %v1572_v50 = vmul.f32 0.5, %v1571_v63 }
 0x2e6   : > { %v1582_v35 = vmul.f32 0.5, %v1581_v53 }
 0x2e7   : > { %v1398_v8 = vpop.xlane.xlu2 %1397  ;;  %v1573_v49 = vsub.f32 1.5, %v1572_v50 }
 0x2e8   : > { %v3792_v9 = vadd.f32 1e-12, %v1398_v8  ;;  %v3808_v11 = vpop.eup %3140  ;;  %v1138_v10 = vpop.f32.mrf.mxu1  ;;  %v3856_v8 = vadd.f32 %v3075_v28, %v1137_v44 }
 0x2e9   : > { %1159 = vmax.xlane.f32.xlu0 %v1158_v52  ;;  %v1426_v60 = vmul.f32 %v3808_v11, %v3776_v5  ;;  %v1139_v25 = vadd.f32 %v3778_v6, %v1138_v10  ;;  %v1583_v52 = vsub.f32 1.5, %v1582_v35  ;;  %vm1432_vm13 = vweird.f32 %v3808_v11 }
 0x2ea   : > { %3142 = vrsqrt.f32 %v3792_v9  ;;  %v1167_v3 = vsel %vm705_vm1, %v3856_v8, -inf  ;;  %vm1441_vm14 = vweird.f32 %v3792_v9  ;;  %vm1433_vm5 = vmor %vm1431_vm4, %vm1432_vm13 }
 0x2eb   : > { %v1427_v32 = vmul.f32 %v3808_v11, %v1426_v60  ;;  %v3861_v41 = vadd.f32 %v3076_v37, %v1139_v25  ;;  %v1106_v60 = vpop.f32.mrf.mxu3  ;;  %v1584_v63 = vmul.f32 %v3806_v19, %v1583_v52 }
 0x2ec   : > { %v1107_v54 = vadd.f32 %v3778_v6, %v1106_v60 }
 0x2ed   : > { %v1428_v40 = vmul.f32 0.5, %v1427_v32  ;;  %v1155_v32 = vsel %vm705_vm1, %v3868_v62, -inf }
 0x2ef   : > { %v1384_v23 = vpop.permute.xlu2 %1383  ;;  %v1429_v29 = vsub.f32 1.5, %v1428_v40 }
 0x2f0   : > { %v3820_v26 = vpop.eup %3142  ;;  %v1414_v48 = vsel %vm705_vm1, %v1384_v23, 0.0  ;;  %v1574_v23 = vmul.f32 %v3803_v51, %v1573_v49 }
 0x2f1   : > { %v1436_v46 = vmul.f32 %v3820_v26, %v3792_v9  ;;  %1415 = vadd.xlane.f32.xlu1 %v1414_v48  ;;  %1162 = vmax.xlane.f32.xlu0 %v1161_v1  ;;  %vm1442_vm9 = vweird.f32 %v3820_v26  ;;  %v1170_v48 = vsel %vm705_vm1, %v3861_v41, -inf  ;;  %v1430_v10 = vmul.f32 %v3808_v11, %v1429_v29 }
 0x2f2   : > { %vm1443_vm2 = vmor %vm1441_vm14, %vm1442_vm9  ;;  %v1578_v58 = vsel %vm3878_vm12, %v3803_v51, %v1574_v23  ;;  %v1588_v9 = vsel %vm1587_vm3, %v3806_v19, %v1584_v63  ;;  %v1010_v23 = vpack.c.bf16 %v3461_v39, %v3461_v39  ;;  %v1008_v63 = vpack.c.bf16 %v3445_v33, %v3445_v33 }
 0x2f3   : > { %v1437_v0 = vmul.f32 %v3820_v26, %v1436_v46  ;;  %v1434_v6 = vsel %vm1433_vm5, %v3808_v11, %v1430_v10  ;;  %v1649_v50 = vmul.f32 %v1578_v58, %v3421_v24  ;;  %v1007_v10 = vpack.c.bf16 %v3437_v30, %v3437_v30 }
 0x2f5   : > { %v1438_v4 = vmul.f32 0.5, %v1437_v0  ;;  %v3072_v0 = vunpack.c.h.bf16 %v3801_v43  ;;  %v1673_v11 = vpack.c.bf16 %v1649_v50, %v1649_v50 }
 0x2f7   : > { %v1439_v20 = vsub.f32 1.5, %v1438_v4  ;;  %v3903_v1 = vadd.f32 %v3072_v0, %v1107_v54  ;;  %v1505_v4 = vmul.f32 %v1434_v6, %v3421_v24  ;;  %v1690_v12 = vunpack.c.l.b16 %v1673_v11 }
 0x2f8   : > { %v1282_v6 = vunpack.c.l.b16 %v1007_v10 }
 0x2f9   : > { %1153 = vmax.xlane.f32.xlu1 %v1152_v13  ;;  %v1440_v38 = vmul.f32 %v3820_v26, %v1439_v20  ;;  %1171 = vmax.xlane.f32.xlu0 %v1170_v48  ;;  %v1164_v51 = vsel %vm705_vm1, %v3903_v1, -inf  ;;  %v1657_v40 = vmul.f32 %v3619_v47, %v1505_v4  ;;  %v1313_v48 = vunpack.c.l.b16 %v1010_v23 }
 0x2fa   : > { %v3885_v53 = vpop.xlane.xlu1 %1544 }
 0x2fb   : > { %v1444_v44 = vsel %vm1443_vm2, %v3820_v26, %v1440_v38  ;;  %v1650_v26 = vmul.f32 %v1588_v9, %v3429_v27  ;;  %v1665_v20 = vpack.c.bf16 %v1657_v40, %v1657_v40  ;;  %v1009_v38 = vpack.c.bf16 %v3453_v36, %v3453_v36 }
 0x2fc   : > { %v1506_v5 = vmul.f32 %v1444_v44, %v3429_v27  ;;  %v1012_v44 = vpack.c.bf16 %v3477_v45, %v3477_v45  ;;  %v1011_v9 = vpack.c.bf16 %v3469_v42, %v3469_v42 }
 0x2fd   : > { %v1674_v35 = vpack.c.bf16 %v1650_v26, %v1650_v26  ;;  %v1683_v24 = vunpack.c.l.b16 %v1665_v20  ;;  %v1312_v46 = vunpack.c.l.b16 %v1009_v38 }
 0x2fe   : > { %1168 = vmax.xlane.f32.xlu2 %v1167_v3  ;;  %v1658_v19 = vmul.f32 %v3619_v47, %v1506_v5  ;;  %v1343_v26 = vunpack.c.l.b16 %v1012_v44  ;;  %v1342_v4 = vunpack.c.l.b16 %v1011_v9 }
 0x2ff   : > { %v1691_v49 = vunpack.c.l.b16 %v1674_v35  ;;  %v3925_v54 = vpack.c.b16 %v1313_v48, %v1312_v46 }
 0x300   : > { %v1666_v13 = vpack.c.bf16 %v1658_v19, %v1658_v19  ;;  %v3937_v11 = vpack.c.b16 %v1343_v26, %v1342_v4 }
 0x301   : > { %1156 = vmax.xlane.f32.xlu1 %v1155_v32  ;;  %v1692_v27 = vpack.c.b16 %v1691_v49, %v1690_v12  ;;  %v1283_v32 = vunpack.c.l.b16 %v1008_v63 }
 0x302   : > { %v3909_v25 = vpop.xlane.xlu1 %1550  ;;  %v1684_v29 = vunpack.c.l.b16 %v1666_v13  ;;  %v1548_v13 = vpop.xlane.xlu0 %1547 }
 0x303   : > { %v3933_v5 = vpack.c.b16 %v1283_v32, %v1282_v6 }
 0x304   : > { %v1685_v60 = vpack.c.b16 %v1684_v29, %v1683_v24 }
 0x309   : > { %1165 = vmax.xlane.f32.xlu1 %v1164_v51 }
 0x30a   : > { %v1401_v52 = vpop.xlane.xlu1 %1400  ;;  %v3943_v23 = vpop.xlane.xlu0 %1553 }
 0x30b   : > { %v1419_v3 = vadd.f32 1e-12, %v1401_v52 }
 0x30d   : > { %1693 = vrot.lane.b32.xlu0 %v1692_v27, %s3293_s24  ;;  %3144 = vrsqrt.f32 %v1419_v3  ;;  %vm1451_vm7 = vweird.f32 %v1419_v3 }
 0x312   : > { %v3949_v6 = vpop.xlane.xlu0 %1406 }
 0x313   : > { %v3145_v58 = vpop.eup %3144 }
 0x314   : > { %v1446_v50 = vmul.f32 %v3145_v58, %v1419_v3  ;;  %vm1452_vm6 = vweird.f32 %v3145_v58 }
 0x315   : > { %vm1453_vm8 = vmor %vm1451_vm7, %vm1452_vm6 }
 0x316   : > { %1686 = vrot.lane.b32.xlu2 %v1685_v60, %s3294_s26  ;;  %v1447_v51 = vmul.f32 %v3145_v58, %v1446_v50 }
 0x318   : > { %v1448_v19 = vmul.f32 0.5, %v1447_v51 }
 0x31a   : > { %v1449_v12 = vsub.f32 1.5, %v1448_v19 }
 0x31c   : > { %v1450_v49 = vmul.f32 %v3145_v58, %v1449_v12  ;;  %v3960_v12 = vadd.f32 1e-12, %v1548_v13 }
 0x31e   : > { %1315 = vrot.lane.b32.xlu2 %v3925_v54, %s3295_s27  ;;  %v1454_v29 = vsel %vm1453_vm8, %v3145_v58, %v1450_v49  ;;  %vm1605_vm6 = vweird.f32 %v3960_v12 }
 0x31f   : > { %v1507_v38 = vmul.f32 %v1454_v29, %v3437_v30 }
 0x321   : > { %v1659_v10 = vmul.f32 %v3619_v47, %v1507_v38 }
 0x322   : > { %1285 = vrot.lane.b32.xlu1 %v3933_v5, %s3295_s27 }
 0x323   : > { %v1667_v58 = vpack.c.bf16 %v1659_v10, %v1659_v10 }
 0x325   : > { %v3951_v50 = vunpack.c.l.b16 %v1667_v58 }
 0x326   : > { %1345 = vrot.lane.b32.xlu2 %v3937_v11, %s3295_s27 }
 0x328   : > { %v1404_v35 = vpop.xlane.xlu2 %1403 }
 0x329   : > { %v1420_v40 = vadd.f32 1e-12, %v1404_v35 }
 0x32b   : > { %3146 = vrsqrt.f32 %v1420_v40  ;;  %vm1461_vm10 = vweird.f32 %v1420_v40 }
 0x330   : > { %v3941_v20 = vpop.xlane.xlu2 %1556 }
 0x331   : > { %v3147_v52 = vpop.eup %3146 }
 0x332   : > { %v1456_v27 = vmul.f32 %v3147_v52, %v1420_v40  ;;  %vm1462_vm9 = vweird.f32 %v3147_v52  ;;  %v1563_v40 = vadd.f32 1e-12, %v3885_v53 }
 0x333   : > { %vm1463_vm11 = vmor %vm1461_vm10, %vm1462_vm9 }
 0x334   : > { %v1457_v24 = vmul.f32 %v3147_v52, %v1456_v27  ;;  %vm1595_vm3 = vweird.f32 %v1563_v40 }
 0x336   : > { %v1458_v60 = vmul.f32 0.5, %v1457_v24  ;;  %v3964_v24 = vpop.xlane.xlu1 %1409 }
 0x338   : > { %v1459_v48 = vsub.f32 1.5, %v1458_v60  ;;  %v1256_v63 = vpop.permute.xlu2 %1255 }
 0x339   : > { %1268 = vmatpush.bf16.msrb.mxu2 %v1256_v63 }
 0x33a   : > { %v1460_v46 = vmul.f32 %v3147_v52, %v1459_v48 }
 0x33c   : > { %v1464_v32 = vsel %vm1463_vm11, %v3147_v52, %v1460_v46 }
 0x33d   : > { %v1508_v3 = vmul.f32 %v1464_v32, %v3445_v33 }
 0x33f   : > { %v1660_v44 = vmul.f32 %v3619_v47, %v1508_v3 }
 0x341   : > { %v1668_v9 = vpack.c.bf16 %v1660_v44, %v1660_v44 }
 0x343   : > { %v3953_v26 = vunpack.c.l.b16 %v1668_v9 }
 0x344   : > { %v3957_v51 = vpop.xlane.xlu0 %1559 }
 0x345   : > { %v1719_v4 = vpack.c.b16 %v3953_v26, %v3951_v50 }
 0x34c   : > { %v1413_v19 = vpop.xlane.xlu0 %1412 }
 0x34d   : > { %v1423_v35 = vadd.f32 1e-12, %v1413_v19 }
 0x34f   : > { %3148 = vrsqrt.f32 %v1423_v35  ;;  %vm1491_vm13 = vweird.f32 %v1423_v35 }
 0x350   : > { %3150 = vrsqrt.f32 %v1563_v40 }
 0x351   : > { %3152 = vrsqrt.f32 %v3960_v12 }
 0x354   : > { %v1151_v49 = vpop.xlane.xlu0 %1150 }
 0x355   : > { %v3149_v52 = vpop.eup %3148  ;;  %v1173_v27 = vsub.f32 %v3774_v57, %v1151_v49 }
 0x356   : > { %v1486_v29 = vmul.f32 %v3149_v52, %v1423_v35  ;;  %v3966_v38 = vpop.eup %3150  ;;  %vm1492_vm12 = vweird.f32 %v3149_v52 }
 0x357   : > { %v1181_v60 = vmul.f32 1.442695, %v1173_v27  ;;  %v3968_v63 = vpop.eup %3152  ;;  %v1590_v53 = vmul.f32 %v3966_v38, %v1563_v40  ;;  %vm1493_vm14 = vmor %vm1491_vm13, %vm1492_vm12  ;;  %vm1596_vm15 = vweird.f32 %v3966_v38 }
 0x358   : > { %v1487_v48 = vmul.f32 %v3149_v52, %v1486_v29  ;;  %v1600_v10 = vmul.f32 %v3968_v63, %v3960_v12  ;;  %vm1606_vm2 = vweird.f32 %v3968_v63  ;;  %vm4001_vm4 = vmor %vm1595_vm3, %vm1596_vm15 }
 0x359   : > { %3154 = vpow2.f32 %v1181_v60  ;;  %v1591_v58 = vmul.f32 %v3966_v38, %v1590_v53  ;;  %vm4015_vm7 = vmor %vm1605_vm6, %vm1606_vm2 }
 0x35a   : > { %v1488_v32 = vmul.f32 0.5, %v1487_v48  ;;  %v1601_v49 = vmul.f32 %v3968_v63, %v1600_v10 }
 0x35c   : > { %v1160_v13 = vpop.xlane.xlu0 %1159  ;;  %v1489_v27 = vsub.f32 1.5, %v1488_v32  ;;  %v1602_v29 = vmul.f32 0.5, %v1601_v49 }
 0x35d   : > { %v1176_v46 = vsub.f32 %v3796_v15, %v1160_v13  ;;  %v1592_v15 = vmul.f32 0.5, %v1591_v58 }
 0x35e   : > { %v1490_v60 = vmul.f32 %v3149_v52, %v1489_v27  ;;  %v1603_v10 = vsub.f32 1.5, %v1602_v29  ;;  %v3989_v27 = vadd.f32 1e-12, %v3943_v23 }
 0x35f   : > { %v3974_v57 = vpop.eup %3154  ;;  %v1187_v3 = vmul.f32 1.442695, %v1176_v46  ;;  %v1593_v21 = vsub.f32 1.5, %v1592_v15 }
 0x360   : > { %v1197_v9 = vsel %vm705_vm1, %v3974_v57, 0.0  ;;  %v1494_v32 = vsel %vm1493_vm14, %v3149_v52, %v1490_v60  ;;  %v1604_v52 = vmul.f32 %v3968_v63, %v1603_v10  ;;  %vm1625_vm15 = vweird.f32 %v3989_v27 }
 0x361   : > { %3156 = vpow2.f32 %v1187_v3  ;;  %1198 = vadd.xlane.f32.xlu2 %v1197_v9  ;;  %v3986_v9 = vadd.f32 1e-12, %v3909_v25  ;;  %v1594_v35 = vmul.f32 %v3966_v38, %v1593_v21  ;;  %v1511_v29 = vmul.f32 %v1494_v32, %v3469_v42 }
 0x362   : > { %v3999_v25 = vadd.f32 1e-12, %v3957_v51  ;;  %v4007_v21 = vadd.f32 1e-12, %v3941_v20 }
 0x363   : > { %v1598_v51 = vsel %vm4001_vm4, %v3966_v38, %v1594_v35  ;;  %v1663_v20 = vmul.f32 %v3619_v47, %v1511_v29  ;;  %v1608_v38 = vsel %vm4015_vm7, %v3968_v63, %v1604_v52  ;;  %vm1615_vm12 = vweird.f32 %v3986_v9 }
 0x364   : > { %v1416_v44 = vpop.xlane.xlu1 %1415  ;;  %v1651_v47 = vmul.f32 %v1598_v51, %v3437_v30  ;;  %v1652_v35 = vmul.f32 %v1608_v38, %v3445_v33  ;;  %vm1645_vm4 = vweird.f32 %v3999_v25  ;;  %vm1635_vm6 = vweird.f32 %v4007_v21 }
 0x365   : > { %v1424_v19 = vadd.f32 1e-12, %v1416_v44 }
 0x366   : > { %v1675_v23 = vpack.c.bf16 %v1651_v47, %v1651_v47 }
 0x367   : > { %3158 = vrsqrt.f32 %v1424_v19  ;;  %v3980_v48 = vpop.eup %3156  ;;  %vm1501_vm8 = vweird.f32 %v1424_v19 }
 0x368   : > { %v1206_v53 = vsel %vm705_vm1, %v3980_v48, 0.0 }
 0x369   : > { %1207 = vadd.xlane.f32.xlu2 %v1206_v53 }
 0x36c   : > { %v1154_v13 = vpop.xlane.xlu1 %1153 }
 0x36d   : > { %v3159_v46 = vpop.eup %3158  ;;  %v1174_v3 = vsub.f32 %v3845_v2, %v1154_v13  ;;  %v3993_v2 = vpop.xlane.xlu0 %1162 }
 0x36e   : > { %v1496_v44 = vmul.f32 %v3159_v46, %v1424_v19  ;;  %vm1502_vm5 = vweird.f32 %v3159_v46 }
 0x36f   : > { %v1183_v58 = vmul.f32 1.442695, %v1174_v3  ;;  %vm1503_vm9 = vmor %vm1501_vm8, %vm1502_vm5 }
 0x370   : > { %v1497_v49 = vmul.f32 %v3159_v46, %v1496_v44 }
 0x371   : > { %3160 = vpow2.f32 %v1183_v58  ;;  %v1169_v15 = vpop.xlane.xlu2 %1168 }
 0x372   : > { %v1498_v13 = vmul.f32 0.5, %v1497_v49  ;;  %3162 = vrsqrt.f32 %v3986_v9  ;;  %v1179_v12 = vsub.f32 %v3856_v8, %v1169_v15  ;;  %v1671_v15 = vpack.c.bf16 %v1663_v20, %v1663_v20 }
 0x373   : > { %3164 = vrsqrt.f32 %v3989_v27 }
 0x374   : > { %v1499_v60 = vsub.f32 1.5, %v1498_v13  ;;  %v1157_v53 = vpop.xlane.xlu1 %1156  ;;  %3166 = vrsqrt.f32 %v3999_v25  ;;  %v1193_v13 = vmul.f32 1.442695, %v1179_v12  ;;  %v4054_v20 = vunpack.c.l.b16 %v1671_v15 }
 0x375   : > { %v1175_v40 = vsub.f32 %v3868_v62, %v1157_v53  ;;  %3168 = vrsqrt.f32 %v4007_v21  ;;  %v1172_v29 = vpop.xlane.xlu0 %1171 }
 0x376   : > { %v1500_v44 = vmul.f32 %v3159_v46, %v1499_v60 }
 0x377   : > { %v4020_v10 = vpop.eup %3160  ;;  %v1185_v62 = vmul.f32 1.442695, %v1175_v40 }
 0x378   : > { %v1504_v32 = vsel %vm1503_vm9, %v3159_v46, %v1500_v44  ;;  %v1200_v19 = vsel %vm705_vm1, %v4020_v10, 0.0  ;;  %v4034_v8 = vpop.eup %3162  ;;  %v4042_v46 = vld [vmem:[%s4617_s3] ss:$0 sm:$0xff]  ;;  %v1676_v44 = vpack.c.bf16 %v1652_v35, %v1652_v35 }
 0x379   : > { %3170 = vpow2.f32 %v1185_v62  ;;  %v4031_v58 = vpop.permute.xlu2 %1686  ;;  %1201 = vadd.xlane.f32.xlu0 %v1200_v19  ;;  %v1512_v49 = vmul.f32 %v1504_v32, %v3477_v45  ;;  %v4037_v63 = vpop.eup %3164  ;;  %v1610_v53 = vmul.f32 %v4034_v8, %v3986_v9  ;;  %v1180_v62 = vsub.f32 %v3861_v41, %v1172_v29 }
 0x37a   : > { %v4045_v60 = vpop.eup %3166  ;;  %v1620_v3 = vmul.f32 %v4037_v63, %v3989_v27  ;;  %3172 = vpow2.f32 %v1193_v13  ;;  %v1724_v19 = vunpack.c.l.b16 %v1675_v23  ;;  %v1725_v13 = vunpack.c.l.b16 %v1676_v44 }
 0x37b   : > { %v1664_v30 = vmul.f32 %v4042_v46, %v1512_v49  ;;  %v4050_v51 = vpop.eup %3168  ;;  %v1611_v49 = vmul.f32 %v4034_v8, %v1610_v53  ;;  %v1195_v29 = vmul.f32 1.442695, %v1180_v62  ;;  %vm1616_vm10 = vweird.f32 %v4034_v8 }
 0x37c   : > { %v1166_v52 = vpop.xlane.xlu1 %1165  ;;  %v1630_v41 = vmul.f32 %v4050_v51, %v4007_v21  ;;  %v1726_v23 = vpack.c.b16 %v1725_v13, %v1724_v19  ;;  %vm1626_vm11 = vweird.f32 %v4037_v63  ;;  %vm4089_vm13 = vmor %vm1615_vm12, %vm1616_vm10  ;;  %vm1646_vm14 = vweird.f32 %v4045_v60 }
 0x37d   : > { %v1178_v33 = vsub.f32 %v3903_v1, %v1166_v52  ;;  %v1672_v40 = vpack.c.bf16 %v1664_v30, %v1664_v30  ;;  %v1640_v1 = vmul.f32 %v4045_v60, %v3999_v25  ;;  %v1621_v30 = vmul.f32 %v4037_v63, %v1620_v3  ;;  %vm1627_vm2 = vmor %vm1625_vm15, %vm1626_vm11 }
 0x37e   : > { %v1612_v53 = vmul.f32 0.5, %v1611_v49  ;;  %vm1636_vm3 = vweird.f32 %v4050_v51  ;;  %vm1647_vm5 = vmor %vm1645_vm4, %vm1646_vm14 }
 0x37f   : > { %v4056_v12 = vpop.eup %3170  ;;  %v1191_v38 = vmul.f32 1.442695, %v1178_v33  ;;  %v4059_v32 = vunpack.c.l.b16 %v1672_v40  ;;  %v1641_v52 = vmul.f32 %v4045_v60, %v1640_v1  ;;  %v1631_v40 = vmul.f32 %v4050_v51, %v1630_v41  ;;  %vm1637_vm7 = vmor %vm1635_vm6, %vm1636_vm3 }
 0x380   : > { %v1203_v47 = vsel %vm705_vm1, %v4056_v12, 0.0  ;;  %v4072_v33 = vpop.eup %3172  ;;  %v1613_v62 = vsub.f32 1.5, %v1612_v53 }
 0x381   : > { %3174 = vpow2.f32 %v1191_v38  ;;  %v1316_v35 = vpop.permute.xlu2 %1315  ;;  %1204 = vadd.xlane.f32.xlu1 %v1203_v47  ;;  %v1787_v15 = vpack.c.b16 %v4059_v32, %v4054_v20  ;;  %1727 = vrot.lane.b32.xlu2 %v1726_v23, %s3293_s24  ;;  %v1622_v47 = vmul.f32 0.5, %v1621_v30  ;;  %v1642_v7 = vmul.f32 0.5, %v1641_v52 }
 0x382   : > { %1328 = vmatpush.bf16.msra.mxu1 %v1316_v35  ;;  %3176 = vpow2.f32 %v1195_v29  ;;  %v1215_v44 = vsel %vm705_vm1, %v4072_v33, 0.0  ;;  %v1632_v19 = vmul.f32 0.5, %v1631_v40  ;;  %v1614_v13 = vmul.f32 %v4034_v8, %v1613_v62  ;;  %v1694_v40 = vpop.permute.xlu0 %1693 }
 0x383   : > { %v1623_v49 = vsub.f32 1.5, %v1622_v47  ;;  %v1643_v35 = vsub.f32 1.5, %v1642_v7 }
 0x384   : > { %v1633_v30 = vsub.f32 1.5, %v1632_v19  ;;  %v1618_v53 = vsel %vm4089_vm13, %v4034_v8, %v1614_v13  ;;  %v1699_v8 = vsel %vm705_vm1, %v1694_v40, 0 }
 0x385   : > { %v1624_v29 = vmul.f32 %v4037_v63, %v1623_v49  ;;  %v1644_v23 = vmul.f32 %v4045_v60, %v1643_v35  ;;  %v1653_v27 = vmul.f32 %v1618_v53, %v3453_v36  ;;  %v1421_v35 = vadd.f32 1e-12, %v3949_v6 }
 0x386   : > { %v1634_v9 = vmul.f32 %v4050_v51, %v1633_v30  ;;  %v1177_v30 = vsub.f32 %v3826_v14, %v3993_v2 }
 0x387   : > { %v4076_v38 = vpop.eup %3174  ;;  %v1628_v47 = vsel %vm1627_vm2, %v4037_v63, %v1624_v29  ;;  %v1677_v19 = vpack.c.bf16 %v1653_v27, %v1653_v27  ;;  %v1422_v63 = vadd.f32 1e-12, %v3964_v24  ;;  %vm1471_vm12 = vweird.f32 %v1421_v35 }
 0x388   : > { %v1212_v3 = vsel %vm705_vm1, %v4076_v38, 0.0  ;;  %v4082_v41 = vpop.eup %3176  ;;  %v1654_v62 = vmul.f32 %v1628_v47, %v3461_v39  ;;  %v1638_v25 = vsel %vm1637_vm7, %v4050_v51, %v1634_v9 }
 0x389   : > { %v1346_v1 = vpop.permute.xlu2 %1345  ;;  %1216 = vadd.xlane.f32.xlu1 %v1215_v44  ;;  %1213 = vadd.xlane.f32.xlu0 %v1212_v3  ;;  %v1218_v7 = vsel %vm705_vm1, %v4082_v41, 0.0  ;;  %v1648_v3 = vsel %vm1647_vm5, %v4045_v60, %v1644_v23  ;;  %v1655_v21 = vmul.f32 %v1638_v25, %v3469_v42  ;;  %v1758_v13 = vunpack.c.l.b16 %v1677_v19 }
 0x38a   : > { %1358 = vmatpush.bf16.msra.mxu2 %v1346_v1  ;;  %v1656_v1 = vmul.f32 %v1648_v3, %v3477_v45  ;;  %v1678_v49 = vpack.c.bf16 %v1654_v62, %v1654_v62  ;;  %3178 = vrsqrt.f32 %v1422_v63  ;;  %v1189_v45 = vmul.f32 1.442695, %v1177_v30 }
 0x38b   : > { %v1679_v29 = vpack.c.bf16 %v1655_v21, %v1655_v21  ;;  %3180 = vrsqrt.f32 %v1421_v35  ;;  %vm1481_vm10 = vweird.f32 %v1422_v63 }
 0x38c   : > { %v1680_v60 = vpack.c.bf16 %v1656_v1, %v1656_v1  ;;  %v1759_v52 = vunpack.c.l.b16 %v1678_v49  ;;  %3182 = vpow2.f32 %v1189_v45 }
 0x38e   : > { %v1793_v51 = vunpack.c.l.b16 %v1680_v60  ;;  %v1760_v23 = vpack.c.b16 %v1759_v52, %v1758_v13 }
 0x390   : > { %v3179_v24 = vpop.eup %3178 }
 0x391   : > { %1219 = vadd.xlane.f32.xlu0 %v1218_v7  ;;  %v1792_v7 = vunpack.c.l.b16 %v1679_v29  ;;  %v3181_v53 = vpop.eup %3180  ;;  %v1476_v6 = vmul.f32 %v3179_v24, %v1422_v63  ;;  %vm1482_vm8 = vweird.f32 %v3179_v24 }
 0x392   : > { %v1466_v9 = vmul.f32 %v3181_v53, %v1421_v35  ;;  %v4119_v47 = vpop.eup %3182  ;;  %vm1472_vm9 = vweird.f32 %v3181_v53  ;;  %vm1483_vm11 = vmor %vm1481_vm10, %vm1482_vm8 }
 0x393   : > { %v1794_v42 = vpack.c.b16 %v1793_v51, %v1792_v7  ;;  %v1477_v40 = vmul.f32 %v3179_v24, %v1476_v6  ;;  %vm1473_vm13 = vmor %vm1471_vm12, %vm1472_vm9 }
 0x394   : > { %v1286_v44 = vpop.permute.xlu1 %1285  ;;  %v1467_v14 = vmul.f32 %v3181_v53, %v1466_v9 }
 0x395   : > { %1298 = vmatpush.bf16.msrb.mxu3 %v1286_v44  ;;  %v1478_v2 = vmul.f32 0.5, %v1477_v40  ;;  %v1209_v44 = vsel %vm705_vm1, %v4119_v47, 0.0 }
 0x396   : > { %v1468_v27 = vmul.f32 0.5, %v1467_v14 }
 0x397   : > { %v1479_v3 = vsub.f32 1.5, %v1478_v2 }
 0x399   : > { %1708 = vmatpush.bf16.xpose.msra.mxu3 %v1699_v8  ;;  %v1469_v8 = vsub.f32 1.5, %v1468_v27  ;;  %v1480_v62 = vmul.f32 %v3179_v24, %v1479_v3 }
 0x39b   : > { %v1470_v25 = vmul.f32 %v3181_v53, %v1469_v8  ;;  %v1484_v1 = vsel %vm1483_vm11, %v3179_v24, %v1480_v62 }
 0x39c   : > { %v1510_v21 = vmul.f32 %v1484_v1, %v3461_v39 }
 0x39d   : > { %v1474_v19 = vsel %vm1473_vm13, %v3181_v53, %v1470_v25 }
 0x39e   : > { %v1509_v49 = vmul.f32 %v1474_v19, %v3453_v36  ;;  %v1662_v60 = vmul.f32 %v4042_v46, %v1510_v21 }
 0x3a0   : > { %v1661_v13 = vmul.f32 %v4042_v46, %v1509_v49  ;;  %v1670_v30 = vpack.c.bf16 %v1662_v60, %v1662_v60 }
 0x3a2   : > { %1761 = vrot.lane.b32.xlu1 %v1760_v23, %s3293_s24  ;;  %v1669_v63 = vpack.c.bf16 %v1661_v13, %v1661_v13  ;;  %v1752_v29 = vunpack.c.l.b16 %v1670_v30 }
 0x3a4   : > { %v1751_v35 = vunpack.c.l.b16 %v1669_v63 }
 0x3a5   : > { %1795 = vrot.lane.b32.xlu0 %v1794_v42, %s3293_s24 }
 0x3a6   : > { %v1753_v52 = vpack.c.b16 %v1752_v29, %v1751_v35 }
 0x3aa   : > { %1210 = vadd.xlane.f32.xlu2 %v1209_v44 }
 0x3c2   : > { %1720 = vrot.lane.b32.xlu2 %v1719_v4, %s3294_s26 }
 0x3ca   : > { %1754 = vrot.lane.b32.xlu2 %v1753_v52, %s3294_s26 }
 0x3d2   : > { %1788 = vrot.lane.b32.xlu2 %v1787_v15, %s3294_s26 }
 0x3d4   : > { %v1199_v36 = vpop.xlane.xlu2 %1198 }
 0x3d5   : > { %3184 = vrcp.f32 %v1199_v36 }
 0x3db   : > { %v3185_v26 = vpop.eup %3184 }
 0x3dc   : > { %v1208_v39 = vpop.xlane.xlu2 %1207  ;;  %v1229_v4 = vmul.f32 %v3185_v26, %v3974_v57 }
 0x3de   : > { %v1237_v45 = vpack.c.bf16 %v1229_v4, %v1229_v4 }
 0x3e0   : > { %v1247_v15 = vunpack.c.l.b16 %v1237_v45 }
 0x3e4   : > { %v1728_v46 = vpop.permute.xlu2 %1727 }
 0x3e5   : > { %v1733_v51 = vsel %vm705_vm1, %v1728_v46, 0 }
 0x3e6   : > { %1742 = vmatpush.bf16.xpose.msrb.mxu1 %v1733_v51 }
 0x3ec   : > { %v1202_v50 = vpop.xlane.xlu0 %1201 }
 0x3ed   : > { %3186 = vrcp.f32 %v1202_v50 }
 0x3ee   : > { %3188 = vrcp.f32 %v1208_v39 }
 0x3f3   : > { %v3187_v23 = vpop.eup %3186 }
 0x3f4   : > { %v1230_v7 = vmul.f32 %v3187_v23, %v4020_v10  ;;  %v1205_v24 = vpop.xlane.xlu1 %1204  ;;  %v3189_v20 = vpop.eup %3188 }
 0x3f5   : > { %3190 = vrcp.f32 %v1205_v24  ;;  %v1232_v42 = vmul.f32 %v3189_v20, %v3980_v48 }
 0x3f6   : > { %v1238_v32 = vpack.c.bf16 %v1230_v7, %v1230_v7 }
 0x3f7   : > { %v1240_v40 = vpack.c.bf16 %v1232_v42, %v1232_v42 }
 0x3f8   : > { %v1248_v53 = vunpack.c.l.b16 %v1238_v32  ;;  %v3077_v32 = vld [vmem:[%s4618_s4 + $0x8] sm:$0xff]  }
 0x3f9   : > { %v1278_v10 = vunpack.c.l.b16 %v1240_v40 }
 0x3fa   : > { %v1249_v6 = vpack.c.b16 %v1248_v53, %v1247_v15  ;;  %v3059_v15 = vunpack.c.l.bf16 %v3077_v32 }
 0x3fb   : > { %v3191_v9 = vpop.eup %3190 }
 0x3fc   : > { %v1231_v14 = vmul.f32 %v3191_v9, %v4056_v12  ;;  %2981 = vmatmul.msk.bf16.vlgmr.msrb.gmra.mxu2 %vm705_vm1, %v1249_v6  ;;  %v1214_v57 = vpop.xlane.xlu0 %1213  ;;  %v1217_v2 = vpop.xlane.xlu1 %1216 }
 0x3fd   : > { %3192 = vrcp.f32 %v1217_v2 }
 0x3fe   : > { %v1239_v44 = vpack.c.bf16 %v1231_v14, %v1231_v14  ;;  %v3060_v14 = vunpack.c.h.bf16 %v3077_v32 }
 0x400   : > { %v1277_v27 = vunpack.c.l.b16 %v1239_v44 }
 0x402   : > { %v1279_v3 = vpack.c.b16 %v1278_v10, %v1277_v27 }
 0x403   : > { %v3193_v62 = vpop.eup %3192 }
 0x404   : > { %v1220_v8 = vpop.xlane.xlu0 %1219  ;;  %2982 = vmatmul.msk.bf16.vlgmr.msrb.gmra.mxu3 %vm705_vm1, %v1279_v3  ;;  %v1235_v48 = vmul.f32 %v3193_v62, %v4072_v33 }
 0x405   : > { %3194 = vrcp.f32 %v1220_v8 }
 0x406   : > { %v1243_v1 = vpack.c.bf16 %v1235_v48, %v1235_v48  ;;  %3196 = vrcp.f32 %v1214_v57 }
 0x408   : > { %v1337_v21 = vunpack.c.l.b16 %v1243_v1 }
 0x40b   : > { %v3195_v25 = vpop.eup %3194 }
 0x40c   : > { %v1236_v12 = vmul.f32 %v3195_v25, %v4082_v41  ;;  %v3197_v41 = vpop.eup %3196 }
 0x40d   : > { %v1234_v35 = vmul.f32 %v3197_v41, %v4076_v38 }
 0x40e   : > { %v1244_v19 = vpack.c.bf16 %v1236_v12, %v1236_v12 }
 0x40f   : > { %v1242_v36 = vpack.c.bf16 %v1234_v35, %v1234_v35 }
 0x410   : > { %v1338_v49 = vunpack.c.l.b16 %v1244_v19 }
 0x411   : > { %v1308_v51 = vunpack.c.l.b16 %v1242_v36 }
 0x412   : > { %v1339_v60 = vpack.c.b16 %v1338_v49, %v1337_v21 }
 0x414   : > { %2984 = vmatmul.msk.bf16.vlgmr.msra.gmra.mxu2 %vm705_vm1, %v1339_v60  ;;  %2985 = vmatmul.msk.bf16.vlgmr.msra.gmra.mxu3 %vm705_vm1, %v4031_v58  ;;  %v1762_v13 = vpop.permute.xlu1 %1761 }
 0x415   : > { %v1767_v30 = vsel %vm705_vm1, %v1762_v13, 0 }
 0x416   : > { %1776 = vmatpush.bf16.xpose.msrb.mxu2 %v1767_v30 }
 0x417   : > { %v1796_v63 = vpop.permute.xlu0 %1795 }
 0x418   : > { %v1801_v33 = vsel %vm705_vm1, %v1796_v63, 0 }
 0x419   : > { %1810 = vmatpush.bf16.xpose.msrb.mxu3 %v1801_v33 }
 0x41d   : > { %v1211_v29 = vpop.xlane.xlu2 %1210 }
 0x41e   : > { %3198 = vrcp.f32 %v1211_v29 }
 0x424   : > { %v3199_v52 = vpop.eup %3198 }
 0x425   : > { %v1233_v39 = vmul.f32 %v3199_v52, %v4119_v47  ;;  %v1721_v46 = vpop.permute.xlu2 %1720 }
 0x427   : > { %v1241_v58 = vpack.c.bf16 %v1233_v39, %v1233_v39 }
 0x429   : > { %v1307_v50 = vunpack.c.l.b16 %v1241_v58 }
 0x42b   : > { %v1309_v26 = vpack.c.b16 %v1308_v51, %v1307_v50 }
 0x42d   : > { %v1755_v4 = vpop.permute.xlu2 %1754  ;;  %2983 = vmatmul.msk.bf16.vlgmr.msra.gmra.mxu1 %vm705_vm1, %v1309_v26 }
 0x42e   : > { %2987 = vmatmul.msk.bf16.vlgmr.msrb.gmra.mxu2 %vm705_vm1, %v1755_v4 }
 0x435   : > { %v1789_v23 = vpop.permute.xlu2 %1788 }
 0x436   : > { %2988 = vmatmul.msk.bf16.vlgmr.msrb.gmra.mxu3 %vm705_vm1, %v1789_v23 }
 0x43d   : > { %2986 = vmatmul.msk.bf16.vlgmr.msrb.gmra.mxu1 %vm705_vm1, %v1721_v46 }
 0x47f   : > { %v4156_v38 = vpop.f32.mrf.mxu2 }
 0x487   : > { %v4158_v45 = vpop.f32.mrf.mxu2  ;;  %v4160_v47 = vpop.f32.mrf.mxu3 }
 0x488   : > { %v1365_v7 = vpack.c.bf16 %v4158_v45, %v4156_v38 }
 0x48f   : > { %v4164_v24 = vpop.f32.mrf.mxu3 }
 0x490   : > { %v1366_v20 = vpack.c.bf16 %v4164_v24, %v4160_v47 }
 0x497   : > { %v4171_v42 = vpop.f32.mrf.mxu2  ;;  %v1710_v53 = vpop.f32.mrf.mxu3 }
 0x498   : > { %v1711_v6 = vadd.f32 %v3059_v15, %v1710_v53 }
 0x49a   : > { %v1817_v9 = vadd.f32 %v3063_v34, %v1711_v6 }
 0x49c   : > { %v1825_v40 = vsel %vm705_vm1, %v1817_v9, -inf }
 0x49d   : > { %1826 = vmax.xlane.f32.xlu2 %v1825_v40 }
 0x49f   : > { %v4176_v57 = vpop.f32.mrf.mxu2  ;;  %v1712_v2 = vpop.f32.mrf.mxu3 }
 0x4a0   : > { %v1368_v44 = vpack.c.bf16 %v4176_v57, %v4171_v42  ;;  %v1713_v10 = vadd.f32 %v3060_v14, %v1712_v2  ;;  %v4275_v57 = vld [vmem:[%s4621_s7] ss:$0 sm:$0xff] }
 0x4a2   : > { %v1818_v27 = vadd.f32 %v3064_v55, %v1713_v10 }
 0x4a4   : > { %v1828_v3 = vsel %vm705_vm1, %v1818_v27, -inf }
 0x4a5   : > { %1829 = vmax.xlane.f32.xlu1 %v1828_v3 }
 0x4aa   : > { %v4183_v8 = vpop.f32.mrf.mxu1 }
 0x4b1   : > { %v1778_v34 = vpop.f32.mrf.mxu2 }
 0x4b2   : > { %v4185_v62 = vpop.f32.mrf.mxu1  ;;  %v1779_v52 = vadd.f32 %v3059_v15, %v1778_v34 }
 0x4b3   : > { %v1367_v48 = vpack.c.bf16 %v4185_v62, %v4183_v8 }
 0x4b9   : > { %v1812_v25 = vpop.f32.mrf.mxu3  ;;  %v1780_v21 = vpop.f32.mrf.mxu2 }
 0x4ba   : > { %v1813_v1 = vadd.f32 %v3059_v15, %v1812_v25  ;;  %v1744_v12 = vpop.f32.mrf.mxu1  ;;  %v1781_v60 = vadd.f32 %v3060_v14, %v1780_v21 }
 0x4bb   : > { %v1745_v19 = vadd.f32 %v3059_v15, %v1744_v12 }
 0x4bc   : > { %v1823_v59 = vadd.f32 %v3075_v28, %v1813_v1  ;;  %v4197_v41 = vadd.f32 %v3072_v0, %v1781_v60  ;;  %v4654_v0 = vunpack.c.l.bf16 %v3801_v43 }
 0x4bd   : > { %v1819_v55 = vadd.f32 %v3067_v56, %v1745_v19  ;;  %v4653_v56 = vunpack.c.h.bf16 %v3784_v31 }
 0x4be   : > { %v1843_v49 = vsel %vm705_vm1, %v1823_v59, -inf  ;;  %v1840_v46 = vsel %vm705_vm1, %v4197_v41, -inf  ;;  %v1821_v22 = vadd.f32 %v4654_v0, %v1779_v52 }
 0x4bf   : > { %1844 = vmax.xlane.f32.xlu2 %v1843_v49  ;;  %v1831_v13 = vsel %vm705_vm1, %v1819_v55, -inf }
 0x4c0   : > { %1832 = vmax.xlane.f32.xlu0 %v1831_v13 }
 0x4c1   : > { %v1814_v30 = vpop.f32.mrf.mxu3 }
 0x4c2   : > { %v1815_v63 = vadd.f32 %v3060_v14, %v1814_v30  ;;  %v1746_v33 = vpop.f32.mrf.mxu1 }
 0x4c3   : > { %v1747_v29 = vadd.f32 %v3060_v14, %v1746_v33 }
 0x4c4   : > { %v4201_v28 = vadd.f32 %v3076_v37, %v1815_v63  ;;  %v1837_v37 = vsel %vm705_vm1, %v1821_v22, -inf }
 0x4c5   : > { %v1820_v35 = vadd.f32 %v4653_v56, %v1747_v29 }
 0x4c6   : > { %v1846_v36 = vsel %vm705_vm1, %v4201_v28, -inf }
 0x4c7   : > { %1847 = vmax.xlane.f32.xlu1 %v1846_v36  ;;  %v1834_v39 = vsel %vm705_vm1, %v1820_v35, -inf }
 0x4c8   : > { %1835 = vmax.xlane.f32.xlu2 %v1834_v39  ;;  %1841 = vmax.xlane.f32.xlu0 %v1840_v46 }
 0x4cf   : > { %1838 = vmax.xlane.f32.xlu1 %v1837_v37 }
 0x4e8   : > { %1926 = vrot.lane.b32.xlu1 %v3748_v61, %s3296_s0 }
 0x510   : > { %v1827_v31 = vpop.xlane.xlu2 %1826 }
 0x511   : > { %v1849_v58 = vsub.f32 %v1817_v9, %v1827_v31 }
 0x513   : > { %v1857_v51 = vmul.f32 1.442695, %v1849_v58 }
 0x515   : > { %3200 = vpow2.f32 %v1857_v51 }
 0x518   : > { %v1830_v50 = vpop.xlane.xlu1 %1829 }
 0x519   : > { %v1850_v26 = vsub.f32 %v1818_v27, %v1830_v50 }
 0x51b   : > { %v3201_v4 = vpop.eup %3200  ;;  %v1859_v23 = vmul.f32 1.442695, %v1850_v26 }
 0x51c   : > { %v1873_v32 = vsel %vm705_vm1, %v3201_v4, 0.0 }
 0x51d   : > { %3202 = vpow2.f32 %v1859_v23  ;;  %1874 = vadd.xlane.f32.xlu0 %v1873_v32 }
 0x523   : > { %v3203_v43 = vpop.eup %3202 }
 0x524   : > { %v1876_v15 = vsel %vm705_vm1, %v3203_v43, 0.0 }
 0x525   : > { %1877 = vadd.xlane.f32.xlu2 %v1876_v15 }
 0x532   : > { %v1845_v53 = vpop.xlane.xlu2 %1844 }
 0x533   : > { %v1855_v6 = vsub.f32 %v1823_v59, %v1845_v53  ;;  %v1833_v40 = vpop.xlane.xlu0 %1832 }
 0x534   : > { %v1851_v61 = vsub.f32 %v1819_v55, %v1833_v40 }
 0x535   : > { %v1869_v14 = vmul.f32 1.442695, %v1855_v6 }
 0x536   : > { %v1861_v9 = vmul.f32 1.442695, %v1851_v61 }
 0x537   : > { %3204 = vpow2.f32 %v1869_v14 }
 0x538   : > { %3206 = vpow2.f32 %v1861_v9 }
 0x53a   : > { %v1848_v2 = vpop.xlane.xlu1 %1847 }
 0x53b   : > { %v1836_v10 = vpop.xlane.xlu2 %1835  ;;  %v1842_v63 = vpop.xlane.xlu0 %1841  ;;  %v1856_v29 = vsub.f32 %v4201_v28, %v1848_v2 }
 0x53c   : > { %v1852_v27 = vsub.f32 %v1820_v35, %v1836_v10  ;;  %v1854_v33 = vsub.f32 %v4197_v41, %v1842_v63 }
 0x53d   : > { %v4217_v3 = vpop.eup %3204  ;;  %v1871_v35 = vmul.f32 1.442695, %v1856_v29 }
 0x53e   : > { %v3207_v34 = vpop.eup %3206  ;;  %v1863_v25 = vmul.f32 1.442695, %v1852_v27  ;;  %v1891_v1 = vsel %vm705_vm1, %v4217_v3, 0.0  ;;  %v1867_v56 = vmul.f32 1.442695, %v1854_v33 }
 0x53f   : > { %1892 = vadd.xlane.f32.xlu1 %v1891_v1  ;;  %v1879_v12 = vsel %vm705_vm1, %v3207_v34, 0.0 }
 0x540   : > { %3208 = vpow2.f32 %v1863_v25  ;;  %1880 = vadd.xlane.f32.xlu0 %v1879_v12 }
 0x542   : > { %v1839_v19 = vpop.xlane.xlu1 %1838 }
 0x543   : > { %v1853_v21 = vsub.f32 %v1821_v22, %v1839_v19 }
 0x545   : > { %v1865_v59 = vmul.f32 1.442695, %v1853_v21 }
 0x546   : > { %v3209_v55 = vpop.eup %3208 }
 0x547   : > { %3210 = vpow2.f32 %v1865_v59  ;;  %v1882_v49 = vsel %vm705_vm1, %v3209_v55, 0.0 }
 0x548   : > { %1883 = vadd.xlane.f32.xlu2 %v1882_v49  ;;  %3212 = vpow2.f32 %v1867_v56 }
 0x549   : > { %3214 = vpow2.f32 %v1871_v35 }
 0x54d   : > { %v4223_v60 = vpop.eup %3210 }
 0x54e   : > { %v1885_v13 = vsel %vm705_vm1, %v4223_v60, 0.0  ;;  %v3213_v52 = vpop.eup %3212 }
 0x54f   : > { %1886 = vadd.xlane.f32.xlu0 %v1885_v13  ;;  %v1888_v36 = vsel %vm705_vm1, %v3213_v52, 0.0  ;;  %v4234_v39 = vpop.eup %3214 }
 0x55a   : > { %v1927_v30 = vpop.permute.xlu1 %1926 }
 0x55b   : > { %1939 = vmatpush.bf16.msrb.mxu0 %v1927_v30 }
 0x560   : > { %1976 = vrot.lane.b32.xlu2 %v3925_v54, %s3296_s0  ;;  %v1894_v54 = vsel %vm705_vm1, %v4234_v39, 0.0 }
 0x563   : > { %1951 = vrot.lane.b32.xlu0 %v3933_v5, %s3296_s0 }
 0x589   : > { %1889 = vadd.xlane.f32.xlu2 %v1888_v36 }
 0x58d   : > { %1895 = vadd.xlane.f32.xlu0 %v1894_v54 }
 0x590   : > { %v1875_v46 = vpop.xlane.xlu0 %1874 }
 0x591   : > { %3216 = vrcp.f32 %v1875_v46 }
 0x597   : > { %v3217_v41 = vpop.eup %3216 }
 0x598   : > { %v1878_v5 = vpop.xlane.xlu2 %1877  ;;  %v1905_v28 = vmul.f32 %v3217_v41, %v3201_v4 }
 0x599   : > { %3218 = vrcp.f32 %v1878_v5 }
 0x59a   : > { %v1913_v22 = vpack.c.bf16 %v1905_v28, %v1905_v28 }
 0x59c   : > { %v1923_v58 = vunpack.c.l.b16 %v1913_v22 }
 0x59f   : > { %v3219_v0 = vpop.eup %3218 }
 0x5a0   : > { %v1906_v37 = vmul.f32 %v3219_v0, %v3203_v43 }
 0x5a1   : > { %2001 = vrot.lane.b32.xlu2 %v3937_v11, %s3296_s0  ;;  %v3045_v11 = vld [vmem:[%s4620_s6] sm:$0xff] }
 0x5a2   : > { %v1914_v31 = vpack.c.bf16 %v1906_v37, %v1906_v37 }
 0x5a4   : > { %v1924_v51 = vunpack.c.l.b16 %v1914_v31 }
 0x5a6   : > { %v1925_v50 = vpack.c.b16 %v1924_v51, %v1923_v58 }
 0x5a8   : > { %2989 = vmatmul.msk.bf16.vlgmr.msrb.gmra.mxu0 %vm705_vm1, %v1925_v50 }
 0x5b2   : > { %v1893_v27 = vpop.xlane.xlu1 %1892 }
 0x5b3   : > { %v1881_v23 = vpop.xlane.xlu0 %1880 }
 0x5bb   : > { %v1884_v26 = vpop.xlane.xlu2 %1883 }
 0x5bc   : > { %3220 = vrcp.f32 %v1884_v26 }
 0x5bd   : > { %3222 = vrcp.f32 %v1881_v23 }
 0x5c2   : > { %v3221_v15 = vpop.eup %3220  ;;  %v1887_v43 = vpop.xlane.xlu0 %1886 }
 0x5c3   : > { %v1977_v32 = vpop.permute.xlu2 %1976  ;;  %v3223_v4 = vpop.eup %3222  ;;  %v1908_v53 = vmul.f32 %v3221_v15, %v3209_v55  ;;  %3224 = vrcp.f32 %v1887_v43 }
 0x5c4   : > { %1989 = vmatpush.bf16.msra.mxu2 %v1977_v32  ;;  %v1907_v6 = vmul.f32 %v3223_v4, %v3207_v34  ;;  %v3046_v34 = vld [vmem:[%s4620_s6 + $0x8] sm:$0xff]  ;;  %3226 = vrcp.f32 %v1893_v27 }
 0x5c5   : > { %v1916_v40 = vpack.c.bf16 %v1908_v53, %v1908_v53  ;;  %2050 = vmatpush.bf16.msra.mxu0 %v3046_v34 }
 0x5c6   : > { %v1915_v61 = vpack.c.bf16 %v1907_v6, %v1907_v6 }
 0x5c7   : > { %v1949_v14 = vunpack.c.l.b16 %v1916_v40 }
 0x5c8   : > { %v1948_v9 = vunpack.c.l.b16 %v1915_v61 }
 0x5c9   : > { %v3225_v1 = vpop.eup %3224 }
 0x5ca   : > { %v1950_v10 = vpack.c.b16 %v1949_v14, %v1948_v9  ;;  %v1909_v38 = vmul.f32 %v3225_v1, %v4223_v60  ;;  %v3297_v14 = vmov 32.0  }
 0x5cc   : > { %v1917_v47 = vpack.c.bf16 %v1909_v38, %v1909_v38 }
 0x5ce   : > { %v1973_v49 = vunpack.c.l.b16 %v1917_v47 }
 0x5d5   : > { %v1952_v2 = vpop.permute.xlu0 %1951 }
 0x5d6   : > { %1964 = vmatpush.bf16.msra.mxu1 %v1952_v2 }
 0x5d9   : > { %2990 = vmatmul.msk.bf16.vlgmr.msra.gmra.mxu1 %vm705_vm1, %v1950_v10 }
 0x5da   : > { %2097 = vmatpush.bf16.msrb.mxu1 %v3045_v11 }
 0x5e9   : > { %3005 = vmatmul.msk.bf16.vlgmr.msrb.gmra.mxu1 %vm705_vm1, %v1365_v7  ;;  %v3227_v7 = vpop.eup %3226 }
 0x5ea   : > { %v1911_v19 = vmul.f32 %v3227_v7, %v4217_v3 }
 0x5ec   : > { %v1919_v55 = vpack.c.bf16 %v1911_v19, %v1911_v19 }
 0x5ee   : > { %v1998_v33 = vunpack.c.l.b16 %v1919_v55 }
 0x5f9   : > { %3006 = vmatmul.msk.bf16.gmra.mxu1 %vm705_vm1, %v1366_v20 }
 0x5fc   : > { %v1890_v25 = vpop.xlane.xlu2 %1889 }
 0x5fd   : > { %3228 = vrcp.f32 %v1890_v25 }
 0x600   : > { %v1896_v45 = vpop.xlane.xlu0 %1895 }
 0x601   : > { %3230 = vrcp.f32 %v1896_v45 }
 0x602   : > { %3232 = vrcp.f32 %v3297_v14 }
 0x603   : > { %v3229_v12 = vpop.eup %3228 }
 0x604   : > { %v1910_v24 = vmul.f32 %v3229_v12, %v3213_v52  ;;  %v2002_v20 = vpop.permute.xlu2 %2001 }
 0x605   : > { %2014 = vmatpush.bf16.msra.mxu3 %v2002_v20 }
 0x606   : > { %v1918_v21 = vpack.c.bf16 %v1910_v24, %v1910_v24 }
 0x607   : > { %v3231_v59 = vpop.eup %3230 }
 0x608   : > { %v1974_v13 = vunpack.c.l.b16 %v1918_v21  ;;  %v1912_v30 = vmul.f32 %v3231_v59, %v4234_v39  ;;  %v3233_v11 = vpop.eup %3232 }
 0x609   : > { %3007 = vmatmul.msk.bf16.gmra.mxu1 %vm705_vm1, %v1367_v48  ;;  %v2158_v9 = vmul.f32 32.0, %v3233_v11 }
 0x60a   : > { %v1975_v60 = vpack.c.b16 %v1974_v13, %v1973_v49  ;;  %v1920_v63 = vpack.c.bf16 %v1912_v30, %v1912_v30 }
 0x60b   : > { %v2159_v10 = vsub.f32 1.0, %v2158_v9  ;;  %v3047_v9 = vld [vmem:[%s4624_s10] sm:$0xff] }
 0x60c   : > { %v1999_v3 = vunpack.c.l.b16 %v1920_v63  ;;  %2991 = vmatmul.msk.bf16.vlgmr.msra.gmra.mxu2 %vm705_vm1, %v1975_v60 }
 0x60d   : > { %v2160_v34 = vmul.f32 %v3233_v11, %v2159_v10 }
 0x60e   : > { %v2000_v29 = vpack.c.b16 %v1999_v3, %v1998_v33 }
 0x60f   : > { %v2161_v45 = vadd.f32 %v3233_v11, %v2160_v34 }
 0x610   : > { %2992 = vmatmul.msk.bf16.vlgmr.msra.gmra.mxu3 %vm705_vm1, %v2000_v29 }
 0x619   : > { %3008 = vmatmul.msk.bf16.gmra.mxu1 %vm705_vm1, %v1368_v44 }
 0x625   : > { %v1941_v56 = vpop.f32.mrf.mxu0 }
 0x62d   : > { %v1943_v35 = vpop.f32.mrf.mxu0 }
 0x62e   : > { %v2021_v52 = vpack.c.bf16 %v1943_v35, %v1941_v56 }
 0x630   : > { %2997 = vmatmul.msk.bf16.vlgmr.msra.gmra.mxu0 %vm705_vm1, %v2021_v52 }
 0x656   : > { %v1966_v8 = vpop.f32.mrf.mxu1 }
 0x65e   : > { %v1968_v62 = vpop.f32.mrf.mxu1 }
 0x65f   : > { %v2022_v48 = vpack.c.bf16 %v1968_v62, %v1966_v8 }
 0x661   : > { %2998 = vmatmul.msk.bf16.gmra.mxu0 %vm705_vm1, %v2022_v48 }
 0x666   : > { %v2099_v42 = vpop.f32.mrf.mxu1 }
 0x66e   : > { %v2101_v37 = vpop.f32.mrf.mxu1 }
 0x676   : > { %v2104_v26 = vpop.f32.mrf.mxu1 }
 0x67e   : > { %v2106_v53 = vpop.f32.mrf.mxu1 }
 0x686   : > { %v2109_v2 = vpop.f32.mrf.mxu1 }
 0x68e   : > { %v2111_v38 = vpop.f32.mrf.mxu1 }
 0x68f   : > { %v1991_v36 = vpop.f32.mrf.mxu2 }
 0x693   : > { %v2016_v54 = vpop.f32.mrf.mxu3 }
 0x696   : > { %v2114_v49 = vpop.f32.mrf.mxu1 }
 0x697   : > { %v1993_v39 = vpop.f32.mrf.mxu2 }
 0x698   : > { %v2023_v46 = vpack.c.bf16 %v1993_v39, %v1991_v36 }
 0x69a   : > { %2999 = vmatmul.msk.bf16.gmra.mxu0 %vm705_vm1, %v2023_v46 }
 0x69b   : > { %v2018_v5 = vpop.f32.mrf.mxu3 }
 0x69c   : > { %v2024_v44 = vpack.c.bf16 %v2018_v5, %v2016_v54 }
 0x69e   : > { %v2116_v8 = vpop.f32.mrf.mxu1 }
 0x6aa   : > { %3000 = vmatmul.msk.bf16.gmra.mxu0 %vm705_vm1, %v2024_v44  ;;  %vm2162_vm1 = vweird.f32 %v3233_v11 }
 0x6ab   : > { %v4288_v19 = vsel %vm2162_vm1, %v3233_v11, %v2161_v45 }
 0x6ad   : > { %v2052_v41 = vpop.f32.mrf.mxu0 }
 0x6ae   : > { %v2100_v28 = vadd.f32 %v2099_v42, %v2052_v41 }
 0x6b0   : > { %v2123_v0 = vadd.f32 %v4275_v57, %v2100_v28 }
 0x6b2   : > { %v2133_v22 = vsel %vm630_vm0, %v2123_v0, 0.0 }
 0x6b3   : > { %2134 = vadd.xlane.f32.xlu2 %v2133_v22 }
 0x6b5   : > { %v2054_v31 = vpop.f32.mrf.mxu0 }
 0x6b6   : > { %v2102_v58 = vadd.f32 %v2101_v37, %v2054_v31 }
 0x6b8   : > { %v2124_v51 = vadd.f32 %v4275_v57, %v2102_v58 }
 0x6ba   : > { %v2136_v50 = vsel %vm630_vm0, %v2124_v51, 0.0 }
 0x6bb   : > { %2137 = vadd.xlane.f32.xlu1 %v2136_v50 }
 0x6de   : > { %v2057_v23 = vpop.f32.mrf.mxu0 }
 0x6df   : > { %v2105_v32 = vadd.f32 %v2104_v26, %v2057_v23 }
 0x6e1   : > { %v2125_v15 = vadd.f32 %v4275_v57, %v2105_v32 }
 0x6e3   : > { %v2139_v4 = vsel %vm630_vm0, %v2125_v15, 0.0 }
 0x6e4   : > { %2140 = vadd.xlane.f32.xlu1 %v2139_v4 }
 0x6e6   : > { %v2059_v6 = vpop.f32.mrf.mxu0 }
 0x6e7   : > { %v2107_v43 = vadd.f32 %v2106_v53, %v2059_v6 }
 0x6e9   : > { %v2126_v40 = vadd.f32 %v4275_v57, %v2107_v43 }
 0x6eb   : > { %v2142_v61 = vsel %vm630_vm0, %v2126_v40, 0.0 }
 0x6ec   : > { %2143 = vadd.xlane.f32.xlu0 %v2142_v61  ;;  %v3048_v61 = vld [vmem:[%s4624_s10 + $0x8] sm:$0xff] }
 0x6ed   : > { %2388 = vmatpush.bf16.msrb.mxu2 %v3048_v61 }
 0x6f1   : > { %2389 = vmatpush.bf16.msrb.mxu2 %v3047_v9 }
 0x717   : > { %v2062_v27 = vpop.f32.mrf.mxu0 }
 0x718   : > { %v2110_v25 = vadd.f32 %v2109_v2, %v2062_v27 }
 0x71a   : > { %v2127_v1 = vadd.f32 %v4275_v57, %v2110_v25 }
 0x71c   : > { %v2145_v7 = vsel %vm630_vm0, %v2127_v1, 0.0 }
 0x71d   : > { %2146 = vadd.xlane.f32.xlu1 %v2145_v7 }
 0x71f   : > { %v2064_v12 = vpop.f32.mrf.mxu0 }
 0x720   : > { %v2112_v47 = vadd.f32 %v2111_v38, %v2064_v12 }
 0x722   : > { %v2128_v20 = vadd.f32 %v4275_v57, %v2112_v47 }
 0x724   : > { %v2148_v59 = vsel %vm630_vm0, %v2128_v20, 0.0 }
 0x725   : > { %2149 = vadd.xlane.f32.xlu0 %v2148_v59 }
 0x726   : > { %v2135_v24 = vpop.xlane.xlu2 %2134 }
 0x727   : > { %v2164_v21 = vmul.f32 %v4288_v19, %v2135_v24  ;;  %v2067_v30 = vpop.f32.mrf.mxu0 }
 0x728   : > { %v2115_v60 = vadd.f32 %v2114_v49, %v2067_v30 }
 0x729   : > { %v4293_v55 = vsub.f32 %v2123_v0, %v2164_v21 }
 0x72a   : > { %v2129_v3 = vadd.f32 %v4275_v57, %v2115_v60 }
 0x72b   : > { %v2180_v13 = vmul.f32 %v4293_v55, %v4293_v55 }
 0x72c   : > { %v2151_v56 = vsel %vm630_vm0, %v2129_v3, 0.0 }
 0x72d   : > { %v2188_v63 = vsel %vm630_vm0, %v2180_v13, 0.0  ;;  %2152 = vadd.xlane.f32.xlu0 %v2151_v56 }
 0x72e   : > { %2189 = vadd.xlane.f32.xlu1 %v2188_v63  ;;  %v2138_v33 = vpop.xlane.xlu1 %2137 }
 0x72f   : > { %v2165_v29 = vmul.f32 %v4288_v19, %v2138_v33  ;;  %v2069_v62 = vpop.f32.mrf.mxu0 }
 0x730   : > { %v2117_v48 = vadd.f32 %v2116_v8, %v2069_v62  ;;  %v4361_v62 = vld [vmem:[%s4623_s9] ss:$0 sm:$0xff] }
 0x731   : > { %v4301_v35 = vsub.f32 %v2124_v51, %v2165_v29  ;;  %v4355_v29 = vld [vmem:[%s4622_s8] ss:$0 sm:$0xff] }
 0x732   : > { %v2130_v39 = vadd.f32 %v4275_v57, %v2117_v48 }
 0x733   : > { %v2181_v52 = vmul.f32 %v4301_v35, %v4301_v35 }
 0x734   : > { %v2154_v46 = vsel %vm630_vm0, %v2130_v39, 0.0 }
 0x735   : > { %v2191_v36 = vsel %vm630_vm0, %v2181_v52, 0.0 }
 0x736   : > { %2192 = vadd.xlane.f32.xlu2 %v2191_v36  ;;  %2155 = vadd.xlane.f32.xlu1 %v2154_v46 }
 0x757   : > { %v2141_v54 = vpop.xlane.xlu1 %2140 }
 0x758   : > { %v2166_v5 = vmul.f32 %v4288_v19, %v2141_v54 }
 0x75a   : > { %v4309_v42 = vsub.f32 %v2125_v15, %v2166_v5  ;;  %v603_v5 = vunpack.c.h.bf16 %v3405_v16 }
 0x75c   : > { %v2182_v44 = vmul.f32 %v4309_v42, %v4309_v42 }
 0x75e   : > { %v2194_v41 = vsel %vm630_vm0, %v2182_v44, 0.0 }
 0x75f   : > { %v2144_v28 = vpop.xlane.xlu0 %2143  ;;  %2195 = vadd.xlane.f32.xlu2 %v2194_v41 }
 0x760   : > { %v2167_v0 = vmul.f32 %v4288_v19, %v2144_v28 }
 0x762   : > { %v4315_v22 = vsub.f32 %v2126_v40, %v2167_v0 }
 0x764   : > { %v2183_v57 = vmul.f32 %v4315_v22, %v4315_v22 }
 0x766   : > { %v2197_v37 = vsel %vm630_vm0, %v2183_v57, 0.0 }
 0x767   : > { %2198 = vadd.xlane.f32.xlu0 %v2197_v37 }
 0x790   : > { %v2147_v31 = vpop.xlane.xlu1 %2146 }
 0x791   : > { %v2168_v58 = vmul.f32 %v4288_v19, %v2147_v31 }
 0x793   : > { %v4321_v51 = vsub.f32 %v2127_v1, %v2168_v58 }
 0x795   : > { %v2184_v50 = vmul.f32 %v4321_v51, %v4321_v51 }
 0x797   : > { %v2200_v26 = vsel %vm630_vm0, %v2184_v50, 0.0 }
 0x798   : > { %v2150_v23 = vpop.xlane.xlu0 %2149  ;;  %2201 = vadd.xlane.f32.xlu1 %v2200_v26 }
 0x799   : > { %v2169_v32 = vmul.f32 %v4288_v19, %v2150_v23 }
 0x79b   : > { %v4327_v15 = vsub.f32 %v2128_v20, %v2169_v32 }
 0x79d   : > { %v2185_v53 = vmul.f32 %v4327_v15, %v4327_v15 }
 0x79f   : > { %v2203_v43 = vsel %vm630_vm0, %v2185_v53, 0.0 }
 0x7a0   : > { %v2153_v14 = vpop.xlane.xlu0 %2152  ;;  %2204 = vadd.xlane.f32.xlu2 %v2203_v43 }
 0x7a1   : > { %v2190_v4 = vpop.xlane.xlu1 %2189  ;;  %v2170_v11 = vmul.f32 %v4288_v19, %v2153_v14 }
 0x7a2   : > { %v2212_v6 = vmul.f32 %v2190_v4, %v4288_v19 }
 0x7a3   : > { %v4340_v2 = vsub.f32 %v2129_v3, %v2170_v11 }
 0x7a4   : > { %v2220_v40 = vadd.f32 1e-05, %v2212_v6 }
 0x7a5   : > { %v2186_v27 = vmul.f32 %v4340_v2, %v4340_v2 }
 0x7a6   : > { %3234 = vrsqrt.f32 %v2220_v40  ;;  %vm2234_vm15 = vweird.f32 %v2220_v40 }
 0x7a7   : > { %v2206_v1 = vsel %vm630_vm0, %v2186_v27, 0.0 }
 0x7a8   : > { %2207 = vadd.xlane.f32.xlu0 %v2206_v1  ;;  %v604_v1 = vunpack.c.l.bf16 %v3409_v17 }
 0x7a9   : > { %v2193_v10 = vpop.xlane.xlu2 %2192  ;;  %v2156_v7 = vpop.xlane.xlu1 %2155 }
 0x7aa   : > { %v2213_v34 = vmul.f32 %v2193_v10, %v4288_v19  ;;  %v2171_v12 = vmul.f32 %v4288_v19, %v2156_v7 }
 0x7ac   : > { %v3235_v25 = vpop.eup %3234  ;;  %v2221_v38 = vadd.f32 1e-05, %v2213_v34  ;;  %v4347_v24 = vsub.f32 %v2130_v39, %v2171_v12 }
 0x7ad   : > { %v2229_v45 = vmul.f32 %v3235_v25, %v2220_v40  ;;  %vm2235_vm14 = vweird.f32 %v3235_v25 }
 0x7ae   : > { %3236 = vrsqrt.f32 %v2221_v38  ;;  %v2187_v21 = vmul.f32 %v4347_v24, %v4347_v24  ;;  %vm2236_vm2 = vmor %vm2234_vm15, %vm2235_vm14  ;;  %vm2244_vm4 = vweird.f32 %v2221_v38 }
 0x7af   : > { %v2230_v47 = vmul.f32 %v3235_v25, %v2229_v45 }
 0x7b0   : > { %v2209_v13 = vsel %vm630_vm0, %v2187_v21, 0.0 }
 0x7b1   : > { %v2231_v20 = vmul.f32 0.5, %v2230_v47  ;;  %2210 = vadd.xlane.f32.xlu1 %v2209_v13 }
 0x7b3   : > { %v2232_v59 = vsub.f32 1.5, %v2231_v20 }
 0x7b4   : > { %v3237_v49 = vpop.eup %3236 }
 0x7b5   : > { %v2233_v30 = vmul.f32 %v3235_v25, %v2232_v59  ;;  %v2239_v60 = vmul.f32 %v3237_v49, %v2221_v38  ;;  %vm2245_vm3 = vweird.f32 %v3237_v49  ;;  %v605_v38 = vunpack.c.h.bf16 %v3409_v17 }
 0x7b6   : > { %vm2246_vm5 = vmor %vm2244_vm4, %vm2245_vm3 }
 0x7b7   : > { %v2237_v63 = vsel %vm2236_vm2, %v3235_v25, %v2233_v30  ;;  %v2240_v33 = vmul.f32 %v3237_v49, %v2239_v60 }
 0x7b8   : > { %v2308_v56 = vmul.f32 %v2237_v63, %v4293_v55  ;;  %v602_v55 = vunpack.c.l.bf16 %v3405_v16 }
 0x7b9   : > { %v2241_v3 = vmul.f32 0.5, %v2240_v33 }
 0x7ba   : > { %v2319_v48 = vmul.f32 %v4355_v29, %v2308_v56 }
 0x7bb   : > { %v2242_v52 = vsub.f32 1.5, %v2241_v3 }
 0x7bc   : > { %v2330_v46 = vadd.f32 %v4361_v62, %v2319_v48 }
 0x7bd   : > { %v2243_v8 = vmul.f32 %v3237_v49, %v2242_v52 }
 0x7be   : > { %v4370_v41 = vadd.f32 %v2330_v46, %v602_v55 }
 0x7bf   : > { %v2247_v36 = vsel %vm2246_vm5, %v3237_v49, %v2243_v8 }
 0x7c0   : > { %v2309_v39 = vmul.f32 %v2247_v36, %v4301_v35 }
 0x7c2   : > { %v2320_v54 = vmul.f32 %v4355_v29, %v2309_v39 }
 0x7c4   : > { %v2331_v44 = vadd.f32 %v4361_v62, %v2320_v54 }
 0x7c6   : > { %v4372_v28 = vadd.f32 %v2331_v44, %v603_v5 }
 0x7c8   : > { %v2346_v0 = vpack.c.bf16 %v4372_v28, %v4370_v41 }
 0x7ca   : > { %3017 = vmatmul.msk.bf16.vlgmr.msrb.gmra.mxu2 %vm630_vm0, %v2346_v0 }
 0x7d2   : > { %v2196_v35 = vpop.xlane.xlu2 %2195 }
 0x7d3   : > { %v2214_v57 = vmul.f32 %v2196_v35, %v4288_v19 }
 0x7d5   : > { %v2222_v37 = vadd.f32 1e-05, %v2214_v57 }
 0x7d7   : > { %3238 = vrsqrt.f32 %v2222_v37  ;;  %vm2254_vm7 = vweird.f32 %v2222_v37 }
 0x7da   : > { %v2199_v31 = vpop.xlane.xlu0 %2198 }
 0x7db   : > { %v2215_v58 = vmul.f32 %v2199_v31, %v4288_v19 }
 0x7dd   : > { %v3239_v16 = vpop.eup %3238  ;;  %v2223_v50 = vadd.f32 1e-05, %v2215_v58 }
 0x7de   : > { %v2249_v26 = vmul.f32 %v3239_v16, %v2222_v37  ;;  %vm2255_vm6 = vweird.f32 %v3239_v16 }
 0x7df   : > { %3240 = vrsqrt.f32 %v2223_v50  ;;  %vm2256_vm8 = vmor %vm2254_vm7, %vm2255_vm6  ;;  %vm2264_vm10 = vweird.f32 %v2223_v50 }
 0x7e0   : > { %v2250_v23 = vmul.f32 %v3239_v16, %v2249_v26 }
 0x7e2   : > { %v2251_v32 = vmul.f32 0.5, %v2250_v23 }
 0x7e4   : > { %v2252_v4 = vsub.f32 1.5, %v2251_v32 }
 0x7e5   : > { %v3241_v53 = vpop.eup %3240 }
 0x7e6   : > { %v2253_v6 = vmul.f32 %v3239_v16, %v2252_v4  ;;  %v2259_v43 = vmul.f32 %v3241_v53, %v2223_v50  ;;  %vm2265_vm9 = vweird.f32 %v3241_v53  ;;  %v607_v4 = vunpack.c.h.bf16 %v3413_v18 }
 0x7e7   : > { %vm2266_vm11 = vmor %vm2264_vm10, %vm2265_vm9  ;;  %vm2523_vm9 = vcmask 523264  }
 0x7e8   : > { %v2257_v40 = vsel %vm2256_vm8, %v3239_v16, %v2253_v6  ;;  %v2260_v61 = vmul.f32 %v3241_v53, %v2259_v43 }
 0x7e9   : > { %v2310_v11 = vmul.f32 %v2257_v40, %v4309_v42 }
 0x7ea   : > { %v2261_v14 = vmul.f32 0.5, %v2260_v61 }
 0x7eb   : > { %v2321_v27 = vmul.f32 %v4355_v29, %v2310_v11 }
 0x7ec   : > { %v2262_v9 = vsub.f32 1.5, %v2261_v14 }
 0x7ed   : > { %v2332_v7 = vadd.f32 %v4361_v62, %v2321_v27 }
 0x7ee   : > { %v2263_v10 = vmul.f32 %v3241_v53, %v2262_v9 }
 0x7ef   : > { %v4387_v12 = vadd.f32 %v2332_v7, %v604_v1 }
 0x7f0   : > { %v2267_v34 = vsel %vm2266_vm11, %v3241_v53, %v2263_v10 }
 0x7f1   : > { %v2311_v25 = vmul.f32 %v2267_v34, %v4315_v22 }
 0x7f3   : > { %v2322_v45 = vmul.f32 %v4355_v29, %v2311_v25 }
 0x7f5   : > { %v2333_v42 = vadd.f32 %v4361_v62, %v2322_v45 }
 0x7f7   : > { %v4389_v47 = vadd.f32 %v2333_v42, %v605_v38 }
 0x7f9   : > { %v2347_v20 = vpack.c.bf16 %v4389_v47, %v4387_v12 }
 0x7fb   : > { %3018 = vmatmul.msk.bf16.gmra.mxu2 %vm630_vm0, %v2347_v20  ;;  %v3283_v20 = vld.sshfl [vmem:[#allocation1] sm:$0xff pattern:$0x73625140] }
 0x80b   : > { %v2202_v22 = vpop.xlane.xlu1 %2201 }
 0x80c   : > { %v2216_v21 = vmul.f32 %v2202_v22, %v4288_v19  ;;  %v608_v22 = vunpack.c.l.bf16 %v3283_v20 }
 0x80e   : > { %v2224_v59 = vadd.f32 1e-05, %v2216_v21  ;;  %v609_v21 = vunpack.c.h.bf16 %v3283_v20 }
 0x810   : > { %3242 = vrsqrt.f32 %v2224_v59  ;;  %vm2274_vm13 = vweird.f32 %v2224_v59 }
 0x813   : > { %v2205_v17 = vpop.xlane.xlu2 %2204 }
 0x814   : > { %v2217_v49 = vmul.f32 %v2205_v17, %v4288_v19 }
 0x816   : > { %v3243_v13 = vpop.eup %3242  ;;  %v2225_v30 = vadd.f32 1e-05, %v2217_v49 }
 0x817   : > { %v2269_v60 = vmul.f32 %v3243_v13, %v2224_v59  ;;  %vm2275_vm12 = vweird.f32 %v3243_v13 }
 0x818   : > { %3244 = vrsqrt.f32 %v2225_v30  ;;  %vm2276_vm1 = vmor %vm2274_vm13, %vm2275_vm12  ;;  %vm2284_vm15 = vweird.f32 %v2225_v30 }
 0x819   : > { %v2270_v63 = vmul.f32 %v3243_v13, %v2269_v60 }
 0x81b   : > { %v2271_v33 = vmul.f32 0.5, %v2270_v63  ;;  %v2208_v3 = vpop.xlane.xlu0 %2207  ;;  %v3051_v63 = vld [vmem:[%s4626_s12 + $0x10] sm:$0xff] }
 0x81c   : > { %v2218_v56 = vmul.f32 %v2208_v3, %v4288_v19 }
 0x81d   : > { %v2272_v52 = vsub.f32 1.5, %v2271_v33 }
 0x81e   : > { %v3245_v8 = vpop.eup %3244  ;;  %v2226_v48 = vadd.f32 1e-05, %v2218_v56  ;;  %v3050_v56 = vld [vmem:[%s4626_s12 + $0x8] sm:$0xff] }
 0x81f   : > { %v2273_v36 = vmul.f32 %v3243_v13, %v2272_v52  ;;  %v2279_v39 = vmul.f32 %v3245_v8, %v2225_v30  ;;  %vm2285_vm14 = vweird.f32 %v3245_v8 }
 0x820   : > { %3246 = vrsqrt.f32 %v2226_v48  ;;  %vm2286_vm2 = vmor %vm2284_vm15, %vm2285_vm14  ;;  %vm2294_vm4 = vweird.f32 %v2226_v48  ;;  %vm2785_vm14 = vcmask 1041408   ;;  %vm2789_vm15 = vcmask 1043458  }
 0x821   : > { %v2277_v46 = vsel %vm2276_vm1, %v3243_v13, %v2273_v36  ;;  %v2280_v54 = vmul.f32 %v3245_v8, %v2279_v39  ;;  %v3049_v39 = vld [vmem:[%s4626_s12] sm:$0xff] }
 0x822   : > { %v2312_v44 = vmul.f32 %v2277_v46, %v4321_v51  ;;  %v606_v51 = vunpack.c.l.bf16 %v3413_v18 }
 0x823   : > { %v2281_v55 = vmul.f32 0.5, %v2280_v54 }
 0x824   : > { %v2211_v5 = vpop.xlane.xlu1 %2210  ;;  %v2323_v16 = vmul.f32 %v4355_v29, %v2312_v44 }
 0x825   : > { %v2219_v0 = vmul.f32 %v2211_v5, %v4288_v19  ;;  %v2282_v35 = vsub.f32 1.5, %v2281_v55 }
 0x826   : > { %v3247_v57 = vpop.eup %3246  ;;  %v2334_v6 = vadd.f32 %v4361_v62, %v2323_v16 }
 0x827   : > { %v2227_v37 = vadd.f32 1e-05, %v2219_v0  ;;  %v2283_v31 = vmul.f32 %v3245_v8, %v2282_v35  ;;  %v2289_v58 = vmul.f32 %v3247_v57, %v2226_v48  ;;  %vm2295_vm3 = vweird.f32 %v3247_v57 }
 0x828   : > { %vm2296_vm5 = vmor %vm2294_vm4, %vm2295_vm3  ;;  %v4406_v9 = vadd.f32 %v2334_v6, %v606_v51 }
 0x829   : > { %3248 = vrsqrt.f32 %v2227_v37  ;;  %v2287_v50 = vsel %vm2286_vm2, %v3245_v8, %v2283_v31  ;;  %v2290_v26 = vmul.f32 %v3247_v57, %v2289_v58  ;;  %vm2304_vm7 = vweird.f32 %v2227_v37 }
 0x82a   : > { %v2313_v23 = vmul.f32 %v2287_v50, %v4327_v15 }
 0x82b   : > { %v2291_v32 = vmul.f32 0.5, %v2290_v26 }
 0x82c   : > { %v2324_v53 = vmul.f32 %v4355_v29, %v2313_v23 }
 0x82d   : > { %v2292_v43 = vsub.f32 1.5, %v2291_v32 }
 0x82e   : > { %v2335_v61 = vadd.f32 %v4361_v62, %v2324_v53 }
 0x82f   : > { %v3249_v40 = vpop.eup %3248  ;;  %v2293_v14 = vmul.f32 %v3247_v57, %v2292_v43 }
 0x830   : > { %v2299_v11 = vmul.f32 %v3249_v40, %v2227_v37  ;;  %v4408_v15 = vadd.f32 %v2335_v61, %v607_v4  ;;  %vm2305_vm6 = vweird.f32 %v3249_v40 }
 0x831   : > { %v2297_v10 = vsel %vm2296_vm5, %v3247_v57, %v2293_v14  ;;  %vm2306_vm8 = vmor %vm2304_vm7, %vm2305_vm6  ;;  %vm2891_vm5 = vcmask 257024  }
 0x832   : > { %v2300_v27 = vmul.f32 %v3249_v40, %v2299_v11  ;;  %v2348_v18 = vpack.c.bf16 %v4408_v15, %v4406_v9  ;;  %v2314_v25 = vmul.f32 %v2297_v10, %v4340_v2 }
 0x834   : > { %v2301_v34 = vmul.f32 0.5, %v2300_v27  ;;  %3019 = vmatmul.msk.bf16.gmra.mxu2 %vm630_vm0, %v2348_v18  ;;  %v2325_v45 = vmul.f32 %v4355_v29, %v2314_v25 }
 0x836   : > { %v2302_v1 = vsub.f32 1.5, %v2301_v34  ;;  %v2336_v17 = vadd.f32 %v4361_v62, %v2325_v45 }
 0x838   : > { %v2303_v38 = vmul.f32 %v3249_v40, %v2302_v1  ;;  %v4419_v49 = vadd.f32 %v2336_v17, %v608_v22 }
 0x83a   : > { %v2307_v7 = vsel %vm2306_vm8, %v3249_v40, %v2303_v38 }
 0x83b   : > { %v2315_v42 = vmul.f32 %v2307_v7, %v4347_v24  ;;  %v4429_v24 = vld [vmem:[%s4625_s11] ss:$0 sm:$0xff] }
 0x83d   : > { %v2326_v59 = vmul.f32 %v4355_v29, %v2315_v42  ;;  %v3052_v29 = vld [vmem:[%s4626_s12 + $0x18] sm:$0xff] }
 0x83e   : > { %2540 = vmatpush.bf16.msrb.mxu3 %v3052_v29 }
 0x83f   : > { %v2337_v2 = vadd.f32 %v4361_v62, %v2326_v59 }
 0x841   : > { %v4421_v13 = vadd.f32 %v2337_v2, %v609_v21 }
 0x842   : > { %2541 = vmatpush.bf16.msrb.mxu3 %v3051_v63 }
 0x843   : > { %v2349_v30 = vpack.c.bf16 %v4421_v13, %v4419_v49 }
 0x845   : > { %3020 = vmatmul.msk.bf16.gmra.mxu2 %vm630_vm0, %v2349_v30 }
 0x846   : > { %2542 = vmatpush.bf16.msrb.mxu3 %v3050_v56 }
 0x84a   : > { %2543 = vmatpush.bf16.msrb.mxu3 %v3049_v39 }
 0x84d   : > { %v2391_v60 = vpop.f32.mrf.mxu2 }
 0x84e   : > { %v2392_v62 = vadd.f32 %v4429_v24, %v2391_v60 }
 0x850   : > { %v2411_v33 = vmul.f32 %v2392_v62, %v2392_v62 }
 0x852   : > { %v2419_v3 = vmul.f32 %v2411_v33, %v2392_v62 }
 0x854   : > { %v2427_v52 = vmul.f32 0.044715, %v2419_v3 }
 0x855   : > { %v2393_v8 = vpop.f32.mrf.mxu2 }
 0x856   : > { %v2435_v48 = vadd.f32 %v2427_v52, %v2392_v62  ;;  %v2394_v36 = vadd.f32 %v4429_v24, %v2393_v8 }
 0x858   : > { %v2443_v46 = vmul.f32 0.7978846, %v2435_v48  ;;  %v2412_v54 = vmul.f32 %v2394_v36, %v2394_v36 }
 0x85a   : > { %v2420_v55 = vmul.f32 %v2412_v54, %v2394_v36  ;;  %3250 = vtanh.f32 %v2443_v46 }
 0x85c   : > { %v2428_v5 = vmul.f32 0.044715, %v2420_v55 }
 0x85e   : > { %v2436_v44 = vadd.f32 %v2428_v5, %v2394_v36 }
 0x860   : > { %v2444_v0 = vmul.f32 0.7978846, %v2436_v44  ;;  %v3251_v35 = vpop.eup %3250 }
 0x861   : > { %v2459_v57 = vadd.f32 1.0, %v3251_v35 }
 0x862   : > { %3252 = vtanh.f32 %v2444_v0 }
 0x863   : > { %v2467_v31 = vmul.f32 0.5, %v2459_v57 }
 0x865   : > { %v2475_v50 = vmul.f32 %v2467_v31, %v2392_v62 }
 0x868   : > { %v3253_v37 = vpop.eup %3252 }
 0x869   : > { %v2460_v58 = vadd.f32 1.0, %v3253_v37 }
 0x86b   : > { %v2468_v16 = vmul.f32 0.5, %v2460_v58 }
 0x86d   : > { %v2476_v26 = vmul.f32 %v2468_v16, %v2394_v36 }
 0x86f   : > { %v2483_v23 = vpack.c.bf16 %v2476_v26, %v2475_v50 }
 0x871   : > { %3037 = vmatmul.msk.bf16.vlgmr.msrb.gmra.mxu3 %vm2523_vm9, %v2483_v23 }
 0x87e   : > { %v2396_v32 = vpop.f32.mrf.mxu2 }
 0x87f   : > { %v2397_v51 = vadd.f32 %v4429_v24, %v2396_v32 }
 0x881   : > { %v2413_v4 = vmul.f32 %v2397_v51, %v2397_v51 }
 0x883   : > { %v2421_v53 = vmul.f32 %v2413_v4, %v2397_v51 }
 0x885   : > { %v2429_v6 = vmul.f32 0.044715, %v2421_v53 }
 0x886   : > { %v2398_v43 = vpop.f32.mrf.mxu2 }
 0x887   : > { %v2437_v40 = vadd.f32 %v2429_v6, %v2397_v51  ;;  %v2399_v61 = vadd.f32 %v4429_v24, %v2398_v43 }
 0x889   : > { %v2445_v14 = vmul.f32 0.7978846, %v2437_v40  ;;  %v2414_v11 = vmul.f32 %v2399_v61, %v2399_v61 }
 0x88b   : > { %v2422_v10 = vmul.f32 %v2414_v11, %v2399_v61  ;;  %3254 = vtanh.f32 %v2445_v14 }
 0x88d   : > { %v2430_v27 = vmul.f32 0.044715, %v2422_v10 }
 0x88f   : > { %v2438_v18 = vadd.f32 %v2430_v27, %v2399_v61 }
 0x891   : > { %v2446_v34 = vmul.f32 0.7978846, %v2438_v18  ;;  %v3255_v25 = vpop.eup %3254 }
 0x892   : > { %v2461_v1 = vadd.f32 1.0, %v3255_v25 }
 0x893   : > { %3256 = vtanh.f32 %v2446_v34 }
 0x894   : > { %v2469_v7 = vmul.f32 0.5, %v2461_v1 }
 0x896   : > { %v2477_v20 = vmul.f32 %v2469_v7, %v2397_v51 }
 0x899   : > { %v3257_v38 = vpop.eup %3256 }
 0x89a   : > { %v2462_v45 = vadd.f32 1.0, %v3257_v38  ;;  %v3101_v38 = vld [vmem:[%s4627_s13] ss:$0 sm:$0xff] }
 0x89c   : > { %v2470_v42 = vmul.f32 0.5, %v2462_v45 }
 0x89e   : > { %v2478_v22 = vmul.f32 %v2470_v42, %v2399_v61 }
 0x8a0   : > { %v2484_v21 = vpack.c.bf16 %v2478_v22, %v2477_v20 }
 0x8a2   : > { %3038 = vmatmul.msk.bf16.gmra.mxu3 %vm2523_vm9, %v2484_v21 }
 0x8b7   : > { %v2401_v59 = vpop.f32.mrf.mxu2 }
 0x8b8   : > { %v2402_v17 = vadd.f32 %v4429_v24, %v2401_v59 }
 0x8ba   : > { %v2415_v2 = vmul.f32 %v2402_v17, %v2402_v17 }
 0x8bc   : > { %v2423_v30 = vmul.f32 %v2415_v2, %v2402_v17 }
 0x8be   : > { %v2431_v29 = vmul.f32 0.044715, %v2423_v30 }
 0x8bf   : > { %v2403_v60 = vpop.f32.mrf.mxu2 }
 0x8c0   : > { %v2439_v62 = vadd.f32 %v2431_v29, %v2402_v17  ;;  %v2404_v63 = vadd.f32 %v4429_v24, %v2403_v60 }
 0x8c2   : > { %v2447_v33 = vmul.f32 0.7978846, %v2439_v62  ;;  %v2416_v3 = vmul.f32 %v2404_v63, %v2404_v63 }
 0x8c4   : > { %v2424_v56 = vmul.f32 %v2416_v3, %v2404_v63  ;;  %3258 = vtanh.f32 %v2447_v33 }
 0x8c6   : > { %v2432_v52 = vmul.f32 0.044715, %v2424_v56 }
 0x8c8   : > { %v2406_v8 = vpop.f32.mrf.mxu2  ;;  %v2440_v48 = vadd.f32 %v2432_v52, %v2404_v63 }
 0x8c9   : > { %v2407_v36 = vadd.f32 %v4429_v24, %v2406_v8 }
 0x8ca   : > { %v2448_v39 = vmul.f32 0.7978846, %v2440_v48  ;;  %v3259_v54 = vpop.eup %3258 }
 0x8cb   : > { %v2417_v46 = vmul.f32 %v2407_v36, %v2407_v36  ;;  %v2463_v0 = vadd.f32 1.0, %v3259_v54 }
 0x8cc   : > { %3260 = vtanh.f32 %v2448_v39 }
 0x8cd   : > { %v2425_v55 = vmul.f32 %v2417_v46, %v2407_v36  ;;  %v2471_v50 = vmul.f32 0.5, %v2463_v0 }
 0x8cf   : > { %v2433_v5 = vmul.f32 0.044715, %v2425_v55  ;;  %v2479_v51 = vmul.f32 %v2471_v50, %v2402_v17 }
 0x8d0   : > { %v2408_v44 = vpop.f32.mrf.mxu2 }
 0x8d1   : > { %v2441_v35 = vadd.f32 %v2433_v5, %v2407_v36  ;;  %v2409_v57 = vadd.f32 %v4429_v24, %v2408_v44 }
 0x8d2   : > { %v3261_v37 = vpop.eup %3260 }
 0x8d3   : > { %v2449_v31 = vmul.f32 0.7978846, %v2441_v35  ;;  %v2418_v58 = vmul.f32 %v2409_v57, %v2409_v57  ;;  %v2464_v16 = vadd.f32 1.0, %v3261_v37 }
 0x8d5   : > { %v2426_v26 = vmul.f32 %v2418_v58, %v2409_v57  ;;  %v2472_v23 = vmul.f32 0.5, %v2464_v16  ;;  %3262 = vtanh.f32 %v2449_v31 }
 0x8d7   : > { %v2434_v32 = vmul.f32 0.044715, %v2426_v26  ;;  %v2480_v4 = vmul.f32 %v2472_v23, %v2404_v63 }
 0x8d9   : > { %v2442_v53 = vadd.f32 %v2434_v32, %v2409_v57  ;;  %v2485_v6 = vpack.c.bf16 %v2480_v4, %v2479_v51 }
 0x8db   : > { %v2450_v43 = vmul.f32 0.7978846, %v2442_v53  ;;  %3039 = vmatmul.msk.bf16.gmra.mxu3 %vm2523_vm9, %v2485_v6  ;;  %v3263_v40 = vpop.eup %3262 }
 0x8dc   : > { %v2465_v61 = vadd.f32 1.0, %v3263_v40 }
 0x8dd   : > { %3264 = vtanh.f32 %v2450_v43 }
 0x8de   : > { %v2473_v11 = vmul.f32 0.5, %v2465_v61 }
 0x8e0   : > { %v2481_v27 = vmul.f32 %v2473_v11, %v2407_v36 }
 0x8e3   : > { %v3265_v24 = vpop.eup %3264 }
 0x8e4   : > { %v2466_v14 = vadd.f32 1.0, %v3265_v24 }
 0x8e6   : > { %v2474_v10 = vmul.f32 0.5, %v2466_v14 }
 0x8e8   : > { %v2482_v18 = vmul.f32 %v2474_v10, %v2409_v57 }
 0x8ea   : > { %v2486_v34 = vpack.c.bf16 %v2482_v18, %v2481_v27 }
 0x8ec   : > { %3040 = vmatmul.msk.bf16.gmra.mxu3 %vm2523_vm9, %v2486_v34 }
 0x8f4   : > { %v2545_v25 = vpop.f32.mrf.mxu3 }
 0x8f5   : > { %v2546_v59 = vadd.f32 %v3101_v38, %v2545_v25 }
 0x8f7   : > { %v2567_v17 = vsel %vm630_vm0, %v2546_v59, 0.0 }
 0x8fc   : > { %v2547_v1 = vpop.f32.mrf.mxu3 }
 0x8fd   : > { %v2548_v3 = vadd.f32 %v3101_v38, %v2547_v1 }
 0x8ff   : > { %v2570_v48 = vsel %vm630_vm0, %v2548_v3, 0.0 }
 0x925   : > { %v2550_v45 = vpop.f32.mrf.mxu3 }
 0x926   : > { %v2551_v7 = vadd.f32 %v3101_v38, %v2550_v45 }
 0x928   : > { %v2573_v42 = vsel %vm630_vm0, %v2551_v7, 0.0 }
 0x929   : > { %2574 = vadd.xlane.f32.xlu2 %v2573_v42 }
 0x92d   : > { %v2552_v20 = vpop.f32.mrf.mxu3 }
 0x92e   : > { %v2553_v22 = vadd.f32 %v3101_v38, %v2552_v20 }
 0x930   : > { %v2576_v21 = vsel %vm630_vm0, %v2553_v22, 0.0 }
 0x931   : > { %2577 = vadd.xlane.f32.xlu0 %v2576_v21 }
 0x939   : > { %2568 = vadd.xlane.f32.xlu0 %v2567_v17 }
 0x95e   : > { %v2555_v2 = vpop.f32.mrf.mxu3 }
 0x95f   : > { %v2556_v36 = vadd.f32 %v3101_v38, %v2555_v2 }
 0x961   : > { %v2579_v39 = vsel %vm630_vm0, %v2556_v36, 0.0 }
 0x966   : > { %v2557_v30 = vpop.f32.mrf.mxu3 }
 0x967   : > { %v2558_v29 = vadd.f32 %v3101_v38, %v2557_v30 }
 0x969   : > { %v2582_v60 = vsel %vm630_vm0, %v2558_v29, 0.0 }
 0x96a   : > { %2583 = vadd.xlane.f32.xlu0 %v2582_v60 }
 0x96f   : > { %v2560_v62 = vpop.f32.mrf.mxu3 }
 0x970   : > { %v2561_v63 = vadd.f32 %v3101_v38, %v2560_v62 }
 0x972   : > { %v2585_v33 = vsel %vm630_vm0, %v2561_v63, 0.0 }
 0x973   : > { %2586 = vadd.xlane.f32.xlu1 %v2585_v33 }
 0x977   : > { %v2562_v56 = vpop.f32.mrf.mxu3 }
 0x978   : > { %v2563_v52 = vadd.f32 %v3101_v38, %v2562_v56 }
 0x97a   : > { %v2588_v8 = vsel %vm630_vm0, %v2563_v52, 0.0 }
 0x97b   : > { %2589 = vadd.xlane.f32.xlu2 %v2588_v8  ;;  %2571 = vadd.xlane.f32.xlu1 %v2570_v48 }
 0x983   : > { %2580 = vadd.xlane.f32.xlu2 %v2579_v39 }
 0x99c   : > { %v2575_v46 = vpop.xlane.xlu2 %2574 }
 0x99d   : > { %v2593_v54 = vmul.f32 %v2575_v46, %v4288_v19 }
 0x99f   : > { %v4467_v55 = vsub.f32 %v2551_v7, %v2593_v54 }
 0x9a1   : > { %v2609_v5 = vmul.f32 %v4467_v55, %v4467_v55 }
 0x9a3   : > { %v2621_v44 = vsel %vm630_vm0, %v2609_v5, 0.0  ;;  %v4520_v5 = vld [vmem:[%s4628_s14] ss:$0 sm:$0xff] }
 0x9a4   : > { %v2578_v0 = vpop.xlane.xlu0 %2577  ;;  %2622 = vadd.xlane.f32.xlu1 %v2621_v44 }
 0x9a5   : > { %v2594_v35 = vmul.f32 %v2578_v0, %v4288_v19 }
 0x9a7   : > { %v4473_v57 = vsub.f32 %v2553_v22, %v2594_v35  ;;  %v4525_v35 = vld [vmem:[%s4629_s15] ss:$0 sm:$0xff] }
 0x9a9   : > { %v2610_v37 = vmul.f32 %v4473_v57, %v4473_v57 }
 0x9ab   : > { %v2624_v31 = vsel %vm630_vm0, %v2610_v37, 0.0 }
 0x9ac   : > { %v2569_v58 = vpop.xlane.xlu0 %2568  ;;  %2625 = vadd.xlane.f32.xlu2 %v2624_v31 }
 0x9ad   : > { %v2591_v16 = vmul.f32 %v2569_v58, %v4288_v19 }
 0x9af   : > { %v4479_v50 = vsub.f32 %v2546_v59, %v2591_v16 }
 0x9b1   : > { %v2607_v26 = vmul.f32 %v4479_v50, %v4479_v50 }
 0x9b3   : > { %v2615_v23 = vsel %vm630_vm0, %v2607_v26, 0.0 }
 0x9b4   : > { %2616 = vadd.xlane.f32.xlu2 %v2615_v23 }
 0x9dd   : > { %v2584_v32 = vpop.xlane.xlu0 %2583 }
 0x9de   : > { %v2596_v51 = vmul.f32 %v2584_v32, %v4288_v19 }
 0x9e0   : > { %v4485_v4 = vsub.f32 %v2558_v29, %v2596_v51 }
 0x9e2   : > { %v2612_v53 = vmul.f32 %v4485_v4, %v4485_v4 }
 0x9e4   : > { %v2630_v6 = vsel %vm630_vm0, %v2612_v53, 0.0 }
 0x9e5   : > { %2631 = vadd.xlane.f32.xlu2 %v2630_v6 }
 0x9e6   : > { %v2587_v43 = vpop.xlane.xlu1 %2586 }
 0x9e7   : > { %v2597_v40 = vmul.f32 %v2587_v43, %v4288_v19 }
 0x9e9   : > { %v4491_v61 = vsub.f32 %v2561_v63, %v2597_v40 }
 0x9eb   : > { %v2613_v24 = vmul.f32 %v4491_v61, %v4491_v61 }
 0x9ed   : > { %v2633_v14 = vsel %vm630_vm0, %v2613_v24, 0.0 }
 0x9ee   : > { %v2590_v11 = vpop.xlane.xlu2 %2589  ;;  %2634 = vadd.xlane.f32.xlu0 %v2633_v14  ;;  %v2572_v10 = vpop.xlane.xlu1 %2571 }
 0x9ef   : > { %v2598_v27 = vmul.f32 %v2590_v11, %v4288_v19  ;;  %v2592_v18 = vmul.f32 %v2572_v10, %v4288_v19 }
 0x9f1   : > { %v4498_v34 = vsub.f32 %v2563_v52, %v2598_v27  ;;  %v4500_v25 = vsub.f32 %v2548_v3, %v2592_v18 }
 0x9f3   : > { %v2614_v1 = vmul.f32 %v4498_v34, %v4498_v34  ;;  %v2608_v38 = vmul.f32 %v4500_v25, %v4500_v25 }
 0x9f5   : > { %v2636_v45 = vsel %vm630_vm0, %v2614_v1, 0.0  ;;  %v2618_v7 = vsel %vm630_vm0, %v2608_v38, 0.0 }
 0x9f6   : > { %v2581_v42 = vpop.xlane.xlu2 %2580  ;;  %2637 = vadd.xlane.f32.xlu1 %v2636_v45  ;;  %2619 = vadd.xlane.f32.xlu0 %v2618_v7 }
 0x9f7   : > { %v2595_v20 = vmul.f32 %v2581_v42, %v4288_v19 }
 0x9f9   : > { %v4509_v22 = vsub.f32 %v2556_v36, %v2595_v20 }
 0x9fb   : > { %v2611_v21 = vmul.f32 %v4509_v22, %v4509_v22 }
 0x9fd   : > { %v2627_v59 = vsel %vm630_vm0, %v2611_v21, 0.0 }
 0x9fe   : > { %2628 = vadd.xlane.f32.xlu1 %v2627_v59 }
 0xa17   : > { %v2623_v17 = vpop.xlane.xlu1 %2622 }
 0xa18   : > { %v2641_v2 = vmul.f32 %v2623_v17, %v4288_v19 }
 0xa1a   : > { %v2649_v30 = vadd.f32 1e-05, %v2641_v2 }
 0xa1c   : > { %3266 = vrsqrt.f32 %v2649_v30  ;;  %vm2681_vm10 = vweird.f32 %v2649_v30 }
 0xa1f   : > { %v2626_v29 = vpop.xlane.xlu2 %2625 }
 0xa20   : > { %v2642_v60 = vmul.f32 %v2626_v29, %v4288_v19 }
 0xa22   : > { %v3267_v62 = vpop.eup %3266  ;;  %v2650_v63 = vadd.f32 1e-05, %v2642_v60 }
 0xa23   : > { %v2676_v33 = vmul.f32 %v3267_v62, %v2649_v30  ;;  %vm2682_vm0 = vweird.f32 %v3267_v62 }
 0xa24   : > { %3268 = vrsqrt.f32 %v2650_v63  ;;  %vm2683_vm11 = vmor %vm2681_vm10, %vm2682_vm0  ;;  %vm2691_vm13 = vweird.f32 %v2650_v63 }
 0xa25   : > { %v2677_v3 = vmul.f32 %v3267_v62, %v2676_v33 }
 0xa27   : > { %v2678_v56 = vmul.f32 0.5, %v2677_v3  ;;  %v2617_v52 = vpop.xlane.xlu2 %2616 }
 0xa28   : > { %v2639_v8 = vmul.f32 %v2617_v52, %v4288_v19 }
 0xa29   : > { %v2679_v48 = vsub.f32 1.5, %v2678_v56 }
 0xa2a   : > { %v3269_v36 = vpop.eup %3268  ;;  %v2647_v39 = vadd.f32 1e-05, %v2639_v8 }
 0xa2b   : > { %v2680_v46 = vmul.f32 %v3267_v62, %v2679_v48  ;;  %v2686_v54 = vmul.f32 %v3269_v36, %v2650_v63  ;;  %vm2692_vm12 = vweird.f32 %v3269_v36 }
 0xa2c   : > { %3270 = vrsqrt.f32 %v2647_v39  ;;  %vm2693_vm1 = vmor %vm2691_vm13, %vm2692_vm12  ;;  %vm2661_vm3 = vweird.f32 %v2647_v39 }
 0xa2d   : > { %v2684_v44 = vsel %vm2683_vm11, %v3267_v62, %v2680_v46  ;;  %v2687_v0 = vmul.f32 %v3269_v36, %v2686_v54 }
 0xa2e   : > { %v2737_v37 = vmul.f32 %v2684_v44, %v4467_v55 }
 0xa2f   : > { %v2688_v31 = vmul.f32 0.5, %v2687_v0 }
 0xa30   : > { %v2748_v58 = vmul.f32 %v4520_v5, %v2737_v37 }
 0xa31   : > { %v2689_v16 = vsub.f32 1.5, %v2688_v31 }
 0xa32   : > { %v3271_v26 = vpop.eup %3270  ;;  %v2759_v23 = vadd.f32 %v4525_v35, %v2748_v58 }
 0xa33   : > { %v2690_v32 = vmul.f32 %v3269_v36, %v2689_v16  ;;  %v2656_v51 = vmul.f32 %v3271_v26, %v2647_v39  ;;  %vm2662_vm2 = vweird.f32 %v3271_v26 }
 0xa34   : > { %v2767_v53 = vadd.f32 %v2759_v23, %v4387_v12  ;;  %vm2663_vm4 = vmor %vm2661_vm3, %vm2662_vm2 }
 0xa35   : > { %v2694_v6 = vsel %vm2693_vm1, %v3269_v36, %v2690_v32  ;;  %v2657_v43 = vmul.f32 %v3271_v26, %v2656_v51 }
 0xa36   : > { %v2775_v40 = vpack.c.bf16 %v2767_v53, %v2767_v53  ;;  %v2738_v24 = vmul.f32 %v2694_v6, %v4473_v57 }
 0xa37   : > { %v2658_v55 = vmul.f32 0.5, %v2657_v43 }
 0xa38   : > { %v2801_v14 = vrot.slane %v2775_v40, 2  ;;  %v2749_v11 = vmul.f32 %v4520_v5, %v2738_v24 }
 0xa39   : > { %v2659_v10 = vsub.f32 1.5, %v2658_v55 }
 0xa3a   : > { %v2805_v27 = vsel %vm2785_vm14, %v2775_v40, %v2801_v14  ;;  %v2806_v18 = vsel %vm2789_vm15, %v2775_v40, %v2801_v14  ;;  %v2760_v12 = vadd.f32 %v4525_v35, %v2749_v11 }
 0xa3b   : > { %v2808_v1 = vrot.slane %v2806_v18, 2  ;;  %2816 = vst [vmem:[#allocation1 + $0x1] ss:$4 sm:$0xff] %v2805_v27  ;;  %v2660_v38 = vmul.f32 %v3271_v26, %v2659_v10 }
 0xa3c   : > { %v2768_v57 = vadd.f32 %v2760_v12, %v4389_v47 }
 0xa3d   : > { %2820 = vst [vmem:[#allocation1 + $0x21] ss:$4 sm:$0xff] %v2808_v1  ;;  %v2664_v45 = vsel %vm2663_vm4, %v3271_v26, %v2660_v38 }
 0xa3e   : > { %v2776_v7 = vpack.c.bf16 %v2768_v57, %v2768_v57  ;;  %v2735_v42 = vmul.f32 %v2664_v45, %v4479_v50 }
 0xa40   : > { %v2802_v20 = vrot.slane %v2776_v7, 2  ;;  %v2746_v21 = vmul.f32 %v4520_v5, %v2735_v42 }
 0xa42   : > { %v2811_v59 = vsel %vm2785_vm14, %v2776_v7, %v2802_v20  ;;  %v2812_v17 = vsel %vm2789_vm15, %v2776_v7, %v2802_v20  ;;  %v2757_v2 = vadd.f32 %v4525_v35, %v2746_v21  ;;  %v2817_v30 = vld.sshfl [vmem:[#allocation1] sm:$0xff pattern:$0x73625140] }
 0xa43   : > { %v2814_v29 = vrot.slane %v2812_v17, 2  ;;  %2822 = vst [vmem:[#allocation1 + $0x1] ss:$4 sm:$0xff] %v2811_v59 }
 0xa44   : > { %v2765_v47 = vadd.f32 %v2757_v2, %v4370_v41  ;;  %v2821_v60 = vld.sshfl [vmem:[#allocation1 + $0x20] sm:$0xff pattern:$0x73625140] }
 0xa45   : > { %2825 = vst [vmem:[#allocation1 + $0x21] ss:$4 sm:$0xff] %v2814_v29 }
 0xa46   : > { %v2773_v62 = vpack.c.bf16 %v2765_v47, %v2765_v47 }
 0xa48   : > { %v2783_v63 = vrot.slane %v2773_v62, 2 }
 0xa4a   : > { %v2788_v50 = vsel %vm2785_vm14, %v2773_v62, %v2783_v63  ;;  %v2790_v33 = vsel %vm2789_vm15, %v2773_v62, %v2783_v63 }
 0xa4b   : > { %v2792_v3 = vrot.slane %v2790_v33, 2  ;;  %v2827_v41 = vsel %vm2785_vm14, %v2788_v50, %v2817_v30 }
 0xa4c   : > { %2892 = vst.msk [vmem:[%s4548_s30] sm:$0xf] %vm2891_vm5, %v2827_v41 }
 0xa4d   : > { %v2830_v56 = vsel %vm2785_vm14, %v2792_v3, %v2821_v60 }
 0xa4e   : > { %2893 = vst.msk [vmem:[%s4548_s30 + $0x4] sm:$0xf] %vm2891_vm5, %v2830_v56 }
 0xa58   : > { %v2632_v52 = vpop.xlane.xlu2 %2631 }
 0xa59   : > { %v2644_v8 = vmul.f32 %v2632_v52, %v4288_v19 }
 0xa5b   : > { %v2652_v48 = vadd.f32 1e-05, %v2644_v8 }
 0xa5d   : > { %3272 = vrsqrt.f32 %v2652_v48  ;;  %vm2711_vm0 = vweird.f32 %v2652_v48 }
 0xa61   : > { %v2635_v36 = vpop.xlane.xlu0 %2634 }
 0xa62   : > { %v2645_v39 = vmul.f32 %v2635_v36, %v4288_v19 }
 0xa63   : > { %v3273_v46 = vpop.eup %3272 }
 0xa64   : > { %v2653_v54 = vadd.f32 1e-05, %v2645_v39  ;;  %v2706_v44 = vmul.f32 %v3273_v46, %v2652_v48  ;;  %vm2712_vm7 = vweird.f32 %v3273_v46 }
 0xa65   : > { %vm2713_vm10 = vmor %vm2711_vm0, %vm2712_vm7 }
 0xa66   : > { %3274 = vrsqrt.f32 %v2653_v54  ;;  %v2707_v0 = vmul.f32 %v3273_v46, %v2706_v44  ;;  %vm2721_vm8 = vweird.f32 %v2653_v54 }
 0xa68   : > { %v2708_v51 = vmul.f32 0.5, %v2707_v0 }
 0xa69   : > { %v2620_v37 = vpop.xlane.xlu0 %2619  ;;  %v2638_v31 = vpop.xlane.xlu1 %2637 }
 0xa6a   : > { %v2640_v58 = vmul.f32 %v2620_v37, %v4288_v19  ;;  %v2646_v16 = vmul.f32 %v2638_v31, %v4288_v19  ;;  %v2709_v43 = vsub.f32 1.5, %v2708_v51 }
 0xa6c   : > { %v3275_v26 = vpop.eup %3274  ;;  %v2648_v23 = vadd.f32 1e-05, %v2640_v58  ;;  %v2654_v32 = vadd.f32 1e-05, %v2646_v16  ;;  %v2710_v18 = vmul.f32 %v3273_v46, %v2709_v43 }
 0xa6d   : > { %v2716_v53 = vmul.f32 %v3275_v26, %v2653_v54  ;;  %vm2722_vm6 = vweird.f32 %v3275_v26  ;;  %v2826_v16 = vld.sshfl [vmem:[#allocation1 + $0x20] sm:$0xff pattern:$0x73625140] }
 0xa6e   : > { %3276 = vrsqrt.f32 %v2648_v23  ;;  %vm2723_vm9 = vmor %vm2721_vm8, %vm2722_vm6  ;;  %v2714_v42 = vsel %vm2713_vm10, %v3273_v46, %v2710_v18  ;;  %vm2671_vm13 = vweird.f32 %v2648_v23  ;;  %vm2731_vm2 = vweird.f32 %v2654_v32 }
 0xa6f   : > { %v2717_v6 = vmul.f32 %v3275_v26, %v2716_v53  ;;  %3278 = vrsqrt.f32 %v2654_v32  ;;  %v2740_v30 = vmul.f32 %v2714_v42, %v4485_v4 }
 0xa71   : > { %v2718_v40 = vmul.f32 0.5, %v2717_v6  ;;  %v2629_v24 = vpop.xlane.xlu1 %2628  ;;  %v2751_v3 = vmul.f32 %v4520_v5, %v2740_v30 }
 0xa72   : > { %v2643_v55 = vmul.f32 %v2629_v24, %v4288_v19 }
 0xa73   : > { %v2719_v14 = vsub.f32 1.5, %v2718_v40  ;;  %v2762_v46 = vadd.f32 %v4525_v35, %v2751_v3 }
 0xa74   : > { %v3277_v11 = vpop.eup %3276  ;;  %v2651_v10 = vadd.f32 1e-05, %v2643_v55 }
 0xa75   : > { %v3279_v27 = vpop.eup %3278  ;;  %v2720_v12 = vmul.f32 %v3275_v26, %v2719_v14  ;;  %v2666_v1 = vmul.f32 %v3277_v11, %v2648_v23  ;;  %vm2672_vm11 = vweird.f32 %v3277_v11 }
 0xa76   : > { %v2726_v38 = vmul.f32 %v3279_v27, %v2654_v32  ;;  %3280 = vrsqrt.f32 %v2651_v10  ;;  %vm2732_vm12 = vweird.f32 %v3279_v27  ;;  %vm2673_vm1 = vmor %vm2671_vm13, %vm2672_vm11  ;;  %vm2701_vm6 = vweird.f32 %v2651_v10 }
 0xa77   : > { %v2724_v57 = vsel %vm2723_vm9, %v3275_v26, %v2720_v12  ;;  %v2667_v45 = vmul.f32 %v3277_v11, %v2666_v1  ;;  %vm2733_vm3 = vmor %vm2731_vm2, %vm2732_vm12  ;;  %v2770_v32 = vadd.f32 %v2762_v46, %v4408_v15 }
 0xa78   : > { %v2741_v7 = vmul.f32 %v2724_v57, %v4491_v61  ;;  %v2727_v19 = vmul.f32 %v3279_v27, %v2726_v38 }
 0xa79   : > { %v2668_v20 = vmul.f32 0.5, %v2667_v45  ;;  %v2778_v55 = vpack.c.bf16 %v2770_v32, %v2770_v32 }
 0xa7a   : > { %v2752_v21 = vmul.f32 %v4520_v5, %v2741_v7  ;;  %v2728_v59 = vmul.f32 0.5, %v2727_v19 }
 0xa7b   : > { %v2669_v17 = vsub.f32 1.5, %v2668_v20  ;;  %v2840_v38 = vrot.slane %v2778_v55, 2 }
 0xa7c   : > { %v3281_v2 = vpop.eup %3280  ;;  %v2763_v29 = vadd.f32 %v4525_v35, %v2752_v21  ;;  %v2729_v47 = vsub.f32 1.5, %v2728_v59 }
 0xa7d   : > { %v2670_v60 = vmul.f32 %v3277_v11, %v2669_v17  ;;  %v2696_v62 = vmul.f32 %v3281_v2, %v2651_v10  ;;  %vm2702_vm4 = vweird.f32 %v3281_v2  ;;  %v2850_v45 = vsel %vm2789_vm15, %v2778_v55, %v2840_v38 }
 0xa7e   : > { %v2771_v61 = vadd.f32 %v2763_v29, %v4419_v49  ;;  %v2730_v63 = vmul.f32 %v3279_v27, %v2729_v47  ;;  %vm2703_vm7 = vmor %vm2701_vm6, %vm2702_vm4  ;;  %v2849_v20 = vsel %vm2785_vm14, %v2778_v55, %v2840_v38  ;;  %v2852_v59 = vrot.slane %v2850_v45, 2 }
 0xa7f   : > { %v2674_v50 = vsel %vm2673_vm1, %v3277_v11, %v2670_v60  ;;  %v2697_v33 = vmul.f32 %v3281_v2, %v2696_v62 }
 0xa80   : > { %v2779_v41 = vpack.c.bf16 %v2771_v61, %v2771_v61  ;;  %v2736_v4 = vmul.f32 %v2674_v50, %v4500_v25  ;;  %v2734_v56 = vsel %vm2733_vm3, %v3279_v27, %v2730_v63  ;;  %v2823_v25 = vld.sshfl [vmem:[#allocation1] sm:$0xff pattern:$0x73625140] }
 0xa81   : > { %v2742_v52 = vmul.f32 %v2734_v56, %v4498_v34  ;;  %v2698_v8 = vmul.f32 0.5, %v2697_v33 }
 0xa82   : > { %v2855_v48 = vrot.slane %v2779_v41, 2  ;;  %v2747_v36 = vmul.f32 %v4520_v5, %v2736_v4 }
 0xa83   : > { %v2753_v49 = vmul.f32 %v4520_v5, %v2742_v52  ;;  %v2699_v39 = vsub.f32 1.5, %v2698_v8 }
 0xa84   : > { %v2859_v54 = vsel %vm2785_vm14, %v2779_v41, %v2855_v48  ;;  %v2860_v44 = vsel %vm2789_vm15, %v2779_v41, %v2855_v48  ;;  %v2758_v0 = vadd.f32 %v4525_v35, %v2747_v36 }
 0xa85   : > { %v2862_v37 = vrot.slane %v2860_v44, 2  ;;  %2870 = vst [vmem:[#allocation1 + $0x1] ss:$4 sm:$0xff] %v2859_v54  ;;  %v2764_v34 = vadd.f32 %v4525_v35, %v2753_v49  ;;  %v2700_v31 = vmul.f32 %v3281_v2, %v2699_v39 }
 0xa86   : > { %v2766_v58 = vadd.f32 %v2758_v0, %v4372_v28 }
 0xa87   : > { %2874 = vst [vmem:[#allocation1 + $0x21] ss:$4 sm:$0xff] %v2862_v37  ;;  %v2772_v26 = vadd.f32 %v2764_v34, %v4421_v13  ;;  %v2704_v23 = vsel %vm2703_vm7, %v3281_v2, %v2700_v31 }
 0xa88   : > { %v2774_v51 = vpack.c.bf16 %v2766_v58, %v2766_v58  ;;  %v2739_v53 = vmul.f32 %v2704_v23, %v4509_v22 }
 0xa89   : > { %v2780_v6 = vpack.c.bf16 %v2772_v26, %v2772_v26 }
 0xa8a   : > { %v2784_v43 = vrot.slane %v2774_v51, 2  ;;  %v2750_v40 = vmul.f32 %v4520_v5, %v2739_v53 }
 0xa8b   : > { %v2856_v24 = vrot.slane %v2780_v6, 2 }
 0xa8c   : > { %v2795_v28 = vsel %vm2785_vm14, %v2774_v51, %v2784_v43  ;;  %v2796_v14 = vsel %vm2789_vm15, %v2774_v51, %v2784_v43  ;;  %v2871_v11 = vld.sshfl [vmem:[#allocation1] sm:$0xff pattern:$0x73625140]  ;;  %v2761_v13 = vadd.f32 %v4525_v35, %v2750_v40 }
 0xa8d   : > { %v2798_v10 = vrot.slane %v2796_v14, 2  ;;  %v2832_v15 = vsel %vm2785_vm14, %v2795_v28, %v2823_v25  ;;  %v2865_v27 = vsel %vm2785_vm14, %v2780_v6, %v2856_v24  ;;  %v2866_v22 = vsel %vm2789_vm15, %v2780_v6, %v2856_v24 }
 0xa8e   : > { %2894 = vst.msk [vmem:[%s4548_s30 + $0x8] sm:$0xf] %vm2891_vm5, %v2832_v15  ;;  %v2868_v5 = vrot.slane %v2866_v22, 2  ;;  %v2875_v18 = vld.sshfl [vmem:[#allocation1 + $0x20] sm:$0xff pattern:$0x73625140]  ;;  %v2769_v12 = vadd.f32 %v2761_v13, %v4406_v9 }
 0xa8f   : > { %v2835_v1 = vsel %vm2785_vm14, %v2798_v10, %v2826_v16  ;;  %2876 = vst [vmem:[#allocation1 + $0x1] ss:$4 sm:$0xff] %v2865_v27 }
 0xa90   : > { %2895 = vst.msk [vmem:[%s4548_s30 + $0xc] sm:$0xf] %vm2891_vm5, %v2835_v1  ;;  %v2777_v35 = vpack.c.bf16 %v2769_v12, %v2769_v12 }
 0xa91   : > { %2879 = vst [vmem:[#allocation1 + $0x21] ss:$4 sm:$0xff] %v2868_v5 }
 0xa92   : > { %v2839_v57 = vrot.slane %v2777_v35, 2 }
 0xa94   : > { %v2843_v7 = vsel %vm2785_vm14, %v2777_v35, %v2839_v57  ;;  %v2844_v19 = vsel %vm2789_vm15, %v2777_v35, %v2839_v57 }
 0xa95   : > { %v2846_v42 = vrot.slane %v2844_v19, 2  ;;  %v2881_v9 = vsel %vm2785_vm14, %v2843_v7, %v2871_v11 }
 0xa96   : > { %v2877_v21 = vld.sshfl [vmem:[#allocation1] sm:$0xff pattern:$0x73625140]  ;;  %2896 = vst.msk [vmem:[%s4548_s30 + $0x10] sm:$0xf] %vm2891_vm5, %v2881_v9 }
 0xa97   : > { %v2886_v17 = vsel %vm2785_vm14, %v2849_v20, %v2877_v21  ;;  %v2884_v2 = vsel %vm2785_vm14, %v2846_v42, %v2875_v18 }
 0xa98   : > { %v2880_v30 = vld.sshfl [vmem:[#allocation1 + $0x20] sm:$0xff pattern:$0x73625140]  ;;  %2898 = vst.msk [vmem:[%s4548_s30 + $0x18] sm:$0xf] %vm2891_vm5, %v2886_v17 }
 0xa99   : > { %v2889_v29 = vsel %vm2785_vm14, %v2852_v59, %v2880_v30  ;;  %2897 = vst.msk [vmem:[%s4548_s30 + $0x14] sm:$0xf] %vm2891_vm5, %v2884_v2 }
 0xa9a   : > { %2899 = vst.msk [vmem:[%s4548_s30 + $0x1c] sm:$0xf] %vm2891_vm5, %v2889_v29 }
 0xa9b PF: > { %s26_s21 = sadd.s32 1, %s3290_s21  }
 0xa9c   : > { %p23_p4 = scmp.ge.s32.totalorder %s26_s21, 4  }
 0xa9e   :  { %25 = sbr.rel (!%p23_p4) target bundleno = 2 (0x2), region = 138 }

// kernel: swin_extractor_forward.13
= control target key start
LH: loop header
LB: loop body
LE: loop exit
PB: predicated region body
PF: predicated region fallthrough
CT: control target
= control target key end

     0   :  { %8 = vsyncpa [#allocation3], 0  ;;  %s570_s0 = inlined_call_operand.vmem [shape: bf16[2,16,64], index: 0, kind: input, shape index: {}]   ;;  %s571_s1 = inlined_call_operand.vmem [shape: f32[1,64], index: 1, kind: input, shape index: {}]   ;;  %s572_s2 = inlined_call_operand.vmem [shape: f32[1,64], index: 2, kind: input, shape index: {}]   ;;  %s573_s3 = inlined_call_operand.hbm [shape: f32[2,1,64], index: 3, kind: output, shape index: {}]  }
   0x1   :  { %10 = vsyncpa [#allocation3 + $0x1], 0  ;;  %s473_s12 = smov 0   ;;  %s475_s13 = smov 0  }
   0x2   :  { %s477_s14 = smov 0   ;;  %s479_s15 = smov 0  }
   0x3 LB: > { %s494_s16 = sadd.s32 4294967295, %s449_s15   ;;  %s323_s17 = sadd.s32 4294967294, %s449_s15   ;;  %s449_s15 = sphi %s479_s15, %s579_s15   ;;  %s445_s14 = sphi %s477_s14, %s578_s14   ;;  %s441_s13 = sphi %s475_s13, %s577_s13   ;;  %s437_s12 = sphi %s473_s12, %s576_s12  }
   0x4   : > { %s498_s18 = sadd.s32 1, %s449_s15   ;;  %s91_s19 = sadd.s32 1, %s445_s14 }
   0x5   : > { %s88_s20 = ssub.s32 %s449_s15, %s498_s18  ;;  %p101_p0 = scmp.ne.s32.totalorder %s445_s14, %s441_s13 }
   0x6   : > { %p89_p1 = scmp.eq.s32.totalorder %s88_s20, 0  ;;  %p102_p2 = scmp.eq.s32.totalorder %s494_s16, 1 }
   0x7   : > { %p107_p3 = scmp.ne.s32.totalorder %s441_s13, %s437_s12  ;;  %p108_p4 = scmp.eq.s32.totalorder %s323_s17, 1 }
   0x8   : > { %s509_s21 = scalar_select %p89_p1, %s445_s14, %s91_s19  }
   0x9   : > { %p511_p5 = por %p102_p2, %p101_p0  ;;  %p515_p6 = por %p108_p4, %p107_p3 }
   0xa   : > { %p326_p7 = scmp.ge.s32.totalorder %s449_s15, 1  ;;  %p140_p8 = scmp.lt.s32.totalorder %s449_s15, 3 }
   0xc   : > { %p141_p9 = pnand %p326_p7, %p140_p8 }
   0xd   : > { %p163_p10 = scmp.lt.s32.totalorder (!%p141_p9), %s494_s16, 1  ;;  %s161_s6 = sand.u32 (!%p141_p9), 1, %s441_s13  }
   0xe   : > { %144 = sbr.rel (%p141_p9) target bundleno = 322 (0x142), region = 32  ;;  %s264_s9 = scalar_lea.hbm (!%p141_p9), %s573_s3, %s494_s16 }
   0xf   : > { %s162_s10 = scalar_lea.vmem (!%p141_p9), [#allocation2], %s161_s6  ;;  %s268_s17 = sshll.u32 (!%p141_p9), %s264_s9, 4  ;;  %s269_s17 = int_to_ptr.hbm [resolvable:$true] %s268_s17 }
  0x10   : > { %s266_s11 = sshll.u32 (!%p141_p9), %s162_s10, 4  ;;  %s256_s19 = scalar_lea.sflag (!%p141_p9), [#allocation3], %s161_s6  ;;  %s267_s11 = int_to_ptr.vmem [resolvable:$true] %s266_s11 }
  0x11   : > { %s401_s20 = sshra.s32 (!%p141_p9), %s269_s17, 4  ;;  %s407_s26 = scalar_lea.hbm (!%p141_p9), %s573_s3, 2  ;;  %s402_s20 = int_to_ptr.hbm [resolvable:$true] %s401_s20 }
  0x12   : > { %p408_p0 = scmp.lt.s32.totalorder (!%p141_p9), %s402_s20, %s573_s3 }
  0x13   : > { %s164_s24 = scalar_select %p163_p10, %s494_s16, 1  ;;  %vm174_vm0 = vcmask 523264   ;;  %v451_v5 = vmov 64.0   ;;  %v452_v39 = vmov 16.0   ;;  %v377_v40 = vld [vmem:[%s571_s1] ss:$0 sm:$0xff] }
  0x14   : > { %379 = vrcp.f32 %v451_v5  ;;  %v378_v44 = vld [vmem:[%s572_s2] ss:$0 sm:$0xff]  ;;  %vm253_vm9 = vcmask 516096  }
  0x15   : > { %s331_s25 = sshll.u32 %s164_s24, 3  ;;  %s403_s24 = scalar_lea.hbm %s402_s20, 1 }
  0x16   : > { %s167_s28 = scalar_lea.vmem %s570_s0, %s331_s25  ;;  %p404_p11 = scmp.ne.s32.totalorder %s402_s20, %s403_s24 }
  0x17   : > { %v333_v0 = vld [vmem:[%s167_s28] sm:$0xff]   ;;  %p409_p1 = scmp.lt.s32.totalorder %s407_s26, %s403_s24 }
  0x18   : > { %v334_v1 = vunpack.c.l.bf16 %v333_v0  ;;  %v335_v3 = vunpack.c.h.bf16 %v333_v0  ;;  %p405_p12 = pnand %p404_p11, %p511_p5 }
  0x19   : > { %p410_p2 = por %p409_p1, %p408_p0 }
  0x1a   : > { %v175_v2 = vsel %vm174_vm0, %v334_v1, 0.0  ;;  %v178_v4 = vsel %vm174_vm0, %v335_v3, 0.0  ;;  %v380_v6 = vpop.eup %379  ;;  %p406_p13 = pneg %p405_p12 }
  0x1b   : > { %176 = vadd.xlane.f32.xlu0 %v175_v2  ;;  %v182_v7 = vmul.f32 64.0, %v380_v6  ;;  %vm186_vm1 = vweird.f32 %v380_v6 }
  0x1c   : > { %p411_p3 = pnand %p410_p2, %p406_p13 }
  0x1d   : > { %v183_v8 = vsub.f32 1.0, %v182_v7 }
  0x1f   : > { %v184_v9 = vmul.f32 %v380_v6, %v183_v8 }
  0x21   : > { %v185_v10 = vadd.f32 %v380_v6, %v184_v9 }
  0x23   : > { %179 = vadd.xlane.f32.xlu0 %v178_v4  ;;  %v187_v11 = vsel %vm186_vm1, %v380_v6, %v185_v10 }
  0x8e   : > { %v177_v12 = vpop.xlane.xlu0 %176 }
  0x8f   : > { %v188_v13 = vmul.f32 %v187_v11, %v177_v12 }
  0x91   : > { %v190_v14 = vsub.f32 %v334_v1, %v188_v13 }
  0x93   : > { %v192_v15 = vmul.f32 %v190_v14, %v190_v14 }
  0x95   : > { %v194_v16 = vsel %vm174_vm0, %v192_v15, 0.0 }
  0x96   : > { %195 = vadd.xlane.f32.xlu1 %v194_v16  ;;  %v180_v17 = vpop.xlane.xlu0 %179 }
  0x97   : > { %v189_v18 = vmul.f32 %v187_v11, %v180_v17 }
  0x99   : > { %v191_v19 = vsub.f32 %v335_v3, %v189_v18 }
  0x9b   : > { %v193_v20 = vmul.f32 %v191_v19, %v191_v19 }
  0x9d   : > { %v197_v21 = vsel %vm174_vm0, %v193_v20, 0.0 }
  0x9e   : > { %198 = vadd.xlane.f32.xlu1 %v197_v21 }
 0x109   : > { %v196_v22 = vpop.xlane.xlu1 %195 }
 0x10a   : > { %v200_v23 = vmul.f32 %v196_v22, %v187_v11 }
 0x10c   : > { %v202_v24 = vadd.f32 1e-05, %v200_v23 }
 0x10e   : > { %381 = vrsqrt.f32 %v202_v24  ;;  %vm210_vm3 = vweird.f32 %v202_v24 }
 0x111   : > { %v199_v25 = vpop.xlane.xlu1 %198 }
 0x112   : > { %v201_v26 = vmul.f32 %v199_v25, %v187_v11 }
 0x114   : > { %v382_v27 = vpop.eup %381  ;;  %v203_v28 = vadd.f32 1e-05, %v201_v26 }
 0x115   : > { %v205_v29 = vmul.f32 %v382_v27, %v202_v24  ;;  %vm211_vm2 = vweird.f32 %v382_v27 }
 0x116   : > { %383 = vrsqrt.f32 %v203_v28  ;;  %vm212_vm4 = vmor %vm210_vm3, %vm211_vm2  ;;  %vm220_vm6 = vweird.f32 %v203_v28 }
 0x117   : > { %v206_v30 = vmul.f32 %v382_v27, %v205_v29  ;;  %385 = vrcp.f32 %v452_v39 }
 0x119   : > { %v207_v31 = vmul.f32 0.5, %v206_v30 }
 0x11b   : > { %v208_v32 = vsub.f32 1.5, %v207_v31 }
 0x11c   : > { %v384_v33 = vpop.eup %383 }
 0x11d   : > { %v209_v34 = vmul.f32 %v382_v27, %v208_v32  ;;  %v215_v35 = vmul.f32 %v384_v33, %v203_v28  ;;  %vm221_vm5 = vweird.f32 %v384_v33  ;;  %v386_v46 = vpop.eup %385 }
 0x11e   : > { %vm222_vm7 = vmor %vm220_vm6, %vm221_vm5  ;;  %v246_v51 = vmul.f32 16.0, %v386_v46  ;;  %vm250_vm8 = vweird.f32 %v386_v46 }
 0x11f   : > { %v213_v36 = vsel %vm212_vm4, %v382_v27, %v209_v34  ;;  %v216_v37 = vmul.f32 %v384_v33, %v215_v35 }
 0x120   : > { %v224_v41 = vmul.f32 %v213_v36, %v190_v14  ;;  %v247_v55 = vsub.f32 1.0, %v246_v51 }
 0x121   : > { %v217_v38 = vmul.f32 0.5, %v216_v37 }
 0x122   : > { %v229_v45 = vmul.f32 %v377_v40, %v224_v41  ;;  %v248_v58 = vmul.f32 %v386_v46, %v247_v55 }
 0x123   : > { %v218_v42 = vsub.f32 1.5, %v217_v38 }
 0x124   : > { %v234_v49 = vadd.f32 %v378_v44, %v229_v45  ;;  %v249_v61 = vadd.f32 %v386_v46, %v248_v58 }
 0x125   : > { %v219_v43 = vmul.f32 %v384_v33, %v218_v42 }
 0x126   : > { %v236_v53 = vsel %vm174_vm0, %v234_v49, 0.0  ;;  %v251_v0 = vsel %vm250_vm8, %v386_v46, %v249_v61 }
 0x127   : > { %v223_v47 = vsel %vm222_vm7, %v384_v33, %v219_v43 }
 0x128   : > { %v225_v48 = vmul.f32 %v223_v47, %v191_v19 }
 0x12a   : > { %v230_v50 = vmul.f32 %v377_v40, %v225_v48 }
 0x12c   : > { %v235_v52 = vadd.f32 %v378_v44, %v230_v50 }
 0x12e   : > { %v237_v54 = vsel %vm174_vm0, %v235_v52, 0.0 }
 0x12f   : > { %v238_v56 = vadd.f32 %v237_v54, %v236_v53 }
 0x131   : > { %v239_v57 = vrot.slane %v238_v56, 4 }
 0x133   : > { %v240_v59 = vadd.f32 %v239_v57, %v238_v56 }
 0x135   : > { %v241_v60 = vrot.slane %v240_v59, 2 }
 0x137   : > { %v242_v62 = vadd.f32 %v241_v60, %v240_v59 }
 0x139   : > { %v243_v63 = vrot.slane %v242_v62, 1 }
 0x13b   : > { %v244_v1 = vadd.f32 %v243_v63, %v242_v62 }
 0x13d   : > { %v252_v2 = vmul.f32 %v251_v0, %v244_v1 }
 0x13f   : > { %254 = vst.msk [vmem:[%s162_s10] sm:$0x1] %vm253_vm9, %v252_v2 }
 0x140   : > { %414 = shalt.err (!%p411_p3)
}
 0x141   : > { %336 = dma.vmem_to_hbm [thread:$0]  (%p511_p5), %s267_s11, 16, %s269_s17, %s256_s19  }
 0x142 PF: > { %p342_p4 = scmp.ge.s32.totalorder %s449_s15, 2  ;;  %s280_s29 = sand.u32 1, %s437_s12  }
 0x143   : > { %s281_s30 = scalar_lea.sflag [#allocation3], %s280_s29 }
 0x144   : > { %p339_p7 = pnand %p342_p4, %p515_p6 }
 0x146   : > { %p340_p8 = pneg %p339_p7 }
 0x148   : > { %432 = dma.done.wait (%p340_p8), %s281_s30, 16  }
 0x149   : > { %434 = vsyncadd (%p340_p8), %s281_s30, 4294967280  ;;  %p13_p9 = scmp.ge.s32.totalorder %s498_s18, 4   ;;  %s576_s12 = smov %s441_s13 }
 0x14a   : > { %s577_s13 = smov %s445_s14  ;;  %s578_s14 = smov %s509_s21 }
 0x14b   : > { %s579_s15 = smov %s498_s18  ;;  %15 = sbr.rel (!%p13_p9) target bundleno = 3 (0x3), region = 67 }
 0x150   :  { %286 = vsyncpa [#allocation3], 1 }
 0x151   :  { %288 = vsyncpa [#allocation3 + $0x1], 1 }

// kernel: swin_extractor_forward.9
= control target key start
LH: loop header
LB: loop body
LE: loop exit
PB: predicated region body
PF: predicated region fallthrough
CT: control target
= control target key end

     0   :  { %s3504_s21 = smov 0   ;;  %s4751_s0 = inlined_call_operand.vmem [shape: bf16[128,32], index: 0, kind: input, shape index: {}]   ;;  %s4752_s1 = inlined_call_operand.vmem [shape: bf16[32,96], index: 1, kind: input, shape index: {}]   ;;  %s4753_s2 = inlined_call_operand.vmem [shape: f32[1,96], index: 2, kind: input, shape index: {}]   ;;  %s4754_s3 = inlined_call_operand.vmem [shape: f32[1,32], index: 3, kind: input, shape index: {}]   ;;  %s4755_s4 = inlined_call_operand.vmem [shape: bf16[2,16,16], index: 4, kind: input, shape index: {}]   ;;  %s4756_s5 = inlined_call_operand.vmem [shape: bf16[4,16,16], index: 5, kind: input, shape index: {}]   ;;  %s4757_s6 = inlined_call_operand.vmem [shape: bf16[32,32], index: 6, kind: input, shape index: {}]   ;;  %s4758_s7 = inlined_call_operand.vmem [shape: f32[1,32], index: 7, kind: input, shape index: {}]   ;;  %s4759_s8 = inlined_call_operand.vmem [shape: f32[1,32], index: 8, kind: input, shape index: {}]   ;;  %s4760_s9 = inlined_call_operand.vmem [shape: f32[1,32], index: 9, kind: input, shape index: {}]   ;;  %s4761_s10 = inlined_call_operand.vmem [shape: bf16[32,64], index: 10, kind: input, shape index: {}]   ;;  %s4762_s11 = inlined_call_operand.vmem [shape: f32[1,64], index: 11, kind: input, shape index: {}]   ;;  %s4763_s12 = inlined_call_operand.vmem [shape: bf16[64,32], index: 12, kind: input, shape index: {}]   ;;  %s4764_s13 = inlined_call_operand.vmem [shape: f32[1,32], index: 13, kind: input, shape index: {}]   ;;  %s4765_s14 = inlined_call_operand.vmem [shape: f32[1,32], index: 14, kind: input, shape index: {}]   ;;  %s4766_s15 = inlined_call_operand.vmem [shape: f32[1,32], index: 15, kind: input, shape index: {}]   ;;  %s4767_s16 = inlined_call_operand.vmem [shape: bf16[128,32], index: 16, kind: output, shape index: {}]  }
   0x1   :  { %4770 = sst [smem:[#allocation2_spill]] %s4751_s0 }
   0x2 LB: > { %s3058_s22 = sadd.s32 4294967295, %s3411_s21   ;;  %p3062_p0 = scmp.ge.s32.totalorder %s3411_s21, 1  ;;  %s3411_s21 = sphi %s3504_s21, %s26_s21  }
   0x3   : > { %p463_p1 = scmp.lt.s32.totalorder %s3411_s21, 3 }
   0x5   : > { %p464_p2 = pnand %p3062_p0, %p463_p1 }
   0x6   : > { %s3063_s25 = sshll.u32 (!%p464_p2), %s3058_s22, 3  ;;  %s4771_s0 = sld [smem:[#allocation2_spill]] (!%p464_p2) }
   0x7   : > { %467 = sbr.rel (%p464_p2) target bundleno = 2739 (0xab3), region = 84  ;;  %p514_p3 = scmp.lt.s32.totalorder (!%p464_p2), %s3063_s25, 15 }
   0x8   : > { %s3413_s20 = smov (!%p464_p2), 96   ;;  %s3414_s24 = smov (!%p464_p2), 80  }
   0x9   : > { %s3415_s26 = smov (!%p464_p2), 112   ;;  %s3416_s27 = smov (!%p464_p2), 64  }
   0xc   : > { %v3146_v0 = vld [vmem:[%s4752_s1 + $0x8] sm:$0xff]  ;;  %v3145_v1 = vld [vmem:[%s4752_s1] sm:$0xff]  ;;  %s4793_s25 = smov (!%p514_p3, %s3063_s25), 15  ;;  %vm574_vm0 = vcmask 1042432   ;;  %vm683_vm1 = vcmask 261120   ;;  %vm758_vm2 = vcmask 130048  }
   0xd   : > { %698 = vmatpush.bf16.msra.mxu0 %v3146_v0  ;;  %s3064_s28 = sshll.u32 %s4793_s25, 2  ;;  %v3216_v58 = vld [vmem:[%s4753_s2] ss:$0 sm:$0xff] }
   0xe   : > { %s517_s17 = scalar_lea.vmem %s4771_s0, %s3064_s28  ;;  %s3417_s0 = smov 48  }
   0xf   : > { %v3195_v2 = vld [vmem:[%s517_s17 + $0x8] sm:$0xff]   ;;  %v3196_v3 = vld [vmem:[%s517_s17 + $0x10] sm:$0xff]   ;;  %v3197_v15 = vld [vmem:[%s517_s17 + $0x18] sm:$0xff]   ;;  %s4680_s30 = scalar_lea.vmem %s4767_s16, %s3064_s28 }
  0x10   : > { %v3161_v4 = vunpack.c.l.b16 %v3195_v2  ;;  %v3162_v5 = vunpack.c.h.b16 %v3195_v2  ;;  %v3165_v6 = vunpack.c.l.b16 %v3196_v3  ;;  %v3166_v9 = vunpack.c.h.b16 %v3196_v3  ;;  %v3156_v26 = vld [vmem:[%s517_s17] sm:$0xff]  }
  0x11   : > { %699 = vmatpush.bf16.msra.mxu0 %v3145_v1  ;;  %v3169_v19 = vunpack.c.l.b16 %v3197_v15  ;;  %v3157_v30 = vunpack.c.l.b16 %v3156_v26  ;;  %v3170_v40 = vunpack.c.h.b16 %v3197_v15  ;;  %v3158_v47 = vunpack.c.h.b16 %v3156_v26 }
  0x12   : > { %v550_v7 = vpack.c.b16 %v3161_v4, %v3161_v4  ;;  %v551_v8 = vpack.c.b16 %v3162_v5, %v3162_v5  ;;  %v552_v12 = vpack.c.b16 %v3165_v6, %v3165_v6  ;;  %v553_v18 = vpack.c.b16 %v3166_v9, %v3166_v9 }
  0x13   : > { %v554_v24 = vpack.c.b16 %v3169_v19, %v3169_v19  ;;  %v556_v33 = vpack.c.b16 %v3157_v30, %v3157_v30  ;;  %v555_v41 = vpack.c.b16 %v3170_v40, %v3170_v40  ;;  %v557_v48 = vpack.c.b16 %v3158_v47, %v3158_v47 }
  0x14   : > { %v558_v10 = vrot.slane %v550_v7, 1  ;;  %v559_v11 = vrot.slane %v551_v8, 1  ;;  %v566_v13 = vrot.slane %v550_v7, 5  ;;  %v567_v14 = vrot.slane %v551_v8, 5 }
  0x15   : > { %v560_v20 = vrot.slane %v552_v12, 1  ;;  %v568_v21 = vrot.slane %v552_v12, 5  ;;  %v561_v22 = vrot.slane %v553_v18, 1  ;;  %v569_v23 = vrot.slane %v553_v18, 5 }
  0x16   : > { %v577_v16 = vsel %vm574_vm0, %v558_v10, %v566_v13  ;;  %v580_v17 = vsel %vm574_vm0, %v559_v11, %v567_v14  ;;  %v562_v31 = vrot.slane %v554_v24, 1  ;;  %v570_v32 = vrot.slane %v554_v24, 5 }
  0x17   : > { %599 = vst.sshfl [vmem:[#allocation1] sm:$0xff pattern:$0x73625140] %v577_v16  ;;  %v583_v25 = vsel %vm574_vm0, %v560_v20, %v568_v21  ;;  %v586_v28 = vsel %vm574_vm0, %v561_v22, %v569_v23  ;;  %v564_v36 = vrot.slane %v556_v33, 1  ;;  %v572_v37 = vrot.slane %v556_v33, 5 }
  0x18   : > { %602 = vst.sshfl [vmem:[#allocation1 + $0x20] sm:$0xff pattern:$0x73625140] %v580_v17  ;;  %v589_v34 = vsel %vm574_vm0, %v562_v31, %v570_v32  ;;  %v563_v42 = vrot.slane %v555_v41, 1  ;;  %v571_v43 = vrot.slane %v555_v41, 5  ;;  %v565_v50 = vrot.slane %v557_v48, 1 }
  0x19   : > { %v595_v38 = vsel %vm574_vm0, %v564_v36, %v572_v37  ;;  %v573_v51 = vrot.slane %v557_v48, 5 }
  0x1a   : > { %v592_v45 = vsel %vm574_vm0, %v563_v42, %v571_v43 }
  0x1b   : > { %v598_v53 = vsel %vm574_vm0, %v565_v50, %v573_v51 }
  0x1e   : > { %v601_v27 = vld [vmem:[#allocation1 + $0x1] ss:$4 sm:$0xff] }
  0x1f   : > { %605 = vst.sshfl [vmem:[#allocation1] sm:$0xff pattern:$0x73625140] %v583_v25  ;;  %v604_v29 = vld [vmem:[#allocation1 + $0x21] ss:$4 sm:$0xff] }
  0x20   : > { %607 = vst.sshfl [vmem:[#allocation1 + $0x20] sm:$0xff pattern:$0x73625140] %v586_v28 }
  0x26   : > { %v606_v35 = vld [vmem:[#allocation1 + $0x1] ss:$4 sm:$0xff] }
  0x27   : > { %609 = vst.sshfl [vmem:[#allocation1] sm:$0xff pattern:$0x73625140] %v589_v34  ;;  %v608_v44 = vld [vmem:[#allocation1 + $0x21] ss:$4 sm:$0xff] }
  0x28   : > { %612 = vst.sshfl [vmem:[#allocation1 + $0x20] sm:$0xff pattern:$0x73625140] %v592_v45 }
  0x2e   : > { %v611_v39 = vld [vmem:[#allocation1 + $0x1] ss:$4 sm:$0xff] }
  0x2f   : > { %615 = vst.sshfl [vmem:[#allocation1] sm:$0xff pattern:$0x73625140] %v595_v38  ;;  %v614_v52 = vld [vmem:[#allocation1 + $0x21] ss:$4 sm:$0xff] }
  0x30   : > { %619 = vst [vmem:[#allocation1] ss:$4 sm:$0xff] %v577_v16 }
  0x31   : > { %623 = vst [vmem:[#allocation1 + $0x2] ss:$4 sm:$0xff] %v583_v25 }
  0x32   : > { %625 = vst [vmem:[#allocation1 + $0x3] ss:$4 sm:$0xff] %v586_v28 }
  0x33   : > { %617 = vst.sshfl [vmem:[#allocation1 + $0x20] sm:$0xff pattern:$0x73625140] %v598_v53 }
  0x36   : > { %v616_v46 = vld [vmem:[#allocation1 + $0x1] ss:$4 sm:$0xff] }
  0x37   : > { %621 = vst [vmem:[#allocation1 + $0x1] ss:$4 sm:$0xff] %v580_v17 }
  0x3a   : > { %v618_v56 = vld [vmem:[#allocation1 + $0x21] ss:$4 sm:$0xff] }
  0x3e   : > { %v3533_v49 = vld.sshfl [vmem:[#allocation1] sm:$0xff pattern:$0x73625140] }
  0x3f   : > { %3075 = vmatmul.msk.bf16.vlgmr.msra.gmra.mxu0 %vm683_vm1, %v3533_v49  ;;  %628 = vst [vmem:[#allocation1] ss:$4 sm:$0xff] %v601_v27 }
  0x40   : > { %632 = vst [vmem:[#allocation1 + $0x2] ss:$4 sm:$0xff] %v606_v35 }
  0x41   : > { %630 = vst [vmem:[#allocation1 + $0x1] ss:$4 sm:$0xff] %v604_v29 }
  0x42   : > { %634 = vst [vmem:[#allocation1 + $0x3] ss:$4 sm:$0xff] %v608_v44 }
  0x49   : > { %v3538_v54 = vld.sshfl [vmem:[#allocation1] sm:$0xff pattern:$0x73625140] }
  0x4a   : > { %637 = vst [vmem:[#allocation1] ss:$4 sm:$0xff] %v589_v34 }
  0x4b   : > { %641 = vst [vmem:[#allocation1 + $0x2] ss:$4 sm:$0xff] %v595_v38 }
  0x4c   : > { %639 = vst [vmem:[#allocation1 + $0x1] ss:$4 sm:$0xff] %v592_v45 }
  0x4d   : > { %643 = vst [vmem:[#allocation1 + $0x3] ss:$4 sm:$0xff] %v598_v53 }
  0x4f   : > { %3076 = vmatmul.msk.bf16.gmra.mxu0 %vm683_vm1, %v3538_v54 }
  0x54   : > { %v3542_v55 = vld.sshfl [vmem:[#allocation1] sm:$0xff pattern:$0x73625140] }
  0x55   : > { %646 = vst [vmem:[#allocation1] ss:$4 sm:$0xff] %v611_v39 }
  0x56   : > { %650 = vst [vmem:[#allocation1 + $0x2] ss:$4 sm:$0xff] %v616_v46 }
  0x57   : > { %648 = vst [vmem:[#allocation1 + $0x1] ss:$4 sm:$0xff] %v614_v52 }
  0x58   : > { %652 = vst [vmem:[#allocation1 + $0x3] ss:$4 sm:$0xff] %v618_v56 }
  0x5f   : > { %3077 = vmatmul.msk.bf16.gmra.mxu0 %vm683_vm1, %v3542_v55  ;;  %v653_v57 = vld.sshfl [vmem:[#allocation1] sm:$0xff pattern:$0x73625140] }
  0x6f   : > { %3078 = vmatmul.msk.bf16.gmra.mxu0 %vm683_vm1, %v653_v57 }
  0xbc   : > { %v701_v59 = vpop.f32.mrf.mxu0 }
  0xbd   : > { %v3550_v60 = vadd.f32 %v3216_v58, %v701_v59 }
  0xbf   : > { %v3554_v61 = vmul.f32 %v3550_v60, %v3550_v60 }
  0xc1   : > { %887 = vrot.lane.b32.xlu1 %v3554_v61, %s3413_s20  ;;  %v759_v30 = vsel %vm758_vm2, %v3554_v61, 0.0 }
  0xc4   : > { %v703_v62 = vpop.f32.mrf.mxu0 }
  0xc5   : > { %v3558_v63 = vadd.f32 %v3216_v58, %v703_v62 }
  0xc7   : > { %v3562_v0 = vmul.f32 %v3558_v63, %v3558_v63 }
  0xc9   : > { %889 = vrot.lane.b32.xlu1 %v3562_v0, %s3413_s20  ;;  %v762_v37 = vsel %vm758_vm2, %v3562_v0, 0.0 }
  0xcc   : > { %v706_v1 = vpop.f32.mrf.mxu0 }
  0xcd   : > { %v3566_v2 = vadd.f32 %v3216_v58, %v706_v1 }
  0xcf   : > { %v3570_v3 = vmul.f32 %v3566_v2, %v3566_v2 }
  0xd1   : > { %891 = vrot.lane.b32.xlu0 %v3570_v3, %s3413_s20  ;;  %v765_v31 = vsel %vm758_vm2, %v3570_v3, 0.0 }
  0xd4   : > { %v708_v4 = vpop.f32.mrf.mxu0 }
  0xd5   : > { %v3574_v5 = vadd.f32 %v3216_v58, %v708_v4 }
  0xd7   : > { %v3578_v6 = vmul.f32 %v3574_v5, %v3574_v5 }
  0xd9   : > { %893 = vrot.lane.b32.xlu0 %v3578_v6, %s3413_s20  ;;  %v768_v21 = vsel %vm758_vm2, %v3578_v6, 0.0 }
  0xdc   : > { %v711_v7 = vpop.f32.mrf.mxu0 }
  0xdd   : > { %v3582_v8 = vadd.f32 %v3216_v58, %v711_v7 }
  0xdf   : > { %v3586_v9 = vmul.f32 %v3582_v8, %v3582_v8 }
  0xe1   : > { %895 = vrot.lane.b32.xlu2 %v3586_v9, %s3413_s20  ;;  %v771_v24 = vsel %vm758_vm2, %v3586_v9, 0.0 }
  0xe4   : > { %v713_v10 = vpop.f32.mrf.mxu0 }
  0xe5   : > { %v3590_v11 = vadd.f32 %v3216_v58, %v713_v10 }
  0xe7   : > { %v3594_v12 = vmul.f32 %v3590_v11, %v3590_v11 }
  0xe9   : > { %897 = vrot.lane.b32.xlu2 %v3594_v12, %s3413_s20  ;;  %v774_v36 = vsel %vm758_vm2, %v3594_v12, 0.0 }
  0xec   : > { %v716_v13 = vpop.f32.mrf.mxu0 }
  0xed   : > { %v3598_v14 = vadd.f32 %v3216_v58, %v716_v13 }
  0xef   : > { %v3602_v15 = vmul.f32 %v3598_v14, %v3598_v14 }
  0xf1   : > { %899 = vrot.lane.b32.xlu0 %v3602_v15, %s3413_s20  ;;  %v777_v41 = vsel %vm758_vm2, %v3602_v15, 0.0 }
  0xf4   : > { %v718_v16 = vpop.f32.mrf.mxu0 }
  0xf5   : > { %v3606_v17 = vadd.f32 %v3216_v58, %v718_v16 }
  0xf7   : > { %v3610_v18 = vmul.f32 %v3606_v17, %v3606_v17 }
  0xf9   : > { %901 = vrot.lane.b32.xlu1 %v3610_v18, %s3413_s20  ;;  %v780_v42 = vsel %vm758_vm2, %v3610_v18, 0.0 }
 0x133   : > { %v888_v19 = vpop.permute.xlu1 %887 }
 0x134   : > { %v911_v20 = vsel %vm758_vm2, %v888_v19, 0.0 }
 0x135   : > { %912 = vadd.xlane.f32.xlu1 %v911_v20 }
 0x13b   : > { %v890_v25 = vpop.permute.xlu1 %889  ;;  %v896_v29 = vpop.permute.xlu2 %895 }
 0x13c   : > { %v914_v27 = vsel %vm758_vm2, %v890_v25, 0.0  ;;  %v923_v33 = vsel %vm758_vm2, %v896_v29, 0.0 }
 0x13d   : > { %769 = vadd.xlane.f32.xlu1 %v768_v21 }
 0x143   : > { %v892_v22 = vpop.permute.xlu0 %891  ;;  %v898_v32 = vpop.permute.xlu2 %897 }
 0x144   : > { %v917_v23 = vsel %vm758_vm2, %v892_v22, 0.0  ;;  %v926_v34 = vsel %vm758_vm2, %v898_v32, 0.0 }
 0x145   : > { %918 = vadd.xlane.f32.xlu2 %v917_v23  ;;  %772 = vadd.xlane.f32.xlu1 %v771_v24 }
 0x14b   : > { %v894_v26 = vpop.permute.xlu0 %893 }
 0x14c   : > { %v920_v28 = vsel %vm758_vm2, %v894_v26, 0.0 }
 0x14d   : > { %915 = vadd.xlane.f32.xlu2 %v914_v27  ;;  %921 = vadd.xlane.f32.xlu0 %v920_v28 }
 0x155   : > { %760 = vadd.xlane.f32.xlu2 %v759_v30  ;;  %766 = vadd.xlane.f32.xlu0 %v765_v31 }
 0x15d   : > { %924 = vadd.xlane.f32.xlu2 %v923_v33  ;;  %927 = vadd.xlane.f32.xlu0 %v926_v34 }
 0x163   : > { %v900_v35 = vpop.permute.xlu0 %899 }
 0x164   : > { %v929_v38 = vsel %vm758_vm2, %v900_v35, 0.0 }
 0x165   : > { %775 = vadd.xlane.f32.xlu2 %v774_v36  ;;  %763 = vadd.xlane.f32.xlu0 %v762_v37 }
 0x166   : > { %930 = vadd.xlane.f32.xlu1 %v929_v38 }
 0x16b   : > { %v902_v39 = vpop.permute.xlu1 %901 }
 0x16c   : > { %v932_v40 = vsel %vm758_vm2, %v902_v39, 0.0 }
 0x16d   : > { %933 = vadd.xlane.f32.xlu2 %v932_v40 }
 0x16e   : > { %778 = vadd.xlane.f32.xlu1 %v777_v41 }
 0x175   : > { %781 = vadd.xlane.f32.xlu2 %v780_v42 }
 0x1a8   : > { %v913_v43 = vpop.xlane.xlu1 %912 }
 0x1a9   : > { %v935_v44 = vadd.f32 1e-12, %v913_v43 }
 0x1ab   : > { %3225 = vrsqrt.f32 %v935_v44  ;;  %vm949_vm4 = vweird.f32 %v935_v44 }
 0x1b0   : > { %v770_v45 = vpop.xlane.xlu1 %769 }
 0x1b1   : > { %v3638_v47 = vpop.eup %3225  ;;  %v3640_v50 = vadd.f32 1e-12, %v770_v45 }
 0x1b2   : > { %v944_v51 = vmul.f32 %v3638_v47, %v935_v44  ;;  %vm950_vm3 = vweird.f32 %v3638_v47 }
 0x1b3   : > { %vm3668_vm6 = vmor %vm949_vm4, %vm950_vm3  ;;  %vm827_vm0 = vweird.f32 %v3640_v50 }
 0x1b4   : > { %v945_v53 = vmul.f32 %v3638_v47, %v944_v51 }
 0x1b6   : > { %v946_v7 = vmul.f32 0.5, %v945_v53 }
 0x1b8   : > { %v919_v46 = vpop.xlane.xlu2 %918  ;;  %v773_v52 = vpop.xlane.xlu1 %772  ;;  %v947_v19 = vsub.f32 1.5, %v946_v7 }
 0x1b9   : > { %v937_v48 = vadd.f32 1e-12, %v919_v46  ;;  %v3648_v4 = vadd.f32 1e-12, %v773_v52 }
 0x1ba   : > { %v948_v30 = vmul.f32 %v3638_v47, %v947_v19 }
 0x1bb   : > { %3227 = vrsqrt.f32 %v937_v48  ;;  %vm969_vm7 = vweird.f32 %v937_v48 }
 0x1bc   : > { %3229 = vrsqrt.f32 %v3640_v50  ;;  %v952_v43 = vsel %vm3668_vm6, %v3638_v47, %v948_v30  ;;  %vm837_vm6 = vweird.f32 %v3648_v4 }
 0x1c0   : > { %v916_v56 = vpop.xlane.xlu2 %915  ;;  %v922_v57 = vpop.xlane.xlu0 %921 }
 0x1c1   : > { %v3645_v58 = vpop.eup %3227  ;;  %v936_v59 = vadd.f32 1e-12, %v916_v56  ;;  %v938_v62 = vadd.f32 1e-12, %v922_v57 }
 0x1c2   : > { %v964_v1 = vmul.f32 %v3645_v58, %v937_v48  ;;  %v3651_v13 = vpop.eup %3229  ;;  %vm970_vm5 = vweird.f32 %v3645_v58 }
 0x1c3   : > { %3231 = vrsqrt.f32 %v936_v59  ;;  %v822_v20 = vmul.f32 %v3651_v13, %v3640_v50  ;;  %vm3677_vm9 = vmor %vm969_vm7, %vm970_vm5  ;;  %vm959_vm11 = vweird.f32 %v936_v59  ;;  %vm979_vm12 = vweird.f32 %v938_v62 }
 0x1c4   : > { %v965_v10 = vmul.f32 %v3645_v58, %v964_v1  ;;  %3233 = vrsqrt.f32 %v938_v62  ;;  %vm828_vm15 = vweird.f32 %v3651_v13 }
 0x1c5   : > { %3235 = vrsqrt.f32 %v3648_v4  ;;  %v823_v31 = vmul.f32 %v3651_v13, %v822_v20  ;;  %vm3719_vm3 = vmor %vm827_vm0, %vm828_vm15 }
 0x1c6   : > { %v966_v16 = vmul.f32 0.5, %v965_v10 }
 0x1c7   : > { %v824_v39 = vmul.f32 0.5, %v823_v31 }
 0x1c8   : > { %v3656_v21 = vpop.xlane.xlu2 %760  ;;  %v767_v22 = vpop.xlane.xlu0 %766  ;;  %v967_v26 = vsub.f32 1.5, %v966_v16 }
 0x1c9   : > { %v3232_v23 = vpop.eup %3231  ;;  %v3658_v24 = vadd.f32 1e-12, %v767_v22  ;;  %v825_v1 = vsub.f32 1.5, %v824_v39 }
 0x1ca   : > { %v3234_v25 = vpop.eup %3233  ;;  %v954_v27 = vmul.f32 %v3232_v23, %v936_v59  ;;  %v968_v34 = vmul.f32 %v3645_v58, %v967_v26  ;;  %vm960_vm8 = vweird.f32 %v3232_v23  ;;  %v1023_v59 = vmul.f32 %v952_v43, %v3550_v60 }
 0x1cb   : > { %v974_v28 = vmul.f32 %v3234_v25, %v938_v62  ;;  %v3661_v29 = vpop.eup %3235  ;;  %3237 = vrsqrt.f32 %v3658_v24  ;;  %vm980_vm10 = vweird.f32 %v3234_v25  ;;  %vm961_vm13 = vmor %vm959_vm11, %vm960_vm8  ;;  %v826_v30 = vmul.f32 %v3651_v13, %v825_v1 }
 0x1cc   : > { %v955_v32 = vmul.f32 %v3232_v23, %v954_v27  ;;  %v832_v37 = vmul.f32 %v3661_v29, %v3648_v4  ;;  %v972_v53 = vsel %vm3677_vm9, %v3645_v58, %v968_v34  ;;  %vm981_vm14 = vmor %vm979_vm12, %vm980_vm10  ;;  %v1050_v27 = vpack.c.bf16 %v1023_v59, %v1023_v59 }
 0x1cd   : > { %v975_v33 = vmul.f32 %v3234_v25, %v974_v28  ;;  %v1025_v58 = vmul.f32 %v972_v53, %v3566_v2  ;;  %v830_v50 = vsel %vm3719_vm3, %v3651_v13, %v826_v30  ;;  %vm817_vm5 = vweird.f32 %v3658_v24 }
 0x1ce   : > { %v956_v35 = vmul.f32 0.5, %v955_v32  ;;  %v833_v47 = vmul.f32 %v3661_v29, %v832_v37  ;;  %v1073_v44 = vunpack.c.l.b16 %v1050_v27  ;;  %vm838_vm7 = vweird.f32 %v3661_v29 }
 0x1cf   : > { %v976_v38 = vmul.f32 0.5, %v975_v33  ;;  %v1052_v33 = vpack.c.bf16 %v1025_v58, %v1025_v58  ;;  %vm3761_vm12 = vmor %vm837_vm6, %vm838_vm7 }
 0x1d0   : > { %v957_v40 = vsub.f32 1.5, %v956_v35  ;;  %v925_v41 = vpop.xlane.xlu2 %924  ;;  %v928_v42 = vpop.xlane.xlu0 %927  ;;  %v834_v20 = vmul.f32 0.5, %v833_v47 }
 0x1d1   : > { %v977_v45 = vsub.f32 1.5, %v976_v38  ;;  %v3681_v46 = vadd.f32 1e-12, %v925_v41  ;;  %v3683_v48 = vadd.f32 1e-12, %v928_v42  ;;  %v3685_v51 = vpop.eup %3237 }
 0x1d2   : > { %v958_v52 = vmul.f32 %v3232_v23, %v957_v40  ;;  %v812_v57 = vmul.f32 %v3685_v51, %v3658_v24  ;;  %v835_v38 = vsub.f32 1.5, %v834_v20  ;;  %vm818_vm4 = vweird.f32 %v3685_v51 }
 0x1d3   : > { %v978_v56 = vmul.f32 %v3234_v25, %v977_v45  ;;  %3239 = vrsqrt.f32 %v3681_v46  ;;  %vm3735_vm8 = vmor %vm817_vm5, %vm818_vm4  ;;  %v874_v20 = vmul.f32 %v830_v50, %v3574_v5  ;;  %vm989_vm10 = vweird.f32 %v3681_v46 }
 0x1d4   : > { %3241 = vrsqrt.f32 %v3683_v48  ;;  %v813_v62 = vmul.f32 %v3685_v51, %v812_v57  ;;  %v962_v10 = vsel %vm961_vm13, %v3232_v23, %v958_v52  ;;  %v1105_v52 = vunpack.c.l.b16 %v1052_v33 }
 0x1d5   : > { %v982_v7 = vsel %vm981_vm14, %v3234_v25, %v978_v56  ;;  %v1024_v19 = vmul.f32 %v962_v10, %v3558_v63  ;;  %v836_v56 = vmul.f32 %v3661_v29, %v835_v38  ;;  %vm999_vm14 = vweird.f32 %v3683_v48 }
 0x1d6   : > { %v1026_v16 = vmul.f32 %v982_v7, %v3574_v5  ;;  %v814_v22 = vmul.f32 0.5, %v813_v62 }
 0x1d7   : > { %v1051_v37 = vpack.c.bf16 %v1024_v19, %v1024_v19  ;;  %v3748_v19 = vld [vmem:[%s4754_s3] ss:$0 sm:$0xff] }
 0x1d8   : > { %v776_v26 = vpop.xlane.xlu2 %775  ;;  %v815_v31 = vsub.f32 1.5, %v814_v22  ;;  %v1053_v36 = vpack.c.bf16 %v1026_v16, %v1026_v16 }
 0x1d9   : > { %v3702_v28 = vpop.eup %3239  ;;  %v3705_v32 = vadd.f32 1e-12, %v776_v26  ;;  %v931_v25 = vpop.xlane.xlu1 %930  ;;  %v1074_v47 = vunpack.c.l.b16 %v1051_v37 }
 0x1da   : > { %v3707_v23 = vpop.eup %3241  ;;  %v984_v34 = vmul.f32 %v3702_v28, %v3681_v46  ;;  %v3711_v35 = vadd.f32 1e-12, %v931_v25  ;;  %v816_v41 = vmul.f32 %v3685_v51, %v815_v31  ;;  %v1106_v53 = vunpack.c.l.b16 %v1053_v36 }
 0x1db   : > { %v994_v39 = vmul.f32 %v3707_v23, %v3683_v48  ;;  %3243 = vrsqrt.f32 %v3705_v32  ;;  %v1075_v62 = vpack.c.b16 %v1074_v47, %v1073_v44  ;;  %vm990_vm9 = vweird.f32 %v3702_v28 }
 0x1dc   : > { %v985_v42 = vmul.f32 %v3702_v28, %v984_v34  ;;  %3245 = vrsqrt.f32 %v3711_v35  ;;  %v820_v24 = vsel %vm3735_vm8, %v3685_v51, %v816_v41  ;;  %v1107_v59 = vpack.c.b16 %v1106_v53, %v1105_v52  ;;  %vm991_vm13 = vmor %vm989_vm10, %vm990_vm9 }
 0x1dd   : > { %v995_v43 = vmul.f32 %v3707_v23, %v994_v39  ;;  %vm1000_vm11 = vweird.f32 %v3707_v23  ;;  %1076 = vrot.lane.b32.xlu1 %v1075_v62, %s3413_s20  ;;  %v873_v31 = vmul.f32 %v820_v24, %v3566_v2  ;;  %v840_v25 = vsel %vm3761_vm12, %v3661_v29, %v836_v56 }
 0x1de   : > { %v986_v45 = vmul.f32 0.5, %v985_v42  ;;  %1108 = vrot.lane.b32.xlu0 %v1107_v59, %s3413_s20  ;;  %vm1001_vm15 = vmor %vm999_vm14, %vm1000_vm11  ;;  %v1037_v36 = vmul.f32 %v3748_v19, %v874_v20  ;;  %v875_v41 = vmul.f32 %v840_v25, %v3582_v8  ;;  %vm847_vm3 = vweird.f32 %v3705_v32 }
 0x1df   : > { %v996_v13 = vmul.f32 0.5, %v995_v43  ;;  %v1036_v42 = vmul.f32 %v3748_v19, %v873_v31  ;;  %vm1009_vm6 = vweird.f32 %v3711_v35 }
 0x1e0   : > { %v987_v1 = vsub.f32 1.5, %v986_v45  ;;  %v934_v7 = vpop.xlane.xlu2 %933  ;;  %v1045_v45 = vpack.c.bf16 %v1037_v36, %v1037_v36  ;;  %v1038_v56 = vmul.f32 %v3748_v19, %v875_v41 }
 0x1e1   : > { %v3244_v58 = vpop.eup %3243  ;;  %v997_v10 = vsub.f32 1.5, %v996_v13  ;;  %v3743_v16 = vadd.f32 1e-12, %v934_v7  ;;  %v1044_v57 = vpack.c.bf16 %v1036_v42, %v1036_v42 }
 0x1e2   : > { %v3246_v22 = vpop.eup %3245  ;;  %v988_v51 = vmul.f32 %v3702_v28, %v987_v1  ;;  %v842_v26 = vmul.f32 %v3244_v58, %v3705_v32  ;;  %vm848_vm0 = vweird.f32 %v3244_v58  ;;  %v3789_v7 = vunpack.c.l.b16 %v1045_v45 }
 0x1e3   : > { %v998_v30 = vmul.f32 %v3707_v23, %v997_v10  ;;  %v1004_v46 = vmul.f32 %v3246_v22, %v3711_v35  ;;  %3247 = vrsqrt.f32 %v3743_v16  ;;  %vm1010_vm4 = vweird.f32 %v3246_v22  ;;  %vm849_vm5 = vmor %vm847_vm3, %vm848_vm0 }
 0x1e4   : > { %v843_v4 = vmul.f32 %v3244_v58, %v842_v26  ;;  %v992_v34 = vsel %vm991_vm13, %v3702_v28, %v988_v51  ;;  %vm1011_vm7 = vmor %vm1009_vm6, %vm1010_vm4  ;;  %v1046_v51 = vpack.c.bf16 %v1038_v56, %v1038_v56  ;;  %v3792_v26 = vunpack.c.l.b16 %v1044_v57 }
 0x1e5   : > { %v1005_v33 = vmul.f32 %v3246_v22, %v1004_v46  ;;  %v1002_v38 = vsel %vm1001_vm15, %v3707_v23, %v998_v30  ;;  %v1027_v39 = vmul.f32 %v992_v34, %v3582_v8  ;;  %1568 = vrot.lane.b32.xlu1 %v3562_v0, %s3414_s24  ;;  %vm1019_vm9 = vweird.f32 %v3743_v16 }
 0x1e6   : > { %v844_v37 = vmul.f32 0.5, %v843_v4  ;;  %v1028_v29 = vmul.f32 %v1002_v38, %v3590_v11  ;;  %v1102_v30 = vpack.c.b16 %v3789_v7, %v3792_v26 }
 0x1e7   : > { %v1006_v40 = vmul.f32 0.5, %v1005_v33  ;;  %v1054_v50 = vpack.c.bf16 %v1027_v39, %v1027_v39 }
 0x1e8   : > { %v845_v48 = vsub.f32 1.5, %v844_v37  ;;  %v1055_v28 = vpack.c.bf16 %v1028_v29, %v1028_v29 }
 0x1e9   : > { %v3248_v43 = vpop.eup %3247  ;;  %v1007_v44 = vsub.f32 1.5, %v1006_v40  ;;  %v1137_v47 = vunpack.c.l.b16 %v1054_v50  ;;  %v783_v40 = vadd.f32 1e-12, %v3656_v21 }
 0x1ea   : > { %v846_v52 = vmul.f32 %v3244_v58, %v845_v48  ;;  %v1014_v23 = vmul.f32 %v3248_v43, %v3743_v16  ;;  %v1138_v1 = vunpack.c.l.b16 %v1055_v28  ;;  %vm1020_vm8 = vweird.f32 %v3248_v43  ;;  %v782_v48 = vpop.xlane.xlu2 %781 }
 0x1eb   : > { %v1008_v53 = vmul.f32 %v3246_v22, %v1007_v44  ;;  %vm1021_vm10 = vmor %vm1019_vm9, %vm1020_vm8  ;;  %v790_v28 = vadd.f32 1e-12, %v782_v48  ;;  %vm797_vm15 = vweird.f32 %v783_v40 }
 0x1ec   : > { %v850_v13 = vsel %vm849_vm5, %v3244_v58, %v846_v52  ;;  %v1015_v24 = vmul.f32 %v3248_v43, %v1014_v23  ;;  %v1139_v10 = vpack.c.b16 %v1138_v1, %v1137_v47 }
 0x1ed   : > { %v876_v32 = vmul.f32 %v850_v13, %v3590_v11  ;;  %v1012_v62 = vsel %vm1011_vm7, %v3246_v22, %v1008_v53  ;;  %1570 = vrot.lane.b32.xlu1 %v3570_v3, %s3414_s24  ;;  %v3801_v22 = vunpack.c.l.b16 %v1046_v51  ;;  %vm867_vm5 = vweird.f32 %v790_v28 }
 0x1ee   : > { %v1016_v59 = vmul.f32 0.5, %v1015_v24  ;;  %1140 = vrot.lane.b32.xlu2 %v1139_v10, %s3413_s20  ;;  %v1029_v35 = vmul.f32 %v1012_v62, %v3598_v14 }
 0x1ef   : > { %v1039_v20 = vmul.f32 %v3748_v19, %v876_v32 }
 0x1f0   : > { %v1017_v27 = vsub.f32 1.5, %v1016_v59  ;;  %v1056_v33 = vpack.c.bf16 %v1029_v35, %v1029_v35 }
 0x1f1   : > { %v1047_v58 = vpack.c.bf16 %v1039_v20, %v1039_v20 }
 0x1f2   : > { %v1018_v46 = vmul.f32 %v3248_v43, %v1017_v27  ;;  %v1169_v16 = vunpack.c.l.b16 %v1056_v33 }
 0x1f3   : > { %v3803_v31 = vunpack.c.l.b16 %v1047_v58 }
 0x1f4   : > { %v1022_v25 = vsel %vm1021_vm10, %v3248_v43, %v1018_v46  ;;  %v779_v43 = vpop.xlane.xlu1 %778 }
 0x1f5   : > { %v1030_v4 = vmul.f32 %v1022_v25, %v3606_v17  ;;  %v1134_v34 = vpack.c.b16 %v3803_v31, %v3801_v22  ;;  %1576 = vrot.lane.b32.xlu1 %v3594_v12, %s3414_s24  ;;  %v789_v21 = vadd.f32 1e-12, %v779_v43 }
 0x1f6   : > { %1424 = vrot.lane.b32.xlu2 %v3562_v0, %s3415_s26  ;;  %v764_v0 = vpop.xlane.xlu0 %763 }
 0x1f7   : > { %v1057_v36 = vpack.c.bf16 %v1030_v4, %v1030_v4  ;;  %v784_v39 = vadd.f32 1e-12, %v764_v0  ;;  %vm857_vm7 = vweird.f32 %v789_v21 }
 0x1f9   : > { %v1170_v37 = vunpack.c.l.b16 %v1057_v36  ;;  %3249 = vrsqrt.f32 %v784_v39  ;;  %vm807_vm13 = vweird.f32 %v784_v39 }
 0x1fa   : > { %3251 = vrsqrt.f32 %v783_v40 }
 0x1fb   : > { %v1171_v38 = vpack.c.b16 %v1170_v37, %v1169_v16  ;;  %3253 = vrsqrt.f32 %v790_v28 }
 0x1fc   : > { %3255 = vrsqrt.f32 %v789_v21 }
 0x1fd   : > { %1172 = vrot.lane.b32.xlu0 %v1171_v38, %s3413_s20 }
 0x1fe   : > { %1574 = vrot.lane.b32.xlu2 %v3586_v9, %s3414_s24 }
 0x205   : > { %1566 = vrot.lane.b32.xlu0 %v3554_v61, %s3414_s24 }
 0x206   : > { %1428 = vrot.lane.b32.xlu2 %v3578_v6, %s3415_s26 }
 0x20d   : > { %1422 = vrot.lane.b32.xlu0 %v3554_v61, %s3415_s26  ;;  %v3250_v61 = vpop.eup %3249 }
 0x20e   : > { %1430 = vrot.lane.b32.xlu2 %v3586_v9, %s3415_s26  ;;  %v802_v9 = vmul.f32 %v3250_v61, %v784_v39  ;;  %vm808_vm11 = vweird.f32 %v3250_v61 }
 0x20f   : > { %vm809_vm14 = vmor %vm807_vm13, %vm808_vm11 }
 0x215   : > { %1572 = vrot.lane.b32.xlu0 %v3578_v6, %s3414_s24  ;;  %v3252_v6 = vpop.eup %3251 }
 0x216   : > { %1432 = vrot.lane.b32.xlu2 %v3594_v12, %s3415_s26  ;;  %v792_v29 = vmul.f32 %v3252_v6, %v783_v40  ;;  %v803_v12 = vmul.f32 %v3250_v61, %v802_v9  ;;  %vm798_vm12 = vweird.f32 %v3252_v6  ;;  %v3254_v56 = vpop.eup %3253 }
 0x217   : > { %vm799_vm0 = vmor %vm797_vm15, %vm798_vm12  ;;  %v3256_v24 = vpop.eup %3255  ;;  %v862_v1 = vmul.f32 %v3254_v56, %v790_v28  ;;  %vm868_vm3 = vweird.f32 %v3254_v56 }
 0x218   : > { %v793_v41 = vmul.f32 %v3252_v6, %v792_v29  ;;  %v804_v42 = vmul.f32 0.5, %v803_v12  ;;  %v852_v59 = vmul.f32 %v3256_v24, %v789_v21  ;;  %vm858_vm4 = vweird.f32 %v3256_v24  ;;  %vm869_vm6 = vmor %vm867_vm5, %vm868_vm3 }
 0x219   : > { %v863_v10 = vmul.f32 %v3254_v56, %v862_v1  ;;  %vm859_vm8 = vmor %vm857_vm7, %vm858_vm4 }
 0x21a   : > { %v805_v50 = vsub.f32 1.5, %v804_v42  ;;  %v853_v35 = vmul.f32 %v3256_v24, %v852_v59 }
 0x21b   : > { %v864_v4 = vmul.f32 0.5, %v863_v10 }
 0x21c   : > { %v806_v45 = vmul.f32 %v3250_v61, %v805_v50  ;;  %v854_v36 = vmul.f32 0.5, %v853_v35 }
 0x21d   : > { %1426 = vrot.lane.b32.xlu0 %v3570_v3, %s3415_s26  ;;  %v794_v3 = vmul.f32 0.5, %v793_v41  ;;  %v865_v37 = vsub.f32 1.5, %v864_v4 }
 0x21e   : > { %v855_v39 = vsub.f32 1.5, %v854_v36 }
 0x21f   : > { %v795_v44 = vsub.f32 1.5, %v794_v3  ;;  %v866_v31 = vmul.f32 %v3254_v56, %v865_v37 }
 0x221   : > { %v796_v52 = vmul.f32 %v3252_v6, %v795_v44  ;;  %v870_v40 = vsel %vm869_vm6, %v3254_v56, %v866_v31  ;;  %v3890_v31 = vld [vmem:[%s4756_s5] sm:$0xff]  }
 0x223   : > { %v800_v23 = vsel %vm799_vm0, %v3252_v6, %v796_v52  ;;  %v878_v6 = vmul.f32 %v870_v40, %v3606_v17 }
 0x224   : > { %v871_v13 = vmul.f32 %v800_v23, %v3550_v60 }
 0x225   : > { %1578 = vrot.lane.b32.xlu0 %v3602_v15, %s3414_s24  ;;  %v1041_v7 = vmul.f32 %v3748_v19, %v878_v6  ;;  %v3181_v6 = vunpack.c.l.bf16 %v3890_v31 }
 0x226   : > { %v1034_v62 = vmul.f32 %v3748_v19, %v871_v13 }
 0x228   : > { %v1042_v25 = vpack.c.bf16 %v1034_v62, %v1034_v62 }
 0x22a   : > { %v1068_v16 = vunpack.c.l.b16 %v1042_v25 }
 0x22d   : > { %1434 = vrot.lane.b32.xlu0 %v3602_v15, %s3415_s26  ;;  %v810_v15 = vsel %vm809_vm14, %v3250_v61, %v806_v45 }
 0x22e   : > { %v872_v47 = vmul.f32 %v810_v15, %v3558_v63 }
 0x230   : > { %v1035_v32 = vmul.f32 %v3748_v19, %v872_v47 }
 0x232   : > { %v1043_v20 = vpack.c.bf16 %v1035_v32, %v1035_v32 }
 0x234   : > { %v1069_v33 = vunpack.c.l.b16 %v1043_v20 }
 0x236   : > { %v1070_v38 = vpack.c.b16 %v1069_v33, %v1068_v16 }
 0x248   : > { %v1141_v53 = vpop.permute.xlu2 %1140 }
 0x249   : > { %v1146_v57 = vsel %vm758_vm2, %v1141_v53, 0 }
 0x24a   : > { %1155 = vmatpush.bf16.xpose.msra.mxu3 %v1146_v57 }
 0x24f   : > { %v1077_v27 = vpop.permute.xlu1 %1076 }
 0x250   : > { %v1109_v51 = vpop.permute.xlu0 %1108  ;;  %v1082_v58 = vsel %vm758_vm2, %v1077_v27, 0  ;;  %v1425_v50 = vpop.permute.xlu2 %1424 }
 0x251   : > { %3081 = vmatmul.msk.bf16.vlgmr.msra.gmra.mxu3 %vm758_vm2, %v1134_v34  ;;  %v1114_v46 = vsel %vm758_vm2, %v1109_v51, 0  ;;  %1091 = vmatpush.bf16.xpose.msra.mxu1 %v1082_v58  ;;  %v856_v34 = vmul.f32 %v3256_v24, %v855_v39  ;;  %v1449_v23 = vsel %vm758_vm2, %v1425_v50, 0.0 }
 0x252   : > { %1123 = vmatpush.bf16.xpose.msra.mxu2 %v1114_v46  ;;  %v1058_v46 = vpack.c.bf16 %v3550_v60, %v3550_v60 }
 0x253   : > { %v860_v61 = vsel %vm859_vm8, %v3256_v24, %v856_v34 }
 0x254   : > { %v877_v9 = vmul.f32 %v860_v61, %v3598_v14  ;;  %v1305_v4 = vunpack.c.l.b16 %v1058_v46 }
 0x256   : > { %v1040_v26 = vmul.f32 %v3748_v19, %v877_v9 }
 0x257   : > { %v1569_v0 = vpop.permute.xlu1 %1568 }
 0x258   : > { %3079 = vmatmul.msk.bf16.vlgmr.msra.gmra.mxu1 %vm758_vm2, %v1070_v38  ;;  %v1593_v22 = vsel %vm758_vm2, %v1569_v0, 0.0  ;;  %v1048_v41 = vpack.c.bf16 %v1040_v26, %v1040_v26  ;;  %v1575_v21 = vpop.permute.xlu2 %1574  ;;  %v3172_v0 = vld [vmem:[%s4755_s4] sm:$0xff]  }
 0x259   : > { %3080 = vmatmul.msk.bf16.vlgmr.msra.gmra.mxu2 %vm758_vm2, %v1102_v30  ;;  %1594 = vadd.xlane.f32.xlu1 %v1593_v22  ;;  %v1049_v30 = vpack.c.bf16 %v1041_v7, %v1041_v7  ;;  %v1602_v32 = vsel %vm758_vm2, %v1575_v21, 0.0  ;;  %v3892_v34 = vunpack.c.l.bf16 %v3172_v0 }
 0x25a   : > { %v1164_v3 = vunpack.c.l.b16 %v1048_v41 }
 0x25b   : > { %v1165_v42 = vunpack.c.l.b16 %v1049_v30 }
 0x25d   : > { %v1166_v48 = vpack.c.b16 %v1165_v42, %v1164_v3  ;;  %v3907_v42 = vunpack.c.h.bf16 %v3172_v0  ;;  %v3913_v3 = vld [vmem:[%s4756_s5 + $0x8] sm:$0xff]  }
 0x25f   : > { %v1571_v52 = vpop.permute.xlu1 %1570 }
 0x260   : > { %v1429_v47 = vpop.permute.xlu2 %1428  ;;  %v1596_v1 = vsel %vm758_vm2, %v1571_v52, 0.0 }
 0x261   : > { %v1455_v51 = vsel %vm758_vm2, %v1429_v47, 0.0 }
 0x267   : > { %v1577_v56 = vpop.permute.xlu1 %1576 }
 0x268   : > { %v1605_v57 = vsel %vm758_vm2, %v1577_v56, 0.0  ;;  %v1431_v13 = vpop.permute.xlu2 %1430 }
 0x269   : > { %v1458_v24 = vsel %vm758_vm2, %v1431_v13, 0.0 }
 0x26f   : > { %v1173_v29 = vpop.permute.xlu0 %1172 }
 0x270   : > { %v1178_v12 = vsel %vm758_vm2, %v1173_v29, 0  ;;  %v1433_v10 = vpop.permute.xlu2 %1432 }
 0x271   : > { %1187 = vmatpush.bf16.xpose.msrb.mxu1 %v1178_v12  ;;  %v1461_v20 = vsel %vm758_vm2, %v1433_v10, 0.0 }
 0x272   : > { %1580 = vrot.lane.b32.xlu1 %v3610_v18, %s3414_s24 }
 0x277   : > { %v1567_v43 = vpop.permute.xlu0 %1566 }
 0x278   : > { %3082 = vmatmul.msk.bf16.vlgmr.msrb.gmra.mxu1 %vm758_vm2, %v1166_v48  ;;  %v1590_v44 = vsel %vm758_vm2, %v1567_v43, 0.0  ;;  %v4769_v43 = vunpack.c.h.bf16 %v3913_v3 }
 0x279   : > { %1591 = vadd.xlane.f32.xlu2 %v1590_v44 }
 0x27f   : > { %v1423_v28 = vpop.permute.xlu0 %1422 }
 0x280   : > { %v1446_v45 = vsel %vm758_vm2, %v1423_v28, 0.0 }
 0x281   : > { %1447 = vadd.xlane.f32.xlu2 %v1446_v45 }
 0x287   : > { %v1573_v15 = vpop.permute.xlu0 %1572 }
 0x288   : > { %v1599_v53 = vsel %vm758_vm2, %v1573_v15, 0.0  ;;  %v3930_v15 = vld [vmem:[%s4756_s5 + $0x10] sm:$0xff]  }
 0x289   : > { %1450 = vadd.xlane.f32.xlu2 %v1449_v23  ;;  %1600 = vadd.xlane.f32.xlu0 %v1599_v53 }
 0x28f   : > { %v1427_v59 = vpop.permute.xlu0 %1426 }
 0x290   : > { %v1452_v62 = vsel %vm758_vm2, %v1427_v59, 0.0 }
 0x291   : > { %1606 = vadd.xlane.f32.xlu0 %v1605_v57  ;;  %v4768_v57 = vunpack.c.l.bf16 %v3930_v15 }
 0x297   : > { %v1579_v27 = vpop.permute.xlu0 %1578 }
 0x298   : > { %v1608_v35 = vsel %vm758_vm2, %v1579_v27, 0.0  ;;  %v3182_v27 = vunpack.c.h.bf16 %v3890_v31 }
 0x299   : > { %1459 = vadd.xlane.f32.xlu0 %v1458_v24 }
 0x29c   : > { %1597 = vadd.xlane.f32.xlu1 %v1596_v1 }
 0x29f   : > { %v1435_v22 = vpop.permute.xlu0 %1434 }
 0x2a0   : > { %v1464_v61 = vsel %vm758_vm2, %v1435_v22, 0.0 }
 0x2a1   : > { %1436 = vrot.lane.b32.xlu2 %v3610_v18, %s3415_s26  ;;  %v1059_v18 = vpack.c.bf16 %v3558_v63, %v3558_v63 }
 0x2a3   : > { %v1306_v25 = vunpack.c.l.b16 %v1059_v18 }
 0x2a4   : > { %1603 = vadd.xlane.f32.xlu1 %v1602_v32 }
 0x2a5   : > { %v3877_v33 = vpack.c.b16 %v1306_v25, %v1305_v4 }
 0x2ac   : > { %1453 = vadd.xlane.f32.xlu1 %v1452_v62 }
 0x2b4   : > { %1462 = vadd.xlane.f32.xlu1 %v1461_v20 }
 0x2ca   : > { %1456 = vadd.xlane.f32.xlu2 %v1455_v51 }
 0x2cc   : > { %v1595_v58 = vpop.xlane.xlu1 %1594 }
 0x2cd   : > { %v3899_v30 = vadd.f32 1e-12, %v1595_v58  ;;  %v3964_v58 = vld [vmem:[%s4756_s5 + $0x18] sm:$0xff]  }
 0x2ce   : > { %v3193_v0 = vunpack.c.l.bf16 %v3964_v58 }
 0x2cf   : > { %vm1638_vm0 = vweird.f32 %v3899_v30 }
 0x2d2   : > { %1609 = vadd.xlane.f32.xlu2 %v1608_v35 }
 0x2d4   : > { %v1157_v21 = vpop.f32.mrf.mxu3 }
 0x2d5   : > { %v1093_v37 = vpop.f32.mrf.mxu1  ;;  %v1158_v56 = vadd.f32 %v3892_v34, %v1157_v21 }
 0x2d6   : > { %v1094_v40 = vadd.f32 %v3892_v34, %v1093_v37 }
 0x2d7   : > { %v3955_v51 = vadd.f32 %v4768_v57, %v1158_v56 }
 0x2d8   : > { %v3903_v29 = vadd.f32 %v3181_v6, %v1094_v40 }
 0x2d9   : > { %v1214_v37 = vsel %vm758_vm2, %v3955_v51, -inf }
 0x2da   : > { %v1202_v50 = vsel %vm758_vm2, %v3903_v29, -inf }
 0x2dc   : > { %v3885_v39 = vpop.f32.mrf.mxu2 }
 0x2dd   : > { %v1095_v7 = vpop.f32.mrf.mxu1 }
 0x2de   : > { %v1096_v10 = vadd.f32 %v3907_v42, %v1095_v7 }
 0x2e4   : > { %v1581_v36 = vpop.permute.xlu1 %1580  ;;  %v1127_v12 = vpop.f32.mrf.mxu2 }
 0x2e5   : > { %v1611_v16 = vsel %vm758_vm2, %v1581_v36, 0.0  ;;  %v1128_v48 = vadd.f32 %v3907_v42, %v1127_v12 }
 0x2e6   : > { %1612 = vadd.xlane.f32.xlu0 %v1611_v16 }
 0x2e7   : > { %v3925_v52 = vadd.f32 %v4769_v43, %v1128_v48  ;;  %v1126_v48 = vadd.f32 %v3892_v34, %v3885_v39 }
 0x2e9   : > { %v1211_v24 = vsel %vm758_vm2, %v3925_v52, -inf }
 0x2ea   : > { %1308 = vrot.lane.b32.xlu2 %v3877_v33, %s3416_s27 }
 0x2ec   : > { %v1592_v38 = vpop.xlane.xlu2 %1591 }
 0x2ed   : > { %v3897_v26 = vadd.f32 1e-12, %v1592_v38  ;;  %v3974_v38 = vadd.f32 %v3182_v27, %v1096_v10 }
 0x2ee   : > { %1465 = vadd.xlane.f32.xlu0 %v1464_v61 }
 0x2ef   : > { %3257 = vrsqrt.f32 %v3897_v26  ;;  %vm1628_vm12 = vweird.f32 %v3897_v26 }
 0x2f0   : > { %3259 = vrsqrt.f32 %v3899_v30 }
 0x2f4   : > { %v1448_v9 = vpop.xlane.xlu2 %1447 }
 0x2f5   : > { %v3905_v41 = vadd.f32 1e-12, %v1448_v9  ;;  %v1189_v28 = vpop.f32.mrf.mxu1  ;;  %v3932_v23 = vpop.eup %3257  ;;  %v3194_v9 = vunpack.c.h.bf16 %v3964_v58 }
 0x2f6   : > { %1203 = vmax.xlane.f32.xlu0 %v1202_v50  ;;  %v3935_v53 = vpop.eup %3259  ;;  %v1623_v13 = vmul.f32 %v3932_v23, %v3897_v26  ;;  %v1190_v16 = vadd.f32 %v3892_v34, %v1189_v28  ;;  %v1205_v50 = vsel %vm758_vm2, %v3974_v38, -inf  ;;  %v3185_v28 = vunpack.c.l.bf16 %v3913_v3 }
 0x2f7   : > { %3261 = vrsqrt.f32 %v3905_v41  ;;  %v1633_v1 = vmul.f32 %v3935_v53, %v3899_v30  ;;  %vm1629_vm9 = vweird.f32 %v3932_v23  ;;  %vm1639_vm11 = vweird.f32 %v3935_v53 }
 0x2f8   : > { %v1624_v35 = vmul.f32 %v3932_v23, %v1623_v13  ;;  %v3997_v34 = vadd.f32 %v3185_v28, %v1126_v48  ;;  %vm4007_vm13 = vmor %vm1628_vm12, %vm1629_vm9  ;;  %vm1484_vm5 = vweird.f32 %v3905_v41 }
 0x2f9   : > { %v1634_v25 = vmul.f32 %v3935_v53, %v1633_v1  ;;  %vm1640_vm4 = vmor %vm1638_vm0, %vm1639_vm11 }
 0x2fa   : > { %v1625_v22 = vmul.f32 0.5, %v1624_v35 }
 0x2fb   : > { %v1635_v7 = vmul.f32 0.5, %v1634_v25 }
 0x2fc   : > { %v1451_v44 = vpop.xlane.xlu2 %1450  ;;  %v1626_v21 = vsub.f32 1.5, %v1625_v22 }
 0x2fd   : > { %v3921_v45 = vadd.f32 1e-12, %v1451_v44  ;;  %v3937_v47 = vpop.eup %3261  ;;  %v1191_v46 = vpop.f32.mrf.mxu1  ;;  %v3985_v44 = vadd.f32 %v3193_v0, %v1190_v16 }
 0x2fe   : > { %1212 = vmax.xlane.f32.xlu0 %v1211_v24  ;;  %v1479_v32 = vmul.f32 %v3937_v47, %v3905_v41  ;;  %v1192_v61 = vadd.f32 %v3907_v42, %v1191_v46  ;;  %v1636_v24 = vsub.f32 1.5, %v1635_v7  ;;  %vm1485_vm14 = vweird.f32 %v3937_v47 }
 0x2ff   : > { %3263 = vrsqrt.f32 %v3921_v45  ;;  %v1220_v39 = vsel %vm758_vm2, %v3985_v44, -inf  ;;  %vm1494_vm15 = vweird.f32 %v3921_v45  ;;  %vm1486_vm6 = vmor %vm1484_vm5, %vm1485_vm14 }
 0x300   : > { %v1480_v4 = vmul.f32 %v3937_v47, %v1479_v32  ;;  %v3990_v13 = vadd.f32 %v3194_v9, %v1192_v61  ;;  %v1159_v32 = vpop.f32.mrf.mxu3  ;;  %v1637_v35 = vmul.f32 %v3935_v53, %v1636_v24 }
 0x301   : > { %v1160_v26 = vadd.f32 %v3907_v42, %v1159_v32 }
 0x302   : > { %v1481_v12 = vmul.f32 0.5, %v1480_v4  ;;  %v1208_v4 = vsel %vm758_vm2, %v3997_v34, -inf }
 0x304   : > { %v1437_v59 = vpop.permute.xlu2 %1436  ;;  %v1482_v1 = vsub.f32 1.5, %v1481_v12 }
 0x305   : > { %v3949_v62 = vpop.eup %3263  ;;  %v1467_v20 = vsel %vm758_vm2, %v1437_v59, 0.0  ;;  %v1627_v59 = vmul.f32 %v3932_v23, %v1626_v21 }
 0x306   : > { %v1489_v18 = vmul.f32 %v3949_v62, %v3921_v45  ;;  %1468 = vadd.xlane.f32.xlu1 %v1467_v20  ;;  %1215 = vmax.xlane.f32.xlu0 %v1214_v37  ;;  %vm1495_vm10 = vweird.f32 %v3949_v62  ;;  %v1223_v20 = vsel %vm758_vm2, %v3990_v13, -inf  ;;  %v1483_v46 = vmul.f32 %v3937_v47, %v1482_v1 }
 0x307   : > { %vm1496_vm3 = vmor %vm1494_vm15, %vm1495_vm10  ;;  %v1631_v30 = vsel %vm4007_vm13, %v3932_v23, %v1627_v59  ;;  %v1641_v45 = vsel %vm1640_vm4, %v3935_v53, %v1637_v35  ;;  %v1063_v59 = vpack.c.bf16 %v3590_v11, %v3590_v11  ;;  %v1061_v35 = vpack.c.bf16 %v3574_v5, %v3574_v5 }
 0x308   : > { %v1490_v36 = vmul.f32 %v3949_v62, %v1489_v18  ;;  %v1487_v42 = vsel %vm1486_vm6, %v3937_v47, %v1483_v46  ;;  %v1702_v22 = vmul.f32 %v1631_v30, %v3550_v60  ;;  %v1060_v46 = vpack.c.bf16 %v3566_v2, %v3566_v2 }
 0x30a   : > { %v1491_v40 = vmul.f32 0.5, %v1490_v36  ;;  %v3190_v36 = vunpack.c.h.bf16 %v3930_v15  ;;  %v1726_v47 = vpack.c.bf16 %v1702_v22, %v1702_v22 }
 0x30c   : > { %v1492_v56 = vsub.f32 1.5, %v1491_v40  ;;  %v4032_v37 = vadd.f32 %v3190_v36, %v1160_v26  ;;  %v1558_v40 = vmul.f32 %v1487_v42, %v3550_v60  ;;  %v1743_v48 = vunpack.c.l.b16 %v1726_v47 }
 0x30d   : > { %v1335_v42 = vunpack.c.l.b16 %v1060_v46 }
 0x30e   : > { %1206 = vmax.xlane.f32.xlu1 %v1205_v50  ;;  %v1493_v10 = vmul.f32 %v3949_v62, %v1492_v56  ;;  %1224 = vmax.xlane.f32.xlu0 %v1223_v20  ;;  %v1217_v23 = vsel %vm758_vm2, %v4032_v37, -inf  ;;  %v1710_v12 = vmul.f32 %v3748_v19, %v1558_v40  ;;  %v1366_v20 = vunpack.c.l.b16 %v1063_v59 }
 0x30f   : > { %v4014_v25 = vpop.xlane.xlu1 %1597 }
 0x310   : > { %v1497_v16 = vsel %vm1496_vm3, %v3949_v62, %v1493_v10  ;;  %v1703_v62 = vmul.f32 %v1641_v45, %v3558_v63  ;;  %v1718_v56 = vpack.c.bf16 %v1710_v12, %v1710_v12  ;;  %v1062_v10 = vpack.c.bf16 %v3582_v8, %v3582_v8 }
 0x311   : > { %v1559_v41 = vmul.f32 %v1497_v16, %v3558_v63  ;;  %v1065_v16 = vpack.c.bf16 %v3606_v17, %v3606_v17  ;;  %v1064_v45 = vpack.c.bf16 %v3598_v14, %v3598_v14 }
 0x312   : > { %v1727_v7 = vpack.c.bf16 %v1703_v62, %v1703_v62  ;;  %v1736_v60 = vunpack.c.l.b16 %v1718_v56  ;;  %v1365_v18 = vunpack.c.l.b16 %v1062_v10 }
 0x313   : > { %1221 = vmax.xlane.f32.xlu2 %v1220_v39  ;;  %v1711_v53 = vmul.f32 %v3748_v19, %v1559_v41  ;;  %v1396_v62 = vunpack.c.l.b16 %v1065_v16  ;;  %v1395_v40 = vunpack.c.l.b16 %v1064_v45 }
 0x314   : > { %v1744_v21 = vunpack.c.l.b16 %v1727_v7  ;;  %v4054_v26 = vpack.c.b16 %v1366_v20, %v1365_v18 }
 0x315   : > { %v1719_v50 = vpack.c.bf16 %v1711_v53, %v1711_v53  ;;  %v4066_v47 = vpack.c.b16 %v1396_v62, %v1395_v40 }
 0x316   : > { %1209 = vmax.xlane.f32.xlu1 %v1208_v4  ;;  %v1745_v63 = vpack.c.b16 %v1744_v21, %v1743_v48  ;;  %v1336_v4 = vunpack.c.l.b16 %v1061_v35 }
 0x317   : > { %v4038_v61 = vpop.xlane.xlu1 %1603  ;;  %v1737_v1 = vunpack.c.l.b16 %v1719_v50  ;;  %v1601_v50 = vpop.xlane.xlu0 %1600 }
 0x318   : > { %v4062_v41 = vpack.c.b16 %v1336_v4, %v1335_v42 }
 0x319   : > { %v1738_v32 = vpack.c.b16 %v1737_v1, %v1736_v60 }
 0x31e   : > { %1218 = vmax.xlane.f32.xlu1 %v1217_v23 }
 0x31f   : > { %v1454_v24 = vpop.xlane.xlu1 %1453  ;;  %v4072_v59 = vpop.xlane.xlu0 %1606 }
 0x320   : > { %v1472_v39 = vadd.f32 1e-12, %v1454_v24 }
 0x322   : > { %1746 = vrot.lane.b32.xlu0 %v1745_v63, %s3414_s24  ;;  %3265 = vrsqrt.f32 %v1472_v39  ;;  %vm1504_vm8 = vweird.f32 %v1472_v39 }
 0x327   : > { %v4078_v42 = vpop.xlane.xlu0 %1459 }
 0x328   : > { %v3266_v30 = vpop.eup %3265 }
 0x329   : > { %v1499_v22 = vmul.f32 %v3266_v30, %v1472_v39  ;;  %vm1505_vm7 = vweird.f32 %v3266_v30 }
 0x32a   : > { %vm1506_vm9 = vmor %vm1504_vm8, %vm1505_vm7 }
 0x32b   : > { %1739 = vrot.lane.b32.xlu2 %v1738_v32, %s3415_s26  ;;  %v1500_v23 = vmul.f32 %v3266_v30, %v1499_v22 }
 0x32d   : > { %v1501_v53 = vmul.f32 0.5, %v1500_v23 }
 0x32f   : > { %v1502_v48 = vsub.f32 1.5, %v1501_v53 }
 0x331   : > { %v1503_v21 = vmul.f32 %v3266_v30, %v1502_v48  ;;  %v4089_v48 = vadd.f32 1e-12, %v1601_v50 }
 0x333   : > { %1368 = vrot.lane.b32.xlu2 %v4054_v26, %s3416_s27  ;;  %v1507_v1 = vsel %vm1506_vm9, %v3266_v30, %v1503_v21  ;;  %vm1658_vm7 = vweird.f32 %v4089_v48 }
 0x334   : > { %v1560_v10 = vmul.f32 %v1507_v1, %v3566_v2 }
 0x336   : > { %v1712_v46 = vmul.f32 %v3748_v19, %v1560_v10 }
 0x337   : > { %1338 = vrot.lane.b32.xlu1 %v4062_v41, %s3416_s27 }
 0x338   : > { %v1720_v30 = vpack.c.bf16 %v1712_v46, %v1712_v46 }
 0x33a   : > { %v4080_v22 = vunpack.c.l.b16 %v1720_v30 }
 0x33b   : > { %1398 = vrot.lane.b32.xlu2 %v4066_v47, %s3416_s27 }
 0x33d   : > { %v1457_v7 = vpop.xlane.xlu2 %1456 }
 0x33e   : > { %v1473_v12 = vadd.f32 1e-12, %v1457_v7 }
 0x340   : > { %3267 = vrsqrt.f32 %v1473_v12  ;;  %vm1514_vm11 = vweird.f32 %v1473_v12 }
 0x345   : > { %v4070_v56 = vpop.xlane.xlu2 %1609 }
 0x346   : > { %v3268_v24 = vpop.eup %3267 }
 0x347   : > { %v1509_v63 = vmul.f32 %v3268_v24, %v1473_v12  ;;  %vm1515_vm10 = vweird.f32 %v3268_v24  ;;  %v1616_v12 = vadd.f32 1e-12, %v4014_v25 }
 0x348   : > { %vm1516_vm12 = vmor %vm1514_vm11, %vm1515_vm10 }
 0x349   : > { %v1510_v60 = vmul.f32 %v3268_v24, %v1509_v63  ;;  %vm1648_vm4 = vweird.f32 %v1616_v12 }
 0x34b   : > { %v1511_v32 = vmul.f32 0.5, %v1510_v60  ;;  %v4093_v60 = vpop.xlane.xlu1 %1462 }
 0x34d   : > { %v1512_v20 = vsub.f32 1.5, %v1511_v32  ;;  %v1309_v35 = vpop.permute.xlu2 %1308 }
 0x34e   : > { %1321 = vmatpush.bf16.msrb.mxu2 %v1309_v35 }
 0x34f   : > { %v1513_v18 = vmul.f32 %v3268_v24, %v1512_v20 }
 0x351   : > { %v1517_v4 = vsel %vm1516_vm12, %v3268_v24, %v1513_v18 }
 0x352   : > { %v1561_v39 = vmul.f32 %v1517_v4, %v3574_v5 }
 0x354   : > { %v1713_v16 = vmul.f32 %v3748_v19, %v1561_v39 }
 0x356   : > { %v1721_v45 = vpack.c.bf16 %v1713_v16, %v1713_v16 }
 0x358   : > { %v4082_v62 = vunpack.c.l.b16 %v1721_v45 }
 0x359   : > { %v4086_v23 = vpop.xlane.xlu0 %1612 }
 0x35a   : > { %v1772_v40 = vpack.c.b16 %v4082_v62, %v4080_v22 }
 0x361   : > { %v1466_v53 = vpop.xlane.xlu0 %1465 }
 0x362   : > { %v1476_v7 = vadd.f32 1e-12, %v1466_v53 }
 0x364   : > { %3269 = vrsqrt.f32 %v1476_v7  ;;  %vm1544_vm14 = vweird.f32 %v1476_v7 }
 0x365   : > { %3271 = vrsqrt.f32 %v1616_v12 }
 0x366   : > { %3273 = vrsqrt.f32 %v4089_v48 }
 0x369   : > { %v1204_v21 = vpop.xlane.xlu0 %1203 }
 0x36a   : > { %v3270_v24 = vpop.eup %3269  ;;  %v1226_v63 = vsub.f32 %v3903_v29, %v1204_v21 }
 0x36b   : > { %v1539_v1 = vmul.f32 %v3270_v24, %v1476_v7  ;;  %v4095_v10 = vpop.eup %3271  ;;  %vm1545_vm13 = vweird.f32 %v3270_v24 }
 0x36c   : > { %v1234_v32 = vmul.f32 1.442695, %v1226_v63  ;;  %v4097_v35 = vpop.eup %3273  ;;  %v1643_v25 = vmul.f32 %v4095_v10, %v1616_v12  ;;  %vm1546_vm15 = vmor %vm1544_vm14, %vm1545_vm13  ;;  %vm1649_vm0 = vweird.f32 %v4095_v10 }
 0x36d   : > { %v1540_v20 = vmul.f32 %v3270_v24, %v1539_v1  ;;  %v1653_v46 = vmul.f32 %v4097_v35, %v4089_v48  ;;  %vm1659_vm3 = vweird.f32 %v4097_v35  ;;  %vm4130_vm5 = vmor %vm1648_vm4, %vm1649_vm0 }
 0x36e   : > { %3275 = vpow2.f32 %v1234_v32  ;;  %v1644_v30 = vmul.f32 %v4095_v10, %v1643_v25  ;;  %vm4144_vm8 = vmor %vm1658_vm7, %vm1659_vm3 }
 0x36f   : > { %v1541_v4 = vmul.f32 0.5, %v1540_v20  ;;  %v1654_v21 = vmul.f32 %v4097_v35, %v1653_v46 }
 0x371   : > { %v1213_v50 = vpop.xlane.xlu0 %1212  ;;  %v1542_v63 = vsub.f32 1.5, %v1541_v4  ;;  %v1655_v1 = vmul.f32 0.5, %v1654_v21 }
 0x372   : > { %v1229_v18 = vsub.f32 %v3925_v52, %v1213_v50  ;;  %v1645_v52 = vmul.f32 0.5, %v1644_v30 }
 0x373   : > { %v1543_v32 = vmul.f32 %v3270_v24, %v1542_v63  ;;  %v1656_v46 = vsub.f32 1.5, %v1655_v1  ;;  %v4118_v63 = vadd.f32 1e-12, %v4072_v59 }
 0x374   : > { %v4103_v29 = vpop.eup %3275  ;;  %v1240_v39 = vmul.f32 1.442695, %v1229_v18  ;;  %v1646_v57 = vsub.f32 1.5, %v1645_v52 }
 0x375   : > { %v1250_v45 = vsel %vm758_vm2, %v4103_v29, 0.0  ;;  %v1547_v4 = vsel %vm1546_vm15, %v3270_v24, %v1543_v32  ;;  %v1657_v24 = vmul.f32 %v4097_v35, %v1656_v46  ;;  %vm1678_vm0 = vweird.f32 %v4118_v63 }
 0x376   : > { %3277 = vpow2.f32 %v1240_v39  ;;  %1251 = vadd.xlane.f32.xlu2 %v1250_v45  ;;  %v4115_v45 = vadd.f32 1e-12, %v4038_v61  ;;  %v1647_v7 = vmul.f32 %v4095_v10, %v1646_v57  ;;  %v1564_v1 = vmul.f32 %v1547_v4, %v3598_v14 }
 0x377   : > { %v4128_v61 = vadd.f32 1e-12, %v4086_v23  ;;  %v4136_v57 = vadd.f32 1e-12, %v4070_v56 }
 0x378   : > { %v1651_v23 = vsel %vm4130_vm5, %v4095_v10, %v1647_v7  ;;  %v1716_v56 = vmul.f32 %v3748_v19, %v1564_v1  ;;  %v1661_v10 = vsel %vm4144_vm8, %v4097_v35, %v1657_v24  ;;  %vm1668_vm13 = vweird.f32 %v4115_v45 }
 0x379   : > { %v1469_v16 = vpop.xlane.xlu1 %1468  ;;  %v1704_v19 = vmul.f32 %v1651_v23, %v3566_v2  ;;  %v1705_v7 = vmul.f32 %v1661_v10, %v3574_v5  ;;  %vm1698_vm5 = vweird.f32 %v4128_v61  ;;  %vm1688_vm7 = vweird.f32 %v4136_v57 }
 0x37a   : > { %v1477_v53 = vadd.f32 1e-12, %v1469_v16 }
 0x37b   : > { %v1728_v59 = vpack.c.bf16 %v1704_v19, %v1704_v19 }
 0x37c   : > { %3279 = vrsqrt.f32 %v1477_v53  ;;  %v4109_v20 = vpop.eup %3277  ;;  %vm1554_vm9 = vweird.f32 %v1477_v53 }
 0x37d   : > { %v1259_v25 = vsel %vm758_vm2, %v4109_v20, 0.0 }
 0x37e   : > { %1260 = vadd.xlane.f32.xlu2 %v1259_v25 }
 0x381   : > { %v1207_v50 = vpop.xlane.xlu1 %1206 }
 0x382   : > { %v3280_v18 = vpop.eup %3279  ;;  %v1227_v39 = vsub.f32 %v3974_v38, %v1207_v50  ;;  %v4122_v38 = vpop.xlane.xlu0 %1215 }
 0x383   : > { %v1549_v16 = vmul.f32 %v3280_v18, %v1477_v53  ;;  %vm1555_vm6 = vweird.f32 %v3280_v18 }
 0x384   : > { %v1236_v30 = vmul.f32 1.442695, %v1227_v39  ;;  %vm1556_vm10 = vmor %vm1554_vm9, %vm1555_vm6 }
 0x385   : > { %v1550_v21 = vmul.f32 %v3280_v18, %v1549_v16 }
 0x386   : > { %3281 = vpow2.f32 %v1236_v30  ;;  %v1222_v52 = vpop.xlane.xlu2 %1221 }
 0x387   : > { %v1551_v50 = vmul.f32 0.5, %v1550_v21  ;;  %3283 = vrsqrt.f32 %v4115_v45  ;;  %v1232_v48 = vsub.f32 %v3985_v44, %v1222_v52  ;;  %v1724_v52 = vpack.c.bf16 %v1716_v56, %v1716_v56 }
 0x388   : > { %3285 = vrsqrt.f32 %v4118_v63 }
 0x389   : > { %v1552_v32 = vsub.f32 1.5, %v1551_v50  ;;  %v1210_v25 = vpop.xlane.xlu1 %1209  ;;  %3287 = vrsqrt.f32 %v4128_v61  ;;  %v1246_v50 = vmul.f32 1.442695, %v1232_v48  ;;  %v4183_v56 = vunpack.c.l.b16 %v1724_v52 }
 0x38a   : > { %v1228_v12 = vsub.f32 %v3997_v34, %v1210_v25  ;;  %3289 = vrsqrt.f32 %v4136_v57  ;;  %v1225_v1 = vpop.xlane.xlu0 %1224 }
 0x38b   : > { %v1553_v16 = vmul.f32 %v3280_v18, %v1552_v32 }
 0x38c   : > { %v4149_v46 = vpop.eup %3281  ;;  %v1238_v34 = vmul.f32 1.442695, %v1228_v12 }
 0x38d   : > { %v1557_v4 = vsel %vm1556_vm10, %v3280_v18, %v1553_v16  ;;  %v1253_v53 = vsel %vm758_vm2, %v4149_v46, 0.0  ;;  %v4163_v44 = vpop.eup %3283  ;;  %v4171_v18 = vld [vmem:[%s4754_s3] ss:$0 sm:$0xff]  ;;  %v1729_v16 = vpack.c.bf16 %v1705_v7, %v1705_v7 }
 0x38e   : > { %3291 = vpow2.f32 %v1238_v34  ;;  %v4160_v30 = vpop.permute.xlu2 %1739  ;;  %1254 = vadd.xlane.f32.xlu0 %v1253_v53  ;;  %v1565_v21 = vmul.f32 %v1557_v4, %v3606_v17  ;;  %v4166_v35 = vpop.eup %3285  ;;  %v1663_v25 = vmul.f32 %v4163_v44, %v4115_v45  ;;  %v1233_v34 = vsub.f32 %v3990_v13, %v1225_v1 }
 0x38f   : > { %v4174_v32 = vpop.eup %3287  ;;  %v1673_v39 = vmul.f32 %v4166_v35, %v4118_v63  ;;  %3293 = vpow2.f32 %v1246_v50  ;;  %v1777_v53 = vunpack.c.l.b16 %v1728_v59  ;;  %v1778_v50 = vunpack.c.l.b16 %v1729_v16 }
 0x390   : > { %v1717_v2 = vmul.f32 %v4171_v18, %v1565_v21  ;;  %v4179_v23 = vpop.eup %3289  ;;  %v1664_v21 = vmul.f32 %v4163_v44, %v1663_v25  ;;  %v1248_v1 = vmul.f32 1.442695, %v1233_v34  ;;  %vm1669_vm11 = vweird.f32 %v4163_v44 }
 0x391   : > { %v1219_v24 = vpop.xlane.xlu1 %1218  ;;  %v1683_v13 = vmul.f32 %v4179_v23, %v4136_v57  ;;  %v1779_v59 = vpack.c.b16 %v1778_v50, %v1777_v53  ;;  %vm1679_vm12 = vweird.f32 %v4166_v35  ;;  %vm4218_vm14 = vmor %vm1668_vm13, %vm1669_vm11  ;;  %vm1699_vm15 = vweird.f32 %v4174_v32 }
 0x392   : > { %v1231_v5 = vsub.f32 %v4032_v37, %v1219_v24  ;;  %v1725_v12 = vpack.c.bf16 %v1717_v2, %v1717_v2  ;;  %v1693_v37 = vmul.f32 %v4174_v32, %v4128_v61  ;;  %v1674_v2 = vmul.f32 %v4166_v35, %v1673_v39  ;;  %vm1680_vm3 = vmor %vm1678_vm0, %vm1679_vm12 }
 0x393   : > { %v1665_v25 = vmul.f32 0.5, %v1664_v21  ;;  %vm1689_vm4 = vweird.f32 %v4179_v23  ;;  %vm1700_vm6 = vmor %vm1698_vm5, %vm1699_vm15 }
 0x394   : > { %v4185_v48 = vpop.eup %3291  ;;  %v1244_v10 = vmul.f32 1.442695, %v1231_v5  ;;  %v4188_v4 = vunpack.c.l.b16 %v1725_v12  ;;  %v1694_v24 = vmul.f32 %v4174_v32, %v1693_v37  ;;  %v1684_v12 = vmul.f32 %v4179_v23, %v1683_v13  ;;  %vm1690_vm8 = vmor %vm1688_vm7, %vm1689_vm4 }
 0x395   : > { %v1256_v19 = vsel %vm758_vm2, %v4185_v48, 0.0  ;;  %v4201_v5 = vpop.eup %3293  ;;  %v1666_v34 = vsub.f32 1.5, %v1665_v25 }
 0x396   : > { %3295 = vpow2.f32 %v1244_v10  ;;  %v1369_v7 = vpop.permute.xlu2 %1368  ;;  %1257 = vadd.xlane.f32.xlu1 %v1256_v19  ;;  %v1840_v52 = vpack.c.b16 %v4188_v4, %v4183_v56  ;;  %1780 = vrot.lane.b32.xlu2 %v1779_v59, %s3414_s24  ;;  %v1675_v19 = vmul.f32 0.5, %v1674_v2  ;;  %v1695_v43 = vmul.f32 0.5, %v1694_v24 }
 0x397   : > { %1381 = vmatpush.bf16.msra.mxu1 %v1369_v7  ;;  %3297 = vpow2.f32 %v1248_v1  ;;  %v1268_v16 = vsel %vm758_vm2, %v4201_v5, 0.0  ;;  %v1685_v53 = vmul.f32 0.5, %v1684_v12  ;;  %v1667_v50 = vmul.f32 %v4163_v44, %v1666_v34  ;;  %v1747_v12 = vpop.permute.xlu0 %1746 }
 0x398   : > { %v1676_v21 = vsub.f32 1.5, %v1675_v19  ;;  %v1696_v7 = vsub.f32 1.5, %v1695_v43 }
 0x399   : > { %v1686_v2 = vsub.f32 1.5, %v1685_v53  ;;  %v1671_v25 = vsel %vm4218_vm14, %v4163_v44, %v1667_v50  ;;  %v1752_v44 = vsel %vm758_vm2, %v1747_v12, 0 }
 0x39a   : > { %v1677_v1 = vmul.f32 %v4166_v35, %v1676_v21  ;;  %v1697_v59 = vmul.f32 %v4174_v32, %v1696_v7  ;;  %v1706_v63 = vmul.f32 %v1671_v25, %v3582_v8  ;;  %v1474_v7 = vadd.f32 1e-12, %v4078_v42 }
 0x39b   : > { %v1687_v45 = vmul.f32 %v4179_v23, %v1686_v2  ;;  %v1230_v2 = vsub.f32 %v3955_v51, %v4122_v38 }
 0x39c   : > { %v4205_v10 = vpop.eup %3295  ;;  %v1681_v19 = vsel %vm1680_vm3, %v4166_v35, %v1677_v1  ;;  %v1730_v53 = vpack.c.bf16 %v1706_v63, %v1706_v63  ;;  %v1475_v35 = vadd.f32 1e-12, %v4093_v60  ;;  %vm1524_vm13 = vweird.f32 %v1474_v7 }
 0x39d   : > { %v1265_v39 = vsel %vm758_vm2, %v4205_v10, 0.0  ;;  %v4211_v13 = vpop.eup %3297  ;;  %v1707_v34 = vmul.f32 %v1681_v19, %v3590_v11  ;;  %v1691_v61 = vsel %vm1690_vm8, %v4179_v23, %v1687_v45 }
 0x39e   : > { %v1399_v37 = vpop.permute.xlu2 %1398  ;;  %1269 = vadd.xlane.f32.xlu1 %v1268_v16  ;;  %1266 = vadd.xlane.f32.xlu0 %v1265_v39  ;;  %v1271_v43 = vsel %vm758_vm2, %v4211_v13, 0.0  ;;  %v1701_v39 = vsel %vm1700_vm6, %v4174_v32, %v1697_v59  ;;  %v1708_v57 = vmul.f32 %v1691_v61, %v3598_v14  ;;  %v1811_v50 = vunpack.c.l.b16 %v1730_v53 }
 0x39f   : > { %1411 = vmatpush.bf16.msra.mxu2 %v1399_v37  ;;  %v1709_v37 = vmul.f32 %v1701_v39, %v3606_v17  ;;  %v1731_v21 = vpack.c.bf16 %v1707_v34, %v1707_v34  ;;  %3299 = vrsqrt.f32 %v1475_v35  ;;  %v1242_v17 = vmul.f32 1.442695, %v1230_v2 }
 0x3a0   : > { %v1732_v1 = vpack.c.bf16 %v1708_v57, %v1708_v57  ;;  %3301 = vrsqrt.f32 %v1474_v7  ;;  %vm1534_vm11 = vweird.f32 %v1475_v35 }
 0x3a1   : > { %v1733_v32 = vpack.c.bf16 %v1709_v37, %v1709_v37  ;;  %v1812_v24 = vunpack.c.l.b16 %v1731_v21  ;;  %3303 = vpow2.f32 %v1242_v17 }
 0x3a3   : > { %v1846_v23 = vunpack.c.l.b16 %v1733_v32  ;;  %v1813_v59 = vpack.c.b16 %v1812_v24, %v1811_v50 }
 0x3a5   : > { %v3300_v60 = vpop.eup %3299 }
 0x3a6   : > { %1272 = vadd.xlane.f32.xlu0 %v1271_v43  ;;  %v1845_v43 = vunpack.c.l.b16 %v1732_v1  ;;  %v3302_v25 = vpop.eup %3301  ;;  %v1529_v42 = vmul.f32 %v3300_v60, %v1475_v35  ;;  %vm1535_vm9 = vweird.f32 %v3300_v60 }
 0x3a7   : > { %v1519_v45 = vmul.f32 %v3302_v25, %v1474_v7  ;;  %v4248_v19 = vpop.eup %3303  ;;  %vm1525_vm10 = vweird.f32 %v3302_v25  ;;  %vm1536_vm12 = vmor %vm1534_vm11, %vm1535_vm9 }
 0x3a8   : > { %v1847_v14 = vpack.c.b16 %v1846_v23, %v1845_v43  ;;  %v1530_v12 = vmul.f32 %v3300_v60, %v1529_v42  ;;  %vm1526_vm14 = vmor %vm1524_vm13, %vm1525_vm10 }
 0x3a9   : > { %v1339_v16 = vpop.permute.xlu1 %1338  ;;  %v1520_v51 = vmul.f32 %v3302_v25, %v1519_v45 }
 0x3aa   : > { %1351 = vmatpush.bf16.msrb.mxu3 %v1339_v16  ;;  %v1531_v38 = vmul.f32 0.5, %v1530_v12  ;;  %v1262_v16 = vsel %vm758_vm2, %v4248_v19, 0.0 }
 0x3ab   : > { %v1521_v63 = vmul.f32 0.5, %v1520_v51 }
 0x3ac   : > { %v1532_v39 = vsub.f32 1.5, %v1531_v38 }
 0x3ae   : > { %1761 = vmatpush.bf16.xpose.msra.mxu3 %v1752_v44  ;;  %v1522_v44 = vsub.f32 1.5, %v1521_v63  ;;  %v1533_v34 = vmul.f32 %v3300_v60, %v1532_v39 }
 0x3b0   : > { %v1523_v61 = vmul.f32 %v3302_v25, %v1522_v44  ;;  %v1537_v37 = vsel %vm1536_vm12, %v3300_v60, %v1533_v34 }
 0x3b1   : > { %v1563_v57 = vmul.f32 %v1537_v37, %v3590_v11 }
 0x3b2   : > { %v1527_v53 = vsel %vm1526_vm14, %v3302_v25, %v1523_v61 }
 0x3b3   : > { %v1562_v21 = vmul.f32 %v1527_v53, %v3582_v8  ;;  %v1715_v32 = vmul.f32 %v4171_v18, %v1563_v57 }
 0x3b5   : > { %v1714_v50 = vmul.f32 %v4171_v18, %v1562_v21  ;;  %v1723_v2 = vpack.c.bf16 %v1715_v32, %v1715_v32 }
 0x3b7   : > { %1814 = vrot.lane.b32.xlu1 %v1813_v59, %s3414_s24  ;;  %v1722_v35 = vpack.c.bf16 %v1714_v50, %v1714_v50  ;;  %v1805_v1 = vunpack.c.l.b16 %v1723_v2 }
 0x3b9   : > { %v1804_v7 = vunpack.c.l.b16 %v1722_v35 }
 0x3ba   : > { %1848 = vrot.lane.b32.xlu0 %v1847_v14, %s3414_s24 }
 0x3bb   : > { %v1806_v24 = vpack.c.b16 %v1805_v1, %v1804_v7 }
 0x3bf   : > { %1263 = vadd.xlane.f32.xlu2 %v1262_v16 }
 0x3d7   : > { %1773 = vrot.lane.b32.xlu2 %v1772_v40, %s3415_s26 }
 0x3df   : > { %1807 = vrot.lane.b32.xlu2 %v1806_v24, %s3415_s26 }
 0x3e7   : > { %1841 = vrot.lane.b32.xlu2 %v1840_v52, %s3415_s26 }
 0x3e9   : > { %v1252_v8 = vpop.xlane.xlu2 %1251 }
 0x3ea   : > { %3305 = vrcp.f32 %v1252_v8 }
 0x3f0   : > { %v3306_v62 = vpop.eup %3305 }
 0x3f1   : > { %v1261_v11 = vpop.xlane.xlu2 %1260  ;;  %v1282_v40 = vmul.f32 %v3306_v62, %v4103_v29 }
 0x3f3   : > { %v1290_v17 = vpack.c.bf16 %v1282_v40, %v1282_v40 }
 0x3f5   : > { %v1300_v52 = vunpack.c.l.b16 %v1290_v17 }
 0x3f9   : > { %v1781_v18 = vpop.permute.xlu2 %1780 }
 0x3fa   : > { %v1786_v23 = vsel %vm758_vm2, %v1781_v18, 0 }
 0x3fb   : > { %1795 = vmatpush.bf16.xpose.msrb.mxu1 %v1786_v23 }
 0x401   : > { %v1255_v22 = vpop.xlane.xlu0 %1254 }
 0x402   : > { %3307 = vrcp.f32 %v1255_v22 }
 0x403   : > { %3309 = vrcp.f32 %v1261_v11 }
 0x408   : > { %v3308_v59 = vpop.eup %3307 }
 0x409   : > { %v1283_v43 = vmul.f32 %v3308_v59, %v4149_v46  ;;  %v1258_v60 = vpop.xlane.xlu1 %1257  ;;  %v3310_v56 = vpop.eup %3309 }
 0x40a   : > { %3311 = vrcp.f32 %v1258_v60  ;;  %v1285_v14 = vmul.f32 %v3310_v56, %v4109_v20 }
 0x40b   : > { %v1291_v4 = vpack.c.bf16 %v1283_v43, %v1283_v43 }
 0x40c   : > { %v1293_v12 = vpack.c.bf16 %v1285_v14, %v1285_v14 }
 0x40d   : > { %v1301_v25 = vunpack.c.l.b16 %v1291_v4  ;;  %v3198_v4 = vld [vmem:[%s4755_s4 + $0x8] sm:$0xff]  }
 0x40e   : > { %v1331_v46 = vunpack.c.l.b16 %v1293_v12 }
 0x40f   : > { %v1302_v42 = vpack.c.b16 %v1301_v25, %v1300_v52  ;;  %v3177_v52 = vunpack.c.l.bf16 %v3198_v4 }
 0x410   : > { %v3312_v45 = vpop.eup %3311 }
 0x411   : > { %v1284_v51 = vmul.f32 %v3312_v45, %v4185_v48  ;;  %3083 = vmatmul.msk.bf16.vlgmr.msrb.gmra.mxu2 %vm758_vm2, %v1302_v42  ;;  %v1267_v29 = vpop.xlane.xlu0 %1266  ;;  %v1270_v38 = vpop.xlane.xlu1 %1269 }
 0x412   : > { %3313 = vrcp.f32 %v1270_v38 }
 0x413   : > { %v1292_v16 = vpack.c.bf16 %v1284_v51, %v1284_v51  ;;  %v3178_v51 = vunpack.c.h.bf16 %v3198_v4 }
 0x415   : > { %v1330_v63 = vunpack.c.l.b16 %v1292_v16 }
 0x417   : > { %v1332_v39 = vpack.c.b16 %v1331_v46, %v1330_v63 }
 0x418   : > { %v3314_v34 = vpop.eup %3313 }
 0x419   : > { %v1273_v44 = vpop.xlane.xlu0 %1272  ;;  %3084 = vmatmul.msk.bf16.vlgmr.msrb.gmra.mxu3 %vm758_vm2, %v1332_v39  ;;  %v1288_v20 = vmul.f32 %v3314_v34, %v4201_v5 }
 0x41a   : > { %3315 = vrcp.f32 %v1273_v44 }
 0x41b   : > { %v1296_v37 = vpack.c.bf16 %v1288_v20, %v1288_v20  ;;  %3317 = vrcp.f32 %v1267_v29 }
 0x41d   : > { %v1390_v57 = vunpack.c.l.b16 %v1296_v37 }
 0x420   : > { %v3316_v61 = vpop.eup %3315 }
 0x421   : > { %v1289_v48 = vmul.f32 %v3316_v61, %v4211_v13  ;;  %v3318_v13 = vpop.eup %3317 }
 0x422   : > { %v1287_v7 = vmul.f32 %v3318_v13, %v4205_v10 }
 0x423   : > { %v1297_v53 = vpack.c.bf16 %v1289_v48, %v1289_v48 }
 0x424   : > { %v1295_v8 = vpack.c.bf16 %v1287_v7, %v1287_v7 }
 0x425   : > { %v1391_v21 = vunpack.c.l.b16 %v1297_v53 }
 0x426   : > { %v1361_v23 = vunpack.c.l.b16 %v1295_v8 }
 0x427   : > { %v1392_v32 = vpack.c.b16 %v1391_v21, %v1390_v57 }
 0x429   : > { %3086 = vmatmul.msk.bf16.vlgmr.msra.gmra.mxu2 %vm758_vm2, %v1392_v32  ;;  %3087 = vmatmul.msk.bf16.vlgmr.msra.gmra.mxu3 %vm758_vm2, %v4160_v30  ;;  %v1815_v50 = vpop.permute.xlu1 %1814 }
 0x42a   : > { %v1820_v2 = vsel %vm758_vm2, %v1815_v50, 0 }
 0x42b   : > { %1829 = vmatpush.bf16.xpose.msrb.mxu2 %v1820_v2 }
 0x42c   : > { %v1849_v35 = vpop.permute.xlu0 %1848 }
 0x42d   : > { %v1854_v5 = vsel %vm758_vm2, %v1849_v35, 0 }
 0x42e   : > { %1863 = vmatpush.bf16.xpose.msrb.mxu3 %v1854_v5 }
 0x432   : > { %v1264_v1 = vpop.xlane.xlu2 %1263 }
 0x433   : > { %3319 = vrcp.f32 %v1264_v1 }
 0x439   : > { %v3320_v24 = vpop.eup %3319 }
 0x43a   : > { %v1286_v11 = vmul.f32 %v3320_v24, %v4248_v19  ;;  %v1774_v18 = vpop.permute.xlu2 %1773 }
 0x43c   : > { %v1294_v30 = vpack.c.bf16 %v1286_v11, %v1286_v11 }
 0x43e   : > { %v1360_v22 = vunpack.c.l.b16 %v1294_v30 }
 0x440   : > { %v1362_v62 = vpack.c.b16 %v1361_v23, %v1360_v22 }
 0x442   : > { %v1808_v40 = vpop.permute.xlu2 %1807  ;;  %3085 = vmatmul.msk.bf16.vlgmr.msra.gmra.mxu1 %vm758_vm2, %v1362_v62 }
 0x443   : > { %3089 = vmatmul.msk.bf16.vlgmr.msrb.gmra.mxu2 %vm758_vm2, %v1808_v40 }
 0x44a   : > { %v1842_v59 = vpop.permute.xlu2 %1841 }
 0x44b   : > { %3090 = vmatmul.msk.bf16.vlgmr.msrb.gmra.mxu3 %vm758_vm2, %v1842_v59 }
 0x452   : > { %3088 = vmatmul.msk.bf16.vlgmr.msrb.gmra.mxu1 %vm758_vm2, %v1774_v18 }
 0x494   : > { %v4285_v10 = vpop.f32.mrf.mxu2 }
 0x49c   : > { %v4287_v17 = vpop.f32.mrf.mxu2  ;;  %v4289_v19 = vpop.f32.mrf.mxu3 }
 0x49d   : > { %v1418_v43 = vpack.c.bf16 %v4287_v17, %v4285_v10 }
 0x4a4   : > { %v4293_v60 = vpop.f32.mrf.mxu3 }
 0x4a5   : > { %v1419_v56 = vpack.c.bf16 %v4293_v60, %v4289_v19 }
 0x4ac   : > { %v4300_v14 = vpop.f32.mrf.mxu2  ;;  %v1763_v25 = vpop.f32.mrf.mxu3 }
 0x4ad   : > { %v1764_v42 = vadd.f32 %v3177_v52, %v1763_v25 }
 0x4af   : > { %v1870_v45 = vadd.f32 %v3181_v6, %v1764_v42 }
 0x4b1   : > { %v1878_v12 = vsel %vm758_vm2, %v1870_v45, -inf }
 0x4b2   : > { %1879 = vmax.xlane.f32.xlu2 %v1878_v12 }
 0x4b4   : > { %v4305_v29 = vpop.f32.mrf.mxu2  ;;  %v1765_v38 = vpop.f32.mrf.mxu3 }
 0x4b5   : > { %v1421_v16 = vpack.c.bf16 %v4305_v29, %v4300_v14  ;;  %v1766_v46 = vadd.f32 %v3178_v51, %v1765_v38  ;;  %v4404_v29 = vld [vmem:[%s4758_s7] ss:$0 sm:$0xff] }
 0x4b7   : > { %v1871_v63 = vadd.f32 %v3182_v27, %v1766_v46 }
 0x4b9   : > { %v1881_v39 = vsel %vm758_vm2, %v1871_v63, -inf }
 0x4ba   : > { %1882 = vmax.xlane.f32.xlu1 %v1881_v39 }
 0x4bf   : > { %v4312_v44 = vpop.f32.mrf.mxu1 }
 0x4c6   : > { %v1831_v6 = vpop.f32.mrf.mxu2 }
 0x4c7   : > { %v4314_v34 = vpop.f32.mrf.mxu1  ;;  %v1832_v24 = vadd.f32 %v3177_v52, %v1831_v6 }
 0x4c8   : > { %v1420_v20 = vpack.c.bf16 %v4314_v34, %v4312_v44 }
 0x4ce   : > { %v1865_v61 = vpop.f32.mrf.mxu3  ;;  %v1833_v57 = vpop.f32.mrf.mxu2 }
 0x4cf   : > { %v1866_v37 = vadd.f32 %v3177_v52, %v1865_v61  ;;  %v1797_v48 = vpop.f32.mrf.mxu1  ;;  %v1834_v32 = vadd.f32 %v3178_v51, %v1833_v57 }
 0x4d0   : > { %v1798_v53 = vadd.f32 %v3177_v52, %v1797_v48 }
 0x4d1   : > { %v1876_v31 = vadd.f32 %v3193_v0, %v1866_v37  ;;  %v4326_v13 = vadd.f32 %v3190_v36, %v1834_v32  ;;  %v4791_v36 = vunpack.c.l.bf16 %v3930_v15 }
 0x4d2   : > { %v1872_v27 = vadd.f32 %v3185_v28, %v1798_v53  ;;  %v4790_v28 = vunpack.c.h.bf16 %v3913_v3 }
 0x4d3   : > { %v1896_v21 = vsel %vm758_vm2, %v1876_v31, -inf  ;;  %v1893_v18 = vsel %vm758_vm2, %v4326_v13, -inf  ;;  %v1874_v58 = vadd.f32 %v4791_v36, %v1832_v24 }
 0x4d4   : > { %1897 = vmax.xlane.f32.xlu2 %v1896_v21  ;;  %v1884_v50 = vsel %vm758_vm2, %v1872_v27, -inf }
 0x4d5   : > { %1885 = vmax.xlane.f32.xlu0 %v1884_v50 }
 0x4d6   : > { %v1867_v2 = vpop.f32.mrf.mxu3 }
 0x4d7   : > { %v1868_v35 = vadd.f32 %v3178_v51, %v1867_v2  ;;  %v1799_v5 = vpop.f32.mrf.mxu1 }
 0x4d8   : > { %v1800_v1 = vadd.f32 %v3178_v51, %v1799_v5 }
 0x4d9   : > { %v4330_v0 = vadd.f32 %v3194_v9, %v1868_v35  ;;  %v1890_v9 = vsel %vm758_vm2, %v1874_v58, -inf }
 0x4da   : > { %v1873_v7 = vadd.f32 %v4790_v28, %v1800_v1 }
 0x4db   : > { %v1899_v8 = vsel %vm758_vm2, %v4330_v0, -inf }
 0x4dc   : > { %1900 = vmax.xlane.f32.xlu1 %v1899_v8  ;;  %v1887_v11 = vsel %vm758_vm2, %v1873_v7, -inf }
 0x4dd   : > { %1888 = vmax.xlane.f32.xlu2 %v1887_v11  ;;  %1894 = vmax.xlane.f32.xlu0 %v1893_v18 }
 0x4e4   : > { %1891 = vmax.xlane.f32.xlu1 %v1890_v9 }
 0x4fd   : > { %1979 = vrot.lane.b32.xlu1 %v3877_v33, %s3417_s0 }
 0x525   : > { %v1880_v3 = vpop.xlane.xlu2 %1879 }
 0x526   : > { %v1902_v30 = vsub.f32 %v1870_v45, %v1880_v3 }
 0x528   : > { %v1910_v23 = vmul.f32 1.442695, %v1902_v30 }
 0x52a   : > { %3321 = vpow2.f32 %v1910_v23 }
 0x52d   : > { %v1883_v22 = vpop.xlane.xlu1 %1882 }
 0x52e   : > { %v1903_v62 = vsub.f32 %v1871_v63, %v1883_v22 }
 0x530   : > { %v3322_v40 = vpop.eup %3321  ;;  %v1912_v59 = vmul.f32 1.442695, %v1903_v62 }
 0x531   : > { %v1926_v4 = vsel %vm758_vm2, %v3322_v40, 0.0 }
 0x532   : > { %3323 = vpow2.f32 %v1912_v59  ;;  %1927 = vadd.xlane.f32.xlu0 %v1926_v4 }
 0x538   : > { %v3324_v15 = vpop.eup %3323 }
 0x539   : > { %v1929_v52 = vsel %vm758_vm2, %v3324_v15, 0.0 }
 0x53a   : > { %1930 = vadd.xlane.f32.xlu2 %v1929_v52 }
 0x547   : > { %v1898_v25 = vpop.xlane.xlu2 %1897 }
 0x548   : > { %v1908_v42 = vsub.f32 %v1876_v31, %v1898_v25  ;;  %v1886_v12 = vpop.xlane.xlu0 %1885 }
 0x549   : > { %v1904_v33 = vsub.f32 %v1872_v27, %v1886_v12 }
 0x54a   : > { %v1922_v51 = vmul.f32 1.442695, %v1908_v42 }
 0x54b   : > { %v1914_v45 = vmul.f32 1.442695, %v1904_v33 }
 0x54c   : > { %3325 = vpow2.f32 %v1922_v51 }
 0x54d   : > { %3327 = vpow2.f32 %v1914_v45 }
 0x54f   : > { %v1901_v38 = vpop.xlane.xlu1 %1900 }
 0x550   : > { %v1889_v46 = vpop.xlane.xlu2 %1888  ;;  %v1895_v35 = vpop.xlane.xlu0 %1894  ;;  %v1909_v1 = vsub.f32 %v4330_v0, %v1901_v38 }
 0x551   : > { %v1905_v63 = vsub.f32 %v1873_v7, %v1889_v46  ;;  %v1907_v5 = vsub.f32 %v4326_v13, %v1895_v35 }
 0x552   : > { %v4346_v39 = vpop.eup %3325  ;;  %v1924_v7 = vmul.f32 1.442695, %v1909_v1 }
 0x553   : > { %v3328_v6 = vpop.eup %3327  ;;  %v1916_v61 = vmul.f32 1.442695, %v1905_v63  ;;  %v1944_v37 = vsel %vm758_vm2, %v4346_v39, 0.0  ;;  %v1920_v28 = vmul.f32 1.442695, %v1907_v5 }
 0x554   : > { %1945 = vadd.xlane.f32.xlu1 %v1944_v37  ;;  %v1932_v48 = vsel %vm758_vm2, %v3328_v6, 0.0 }
 0x555   : > { %3329 = vpow2.f32 %v1916_v61  ;;  %1933 = vadd.xlane.f32.xlu0 %v1932_v48 }
 0x557   : > { %v1892_v53 = vpop.xlane.xlu1 %1891 }
 0x558   : > { %v1906_v57 = vsub.f32 %v1874_v58, %v1892_v53 }
 0x55a   : > { %v1918_v31 = vmul.f32 1.442695, %v1906_v57 }
 0x55b   : > { %v3330_v27 = vpop.eup %3329 }
 0x55c   : > { %3331 = vpow2.f32 %v1918_v31  ;;  %v1935_v21 = vsel %vm758_vm2, %v3330_v27, 0.0 }
 0x55d   : > { %1936 = vadd.xlane.f32.xlu2 %v1935_v21  ;;  %3333 = vpow2.f32 %v1920_v28 }
 0x55e   : > { %3335 = vpow2.f32 %v1924_v7 }
 0x562   : > { %v4352_v32 = vpop.eup %3331 }
 0x563   : > { %v1938_v50 = vsel %vm758_vm2, %v4352_v32, 0.0  ;;  %v3334_v24 = vpop.eup %3333 }
 0x564   : > { %1939 = vadd.xlane.f32.xlu0 %v1938_v50  ;;  %v1941_v8 = vsel %vm758_vm2, %v3334_v24, 0.0  ;;  %v4363_v11 = vpop.eup %3335 }
 0x56f   : > { %v1980_v2 = vpop.permute.xlu1 %1979 }
 0x570   : > { %1992 = vmatpush.bf16.msrb.mxu0 %v1980_v2 }
 0x575   : > { %2029 = vrot.lane.b32.xlu2 %v4054_v26, %s3417_s0  ;;  %v1947_v26 = vsel %vm758_vm2, %v4363_v11, 0.0 }
 0x578   : > { %2004 = vrot.lane.b32.xlu0 %v4062_v41, %s3417_s0 }
 0x59e   : > { %1942 = vadd.xlane.f32.xlu2 %v1941_v8 }
 0x5a2   : > { %1948 = vadd.xlane.f32.xlu0 %v1947_v26 }
 0x5a5   : > { %v1928_v18 = vpop.xlane.xlu0 %1927 }
 0x5a6   : > { %3337 = vrcp.f32 %v1928_v18 }
 0x5ac   : > { %v3338_v13 = vpop.eup %3337 }
 0x5ad   : > { %v1931_v41 = vpop.xlane.xlu2 %1930  ;;  %v1958_v0 = vmul.f32 %v3338_v13, %v3322_v40 }
 0x5ae   : > { %3339 = vrcp.f32 %v1931_v41 }
 0x5af   : > { %v1966_v58 = vpack.c.bf16 %v1958_v0, %v1958_v0 }
 0x5b1   : > { %v1976_v30 = vunpack.c.l.b16 %v1966_v58 }
 0x5b4   : > { %v3340_v36 = vpop.eup %3339 }
 0x5b5   : > { %v1959_v9 = vmul.f32 %v3340_v36, %v3324_v15 }
 0x5b6   : > { %2054 = vrot.lane.b32.xlu2 %v4066_v47, %s3417_s0  ;;  %v3147_v47 = vld [vmem:[%s4757_s6] sm:$0xff] }
 0x5b7   : > { %v1967_v3 = vpack.c.bf16 %v1959_v9, %v1959_v9 }
 0x5b9   : > { %v1977_v23 = vunpack.c.l.b16 %v1967_v3 }
 0x5bb   : > { %v1978_v22 = vpack.c.b16 %v1977_v23, %v1976_v30 }
 0x5bd   : > { %3091 = vmatmul.msk.bf16.vlgmr.msrb.gmra.mxu0 %vm758_vm2, %v1978_v22 }
 0x5c7   : > { %v1946_v63 = vpop.xlane.xlu1 %1945 }
 0x5c8   : > { %v1934_v59 = vpop.xlane.xlu0 %1933 }
 0x5d0   : > { %v1937_v62 = vpop.xlane.xlu2 %1936 }
 0x5d1   : > { %3341 = vrcp.f32 %v1937_v62 }
 0x5d2   : > { %3343 = vrcp.f32 %v1934_v59 }
 0x5d7   : > { %v3342_v52 = vpop.eup %3341  ;;  %v1940_v15 = vpop.xlane.xlu0 %1939 }
 0x5d8   : > { %v2030_v4 = vpop.permute.xlu2 %2029  ;;  %v3344_v40 = vpop.eup %3343  ;;  %v1961_v25 = vmul.f32 %v3342_v52, %v3330_v27  ;;  %3345 = vrcp.f32 %v1940_v15 }
 0x5d9   : > { %2042 = vmatpush.bf16.msra.mxu2 %v2030_v4  ;;  %v1960_v42 = vmul.f32 %v3344_v40, %v3328_v6  ;;  %v3148_v6 = vld [vmem:[%s4757_s6 + $0x8] sm:$0xff]  ;;  %3347 = vrcp.f32 %v1946_v63 }
 0x5da   : > { %v1969_v12 = vpack.c.bf16 %v1961_v25, %v1961_v25  ;;  %2103 = vmatpush.bf16.msra.mxu0 %v3148_v6 }
 0x5db   : > { %v1968_v33 = vpack.c.bf16 %v1960_v42, %v1960_v42 }
 0x5dc   : > { %v2002_v51 = vunpack.c.l.b16 %v1969_v12 }
 0x5dd   : > { %v2001_v45 = vunpack.c.l.b16 %v1968_v33 }
 0x5de   : > { %v3346_v37 = vpop.eup %3345 }
 0x5df   : > { %v2003_v46 = vpack.c.b16 %v2002_v51, %v2001_v45  ;;  %v1962_v10 = vmul.f32 %v3346_v37, %v4352_v32  ;;  %v3418_v51 = vmov 32.0  }
 0x5e1   : > { %v1970_v19 = vpack.c.bf16 %v1962_v10, %v1962_v10 }
 0x5e3   : > { %v2026_v21 = vunpack.c.l.b16 %v1970_v19 }
 0x5ea   : > { %v2005_v38 = vpop.permute.xlu0 %2004 }
 0x5eb   : > { %2017 = vmatpush.bf16.msra.mxu1 %v2005_v38 }
 0x5ee   : > { %3092 = vmatmul.msk.bf16.vlgmr.msra.gmra.mxu1 %vm758_vm2, %v2003_v46 }
 0x5ef   : > { %2150 = vmatpush.bf16.msrb.mxu1 %v3147_v47 }
 0x5fe   : > { %3107 = vmatmul.msk.bf16.vlgmr.msrb.gmra.mxu1 %vm758_vm2, %v1418_v43  ;;  %v3348_v43 = vpop.eup %3347 }
 0x5ff   : > { %v1964_v53 = vmul.f32 %v3348_v43, %v4346_v39 }
 0x601   : > { %v1972_v27 = vpack.c.bf16 %v1964_v53, %v1964_v53 }
 0x603   : > { %v2051_v5 = vunpack.c.l.b16 %v1972_v27 }
 0x60e   : > { %3108 = vmatmul.msk.bf16.gmra.mxu1 %vm758_vm2, %v1419_v56 }
 0x611   : > { %v1943_v61 = vpop.xlane.xlu2 %1942 }
 0x612   : > { %3349 = vrcp.f32 %v1943_v61 }
 0x615   : > { %v1949_v17 = vpop.xlane.xlu0 %1948 }
 0x616   : > { %3351 = vrcp.f32 %v1949_v17 }
 0x617   : > { %3353 = vrcp.f32 %v3418_v51 }
 0x618   : > { %v3350_v48 = vpop.eup %3349 }
 0x619   : > { %v1963_v60 = vmul.f32 %v3350_v48, %v3334_v24  ;;  %v2055_v56 = vpop.permute.xlu2 %2054 }
 0x61a   : > { %2067 = vmatpush.bf16.msra.mxu3 %v2055_v56 }
 0x61b   : > { %v1971_v57 = vpack.c.bf16 %v1963_v60, %v1963_v60 }
 0x61c   : > { %v3352_v31 = vpop.eup %3351 }
 0x61d   : > { %v2027_v50 = vunpack.c.l.b16 %v1971_v57  ;;  %v1965_v2 = vmul.f32 %v3352_v31, %v4363_v11  ;;  %v3354_v47 = vpop.eup %3353 }
 0x61e   : > { %3109 = vmatmul.msk.bf16.gmra.mxu1 %vm758_vm2, %v1420_v20  ;;  %v2211_v45 = vmul.f32 32.0, %v3354_v47 }
 0x61f   : > { %v2028_v32 = vpack.c.b16 %v2027_v50, %v2026_v21  ;;  %v1973_v35 = vpack.c.bf16 %v1965_v2, %v1965_v2 }
 0x620   : > { %v2212_v46 = vsub.f32 1.0, %v2211_v45  ;;  %v3149_v45 = vld [vmem:[%s4761_s10] sm:$0xff] }
 0x621   : > { %v2052_v39 = vunpack.c.l.b16 %v1973_v35  ;;  %3093 = vmatmul.msk.bf16.vlgmr.msra.gmra.mxu2 %vm758_vm2, %v2028_v32 }
 0x622   : > { %v2213_v6 = vmul.f32 %v3354_v47, %v2212_v46 }
 0x623   : > { %v2053_v1 = vpack.c.b16 %v2052_v39, %v2051_v5 }
 0x624   : > { %v2214_v17 = vadd.f32 %v3354_v47, %v2213_v6 }
 0x625   : > { %3094 = vmatmul.msk.bf16.vlgmr.msra.gmra.mxu3 %vm758_vm2, %v2053_v1 }
 0x62e   : > { %3110 = vmatmul.msk.bf16.gmra.mxu1 %vm758_vm2, %v1421_v16 }
 0x63a   : > { %v1994_v28 = vpop.f32.mrf.mxu0 }
 0x642   : > { %v1996_v7 = vpop.f32.mrf.mxu0 }
 0x643   : > { %v2074_v24 = vpack.c.bf16 %v1996_v7, %v1994_v28 }
 0x645   : > { %3099 = vmatmul.msk.bf16.vlgmr.msra.gmra.mxu0 %vm758_vm2, %v2074_v24 }
 0x66b   : > { %v2019_v44 = vpop.f32.mrf.mxu1 }
 0x673   : > { %v2021_v34 = vpop.f32.mrf.mxu1 }
 0x674   : > { %v2075_v20 = vpack.c.bf16 %v2021_v34, %v2019_v44 }
 0x676   : > { %3100 = vmatmul.msk.bf16.gmra.mxu0 %vm758_vm2, %v2075_v20 }
 0x67b   : > { %v2152_v14 = vpop.f32.mrf.mxu1 }
 0x683   : > { %v2154_v9 = vpop.f32.mrf.mxu1 }
 0x68b   : > { %v2157_v62 = vpop.f32.mrf.mxu1 }
 0x693   : > { %v2159_v25 = vpop.f32.mrf.mxu1 }
 0x69b   : > { %v2162_v38 = vpop.f32.mrf.mxu1 }
 0x6a3   : > { %v2164_v10 = vpop.f32.mrf.mxu1 }
 0x6a4   : > { %v2044_v8 = vpop.f32.mrf.mxu2 }
 0x6a8   : > { %v2069_v26 = vpop.f32.mrf.mxu3 }
 0x6ab   : > { %v2167_v21 = vpop.f32.mrf.mxu1 }
 0x6ac   : > { %v2046_v11 = vpop.f32.mrf.mxu2 }
 0x6ad   : > { %v2076_v18 = vpack.c.bf16 %v2046_v11, %v2044_v8 }
 0x6af   : > { %3101 = vmatmul.msk.bf16.gmra.mxu0 %vm758_vm2, %v2076_v18 }
 0x6b0   : > { %v2071_v41 = vpop.f32.mrf.mxu3 }
 0x6b1   : > { %v2077_v16 = vpack.c.bf16 %v2071_v41, %v2069_v26 }
 0x6b3   : > { %v2169_v44 = vpop.f32.mrf.mxu1 }
 0x6bf   : > { %3102 = vmatmul.msk.bf16.gmra.mxu0 %vm758_vm2, %v2077_v16  ;;  %vm2215_vm2 = vweird.f32 %v3354_v47 }
 0x6c0   : > { %v4417_v53 = vsel %vm2215_vm2, %v3354_v47, %v2214_v17 }
 0x6c2   : > { %v2105_v13 = vpop.f32.mrf.mxu0 }
 0x6c3   : > { %v2153_v0 = vadd.f32 %v2152_v14, %v2105_v13 }
 0x6c5   : > { %v2176_v36 = vadd.f32 %v4404_v29, %v2153_v0 }
 0x6c7   : > { %v2186_v58 = vsel %vm683_vm1, %v2176_v36, 0.0 }
 0x6c8   : > { %2187 = vadd.xlane.f32.xlu2 %v2186_v58 }
 0x6ca   : > { %v2107_v3 = vpop.f32.mrf.mxu0 }
 0x6cb   : > { %v2155_v30 = vadd.f32 %v2154_v9, %v2107_v3 }
 0x6cd   : > { %v2177_v23 = vadd.f32 %v4404_v29, %v2155_v30 }
 0x6cf   : > { %v2189_v22 = vsel %vm683_vm1, %v2177_v23, 0.0 }
 0x6d0   : > { %2190 = vadd.xlane.f32.xlu1 %v2189_v22 }
 0x6f3   : > { %v2110_v59 = vpop.f32.mrf.mxu0 }
 0x6f4   : > { %v2158_v4 = vadd.f32 %v2157_v62, %v2110_v59 }
 0x6f6   : > { %v2178_v52 = vadd.f32 %v4404_v29, %v2158_v4 }
 0x6f8   : > { %v2192_v40 = vsel %vm683_vm1, %v2178_v52, 0.0 }
 0x6f9   : > { %2193 = vadd.xlane.f32.xlu1 %v2192_v40 }
 0x6fb   : > { %v2112_v42 = vpop.f32.mrf.mxu0 }
 0x6fc   : > { %v2160_v15 = vadd.f32 %v2159_v25, %v2112_v42 }
 0x6fe   : > { %v2179_v12 = vadd.f32 %v4404_v29, %v2160_v15 }
 0x700   : > { %v2195_v33 = vsel %vm683_vm1, %v2179_v12, 0.0 }
 0x701   : > { %2196 = vadd.xlane.f32.xlu0 %v2195_v33  ;;  %v3150_v33 = vld [vmem:[%s4761_s10 + $0x8] sm:$0xff] }
 0x702   : > { %2441 = vmatpush.bf16.msrb.mxu2 %v3150_v33 }
 0x706   : > { %2442 = vmatpush.bf16.msrb.mxu2 %v3149_v45 }
 0x72c   : > { %v2115_v63 = vpop.f32.mrf.mxu0 }
 0x72d   : > { %v2163_v61 = vadd.f32 %v2162_v38, %v2115_v63 }
 0x72f   : > { %v2180_v37 = vadd.f32 %v4404_v29, %v2163_v61 }
 0x731   : > { %v2198_v43 = vsel %vm683_vm1, %v2180_v37, 0.0 }
 0x732   : > { %2199 = vadd.xlane.f32.xlu1 %v2198_v43 }
 0x734   : > { %v2117_v48 = vpop.f32.mrf.mxu0 }
 0x735   : > { %v2165_v19 = vadd.f32 %v2164_v10, %v2117_v48 }
 0x737   : > { %v2181_v56 = vadd.f32 %v4404_v29, %v2165_v19 }
 0x739   : > { %v2201_v31 = vsel %vm683_vm1, %v2181_v56, 0.0 }
 0x73a   : > { %2202 = vadd.xlane.f32.xlu0 %v2201_v31 }
 0x73b   : > { %v2188_v60 = vpop.xlane.xlu2 %2187 }
 0x73c   : > { %v2217_v57 = vmul.f32 %v4417_v53, %v2188_v60  ;;  %v2120_v2 = vpop.f32.mrf.mxu0 }
 0x73d   : > { %v2168_v32 = vadd.f32 %v2167_v21, %v2120_v2 }
 0x73e   : > { %v4422_v27 = vsub.f32 %v2176_v36, %v2217_v57 }
 0x73f   : > { %v2182_v39 = vadd.f32 %v4404_v29, %v2168_v32 }
 0x740   : > { %v2233_v50 = vmul.f32 %v4422_v27, %v4422_v27 }
 0x741   : > { %v2204_v28 = vsel %vm683_vm1, %v2182_v39, 0.0 }
 0x742   : > { %v2241_v35 = vsel %vm683_vm1, %v2233_v50, 0.0  ;;  %2205 = vadd.xlane.f32.xlu0 %v2204_v28 }
 0x743   : > { %2242 = vadd.xlane.f32.xlu1 %v2241_v35  ;;  %v2191_v5 = vpop.xlane.xlu1 %2190 }
 0x744   : > { %v2218_v1 = vmul.f32 %v4417_v53, %v2191_v5  ;;  %v2122_v34 = vpop.f32.mrf.mxu0 }
 0x745   : > { %v2170_v20 = vadd.f32 %v2169_v44, %v2122_v34  ;;  %v4490_v34 = vld [vmem:[%s4760_s9] ss:$0 sm:$0xff] }
 0x746   : > { %v4430_v7 = vsub.f32 %v2177_v23, %v2218_v1  ;;  %v4484_v1 = vld [vmem:[%s4759_s8] ss:$0 sm:$0xff] }
 0x747   : > { %v2183_v11 = vadd.f32 %v4404_v29, %v2170_v20 }
 0x748   : > { %v2234_v24 = vmul.f32 %v4430_v7, %v4430_v7 }
 0x749   : > { %v2207_v18 = vsel %vm683_vm1, %v2183_v11, 0.0 }
 0x74a   : > { %v2244_v8 = vsel %vm683_vm1, %v2234_v24, 0.0 }
 0x74b   : > { %2245 = vadd.xlane.f32.xlu2 %v2244_v8  ;;  %2208 = vadd.xlane.f32.xlu1 %v2207_v18 }
 0x76c   : > { %v2194_v26 = vpop.xlane.xlu1 %2193 }
 0x76d   : > { %v2219_v41 = vmul.f32 %v4417_v53, %v2194_v26 }
 0x76f   : > { %v4438_v14 = vsub.f32 %v2178_v52, %v2219_v41  ;;  %v656_v41 = vunpack.c.h.bf16 %v3533_v49 }
 0x771   : > { %v2235_v16 = vmul.f32 %v4438_v14, %v4438_v14 }
 0x773   : > { %v2247_v13 = vsel %vm683_vm1, %v2235_v16, 0.0 }
 0x774   : > { %v2197_v0 = vpop.xlane.xlu0 %2196  ;;  %2248 = vadd.xlane.f32.xlu2 %v2247_v13 }
 0x775   : > { %v2220_v36 = vmul.f32 %v4417_v53, %v2197_v0 }
 0x777   : > { %v4444_v58 = vsub.f32 %v2179_v12, %v2220_v36 }
 0x779   : > { %v2236_v29 = vmul.f32 %v4444_v58, %v4444_v58 }
 0x77b   : > { %v2250_v9 = vsel %vm683_vm1, %v2236_v29, 0.0 }
 0x77c   : > { %2251 = vadd.xlane.f32.xlu0 %v2250_v9 }
 0x7a5   : > { %v2200_v3 = vpop.xlane.xlu1 %2199 }
 0x7a6   : > { %v2221_v30 = vmul.f32 %v4417_v53, %v2200_v3 }
 0x7a8   : > { %v4450_v23 = vsub.f32 %v2180_v37, %v2221_v30 }
 0x7aa   : > { %v2237_v22 = vmul.f32 %v4450_v23, %v4450_v23 }
 0x7ac   : > { %v2253_v62 = vsel %vm683_vm1, %v2237_v22, 0.0 }
 0x7ad   : > { %v2203_v59 = vpop.xlane.xlu0 %2202  ;;  %2254 = vadd.xlane.f32.xlu1 %v2253_v62 }
 0x7ae   : > { %v2222_v4 = vmul.f32 %v4417_v53, %v2203_v59 }
 0x7b0   : > { %v4456_v52 = vsub.f32 %v2181_v56, %v2222_v4 }
 0x7b2   : > { %v2238_v25 = vmul.f32 %v4456_v52, %v4456_v52 }
 0x7b4   : > { %v2256_v15 = vsel %vm683_vm1, %v2238_v25, 0.0 }
 0x7b5   : > { %v2206_v51 = vpop.xlane.xlu0 %2205  ;;  %2257 = vadd.xlane.f32.xlu2 %v2256_v15 }
 0x7b6   : > { %v2243_v40 = vpop.xlane.xlu1 %2242  ;;  %v2223_v47 = vmul.f32 %v4417_v53, %v2206_v51 }
 0x7b7   : > { %v2265_v42 = vmul.f32 %v2243_v40, %v4417_v53 }
 0x7b8   : > { %v4469_v38 = vsub.f32 %v2182_v39, %v2223_v47 }
 0x7b9   : > { %v2273_v12 = vadd.f32 1e-05, %v2265_v42 }
 0x7ba   : > { %v2239_v63 = vmul.f32 %v4469_v38, %v4469_v38 }
 0x7bb   : > { %3355 = vrsqrt.f32 %v2273_v12  ;;  %vm2287_vm0 = vweird.f32 %v2273_v12 }
 0x7bc   : > { %v2259_v37 = vsel %vm683_vm1, %v2239_v63, 0.0 }
 0x7bd   : > { %2260 = vadd.xlane.f32.xlu0 %v2259_v37  ;;  %v657_v37 = vunpack.c.l.bf16 %v3538_v54 }
 0x7be   : > { %v2246_v46 = vpop.xlane.xlu2 %2245  ;;  %v2209_v43 = vpop.xlane.xlu1 %2208 }
 0x7bf   : > { %v2266_v6 = vmul.f32 %v2246_v46, %v4417_v53  ;;  %v2224_v48 = vmul.f32 %v4417_v53, %v2209_v43 }
 0x7c1   : > { %v3356_v61 = vpop.eup %3355  ;;  %v2274_v10 = vadd.f32 1e-05, %v2266_v6  ;;  %v4476_v60 = vsub.f32 %v2183_v11, %v2224_v48 }
 0x7c2   : > { %v2282_v17 = vmul.f32 %v3356_v61, %v2273_v12  ;;  %vm2288_vm15 = vweird.f32 %v3356_v61 }
 0x7c3   : > { %3357 = vrsqrt.f32 %v2274_v10  ;;  %v2240_v57 = vmul.f32 %v4476_v60, %v4476_v60  ;;  %vm2289_vm3 = vmor %vm2287_vm0, %vm2288_vm15  ;;  %vm2297_vm5 = vweird.f32 %v2274_v10 }
 0x7c4   : > { %v2283_v19 = vmul.f32 %v3356_v61, %v2282_v17 }
 0x7c5   : > { %v2262_v50 = vsel %vm683_vm1, %v2240_v57, 0.0 }
 0x7c6   : > { %v2284_v56 = vmul.f32 0.5, %v2283_v19  ;;  %2263 = vadd.xlane.f32.xlu1 %v2262_v50 }
 0x7c8   : > { %v2285_v31 = vsub.f32 1.5, %v2284_v56 }
 0x7c9   : > { %v3358_v21 = vpop.eup %3357 }
 0x7ca   : > { %v2286_v2 = vmul.f32 %v3356_v61, %v2285_v31  ;;  %v2292_v32 = vmul.f32 %v3358_v21, %v2274_v10  ;;  %vm2298_vm4 = vweird.f32 %v3358_v21  ;;  %v658_v10 = vunpack.c.h.bf16 %v3538_v54 }
 0x7cb   : > { %vm2299_vm6 = vmor %vm2297_vm5, %vm2298_vm4 }
 0x7cc   : > { %v2290_v35 = vsel %vm2289_vm3, %v3356_v61, %v2286_v2  ;;  %v2293_v5 = vmul.f32 %v3358_v21, %v2292_v32 }
 0x7cd   : > { %v2361_v28 = vmul.f32 %v2290_v35, %v4422_v27  ;;  %v655_v27 = vunpack.c.l.bf16 %v3533_v49 }
 0x7ce   : > { %v2294_v39 = vmul.f32 0.5, %v2293_v5 }
 0x7cf   : > { %v2372_v20 = vmul.f32 %v4484_v1, %v2361_v28 }
 0x7d0   : > { %v2295_v24 = vsub.f32 1.5, %v2294_v39 }
 0x7d1   : > { %v2383_v18 = vadd.f32 %v4490_v34, %v2372_v20 }
 0x7d2   : > { %v2296_v44 = vmul.f32 %v3358_v21, %v2295_v24 }
 0x7d3   : > { %v4499_v13 = vadd.f32 %v2383_v18, %v655_v27 }
 0x7d4   : > { %v2300_v8 = vsel %vm2299_vm6, %v3358_v21, %v2296_v44 }
 0x7d5   : > { %v2362_v11 = vmul.f32 %v2300_v8, %v4430_v7 }
 0x7d7   : > { %v2373_v26 = vmul.f32 %v4484_v1, %v2362_v11 }
 0x7d9   : > { %v2384_v16 = vadd.f32 %v4490_v34, %v2373_v26 }
 0x7db   : > { %v4501_v0 = vadd.f32 %v2384_v16, %v656_v41 }
 0x7dd   : > { %v2399_v36 = vpack.c.bf16 %v4501_v0, %v4499_v13 }
 0x7df   : > { %3119 = vmatmul.msk.bf16.vlgmr.msrb.gmra.mxu2 %vm683_vm1, %v2399_v36 }
 0x7e7   : > { %v2249_v7 = vpop.xlane.xlu2 %2248 }
 0x7e8   : > { %v2267_v29 = vmul.f32 %v2249_v7, %v4417_v53 }
 0x7ea   : > { %v2275_v9 = vadd.f32 1e-05, %v2267_v29 }
 0x7ec   : > { %3359 = vrsqrt.f32 %v2275_v9  ;;  %vm2307_vm8 = vweird.f32 %v2275_v9 }
 0x7ef   : > { %v2252_v3 = vpop.xlane.xlu0 %2251 }
 0x7f0   : > { %v2268_v30 = vmul.f32 %v2252_v3, %v4417_v53 }
 0x7f2   : > { %v3360_v49 = vpop.eup %3359  ;;  %v2276_v22 = vadd.f32 1e-05, %v2268_v30 }
 0x7f3   : > { %v2302_v62 = vmul.f32 %v3360_v49, %v2275_v9  ;;  %vm2308_vm7 = vweird.f32 %v3360_v49 }
 0x7f4   : > { %3361 = vrsqrt.f32 %v2276_v22  ;;  %vm2309_vm9 = vmor %vm2307_vm8, %vm2308_vm7  ;;  %vm2317_vm11 = vweird.f32 %v2276_v22 }
 0x7f5   : > { %v2303_v59 = vmul.f32 %v3360_v49, %v2302_v62 }
 0x7f7   : > { %v2304_v4 = vmul.f32 0.5, %v2303_v59 }
 0x7f9   : > { %v2305_v40 = vsub.f32 1.5, %v2304_v4 }
 0x7fa   : > { %v3362_v25 = vpop.eup %3361 }
 0x7fb   : > { %v2306_v42 = vmul.f32 %v3360_v49, %v2305_v40  ;;  %v2312_v15 = vmul.f32 %v3362_v25, %v2276_v22  ;;  %vm2318_vm10 = vweird.f32 %v3362_v25  ;;  %v660_v40 = vunpack.c.h.bf16 %v3542_v55 }
 0x7fc   : > { %vm2319_vm12 = vmor %vm2317_vm11, %vm2318_vm10  ;;  %vm2576_vm10 = vcmask 523264  }
 0x7fd   : > { %v2310_v12 = vsel %vm2309_vm9, %v3360_v49, %v2306_v42  ;;  %v2313_v33 = vmul.f32 %v3362_v25, %v2312_v15 }
 0x7fe   : > { %v2363_v47 = vmul.f32 %v2310_v12, %v4438_v14 }
 0x7ff   : > { %v2314_v51 = vmul.f32 0.5, %v2313_v33 }
 0x800   : > { %v2374_v63 = vmul.f32 %v4484_v1, %v2363_v47 }
 0x801   : > { %v2315_v45 = vsub.f32 1.5, %v2314_v51 }
 0x802   : > { %v2385_v43 = vadd.f32 %v4490_v34, %v2374_v63 }
 0x803   : > { %v2316_v46 = vmul.f32 %v3362_v25, %v2315_v45 }
 0x804   : > { %v4516_v48 = vadd.f32 %v2385_v43, %v657_v37 }
 0x805   : > { %v2320_v6 = vsel %vm2319_vm12, %v3362_v25, %v2316_v46 }
 0x806   : > { %v2364_v61 = vmul.f32 %v2320_v6, %v4444_v58 }
 0x808   : > { %v2375_v17 = vmul.f32 %v4484_v1, %v2364_v61 }
 0x80a   : > { %v2386_v14 = vadd.f32 %v4490_v34, %v2375_v17 }
 0x80c   : > { %v4518_v19 = vadd.f32 %v2386_v14, %v658_v10 }
 0x80e   : > { %v2400_v56 = vpack.c.bf16 %v4518_v19, %v4516_v48 }
 0x810   : > { %3120 = vmatmul.msk.bf16.gmra.mxu2 %vm683_vm1, %v2400_v56  ;;  %v3404_v56 = vld.sshfl [vmem:[#allocation1] sm:$0xff pattern:$0x73625140] }
 0x820   : > { %v2255_v58 = vpop.xlane.xlu1 %2254 }
 0x821   : > { %v2269_v57 = vmul.f32 %v2255_v58, %v4417_v53  ;;  %v661_v58 = vunpack.c.l.bf16 %v3404_v56 }
 0x823   : > { %v2277_v31 = vadd.f32 1e-05, %v2269_v57  ;;  %v662_v57 = vunpack.c.h.bf16 %v3404_v56 }
 0x825   : > { %3363 = vrsqrt.f32 %v2277_v31  ;;  %vm2327_vm14 = vweird.f32 %v2277_v31 }
 0x828   : > { %v2258_v54 = vpop.xlane.xlu2 %2257 }
 0x829   : > { %v2270_v21 = vmul.f32 %v2258_v54, %v4417_v53 }
 0x82b   : > { %v3364_v50 = vpop.eup %3363  ;;  %v2278_v2 = vadd.f32 1e-05, %v2270_v21 }
 0x82c   : > { %v2322_v32 = vmul.f32 %v3364_v50, %v2277_v31  ;;  %vm2328_vm13 = vweird.f32 %v3364_v50 }
 0x82d   : > { %3365 = vrsqrt.f32 %v2278_v2  ;;  %vm2329_vm2 = vmor %vm2327_vm14, %vm2328_vm13  ;;  %vm2337_vm0 = vweird.f32 %v2278_v2 }
 0x82e   : > { %v2323_v35 = vmul.f32 %v3364_v50, %v2322_v32 }
 0x830   : > { %v2324_v5 = vmul.f32 0.5, %v2323_v35  ;;  %v2261_v39 = vpop.xlane.xlu0 %2260  ;;  %v3153_v35 = vld [vmem:[%s4763_s12 + $0x10] sm:$0xff] }
 0x831   : > { %v2271_v28 = vmul.f32 %v2261_v39, %v4417_v53 }
 0x832   : > { %v2325_v24 = vsub.f32 1.5, %v2324_v5 }
 0x833   : > { %v3366_v44 = vpop.eup %3365  ;;  %v2279_v20 = vadd.f32 1e-05, %v2271_v28  ;;  %v3152_v28 = vld [vmem:[%s4763_s12 + $0x8] sm:$0xff] }
 0x834   : > { %v2326_v8 = vmul.f32 %v3364_v50, %v2325_v24  ;;  %v2332_v11 = vmul.f32 %v3366_v44, %v2278_v2  ;;  %vm2338_vm15 = vweird.f32 %v3366_v44 }
 0x835   : > { %3367 = vrsqrt.f32 %v2279_v20  ;;  %vm2339_vm3 = vmor %vm2337_vm0, %vm2338_vm15  ;;  %vm2347_vm5 = vweird.f32 %v2279_v20  ;;  %vm2838_vm15 = vcmask 1041408   ;;  %vm2842_vm0 = vcmask 1043458  }
 0x836   : > { %v2330_v18 = vsel %vm2329_vm2, %v3364_v50, %v2326_v8  ;;  %v2333_v26 = vmul.f32 %v3366_v44, %v2332_v11  ;;  %v3151_v11 = vld [vmem:[%s4763_s12] sm:$0xff] }
 0x837   : > { %v2365_v16 = vmul.f32 %v2330_v18, %v4450_v23  ;;  %v659_v23 = vunpack.c.l.bf16 %v3542_v55 }
 0x838   : > { %v2334_v27 = vmul.f32 0.5, %v2333_v26 }
 0x839   : > { %v2264_v41 = vpop.xlane.xlu1 %2263  ;;  %v2376_v49 = vmul.f32 %v4484_v1, %v2365_v16 }
 0x83a   : > { %v2272_v36 = vmul.f32 %v2264_v41, %v4417_v53  ;;  %v2335_v7 = vsub.f32 1.5, %v2334_v27 }
 0x83b   : > { %v3368_v29 = vpop.eup %3367  ;;  %v2387_v42 = vadd.f32 %v4490_v34, %v2376_v49 }
 0x83c   : > { %v2280_v9 = vadd.f32 1e-05, %v2272_v36  ;;  %v2336_v3 = vmul.f32 %v3366_v44, %v2335_v7  ;;  %v2342_v30 = vmul.f32 %v3368_v29, %v2279_v20  ;;  %vm2348_vm4 = vweird.f32 %v3368_v29 }
 0x83d   : > { %vm2349_vm6 = vmor %vm2347_vm5, %vm2348_vm4  ;;  %v4535_v45 = vadd.f32 %v2387_v42, %v659_v23 }
 0x83e   : > { %3369 = vrsqrt.f32 %v2280_v9  ;;  %v2340_v22 = vsel %vm2339_vm3, %v3366_v44, %v2336_v3  ;;  %v2343_v62 = vmul.f32 %v3368_v29, %v2342_v30  ;;  %vm2357_vm8 = vweird.f32 %v2280_v9 }
 0x83f   : > { %v2366_v59 = vmul.f32 %v2340_v22, %v4456_v52 }
 0x840   : > { %v2344_v4 = vmul.f32 0.5, %v2343_v62 }
 0x841   : > { %v2377_v25 = vmul.f32 %v4484_v1, %v2366_v59 }
 0x842   : > { %v2345_v15 = vsub.f32 1.5, %v2344_v4 }
 0x843   : > { %v2388_v33 = vadd.f32 %v4490_v34, %v2377_v25 }
 0x844   : > { %v3370_v12 = vpop.eup %3369  ;;  %v2346_v51 = vmul.f32 %v3368_v29, %v2345_v15 }
 0x845   : > { %v2352_v47 = vmul.f32 %v3370_v12, %v2280_v9  ;;  %v4537_v52 = vadd.f32 %v2388_v33, %v660_v40  ;;  %vm2358_vm7 = vweird.f32 %v3370_v12 }
 0x846   : > { %v2350_v46 = vsel %vm2349_vm6, %v3368_v29, %v2346_v51  ;;  %vm2359_vm9 = vmor %vm2357_vm8, %vm2358_vm7  ;;  %vm2960_vm6 = vcmask 1040384   ;;  %vm2993_vm7 = vcmask 257024  }
 0x847   : > { %v2353_v63 = vmul.f32 %v3370_v12, %v2352_v47  ;;  %v2401_v55 = vpack.c.bf16 %v4537_v52, %v4535_v45  ;;  %v2367_v61 = vmul.f32 %v2350_v46, %v4469_v38 }
 0x849   : > { %v2354_v6 = vmul.f32 0.5, %v2353_v63  ;;  %3121 = vmatmul.msk.bf16.gmra.mxu2 %vm683_vm1, %v2401_v55  ;;  %v2378_v17 = vmul.f32 %v4484_v1, %v2367_v61 }
 0x84b   : > { %v2355_v37 = vsub.f32 1.5, %v2354_v6  ;;  %v2389_v54 = vadd.f32 %v4490_v34, %v2378_v17 }
 0x84d   : > { %v2356_v10 = vmul.f32 %v3370_v12, %v2355_v37  ;;  %v4548_v21 = vadd.f32 %v2389_v54, %v661_v58 }
 0x84f   : > { %v2360_v43 = vsel %vm2359_vm9, %v3370_v12, %v2356_v10 }
 0x850   : > { %v2368_v14 = vmul.f32 %v2360_v43, %v4476_v60  ;;  %v4558_v60 = vld [vmem:[%s4762_s11] ss:$0 sm:$0xff] }
 0x852   : > { %v2379_v31 = vmul.f32 %v4484_v1, %v2368_v14  ;;  %v3154_v1 = vld [vmem:[%s4763_s12 + $0x18] sm:$0xff] }
 0x853   : > { %2593 = vmatpush.bf16.msrb.mxu3 %v3154_v1 }
 0x854   : > { %v2390_v38 = vadd.f32 %v4490_v34, %v2379_v31 }
 0x856   : > { %v4550_v50 = vadd.f32 %v2390_v38, %v662_v57 }
 0x857   : > { %2594 = vmatpush.bf16.msrb.mxu3 %v3153_v35 }
 0x858   : > { %v2402_v2 = vpack.c.bf16 %v4550_v50, %v4548_v21 }
 0x85a   : > { %3122 = vmatmul.msk.bf16.gmra.mxu2 %vm683_vm1, %v2402_v2 }
 0x85b   : > { %2595 = vmatpush.bf16.msrb.mxu3 %v3152_v28 }
 0x85f   : > { %2596 = vmatpush.bf16.msrb.mxu3 %v3151_v11 }
 0x862   : > { %v2444_v32 = vpop.f32.mrf.mxu2 }
 0x863   : > { %v2445_v34 = vadd.f32 %v4558_v60, %v2444_v32 }
 0x865   : > { %v2464_v5 = vmul.f32 %v2445_v34, %v2445_v34 }
 0x867   : > { %v2472_v39 = vmul.f32 %v2464_v5, %v2445_v34 }
 0x869   : > { %v2480_v24 = vmul.f32 0.044715, %v2472_v39 }
 0x86a   : > { %v2446_v44 = vpop.f32.mrf.mxu2 }
 0x86b   : > { %v2488_v20 = vadd.f32 %v2480_v24, %v2445_v34  ;;  %v2447_v8 = vadd.f32 %v4558_v60, %v2446_v44 }
 0x86d   : > { %v2496_v18 = vmul.f32 0.7978846, %v2488_v20  ;;  %v2465_v26 = vmul.f32 %v2447_v8, %v2447_v8 }
 0x86f   : > { %v2473_v27 = vmul.f32 %v2465_v26, %v2447_v8  ;;  %3371 = vtanh.f32 %v2496_v18 }
 0x871   : > { %v2481_v41 = vmul.f32 0.044715, %v2473_v27 }
 0x873   : > { %v2489_v16 = vadd.f32 %v2481_v41, %v2447_v8 }
 0x875   : > { %v2497_v36 = vmul.f32 0.7978846, %v2489_v16  ;;  %v3372_v7 = vpop.eup %3371 }
 0x876   : > { %v2512_v29 = vadd.f32 1.0, %v3372_v7 }
 0x877   : > { %3373 = vtanh.f32 %v2497_v36 }
 0x878   : > { %v2520_v3 = vmul.f32 0.5, %v2512_v29 }
 0x87a   : > { %v2528_v22 = vmul.f32 %v2520_v3, %v2445_v34 }
 0x87d   : > { %v3374_v9 = vpop.eup %3373 }
 0x87e   : > { %v2513_v30 = vadd.f32 1.0, %v3374_v9 }
 0x880   : > { %v2521_v49 = vmul.f32 0.5, %v2513_v30 }
 0x882   : > { %v2529_v62 = vmul.f32 %v2521_v49, %v2447_v8 }
 0x884   : > { %v2536_v59 = vpack.c.bf16 %v2529_v62, %v2528_v22 }
 0x886   : > { %3139 = vmatmul.msk.bf16.vlgmr.msrb.gmra.mxu3 %vm2576_vm10, %v2536_v59 }
 0x893   : > { %v2449_v4 = vpop.f32.mrf.mxu2 }
 0x894   : > { %v2450_v23 = vadd.f32 %v4558_v60, %v2449_v4 }
 0x896   : > { %v2466_v40 = vmul.f32 %v2450_v23, %v2450_v23 }
 0x898   : > { %v2474_v25 = vmul.f32 %v2466_v40, %v2450_v23 }
 0x89a   : > { %v2482_v42 = vmul.f32 0.044715, %v2474_v25 }
 0x89b   : > { %v2451_v15 = vpop.f32.mrf.mxu2 }
 0x89c   : > { %v2490_v12 = vadd.f32 %v2482_v42, %v2450_v23  ;;  %v2452_v33 = vadd.f32 %v4558_v60, %v2451_v15 }
 0x89e   : > { %v2498_v51 = vmul.f32 0.7978846, %v2490_v12  ;;  %v2467_v47 = vmul.f32 %v2452_v33, %v2452_v33 }
 0x8a0   : > { %v2475_v46 = vmul.f32 %v2467_v47, %v2452_v33  ;;  %3375 = vtanh.f32 %v2498_v51 }
 0x8a2   : > { %v2483_v63 = vmul.f32 0.044715, %v2475_v46 }
 0x8a4   : > { %v2491_v55 = vadd.f32 %v2483_v63, %v2452_v33 }
 0x8a6   : > { %v2499_v6 = vmul.f32 0.7978846, %v2491_v55  ;;  %v3376_v61 = vpop.eup %3375 }
 0x8a7   : > { %v2514_v37 = vadd.f32 1.0, %v3376_v61 }
 0x8a8   : > { %3377 = vtanh.f32 %v2499_v6 }
 0x8a9   : > { %v2522_v43 = vmul.f32 0.5, %v2514_v37 }
 0x8ab   : > { %v2530_v56 = vmul.f32 %v2522_v43, %v2450_v23 }
 0x8ae   : > { %v3378_v10 = vpop.eup %3377 }
 0x8af   : > { %v2515_v17 = vadd.f32 1.0, %v3378_v10  ;;  %v3222_v10 = vld [vmem:[%s4764_s13] ss:$0 sm:$0xff] }
 0x8b1   : > { %v2523_v14 = vmul.f32 0.5, %v2515_v17 }
 0x8b3   : > { %v2531_v58 = vmul.f32 %v2523_v14, %v2452_v33 }
 0x8b5   : > { %v2537_v57 = vpack.c.bf16 %v2531_v58, %v2530_v56 }
 0x8b7   : > { %3140 = vmatmul.msk.bf16.gmra.mxu3 %vm2576_vm10, %v2537_v57 }
 0x8cc   : > { %v2454_v31 = vpop.f32.mrf.mxu2 }
 0x8cd   : > { %v2455_v54 = vadd.f32 %v4558_v60, %v2454_v31 }
 0x8cf   : > { %v2468_v38 = vmul.f32 %v2455_v54, %v2455_v54 }
 0x8d1   : > { %v2476_v2 = vmul.f32 %v2468_v38, %v2455_v54 }
 0x8d3   : > { %v2484_v1 = vmul.f32 0.044715, %v2476_v2 }
 0x8d4   : > { %v2456_v32 = vpop.f32.mrf.mxu2 }
 0x8d5   : > { %v2492_v34 = vadd.f32 %v2484_v1, %v2455_v54  ;;  %v2457_v35 = vadd.f32 %v4558_v60, %v2456_v32 }
 0x8d7   : > { %v2500_v5 = vmul.f32 0.7978846, %v2492_v34  ;;  %v2469_v39 = vmul.f32 %v2457_v35, %v2457_v35 }
 0x8d9   : > { %v2477_v28 = vmul.f32 %v2469_v39, %v2457_v35  ;;  %3379 = vtanh.f32 %v2500_v5 }
 0x8db   : > { %v2485_v24 = vmul.f32 0.044715, %v2477_v28 }
 0x8dd   : > { %v2459_v44 = vpop.f32.mrf.mxu2  ;;  %v2493_v20 = vadd.f32 %v2485_v24, %v2457_v35 }
 0x8de   : > { %v2460_v8 = vadd.f32 %v4558_v60, %v2459_v44 }
 0x8df   : > { %v2501_v11 = vmul.f32 0.7978846, %v2493_v20  ;;  %v3380_v26 = vpop.eup %3379 }
 0x8e0   : > { %v2470_v18 = vmul.f32 %v2460_v8, %v2460_v8  ;;  %v2516_v36 = vadd.f32 1.0, %v3380_v26 }
 0x8e1   : > { %3381 = vtanh.f32 %v2501_v11 }
 0x8e2   : > { %v2478_v27 = vmul.f32 %v2470_v18, %v2460_v8  ;;  %v2524_v22 = vmul.f32 0.5, %v2516_v36 }
 0x8e4   : > { %v2486_v41 = vmul.f32 0.044715, %v2478_v27  ;;  %v2532_v23 = vmul.f32 %v2524_v22, %v2455_v54 }
 0x8e5   : > { %v2461_v16 = vpop.f32.mrf.mxu2 }
 0x8e6   : > { %v2494_v7 = vadd.f32 %v2486_v41, %v2460_v8  ;;  %v2462_v29 = vadd.f32 %v4558_v60, %v2461_v16 }
 0x8e7   : > { %v3382_v9 = vpop.eup %3381 }
 0x8e8   : > { %v2502_v3 = vmul.f32 0.7978846, %v2494_v7  ;;  %v2471_v30 = vmul.f32 %v2462_v29, %v2462_v29  ;;  %v2517_v49 = vadd.f32 1.0, %v3382_v9 }
 0x8ea   : > { %v2479_v62 = vmul.f32 %v2471_v30, %v2462_v29  ;;  %v2525_v59 = vmul.f32 0.5, %v2517_v49  ;;  %3383 = vtanh.f32 %v2502_v3 }
 0x8ec   : > { %v2487_v4 = vmul.f32 0.044715, %v2479_v62  ;;  %v2533_v40 = vmul.f32 %v2525_v59, %v2457_v35 }
 0x8ee   : > { %v2495_v25 = vadd.f32 %v2487_v4, %v2462_v29  ;;  %v2538_v42 = vpack.c.bf16 %v2533_v40, %v2532_v23 }
 0x8f0   : > { %v2503_v15 = vmul.f32 0.7978846, %v2495_v25  ;;  %3141 = vmatmul.msk.bf16.gmra.mxu3 %vm2576_vm10, %v2538_v42  ;;  %v3384_v12 = vpop.eup %3383 }
 0x8f1   : > { %v2518_v33 = vadd.f32 1.0, %v3384_v12 }
 0x8f2   : > { %3385 = vtanh.f32 %v2503_v15 }
 0x8f3   : > { %v2526_v47 = vmul.f32 0.5, %v2518_v33 }
 0x8f5   : > { %v2534_v63 = vmul.f32 %v2526_v47, %v2460_v8 }
 0x8f8   : > { %v3386_v60 = vpop.eup %3385 }
 0x8f9   : > { %v2519_v51 = vadd.f32 1.0, %v3386_v60 }
 0x8fb   : > { %v2527_v46 = vmul.f32 0.5, %v2519_v51 }
 0x8fd   : > { %v2535_v55 = vmul.f32 %v2527_v46, %v2462_v29 }
 0x8ff   : > { %v2539_v6 = vpack.c.bf16 %v2535_v55, %v2534_v63 }
 0x901   : > { %3142 = vmatmul.msk.bf16.gmra.mxu3 %vm2576_vm10, %v2539_v6 }
 0x909   : > { %v2598_v61 = vpop.f32.mrf.mxu3 }
 0x90a   : > { %v2599_v31 = vadd.f32 %v3222_v10, %v2598_v61 }
 0x90c   : > { %v2620_v54 = vsel %vm683_vm1, %v2599_v31, 0.0 }
 0x911   : > { %v2600_v37 = vpop.f32.mrf.mxu3 }
 0x912   : > { %v2601_v39 = vadd.f32 %v3222_v10, %v2600_v37 }
 0x914   : > { %v2623_v20 = vsel %vm683_vm1, %v2601_v39, 0.0 }
 0x93a   : > { %v2603_v17 = vpop.f32.mrf.mxu3 }
 0x93b   : > { %v2604_v43 = vadd.f32 %v3222_v10, %v2603_v17 }
 0x93d   : > { %v2626_v14 = vsel %vm683_vm1, %v2604_v43, 0.0 }
 0x93e   : > { %2627 = vadd.xlane.f32.xlu2 %v2626_v14 }
 0x942   : > { %v2605_v56 = vpop.f32.mrf.mxu3 }
 0x943   : > { %v2606_v58 = vadd.f32 %v3222_v10, %v2605_v56 }
 0x945   : > { %v2629_v57 = vsel %vm683_vm1, %v2606_v58, 0.0 }
 0x946   : > { %2630 = vadd.xlane.f32.xlu0 %v2629_v57 }
 0x94e   : > { %2621 = vadd.xlane.f32.xlu0 %v2620_v54 }
 0x973   : > { %v2608_v38 = vpop.f32.mrf.mxu3 }
 0x974   : > { %v2609_v8 = vadd.f32 %v3222_v10, %v2608_v38 }
 0x976   : > { %v2632_v11 = vsel %vm683_vm1, %v2609_v8, 0.0 }
 0x97b   : > { %v2610_v2 = vpop.f32.mrf.mxu3 }
 0x97c   : > { %v2611_v1 = vadd.f32 %v3222_v10, %v2610_v2 }
 0x97e   : > { %v2635_v32 = vsel %vm683_vm1, %v2611_v1, 0.0 }
 0x97f   : > { %2636 = vadd.xlane.f32.xlu0 %v2635_v32 }
 0x984   : > { %v2613_v34 = vpop.f32.mrf.mxu3 }
 0x985   : > { %v2614_v35 = vadd.f32 %v3222_v10, %v2613_v34 }
 0x987   : > { %v2638_v5 = vsel %vm683_vm1, %v2614_v35, 0.0 }
 0x988   : > { %2639 = vadd.xlane.f32.xlu1 %v2638_v5 }
 0x98c   : > { %v2615_v28 = vpop.f32.mrf.mxu3 }
 0x98d   : > { %v2616_v24 = vadd.f32 %v3222_v10, %v2615_v28 }
 0x98f   : > { %v2641_v44 = vsel %vm683_vm1, %v2616_v24, 0.0 }
 0x990   : > { %2642 = vadd.xlane.f32.xlu2 %v2641_v44  ;;  %2624 = vadd.xlane.f32.xlu1 %v2623_v20 }
 0x998   : > { %2633 = vadd.xlane.f32.xlu2 %v2632_v11 }
 0x9b1   : > { %v2628_v18 = vpop.xlane.xlu2 %2627 }
 0x9b2   : > { %v2646_v26 = vmul.f32 %v2628_v18, %v4417_v53 }
 0x9b4   : > { %v4596_v27 = vsub.f32 %v2604_v43, %v2646_v26 }
 0x9b6   : > { %v2662_v41 = vmul.f32 %v4596_v27, %v4596_v27 }
 0x9b8   : > { %v2674_v16 = vsel %vm683_vm1, %v2662_v41, 0.0  ;;  %v4649_v41 = vld [vmem:[%s4765_s14] ss:$0 sm:$0xff] }
 0x9b9   : > { %v2631_v36 = vpop.xlane.xlu0 %2630  ;;  %2675 = vadd.xlane.f32.xlu1 %v2674_v16 }
 0x9ba   : > { %v2647_v7 = vmul.f32 %v2631_v36, %v4417_v53 }
 0x9bc   : > { %v4602_v29 = vsub.f32 %v2606_v58, %v2647_v7  ;;  %v4654_v7 = vld [vmem:[%s4766_s15] ss:$0 sm:$0xff] }
 0x9be   : > { %v2663_v9 = vmul.f32 %v4602_v29, %v4602_v29 }
 0x9c0   : > { %v2677_v3 = vsel %vm683_vm1, %v2663_v9, 0.0 }
 0x9c1   : > { %v2622_v30 = vpop.xlane.xlu0 %2621  ;;  %2678 = vadd.xlane.f32.xlu2 %v2677_v3 }
 0x9c2   : > { %v2644_v49 = vmul.f32 %v2622_v30, %v4417_v53 }
 0x9c4   : > { %v4608_v22 = vsub.f32 %v2599_v31, %v2644_v49 }
 0x9c6   : > { %v2660_v62 = vmul.f32 %v4608_v22, %v4608_v22 }
 0x9c8   : > { %v2668_v59 = vsel %vm683_vm1, %v2660_v62, 0.0 }
 0x9c9   : > { %2669 = vadd.xlane.f32.xlu2 %v2668_v59 }
 0x9f2   : > { %v2637_v4 = vpop.xlane.xlu0 %2636 }
 0x9f3   : > { %v2649_v23 = vmul.f32 %v2637_v4, %v4417_v53 }
 0x9f5   : > { %v4614_v40 = vsub.f32 %v2611_v1, %v2649_v23 }
 0x9f7   : > { %v2665_v25 = vmul.f32 %v4614_v40, %v4614_v40 }
 0x9f9   : > { %v2683_v42 = vsel %vm683_vm1, %v2665_v25, 0.0 }
 0x9fa   : > { %2684 = vadd.xlane.f32.xlu2 %v2683_v42 }
 0x9fb   : > { %v2640_v15 = vpop.xlane.xlu1 %2639 }
 0x9fc   : > { %v2650_v12 = vmul.f32 %v2640_v15, %v4417_v53 }
 0x9fe   : > { %v4620_v33 = vsub.f32 %v2614_v35, %v2650_v12 }
 0xa00   : > { %v2666_v60 = vmul.f32 %v4620_v33, %v4620_v33 }
 0xa02   : > { %v2686_v51 = vsel %vm683_vm1, %v2666_v60, 0.0 }
 0xa03   : > { %v2643_v47 = vpop.xlane.xlu2 %2642  ;;  %2687 = vadd.xlane.f32.xlu0 %v2686_v51  ;;  %v2625_v46 = vpop.xlane.xlu1 %2624 }
 0xa04   : > { %v2651_v63 = vmul.f32 %v2643_v47, %v4417_v53  ;;  %v2645_v55 = vmul.f32 %v2625_v46, %v4417_v53 }
 0xa06   : > { %v4627_v6 = vsub.f32 %v2616_v24, %v2651_v63  ;;  %v4629_v61 = vsub.f32 %v2601_v39, %v2645_v55 }
 0xa08   : > { %v2667_v37 = vmul.f32 %v4627_v6, %v4627_v6  ;;  %v2661_v10 = vmul.f32 %v4629_v61, %v4629_v61 }
 0xa0a   : > { %v2689_v17 = vsel %vm683_vm1, %v2667_v37, 0.0  ;;  %v2671_v43 = vsel %vm683_vm1, %v2661_v10, 0.0 }
 0xa0b   : > { %v2634_v14 = vpop.xlane.xlu2 %2633  ;;  %2690 = vadd.xlane.f32.xlu1 %v2689_v17  ;;  %2672 = vadd.xlane.f32.xlu0 %v2671_v43 }
 0xa0c   : > { %v2648_v56 = vmul.f32 %v2634_v14, %v4417_v53 }
 0xa0e   : > { %v4638_v58 = vsub.f32 %v2609_v8, %v2648_v56 }
 0xa10   : > { %v2664_v57 = vmul.f32 %v4638_v58, %v4638_v58 }
 0xa12   : > { %v2680_v31 = vsel %vm683_vm1, %v2664_v57, 0.0 }
 0xa13   : > { %2681 = vadd.xlane.f32.xlu1 %v2680_v31 }
 0xa2c   : > { %v2676_v54 = vpop.xlane.xlu1 %2675 }
 0xa2d   : > { %v2694_v38 = vmul.f32 %v2676_v54, %v4417_v53 }
 0xa2f   : > { %v2702_v2 = vadd.f32 1e-05, %v2694_v38 }
 0xa31   : > { %3387 = vrsqrt.f32 %v2702_v2  ;;  %vm2734_vm11 = vweird.f32 %v2702_v2 }
 0xa34   : > { %v2679_v1 = vpop.xlane.xlu2 %2678 }
 0xa35   : > { %v2695_v32 = vmul.f32 %v2679_v1, %v4417_v53 }
 0xa37   : > { %v3388_v34 = vpop.eup %3387  ;;  %v2703_v35 = vadd.f32 1e-05, %v2695_v32 }
 0xa38   : > { %v2729_v5 = vmul.f32 %v3388_v34, %v2702_v2  ;;  %vm2735_vm1 = vweird.f32 %v3388_v34 }
 0xa39   : > { %3389 = vrsqrt.f32 %v2703_v35  ;;  %vm2736_vm12 = vmor %vm2734_vm11, %vm2735_vm1  ;;  %vm2744_vm14 = vweird.f32 %v2703_v35 }
 0xa3a   : > { %v2730_v39 = vmul.f32 %v3388_v34, %v2729_v5 }
 0xa3c   : > { %v2731_v28 = vmul.f32 0.5, %v2730_v39  ;;  %v2670_v24 = vpop.xlane.xlu2 %2669 }
 0xa3d   : > { %v2692_v44 = vmul.f32 %v2670_v24, %v4417_v53 }
 0xa3e   : > { %v2732_v20 = vsub.f32 1.5, %v2731_v28 }
 0xa3f   : > { %v3390_v8 = vpop.eup %3389  ;;  %v2700_v11 = vadd.f32 1e-05, %v2692_v44 }
 0xa40   : > { %v2733_v18 = vmul.f32 %v3388_v34, %v2732_v20  ;;  %v2739_v26 = vmul.f32 %v3390_v8, %v2703_v35  ;;  %vm2745_vm13 = vweird.f32 %v3390_v8 }
 0xa41   : > { %3391 = vrsqrt.f32 %v2700_v11  ;;  %vm2746_vm2 = vmor %vm2744_vm14, %vm2745_vm13  ;;  %vm2714_vm4 = vweird.f32 %v2700_v11 }
 0xa42   : > { %v2737_v16 = vsel %vm2736_vm12, %v3388_v34, %v2733_v18  ;;  %v2740_v36 = vmul.f32 %v3390_v8, %v2739_v26 }
 0xa43   : > { %v2790_v9 = vmul.f32 %v2737_v16, %v4596_v27 }
 0xa44   : > { %v2741_v3 = vmul.f32 0.5, %v2740_v36 }
 0xa45   : > { %v2801_v30 = vmul.f32 %v4649_v41, %v2790_v9 }
 0xa46   : > { %v2742_v49 = vsub.f32 1.5, %v2741_v3 }
 0xa47   : > { %v3392_v62 = vpop.eup %3391  ;;  %v2812_v59 = vadd.f32 %v4654_v7, %v2801_v30 }
 0xa48   : > { %v2743_v4 = vmul.f32 %v3390_v8, %v2742_v49  ;;  %v2709_v23 = vmul.f32 %v3392_v62, %v2700_v11  ;;  %vm2715_vm3 = vweird.f32 %v3392_v62 }
 0xa49   : > { %v2820_v25 = vadd.f32 %v2812_v59, %v4516_v48  ;;  %vm2716_vm5 = vmor %vm2714_vm4, %vm2715_vm3 }
 0xa4a   : > { %v2747_v42 = vsel %vm2746_vm2, %v3390_v8, %v2743_v4  ;;  %v2710_v15 = vmul.f32 %v3392_v62, %v2709_v23 }
 0xa4b   : > { %v2828_v12 = vpack.c.bf16 %v2820_v25, %v2820_v25  ;;  %v2791_v60 = vmul.f32 %v2747_v42, %v4602_v29 }
 0xa4c   : > { %v2711_v27 = vmul.f32 0.5, %v2710_v15 }
 0xa4d   : > { %v2854_v51 = vrot.slane %v2828_v12, 2  ;;  %v2802_v47 = vmul.f32 %v4649_v41, %v2791_v60 }
 0xa4e   : > { %v2712_v46 = vsub.f32 1.5, %v2711_v27 }
 0xa4f   : > { %v2858_v63 = vsel %vm2838_vm15, %v2828_v12, %v2854_v51  ;;  %v2859_v55 = vsel %vm2842_vm0, %v2828_v12, %v2854_v51  ;;  %v2813_v48 = vadd.f32 %v4654_v7, %v2802_v47 }
 0xa50   : > { %v2861_v37 = vrot.slane %v2859_v55, 2  ;;  %2869 = vst [vmem:[#allocation1 + $0x1] ss:$4 sm:$0xff] %v2858_v63  ;;  %v2713_v10 = vmul.f32 %v3392_v62, %v2712_v46 }
 0xa51   : > { %v2821_v29 = vadd.f32 %v2813_v48, %v4518_v19 }
 0xa52   : > { %2873 = vst [vmem:[#allocation1 + $0x21] ss:$4 sm:$0xff] %v2861_v37  ;;  %v2717_v17 = vsel %vm2716_vm5, %v3392_v62, %v2713_v10 }
 0xa53   : > { %v2829_v43 = vpack.c.bf16 %v2821_v29, %v2821_v29  ;;  %v2788_v14 = vmul.f32 %v2717_v17, %v4608_v22 }
 0xa55   : > { %v2855_v56 = vrot.slane %v2829_v43, 2  ;;  %v2799_v57 = vmul.f32 %v4649_v41, %v2788_v14 }
 0xa57   : > { %v2864_v31 = vsel %vm2838_vm15, %v2829_v43, %v2855_v56  ;;  %v2865_v54 = vsel %vm2842_vm0, %v2829_v43, %v2855_v56  ;;  %v2810_v38 = vadd.f32 %v4654_v7, %v2799_v57  ;;  %v2870_v2 = vld.sshfl [vmem:[#allocation1] sm:$0xff pattern:$0x73625140] }
 0xa58   : > { %v2867_v1 = vrot.slane %v2865_v54, 2  ;;  %2875 = vst [vmem:[#allocation1 + $0x1] ss:$4 sm:$0xff] %v2864_v31 }
 0xa59   : > { %v2818_v19 = vadd.f32 %v2810_v38, %v4499_v13  ;;  %v2874_v32 = vld.sshfl [vmem:[#allocation1 + $0x20] sm:$0xff pattern:$0x73625140] }
 0xa5a   : > { %2878 = vst [vmem:[#allocation1 + $0x21] ss:$4 sm:$0xff] %v2867_v1 }
 0xa5b   : > { %v2826_v34 = vpack.c.bf16 %v2818_v19, %v2818_v19 }
 0xa5d   : > { %v2836_v35 = vrot.slane %v2826_v34, 2 }
 0xa5f   : > { %v2841_v22 = vsel %vm2838_vm15, %v2826_v34, %v2836_v35  ;;  %v2843_v5 = vsel %vm2842_vm0, %v2826_v34, %v2836_v35 }
 0xa60   : > { %v2845_v39 = vrot.slane %v2843_v5, 2  ;;  %v2880_v28 = vsel %vm2838_vm15, %v2841_v22, %v2870_v2 }
 0xa61   : > { %v2946_v13 = vrot.slane %v2880_v28, 3  ;;  %v2954_v24 = vrot.slane %v2880_v28, 7 }
 0xa62   : > { %v2882_v44 = vsel %vm2838_vm15, %v2845_v39, %v2874_v32 }
 0xa63   : > { %v2947_v20 = vrot.slane %v2882_v44, 3  ;;  %v2955_v8 = vrot.slane %v2882_v44, 7  ;;  %v2971_v11 = vsel %vm2960_vm6, %v2946_v13, %v2954_v24 }
 0xa64   : > { %2996 = vst.msk [vmem:[%s4680_s30 + $0x8] sm:$0xf] %vm2993_vm7, %v2971_v11 }
 0xa65   : > { %v2975_v18 = vsel %vm2960_vm6, %v2947_v20, %v2955_v8 }
 0xa66   : > { %2997 = vst.msk [vmem:[%s4680_s30 + $0xc] sm:$0xf] %vm2993_vm7, %v2975_v18 }
 0xa6d   : > { %v2685_v26 = vpop.xlane.xlu2 %2684 }
 0xa6e   : > { %v2697_v16 = vmul.f32 %v2685_v26, %v4417_v53 }
 0xa70   : > { %v2705_v36 = vadd.f32 1e-05, %v2697_v16 }
 0xa72   : > { %3393 = vrsqrt.f32 %v2705_v36  ;;  %vm2764_vm1 = vweird.f32 %v2705_v36 }
 0xa76   : > { %v2688_v9 = vpop.xlane.xlu0 %2687 }
 0xa77   : > { %v2698_v3 = vmul.f32 %v2688_v9, %v4417_v53 }
 0xa78   : > { %v3394_v30 = vpop.eup %3393 }
 0xa79   : > { %v2706_v49 = vadd.f32 1e-05, %v2698_v3  ;;  %v2759_v62 = vmul.f32 %v3394_v30, %v2705_v36  ;;  %vm2765_vm9 = vweird.f32 %v3394_v30 }
 0xa7a   : > { %vm2766_vm12 = vmor %vm2764_vm1, %vm2765_vm9 }
 0xa7b   : > { %3395 = vrsqrt.f32 %v2706_v49  ;;  %v2760_v59 = vmul.f32 %v3394_v30, %v2759_v62  ;;  %vm2774_vm10 = vweird.f32 %v2706_v49 }
 0xa7d   : > { %v2761_v12 = vmul.f32 0.5, %v2760_v59 }
 0xa7e   : > { %v2673_v4 = vpop.xlane.xlu0 %2672  ;;  %v2691_v23 = vpop.xlane.xlu1 %2690 }
 0xa7f   : > { %v2693_v25 = vmul.f32 %v2673_v4, %v4417_v53  ;;  %v2699_v42 = vmul.f32 %v2691_v23, %v4417_v53  ;;  %v2762_v46 = vsub.f32 1.5, %v2761_v12 }
 0xa81   : > { %v3396_v15 = vpop.eup %3395  ;;  %v2701_v60 = vadd.f32 1e-05, %v2693_v25  ;;  %v2707_v27 = vadd.f32 1e-05, %v2699_v42  ;;  %v2763_v29 = vmul.f32 %v3394_v30, %v2762_v46 }
 0xa82   : > { %v2769_v51 = vmul.f32 %v3396_v15, %v2706_v49  ;;  %vm2775_vm8 = vweird.f32 %v3396_v15  ;;  %v2879_v42 = vld.sshfl [vmem:[#allocation1 + $0x20] sm:$0xff pattern:$0x73625140] }
 0xa83   : > { %3397 = vrsqrt.f32 %v2701_v60  ;;  %vm2776_vm11 = vmor %vm2774_vm10, %vm2775_vm8  ;;  %v2767_v38 = vsel %vm2766_vm12, %v3394_v30, %v2763_v29  ;;  %vm2724_vm2 = vweird.f32 %v2701_v60  ;;  %vm2784_vm4 = vweird.f32 %v2707_v27 }
 0xa84   : > { %v2770_v47 = vmul.f32 %v3396_v15, %v2769_v51  ;;  %3399 = vrsqrt.f32 %v2707_v27  ;;  %v2793_v34 = vmul.f32 %v2767_v38, %v4614_v40 }
 0xa86   : > { %v2771_v63 = vmul.f32 0.5, %v2770_v47  ;;  %v2682_v55 = vpop.xlane.xlu1 %2681  ;;  %v2804_v44 = vmul.f32 %v4649_v41, %v2793_v34 }
 0xa87   : > { %v2696_v48 = vmul.f32 %v2682_v55, %v4417_v53 }
 0xa88   : > { %v2772_v37 = vsub.f32 1.5, %v2771_v63 }
 0xa89   : > { %v3398_v10 = vpop.eup %3397  ;;  %v2704_v17 = vadd.f32 1e-05, %v2696_v48 }
 0xa8a   : > { %v3400_v43 = vpop.eup %3399  ;;  %v2773_v14 = vmul.f32 %v3396_v15, %v2772_v37  ;;  %v2719_v56 = vmul.f32 %v3398_v10, %v2701_v60  ;;  %vm2725_vm13 = vweird.f32 %v3398_v10 }
 0xa8b   : > { %v2779_v57 = vmul.f32 %v3400_v43, %v2707_v27  ;;  %3401 = vrsqrt.f32 %v2704_v17  ;;  %vm2785_vm14 = vweird.f32 %v3400_v43  ;;  %vm2726_vm3 = vmor %vm2724_vm2, %vm2725_vm13  ;;  %vm2754_vm9 = vweird.f32 %v2704_v17 }
 0xa8c   : > { %v2777_v31 = vsel %vm2776_vm11, %v3396_v15, %v2773_v14  ;;  %v2720_v54 = vmul.f32 %v3398_v10, %v2719_v56  ;;  %vm2786_vm5 = vmor %vm2784_vm4, %vm2785_vm14 }
 0xa8d   : > { %v2794_v53 = vmul.f32 %v2777_v31, %v4620_v33  ;;  %v2780_v2 = vmul.f32 %v3400_v43, %v2779_v57 }
 0xa8e   : > { %v2721_v1 = vmul.f32 0.5, %v2720_v54 }
 0xa8f   : > { %v2805_v19 = vmul.f32 %v4649_v41, %v2794_v53  ;;  %v2781_v32 = vmul.f32 0.5, %v2780_v2 }
 0xa90   : > { %v2722_v35 = vsub.f32 1.5, %v2721_v1 }
 0xa91   : > { %v3402_v22 = vpop.eup %3401  ;;  %v2816_v5 = vadd.f32 %v4654_v7, %v2805_v19  ;;  %v2782_v39 = vsub.f32 1.5, %v2781_v32 }
 0xa92   : > { %v2723_v28 = vmul.f32 %v3398_v10, %v2722_v35  ;;  %v2749_v13 = vmul.f32 %v3402_v22, %v2704_v17  ;;  %vm2755_vm8 = vweird.f32 %v3402_v22 }
 0xa93   : > { %v2824_v24 = vadd.f32 %v2816_v5, %v4548_v21  ;;  %v2783_v33 = vmul.f32 %v3400_v43, %v2782_v39  ;;  %v2815_v21 = vadd.f32 %v4654_v7, %v2804_v44  ;;  %vm2756_vm10 = vmor %vm2754_vm9, %vm2755_vm8 }
 0xa94   : > { %v2727_v20 = vsel %vm2726_vm3, %v3398_v10, %v2723_v28  ;;  %v2750_v40 = vmul.f32 %v3402_v22, %v2749_v13 }
 0xa95   : > { %v2832_v8 = vpack.c.bf16 %v2824_v24, %v2824_v24  ;;  %v2789_v11 = vmul.f32 %v2727_v20, %v4629_v61  ;;  %v2787_v18 = vsel %vm2786_vm5, %v3400_v43, %v2783_v33  ;;  %v2876_v61 = vld.sshfl [vmem:[#allocation1] sm:$0xff pattern:$0x73625140]  ;;  %v2823_v15 = vadd.f32 %v2815_v21, %v4537_v52 }
 0xa96   : > { %v2795_v26 = vmul.f32 %v2787_v18, %v4627_v6  ;;  %v2751_v16 = vmul.f32 0.5, %v2750_v40 }
 0xa97   : > { %v2904_v36 = vrot.slane %v2832_v8, 2  ;;  %v2800_v9 = vmul.f32 %v4649_v41, %v2789_v11  ;;  %v2831_v55 = vpack.c.bf16 %v2823_v15, %v2823_v15 }
 0xa98   : > { %v2806_v3 = vmul.f32 %v4649_v41, %v2795_v26  ;;  %v2752_v30 = vsub.f32 1.5, %v2751_v16 }
 0xa99   : > { %v2908_v49 = vsel %vm2838_vm15, %v2832_v8, %v2904_v36  ;;  %v2909_v62 = vsel %vm2842_vm0, %v2832_v8, %v2904_v36  ;;  %v2811_v59 = vadd.f32 %v4654_v7, %v2800_v9  ;;  %v2889_v31 = vrot.slane %v2831_v55, 2 }
 0xa9a   : > { %v2911_v4 = vrot.slane %v2909_v62, 2  ;;  %2919 = vst [vmem:[#allocation1 + $0x1] ss:$4 sm:$0xff] %v2908_v49  ;;  %v2817_v6 = vadd.f32 %v4654_v7, %v2806_v3  ;;  %v2753_v23 = vmul.f32 %v3402_v22, %v2752_v30 }
 0xa9b   : > { %v2819_v25 = vadd.f32 %v2811_v59, %v4501_v0  ;;  %v2899_v32 = vsel %vm2842_vm0, %v2831_v55, %v2889_v31  ;;  %v2898_v5 = vsel %vm2838_vm15, %v2831_v55, %v2889_v31 }
 0xa9c   : > { %2923 = vst [vmem:[#allocation1 + $0x21] ss:$4 sm:$0xff] %v2911_v4  ;;  %v2825_v12 = vadd.f32 %v2817_v6, %v4550_v50  ;;  %v2757_v60 = vsel %vm2756_vm10, %v3402_v22, %v2753_v23  ;;  %v2901_v39 = vrot.slane %v2899_v32, 2 }
 0xa9d   : > { %v2827_v27 = vpack.c.bf16 %v2819_v25, %v2819_v25  ;;  %v2792_v51 = vmul.f32 %v2757_v60, %v4638_v58 }
 0xa9e   : > { %v2833_v47 = vpack.c.bf16 %v2825_v12, %v2825_v12 }
 0xa9f   : > { %v2837_v46 = vrot.slane %v2827_v27, 2  ;;  %v2803_v63 = vmul.f32 %v4649_v41, %v2792_v51 }
 0xaa0   : > { %v2905_v48 = vrot.slane %v2833_v47, 2 }
 0xaa1   : > { %v2848_v37 = vsel %vm2838_vm15, %v2827_v27, %v2837_v46  ;;  %v2849_v0 = vsel %vm2842_vm0, %v2827_v27, %v2837_v46  ;;  %v2920_v10 = vld.sshfl [vmem:[#allocation1] sm:$0xff pattern:$0x73625140]  ;;  %v2814_v52 = vadd.f32 %v4654_v7, %v2803_v63 }
 0xaa2   : > { %v2851_v29 = vrot.slane %v2849_v0, 2  ;;  %v2883_v50 = vsel %vm2838_vm15, %v2848_v37, %v2876_v61  ;;  %v2914_v17 = vsel %vm2838_vm15, %v2833_v47, %v2905_v48  ;;  %v2915_v58 = vsel %vm2842_vm0, %v2833_v47, %v2905_v48 }
 0xaa3   : > { %v2948_v43 = vrot.slane %v2883_v50, 3  ;;  %v2956_v14 = vrot.slane %v2883_v50, 7  ;;  %v2917_v41 = vrot.slane %v2915_v58, 2  ;;  %v2924_v56 = vld.sshfl [vmem:[#allocation1 + $0x20] sm:$0xff pattern:$0x73625140]  ;;  %v2822_v57 = vadd.f32 %v2814_v52, %v4535_v45 }
 0xaa4   : > { %v2885_v54 = vsel %vm2838_vm15, %v2851_v29, %v2879_v42  ;;  %2925 = vst [vmem:[#allocation1 + $0x1] ss:$4 sm:$0xff] %v2914_v17 }
 0xaa5   : > { %v2949_v7 = vrot.slane %v2885_v54, 3  ;;  %v2957_v38 = vrot.slane %v2885_v54, 7  ;;  %v2979_v53 = vsel %vm2960_vm6, %v2948_v43, %v2956_v14  ;;  %2928 = vst [vmem:[#allocation1 + $0x21] ss:$4 sm:$0xff] %v2917_v41  ;;  %v2830_v2 = vpack.c.bf16 %v2822_v57, %v2822_v57 }
 0xaa6   : > { %2998 = vst.msk [vmem:[%s4680_s30 + $0x10] sm:$0xf] %vm2993_vm7, %v2979_v53 }
 0xaa7   : > { %v2983_v1 = vsel %vm2960_vm6, %v2949_v7, %v2957_v38  ;;  %v2888_v19 = vrot.slane %v2830_v2, 2 }
 0xaa8   : > { %2999 = vst.msk [vmem:[%s4680_s30 + $0x14] sm:$0xf] %vm2993_vm7, %v2983_v1 }
 0xaa9   : > { %v2892_v45 = vsel %vm2838_vm15, %v2830_v2, %v2888_v19  ;;  %v2893_v34 = vsel %vm2842_vm0, %v2830_v2, %v2888_v19 }
 0xaaa   : > { %v2895_v35 = vrot.slane %v2893_v34, 2  ;;  %v2930_v22 = vsel %vm2838_vm15, %v2892_v45, %v2920_v10 }
 0xaab   : > { %v2926_v28 = vld.sshfl [vmem:[#allocation1] sm:$0xff pattern:$0x73625140]  ;;  %v2950_v13 = vrot.slane %v2930_v22, 3  ;;  %v2958_v24 = vrot.slane %v2930_v22, 7 }
 0xaac   : > { %v2929_v33 = vld.sshfl [vmem:[#allocation1 + $0x20] sm:$0xff pattern:$0x73625140]  ;;  %v2933_v44 = vsel %vm2838_vm15, %v2898_v5, %v2926_v28  ;;  %v2932_v20 = vsel %vm2838_vm15, %v2895_v35, %v2924_v56 }
 0xaad   : > { %v2935_v40 = vsel %vm2838_vm15, %v2901_v39, %v2929_v33  ;;  %v2944_v8 = vrot.slane %v2933_v44, 3  ;;  %v2952_v11 = vrot.slane %v2933_v44, 7  ;;  %v2951_v18 = vrot.slane %v2932_v20, 3 }
 0xaae   : > { %v2945_v26 = vrot.slane %v2935_v40, 3  ;;  %v2953_v16 = vrot.slane %v2935_v40, 7  ;;  %v2959_v36 = vrot.slane %v2932_v20, 7  ;;  %v2987_v9 = vsel %vm2960_vm6, %v2950_v13, %v2958_v24 }
 0xaaf   : > { %v2963_v21 = vsel %vm2960_vm6, %v2944_v8, %v2952_v11  ;;  %3000 = vst.msk [vmem:[%s4680_s30 + $0x18] sm:$0xf] %vm2993_vm7, %v2987_v9 }
 0xab0   : > { %v2967_v3 = vsel %vm2960_vm6, %v2945_v26, %v2953_v16  ;;  %2994 = vst.msk [vmem:[%s4680_s30] sm:$0xf] %vm2993_vm7, %v2963_v21  ;;  %v2991_v30 = vsel %vm2960_vm6, %v2951_v18, %v2959_v36 }
 0xab1   : > { %2995 = vst.msk [vmem:[%s4680_s30 + $0x4] sm:$0xf] %vm2993_vm7, %v2967_v3 }
 0xab2   : > { %3001 = vst.msk [vmem:[%s4680_s30 + $0x1c] sm:$0xf] %vm2993_vm7, %v2991_v30 }
 0xab3 PF: > { %s26_s21 = sadd.s32 1, %s3411_s21  }
 0xab4   : > { %p23_p4 = scmp.ge.s32.totalorder %s26_s21, 4  }
 0xab6   :  { %25 = sbr.rel (!%p23_p4) target bundleno = 2 (0x2), region = 134 }

// kernel: swin_extractor_forward.11
= control target key start
LH: loop header
LB: loop body
LE: loop exit
PB: predicated region body
PF: predicated region fallthrough
CT: control target
= control target key end

     0   :  { %s2129_s21 = smov 0   ;;  %s2501_s0 = inlined_call_operand.vmem [shape: bf16[32,64], index: 0, kind: input, shape index: {}]   ;;  %s2502_s1 = inlined_call_operand.vmem [shape: bf16[64,192], index: 1, kind: input, shape index: {}]   ;;  %s2503_s2 = inlined_call_operand.vmem [shape: f32[1,192], index: 2, kind: input, shape index: {}]   ;;  %s2504_s3 = inlined_call_operand.vmem [shape: f32[1,64], index: 3, kind: input, shape index: {}]   ;;  %s2505_s4 = inlined_call_operand.vmem [shape: bf16[4,16,16], index: 4, kind: input, shape index: {}]   ;;  %s2506_s5 = inlined_call_operand.vmem [shape: bf16[1,16,16], index: 5, kind: input, shape index: {}]   ;;  %s2507_s6 = inlined_call_operand.vmem [shape: bf16[64,64], index: 6, kind: input, shape index: {}]   ;;  %s2508_s7 = inlined_call_operand.vmem [shape: f32[1,64], index: 7, kind: input, shape index: {}]   ;;  %s2509_s8 = inlined_call_operand.vmem [shape: f32[1,64], index: 8, kind: input, shape index: {}]   ;;  %s2510_s9 = inlined_call_operand.vmem [shape: f32[1,64], index: 9, kind: input, shape index: {}]   ;;  %s2511_s10 = inlined_call_operand.vmem [shape: bf16[64,128], index: 10, kind: input, shape index: {}]   ;;  %s2512_s11 = inlined_call_operand.vmem [shape: f32[1,128], index: 11, kind: input, shape index: {}]   ;;  %s2513_s12 = inlined_call_operand.vmem [shape: bf16[128,64], index: 12, kind: input, shape index: {}]   ;;  %s2514_s13 = inlined_call_operand.vmem [shape: f32[1,64], index: 13, kind: input, shape index: {}]   ;;  %s2515_s14 = inlined_call_operand.vmem [shape: f32[1,64], index: 14, kind: input, shape index: {}]   ;;  %s2516_s15 = inlined_call_operand.vmem [shape: f32[1,64], index: 15, kind: input, shape index: {}]   ;;  %s2517_s16 = inlined_call_operand.vmem [shape: bf16[32,64], index: 16, kind: output, shape index: {}]  }
   0x1   :  { %2518 = sst [smem:[#allocation2_spill]] %s2501_s0 }
   0x2 LB: > { %s1752_s22 = sadd.s32 4294967295, %s2034_s21   ;;  %p1756_p0 = scmp.ge.s32.totalorder %s2034_s21, 1  ;;  %s2034_s21 = sphi %s2129_s21, %s26_s21  }
   0x3   : > { %p463_p1 = scmp.lt.s32.totalorder %s2034_s21, 3 }
   0x5   : > { %p464_p2 = pnand %p1756_p0, %p463_p1 }
   0x6   : > { %s1757_s0 = sshll.u32 (!%p464_p2), %s1752_s22, 1  ;;  %s2519_s29 = sld [smem:[#allocation2_spill]] (!%p464_p2) }
   0x7   : > { %467 = sbr.rel (%p464_p2) target bundleno = 2771 (0xad3), region = 84  ;;  %p514_p3 = scmp.lt.s32.totalorder (!%p464_p2), %s1757_s0, 3 }
   0x8   : > { %s2036_s19 = smov (!%p464_p2), 64   ;;  %s2037_s28 = smov (!%p464_p2), 48  }
   0x9   : > { %s2038_s24 = smov (!%p464_p2), 32   ;;  %s2040_s20 = smov (!%p464_p2), 16  }
   0xa   : > { %s2041_s23 = smov (!%p464_p2), 96   ;;  %s2042_s17 = smov (!%p464_p2), 80  }
   0xc   : > { %v1791_v0 = vld [vmem:[%s2502_s1 + $0x30] sm:$0xf]  ;;  %v1886_v1 = vld [vmem:[%s2502_s1 + $0x34] sm:$0xf0]  ;;  %v1783_v2 = vld [vmem:[%s2502_s1 + $0x20] sm:$0xf] }
   0xd   : > { %v1792_v3 = vor.u32 %v1886_v1, %v1791_v0  ;;  %v1884_v4 = vld [vmem:[%s2502_s1 + $0x24] sm:$0xf0]  ;;  %v1775_v6 = vld [vmem:[%s2502_s1 + $0x10] sm:$0xf]  ;;  %v1882_v7 = vld [vmem:[%s2502_s1 + $0x14] sm:$0xf0] }
   0xe   : > { %v1784_v5 = vor.u32 %v1884_v4, %v1783_v2  ;;  %s2525_s0 = smov (!%p514_p3, %s1757_s0), 3  ;;  %v1776_v8 = vor.u32 %v1882_v7, %v1775_v6  ;;  %v1767_v9 = vld [vmem:[%s2502_s1] sm:$0xf]  ;;  %v1880_v10 = vld [vmem:[%s2502_s1 + $0x4] sm:$0xf0]  ;;  %vm589_vm0 = vcmask 523264  }
   0xf   : > { %597 = vmatpush.bf16.msra.mxu0 %v1792_v3  ;;  %s1758_s26 = sshll.u32 %s2525_s0, 2  ;;  %v1768_v11 = vor.u32 %v1880_v10, %v1767_v9  ;;  %v2179_v13 = vld [vmem:[%s2503_s2] sm:$0x3]  ;;  %vm652_vm1 = vcmask 130048  }
  0x10   : > { %s2169_s30 = scalar_lea.vmem %s2519_s29, %s1758_s26  ;;  %v540_v14 = vperm.slane %v2179_v13, 0 }
  0x11   : > { %v2172_v12 = vld [vmem:[%s2169_s30] sm:$0xff] }
  0x13   : > { %598 = vmatpush.bf16.msra.mxu0 %v1784_v5 }
  0x17   : > { %599 = vmatpush.bf16.msra.mxu0 %v1776_v8  ;;  %v2212_v8 = vld [vmem:[%s2504_s3] ss:$0 sm:$0xff] }
  0x1b   : > { %600 = vmatpush.bf16.msra.mxu0 %v1768_v11 }
  0x1e   : > { %1797 = vmatmul.msk.bf16.vlgmr.msra.gmra.mxu0 %vm589_vm0, %v2172_v12 }
  0x9b   : > { %v602_v15 = vpop.f32.mrf.mxu0 }
  0x9c   : > { %v2182_v16 = vadd.f32 %v602_v15, %v540_v14 }
  0x9e   : > { %v2186_v17 = vmul.f32 %v2182_v16, %v2182_v16 }
  0xa0   : > { %685 = vrot.lane.b32.xlu0 %v2186_v17, %s2036_s19  ;;  %v653_v18 = vsel %vm652_vm1, %v2186_v17, 0.0 }
  0xa1   : > { %654 = vadd.xlane.f32.xlu2 %v653_v18 }
  0xa3   : > { %v604_v19 = vpop.f32.mrf.mxu0 }
  0xa4   : > { %v2192_v20 = vadd.f32 %v604_v19, %v540_v14 }
  0xa6   : > { %v2196_v21 = vmul.f32 %v2192_v20, %v2192_v20 }
  0xa8   : > { %687 = vrot.lane.b32.xlu0 %v2196_v21, %s2036_s19  ;;  %v656_v22 = vsel %vm652_vm1, %v2196_v21, 0.0 }
  0xa9   : > { %657 = vadd.xlane.f32.xlu2 %v656_v22 }
 0x112   : > { %v686_v23 = vpop.permute.xlu0 %685 }
 0x113   : > { %v691_v24 = vsel %vm652_vm1, %v686_v23, 0.0 }
 0x114   : > { %692 = vadd.xlane.f32.xlu1 %v691_v24  ;;  %v655_v52 = vpop.xlane.xlu2 %654  ;;  %v1904_v24 = vld [vmem:[%s2505_s4] sm:$0xff]  }
 0x115   : > { %v659_v55 = vadd.f32 1e-12, %v655_v52 }
 0x117   : > { %vm667_vm12 = vweird.f32 %v659_v55 }
 0x11a   : > { %v688_v25 = vpop.permute.xlu0 %687 }
 0x11b   : > { %v694_v26 = vsel %vm652_vm1, %v688_v25, 0.0  ;;  %v1920_v25 = vld [vmem:[%s2506_s5] sm:$0xff]  }
 0x11c   : > { %695 = vadd.xlane.f32.xlu1 %v694_v26  ;;  %v658_v53 = vpop.xlane.xlu2 %657  ;;  %v1905_v26 = vunpack.c.l.bf16 %v1904_v24 }
 0x11d   : > { %v660_v54 = vadd.f32 1e-12, %v658_v53 }
 0x11f   : > { %vm677_vm10 = vweird.f32 %v660_v54 }
 0x187   : > { %v693_v27 = vpop.xlane.xlu1 %692 }
 0x188   : > { %v697_v28 = vadd.f32 1e-12, %v693_v27  ;;  %v2224_v27 = vunpack.c.l.bf16 %v1920_v25 }
 0x18a   : > { %1950 = vrsqrt.f32 %v697_v28  ;;  %vm705_vm3 = vweird.f32 %v697_v28 }
 0x18f   : > { %v696_v29 = vpop.xlane.xlu1 %695 }
 0x190   : > { %v1951_v30 = vpop.eup %1950  ;;  %v698_v31 = vadd.f32 1e-12, %v696_v29 }
 0x191   : > { %v700_v32 = vmul.f32 %v1951_v30, %v697_v28  ;;  %vm706_vm2 = vweird.f32 %v1951_v30 }
 0x192   : > { %1952 = vrsqrt.f32 %v698_v31  ;;  %vm707_vm4 = vmor %vm705_vm3, %vm706_vm2  ;;  %vm715_vm6 = vweird.f32 %v698_v31 }
 0x193   : > { %v701_v33 = vmul.f32 %v1951_v30, %v700_v32  ;;  %1954 = vrsqrt.f32 %v660_v54  ;;  %v1906_v32 = vunpack.c.h.bf16 %v1904_v24 }
 0x194   : > { %1956 = vrsqrt.f32 %v659_v55 }
 0x195   : > { %v702_v34 = vmul.f32 0.5, %v701_v33  ;;  %v2228_v33 = vunpack.c.h.bf16 %v1920_v25 }
 0x197   : > { %v703_v35 = vsub.f32 1.5, %v702_v34 }
 0x198   : > { %v1953_v36 = vpop.eup %1952 }
 0x199   : > { %v704_v37 = vmul.f32 %v1951_v30, %v703_v35  ;;  %v710_v38 = vmul.f32 %v1953_v36, %v698_v31  ;;  %vm716_vm5 = vweird.f32 %v1953_v36  ;;  %v1955_v56 = vpop.eup %1954 }
 0x19a   : > { %vm717_vm7 = vmor %vm715_vm6, %vm716_vm5  ;;  %v1957_v57 = vpop.eup %1956  ;;  %v672_v58 = vmul.f32 %v1955_v56, %v660_v54  ;;  %vm678_vm8 = vweird.f32 %v1955_v56 }
 0x19b   : > { %v711_v39 = vmul.f32 %v1953_v36, %v710_v38  ;;  %v708_v41 = vsel %vm707_vm4, %v1951_v30, %v704_v37  ;;  %v662_v59 = vmul.f32 %v1957_v57, %v659_v55  ;;  %vm668_vm9 = vweird.f32 %v1957_v57  ;;  %vm679_vm11 = vmor %vm677_vm10, %vm678_vm8  ;;  %v1885_v38 = vld [vmem:[%s2502_s1 + $0x34] sm:$0xf] }
 0x19c   : > { %v719_v43 = vmul.f32 %v708_v41, %v2182_v16  ;;  %v673_v60 = vmul.f32 %v1955_v56, %v672_v58  ;;  %vm669_vm13 = vmor %vm667_vm12, %vm668_vm9 }
 0x19d   : > { %v712_v40 = vmul.f32 0.5, %v711_v39  ;;  %v663_v61 = vmul.f32 %v1957_v57, %v662_v59  ;;  %v1793_v39 = vld [vmem:[%s2502_s1 + $0x38] sm:$0xf0] }
 0x19e   : > { %v728_v47 = vpack.c.bf16 %v719_v43, %v719_v43  ;;  %v674_v62 = vmul.f32 0.5, %v673_v60  ;;  %v1796_v41 = vor.u32 %v1885_v38, %v1793_v39 }
 0x19f   : > { %v713_v42 = vsub.f32 1.5, %v712_v40  ;;  %v664_v63 = vmul.f32 0.5, %v663_v61  ;;  %v1883_v40 = vld [vmem:[%s2502_s1 + $0x24] sm:$0xf] }
 0x1a0   : > { %v739_v49 = vunpack.c.l.b16 %v728_v47  ;;  %v675_v0 = vsub.f32 1.5, %v674_v62  ;;  %611 = vmatpush.bf16.msra.mxu1 %v1796_v41  ;;  %v1879_v47 = vld [vmem:[%s2502_s1 + $0x4] sm:$0xf] }
 0x1a1   : > { %v714_v44 = vmul.f32 %v1953_v36, %v713_v42  ;;  %v665_v1 = vsub.f32 1.5, %v664_v63  ;;  %v1785_v42 = vld [vmem:[%s2502_s1 + $0x28] sm:$0xf0] }
 0x1a2   : > { %v676_v2 = vmul.f32 %v1955_v56, %v675_v0  ;;  %v1788_v43 = vor.u32 %v1883_v40, %v1785_v42 }
 0x1a3   : > { %v718_v45 = vsel %vm717_vm7, %v1953_v36, %v714_v44  ;;  %v666_v3 = vmul.f32 %v1957_v57, %v665_v1  ;;  %v1881_v44 = vld [vmem:[%s2502_s1 + $0x14] sm:$0xf] }
 0x1a4   : > { %v720_v46 = vmul.f32 %v718_v45, %v2192_v20  ;;  %v680_v4 = vsel %vm679_vm11, %v1955_v56, %v676_v2  ;;  %v1777_v45 = vld [vmem:[%s2502_s1 + $0x18] sm:$0xf0]  ;;  %612 = vmatpush.bf16.msra.mxu1 %v1788_v43 }
 0x1a5   : > { %v670_v5 = vsel %vm669_vm13, %v1957_v57, %v666_v3  ;;  %v682_v6 = vmul.f32 %v680_v4, %v2192_v20 }
 0x1a6   : > { %v729_v48 = vpack.c.bf16 %v720_v46, %v720_v46  ;;  %v681_v7 = vmul.f32 %v670_v5, %v2182_v16  ;;  %v1780_v46 = vor.u32 %v1881_v44, %v1777_v45 }
 0x1a7   : > { %v725_v9 = vmul.f32 %v2212_v8, %v682_v6 }
 0x1a8   : > { %v740_v50 = vunpack.c.l.b16 %v729_v48  ;;  %v724_v10 = vmul.f32 %v2212_v8, %v681_v7  ;;  %613 = vmatpush.bf16.msra.mxu1 %v1780_v46  ;;  %v1769_v48 = vld [vmem:[%s2502_s1 + $0x8] sm:$0xf0] }
 0x1a9   : > { %v727_v11 = vpack.c.bf16 %v725_v9, %v725_v9 }
 0x1aa   : > { %v741_v51 = vpack.c.b16 %v740_v50, %v739_v49  ;;  %v726_v18 = vpack.c.bf16 %v724_v10, %v724_v10  ;;  %v1772_v49 = vor.u32 %v1879_v47, %v1769_v48 }
 0x1ab   : > { %v735_v19 = vunpack.c.l.b16 %v727_v11 }
 0x1ac   : > { %742 = vrot.lane.b32.xlu0 %v741_v51, %s2036_s19  ;;  %v734_v22 = vunpack.c.l.b16 %v726_v18  ;;  %s2039_s19 = smov 112   ;;  %614 = vmatpush.bf16.msra.mxu1 %v1772_v49 }
 0x1ae   : > { %v736_v23 = vpack.c.b16 %v735_v19, %v734_v22 }
 0x1af   : > { %1798 = vmatmul.msk.bf16.vlgmr.msra.gmra.mxu1 %vm589_vm0, %v2172_v12 }
 0x21e   : > { %v743_v14 = vpop.permute.xlu0 %742 }
 0x21f   : > { %v748_v15 = vsel %vm652_vm1, %v743_v14, 0 }
 0x220   : > { %757 = vmatpush.bf16.xpose.msra.mxu2 %v748_v15 }
 0x227   : > { %1799 = vmatmul.msk.bf16.vlgmr.msra.gmra.mxu2 %vm652_vm1, %v736_v23 }
 0x22c   : > { %v616_v9 = vpop.f32.mrf.mxu1 }
 0x234   : > { %v618_v15 = vpop.f32.mrf.mxu1 }
 0x2aa   : > { %v759_v28 = vpop.f32.mrf.mxu2 }
 0x2ab   : > { %v760_v29 = vadd.f32 %v1905_v26, %v759_v28 }
 0x2ad   : > { %v764_v30 = vadd.f32 %v2224_v27, %v760_v29 }
 0x2af   : > { %v766_v31 = vsel %vm652_vm1, %v764_v30, -inf }
 0x2b0   : > { %767 = vmax.xlane.f32.xlu1 %v766_v31 }
 0x2b2   : > { %v761_v34 = vpop.f32.mrf.mxu2 }
 0x2b3   : > { %v762_v35 = vadd.f32 %v1906_v32, %v761_v34 }
 0x2b5   : > { %v765_v36 = vadd.f32 %v2228_v33, %v762_v35 }
 0x2b7   : > { %v769_v37 = vsel %vm652_vm1, %v765_v36, -inf }
 0x2b8   : > { %770 = vmax.xlane.f32.xlu2 %v769_v37 }
 0x2c9   : > { %857 = vrot.lane.b32.xlu1 %v2196_v21, %s2037_s28 }
 0x2d0   : > { %855 = vrot.lane.b32.xlu2 %v2186_v17, %s2037_s28 }
 0x2d1   : > { %1065 = vrot.lane.b32.xlu1 %v2186_v17, %s2038_s24 }
 0x2d8   : > { %819 = vrot.lane.b32.xlu2 %v2186_v17, %s2039_s19 }
 0x2d9   : > { %1254 = vrot.lane.b32.xlu1 %v2186_v17, %s2040_s20 }
 0x2e0   : > { %821 = vrot.lane.b32.xlu2 %v2196_v21, %s2039_s19 }
 0x2e8   : > { %1067 = vrot.lane.b32.xlu2 %v2196_v21, %s2038_s24 }
 0x2f0   : > { %1029 = vrot.lane.b32.xlu2 %v2186_v17, %s2041_s23 }
 0x323   : > { %v768_v50 = vpop.xlane.xlu1 %767 }
 0x324   : > { %v772_v51 = vsub.f32 %v764_v30, %v768_v50 }
 0x326   : > { %v774_v52 = vmul.f32 1.442695, %v772_v51 }
 0x328   : > { %1958 = vpow2.f32 %v774_v52 }
 0x32b   : > { %v771_v53 = vpop.xlane.xlu2 %770 }
 0x32c   : > { %v773_v54 = vsub.f32 %v765_v36, %v771_v53 }
 0x32e   : > { %v1959_v55 = vpop.eup %1958  ;;  %v776_v56 = vmul.f32 1.442695, %v773_v54 }
 0x32f   : > { %v778_v57 = vsel %vm652_vm1, %v1959_v55, 0.0 }
 0x330   : > { %1960 = vpow2.f32 %v776_v56  ;;  %779 = vadd.xlane.f32.xlu0 %v778_v57 }
 0x333   : > { %v856_v58 = vpop.permute.xlu2 %855 }
 0x334   : > { %v861_v59 = vsel %vm652_vm1, %v856_v58, 0.0 }
 0x335   : > { %862 = vadd.xlane.f32.xlu2 %v861_v59 }
 0x336   : > { %v1961_v60 = vpop.eup %1960 }
 0x337   : > { %v781_v61 = vsel %vm652_vm1, %v1961_v60, 0.0 }
 0x338   : > { %782 = vadd.xlane.f32.xlu1 %v781_v61 }
 0x33b   : > { %v820_v12 = vpop.permute.xlu2 %819  ;;  %v858_v2 = vpop.permute.xlu1 %857 }
 0x33c   : > { %v864_v3 = vsel %vm652_vm1, %v858_v2, 0.0  ;;  %v825_v5 = vsel %vm652_vm1, %v820_v12, 0.0 }
 0x343   : > { %v822_v62 = vpop.permute.xlu2 %821  ;;  %v1066_v4 = vpop.permute.xlu1 %1065 }
 0x344   : > { %1256 = vrot.lane.b32.xlu0 %v2196_v21, %s2040_s20  ;;  %v828_v63 = vsel %vm652_vm1, %v822_v62, 0.0  ;;  %v1071_v6 = vsel %vm652_vm1, %v1066_v4, 0.0 }
 0x345   : > { %829 = vadd.xlane.f32.xlu2 %v828_v63 }
 0x34b   : > { %v1068_v0 = vpop.permute.xlu2 %1067  ;;  %v1255_v7 = vpop.permute.xlu1 %1254 }
 0x34c   : > { %1218 = vrot.lane.b32.xlu0 %v2186_v17, %s2042_s17  ;;  %v1074_v1 = vsel %vm652_vm1, %v1068_v0, 0.0  ;;  %v541_v17 = vperm.slane %v2179_v13, 1  ;;  %v1260_v10 = vsel %vm652_vm1, %v1255_v7, 0.0 }
 0x34d   : > { %1075 = vadd.xlane.f32.xlu2 %v1074_v1 }
 0x34e   : > { %v617_v11 = vadd.f32 %v616_v9, %v541_v17  ;;  %v619_v18 = vadd.f32 %v618_v15, %v541_v17 }
 0x350   : > { %v731_v23 = vpack.c.bf16 %v619_v18, %v619_v18 }
 0x351   : > { %1031 = vrot.lane.b32.xlu1 %v2196_v21, %s2041_s23 }
 0x352   : > { %v798_v24 = vunpack.c.l.b16 %v731_v23 }
 0x353   : > { %v1030_v14 = vpop.permute.xlu2 %1029 }
 0x354   : > { %1220 = vrot.lane.b32.xlu0 %v2196_v21, %s2042_s17  ;;  %v730_v21 = vpack.c.bf16 %v617_v11, %v617_v11  ;;  %v1035_v19 = vsel %vm652_vm1, %v1030_v14, 0.0 }
 0x356   : > { %v797_v22 = vunpack.c.l.b16 %v730_v21 }
 0x358   : > { %v2293_v25 = vpack.c.b16 %v798_v24, %v797_v22 }
 0x35a   : > { %811 = vmatpush.bf16.msra.mxu3 %v2293_v25 }
 0x37b   : > { %865 = vadd.xlane.f32.xlu1 %v864_v3 }
 0x37e   : > { %826 = vadd.xlane.f32.xlu0 %v825_v5 }
 0x383   : > { %1072 = vadd.xlane.f32.xlu1 %v1071_v6 }
 0x38b   : > { %1261 = vadd.xlane.f32.xlu1 %v1260_v10 }
 0x393   : > { %1036 = vadd.xlane.f32.xlu1 %v1035_v19 }
 0x3a3   : > { %v780_v13 = vpop.xlane.xlu0 %779 }
 0x3a4   : > { %1962 = vrcp.f32 %v780_v13 }
 0x3a8   : > { %v863_v46 = vpop.xlane.xlu2 %862 }
 0x3a9   : > { %v867_v48 = vadd.f32 1e-12, %v863_v46 }
 0x3aa   : > { %v1963_v28 = vpop.eup %1962 }
 0x3ab   : > { %v783_v26 = vpop.xlane.xlu1 %782  ;;  %v786_v29 = vmul.f32 %v1963_v28, %v1959_v55  ;;  %vm875_vm2 = vweird.f32 %v867_v48 }
 0x3ac   : > { %1964 = vrcp.f32 %v783_v26 }
 0x3ad   : > { %v788_v32 = vpack.c.bf16 %v786_v29, %v786_v29  ;;  %1966 = vrsqrt.f32 %v867_v48 }
 0x3af   : > { %v792_v37 = vunpack.c.l.b16 %v788_v32 }
 0x3b2   : > { %v1965_v30 = vpop.eup %1964 }
 0x3b3   : > { %v787_v31 = vmul.f32 %v1965_v30, %v1961_v60  ;;  %v1967_v52 = vpop.eup %1966 }
 0x3b4   : > { %v870_v54 = vmul.f32 %v1967_v52, %v867_v48  ;;  %vm876_vm14 = vweird.f32 %v1967_v52 }
 0x3b5   : > { %v789_v34 = vpack.c.bf16 %v787_v31, %v787_v31  ;;  %vm877_vm3 = vmor %vm875_vm2, %vm876_vm14 }
 0x3b6   : > { %v1257_v35 = vpop.permute.xlu0 %1256  ;;  %v871_v56 = vmul.f32 %v1967_v52, %v870_v54 }
 0x3b7   : > { %v1263_v36 = vsel %vm652_vm1, %v1257_v35, 0.0  ;;  %v793_v38 = vunpack.c.l.b16 %v789_v34 }
 0x3b8   : > { %1264 = vadd.xlane.f32.xlu2 %v1263_v36  ;;  %v830_v47 = vpop.xlane.xlu2 %829  ;;  %v872_v60 = vmul.f32 0.5, %v871_v56 }
 0x3b9   : > { %v794_v39 = vpack.c.b16 %v793_v38, %v792_v37  ;;  %v832_v49 = vadd.f32 1e-12, %v830_v47 }
 0x3ba   : > { %v873_v1 = vsub.f32 1.5, %v872_v60 }
 0x3bb   : > { %1800 = vmatmul.msk.bf16.vlgmr.msra.gmra.mxu3 %vm652_vm1, %v794_v39  ;;  %1968 = vrsqrt.f32 %v832_v49  ;;  %vm849_vm4 = vweird.f32 %v832_v49 }
 0x3bc   : > { %v874_v6 = vmul.f32 %v1967_v52, %v873_v1 }
 0x3be   : > { %v1219_v40 = vpop.permute.xlu0 %1218  ;;  %v878_v22 = vsel %vm877_vm3, %v1967_v52, %v874_v6 }
 0x3bf   : > { %v1224_v41 = vsel %vm652_vm1, %v1219_v40, 0.0  ;;  %v889_v28 = vmul.f32 %v878_v22, %v2182_v16 }
 0x3c0   : > { %1225 = vadd.xlane.f32.xlu2 %v1224_v41  ;;  %v1076_v50 = vpop.xlane.xlu2 %1075 }
 0x3c1   : > { %v1078_v51 = vadd.f32 1e-12, %v1076_v50  ;;  %v1969_v53 = vpop.eup %1968  ;;  %v895_v40 = vpack.c.bf16 %v889_v28, %v889_v28 }
 0x3c2   : > { %v844_v55 = vmul.f32 %v1969_v53, %v832_v49  ;;  %vm850_vm15 = vweird.f32 %v1969_v53 }
 0x3c3   : > { %v1032_v42 = vpop.permute.xlu1 %1031  ;;  %1970 = vrsqrt.f32 %v1078_v51  ;;  %vm851_vm5 = vmor %vm849_vm4, %vm850_vm15  ;;  %vm1095_vm11 = vweird.f32 %v1078_v51  ;;  %v906_v48 = vunpack.c.l.b16 %v895_v40 }
 0x3c4   : > { %v1038_v43 = vsel %vm652_vm1, %v1032_v42, 0.0  ;;  %v845_v57 = vmul.f32 %v1969_v53, %v844_v55 }
 0x3c5   : > { %1039 = vadd.xlane.f32.xlu0 %v1038_v43 }
 0x3c6   : > { %v1221_v44 = vpop.permute.xlu0 %1220  ;;  %v846_v12 = vmul.f32 0.5, %v845_v57 }
 0x3c7   : > { %v1227_v45 = vsel %vm652_vm1, %v1221_v44, 0.0 }
 0x3c8   : > { %1228 = vadd.xlane.f32.xlu1 %v1227_v45  ;;  %v847_v2 = vsub.f32 1.5, %v846_v12 }
 0x3c9   : > { %v2301_v58 = vpop.eup %1970 }
 0x3ca   : > { %v1090_v62 = vmul.f32 %v2301_v58, %v1078_v51  ;;  %v848_v7 = vmul.f32 %v1969_v53, %v847_v2  ;;  %vm1096_vm7 = vweird.f32 %v2301_v58 }
 0x3cb   : > { %vm2309_vm12 = vmor %vm1095_vm11, %vm1096_vm7 }
 0x3cc   : > { %v1091_v3 = vmul.f32 %v2301_v58, %v1090_v62  ;;  %v852_v15 = vsel %vm851_vm5, %v1969_v53, %v848_v7 }
 0x3cd   : > { %v854_v29 = vmul.f32 %v852_v15, %v2192_v20 }
 0x3ce   : > { %v1092_v9 = vmul.f32 0.5, %v1091_v3 }
 0x3cf   : > { %v892_v42 = vmul.f32 %v2212_v8, %v854_v29 }
 0x3d0   : > { %v1093_v18 = vsub.f32 1.5, %v1092_v9 }
 0x3d1   : > { %v894_v53 = vpack.c.bf16 %v892_v42, %v892_v42 }
 0x3d2   : > { %v1094_v30 = vmul.f32 %v2301_v58, %v1093_v18 }
 0x3d3   : > { %v900_v60 = vunpack.c.l.b16 %v894_v53 }
 0x3d4   : > { %v1098_v43 = vsel %vm2309_vm12, %v2301_v58, %v1094_v30 }
 0x3d5   : > { %v1100_v50 = vmul.f32 %v1098_v43, %v2192_v20 }
 0x3d7   : > { %v1106_v58 = vpack.c.bf16 %v1100_v50, %v1100_v50 }
 0x3ee   : > { %v866_v59 = vpop.xlane.xlu1 %865 }
 0x3ef   : > { %v868_v61 = vadd.f32 1e-12, %v866_v59 }
 0x3f1   : > { %1972 = vrsqrt.f32 %v868_v61  ;;  %v827_v63 = vpop.xlane.xlu0 %826  ;;  %vm885_vm8 = vweird.f32 %v868_v61 }
 0x3f2   : > { %v831_v0 = vadd.f32 1e-12, %v827_v63  ;;  %v1117_v63 = vunpack.c.l.b16 %v1106_v58 }
 0x3f4   : > { %1974 = vrsqrt.f32 %v831_v0  ;;  %vm839_vm13 = vweird.f32 %v831_v0 }
 0x3f6   : > { %v1073_v4 = vpop.xlane.xlu1 %1072 }
 0x3f7   : > { %v1973_v5 = vpop.eup %1972  ;;  %v1077_v17 = vadd.f32 1e-12, %v1073_v4 }
 0x3f8   : > { %v880_v10 = vmul.f32 %v1973_v5, %v868_v61  ;;  %vm886_vm6 = vweird.f32 %v1973_v5 }
 0x3f9   : > { %1976 = vrsqrt.f32 %v1077_v17  ;;  %vm887_vm9 = vmor %vm885_vm8, %vm886_vm6  ;;  %vm1085_vm2 = vweird.f32 %v1077_v17 }
 0x3fa   : > { %v1975_v11 = vpop.eup %1974  ;;  %v881_v21 = vmul.f32 %v1973_v5, %v880_v10 }
 0x3fb   : > { %v834_v14 = vmul.f32 %v1975_v11, %v831_v0  ;;  %vm840_vm10 = vweird.f32 %v1975_v11 }
 0x3fc   : > { %v882_v19 = vmul.f32 0.5, %v881_v21  ;;  %vm841_vm14 = vmor %vm839_vm13, %vm840_vm10 }
 0x3fd   : > { %v835_v23 = vmul.f32 %v1975_v11, %v834_v14 }
 0x3fe   : > { %v883_v24 = vsub.f32 1.5, %v882_v19  ;;  %v1262_v1 = vpop.xlane.xlu1 %1261 }
 0x3ff   : > { %v1977_v13 = vpop.eup %1976  ;;  %v836_v26 = vmul.f32 0.5, %v835_v23  ;;  %v1266_v2 = vadd.f32 1e-12, %v1262_v1 }
 0x400   : > { %v884_v31 = vmul.f32 %v1973_v5, %v883_v24  ;;  %v1080_v32 = vmul.f32 %v1977_v13, %v1077_v17  ;;  %vm1086_vm15 = vweird.f32 %v1977_v13 }
 0x401   : > { %v837_v34 = vsub.f32 1.5, %v836_v26  ;;  %vm1087_vm3 = vmor %vm1085_vm2, %vm1086_vm15  ;;  %1978 = vrsqrt.f32 %v1266_v2  ;;  %vm1274_vm5 = vweird.f32 %v1266_v2 }
 0x402   : > { %v1081_v35 = vmul.f32 %v1977_v13, %v1080_v32  ;;  %v888_v36 = vsel %vm887_vm9, %v1973_v5, %v884_v31 }
 0x403   : > { %v838_v38 = vmul.f32 %v1975_v11, %v837_v34  ;;  %v890_v39 = vmul.f32 %v888_v36, %v2192_v20 }
 0x404   : > { %v1082_v41 = vmul.f32 0.5, %v1081_v35 }
 0x405   : > { %v842_v44 = vsel %vm841_vm14, %v1975_v11, %v838_v38  ;;  %v896_v45 = vpack.c.bf16 %v890_v39, %v890_v39 }
 0x406   : > { %v1083_v46 = vsub.f32 1.5, %v1082_v41  ;;  %v853_v47 = vmul.f32 %v842_v44, %v2182_v16  ;;  %v1037_v3 = vpop.xlane.xlu1 %1036 }
 0x407   : > { %v907_v49 = vunpack.c.l.b16 %v896_v45  ;;  %v1979_v4 = vpop.eup %1978  ;;  %v1041_v5 = vadd.f32 1e-12, %v1037_v3 }
 0x408   : > { %v1084_v51 = vmul.f32 %v1977_v13, %v1083_v46  ;;  %v891_v52 = vmul.f32 %v2212_v8, %v853_v47  ;;  %v1269_v6 = vmul.f32 %v1979_v4, %v1266_v2  ;;  %vm1275_vm4 = vweird.f32 %v1979_v4 }
 0x409   : > { %v908_v54 = vpack.c.b16 %v907_v49, %v906_v48  ;;  %1980 = vrsqrt.f32 %v1041_v5  ;;  %vm1276_vm6 = vmor %vm1274_vm5, %vm1275_vm4  ;;  %vm1049_vm11 = vweird.f32 %v1041_v5 }
 0x40a   : > { %v893_v55 = vpack.c.bf16 %v891_v52, %v891_v52  ;;  %v1088_v56 = vsel %vm1087_vm3, %v1977_v13, %v1084_v51  ;;  %v1270_v17 = vmul.f32 %v1979_v4, %v1269_v6 }
 0x40b   : > { %909 = vrot.lane.b32.xlu0 %v908_v54, %s2037_s28  ;;  %v1099_v57 = vmul.f32 %v1088_v56, %v2182_v16 }
 0x40c   : > { %v899_v59 = vunpack.c.l.b16 %v893_v55  ;;  %v1271_v11 = vmul.f32 0.5, %v1270_v17 }
 0x40d   : > { %v1105_v61 = vpack.c.bf16 %v1099_v57, %v1099_v57 }
 0x40e   : > { %v901_v12 = vpack.c.b16 %v900_v60, %v899_v59  ;;  %v1272_v14 = vsub.f32 1.5, %v1271_v11 }
 0x40f   : > { %v1116_v62 = vunpack.c.l.b16 %v1105_v61  ;;  %v1981_v10 = vpop.eup %1980 }
 0x410   : > { %902 = vrot.lane.b32.xlu2 %v901_v12, %s2039_s19  ;;  %v1044_v21 = vmul.f32 %v1981_v10, %v1041_v5  ;;  %v1273_v23 = vmul.f32 %v1979_v4, %v1272_v14  ;;  %vm1050_vm10 = vweird.f32 %v1981_v10 }
 0x411   : > { %v1118_v0 = vpack.c.b16 %v1117_v63, %v1116_v62  ;;  %vm2327_vm12 = vmor %vm1049_vm11, %vm1050_vm10 }
 0x412   : > { %v1045_v19 = vmul.f32 %v1981_v10, %v1044_v21  ;;  %v1277_v31 = vsel %vm1276_vm6, %v1979_v4, %v1273_v23 }
 0x413   : > { %1119 = vrot.lane.b32.xlu1 %v1118_v0, %s2038_s24  ;;  %v1288_v38 = vmul.f32 %v1277_v31, %v2182_v16 }
 0x414   : > { %v1046_v26 = vmul.f32 0.5, %v1045_v19 }
 0x415   : > { %v1294_v45 = vpack.c.bf16 %v1288_v38, %v1288_v38 }
 0x416   : > { %v1047_v36 = vsub.f32 1.5, %v1046_v26 }
 0x417   : > { %v1305_v55 = vunpack.c.l.b16 %v1294_v45 }
 0x418   : > { %v1048_v43 = vmul.f32 %v1981_v10, %v1047_v36 }
 0x41a   : > { %v1052_v53 = vsel %vm2327_vm12, %v1981_v10, %v1048_v43 }
 0x41b   : > { %v1063_v62 = vmul.f32 %v1052_v53, %v2182_v16  ;;  %v1924_v53 = vld [vmem:[%s2505_s4 + $0x10] sm:$0xff]  }
 0x41d   : > { %v1101_v4 = vmul.f32 %v2212_v8, %v1063_v62 }
 0x41f   : > { %v1103_v11 = vpack.c.bf16 %v1101_v4, %v1101_v4 }
 0x42b   : > { %v1265_v7 = vpop.xlane.xlu2 %1264 }
 0x42c   : > { %v1267_v9 = vadd.f32 1e-12, %v1265_v7 }
 0x42e   : > { %1982 = vrsqrt.f32 %v1267_v9  ;;  %vm1284_vm8 = vweird.f32 %v1267_v9 }
 0x433   : > { %v1226_v15 = vpop.xlane.xlu2 %1225 }
 0x434   : > { %v1983_v18 = vpop.eup %1982  ;;  %v1230_v22 = vadd.f32 1e-12, %v1226_v15 }
 0x435   : > { %v1279_v24 = vmul.f32 %v1983_v18, %v1267_v9  ;;  %vm1285_vm7 = vweird.f32 %v1983_v18 }
 0x436   : > { %1984 = vrsqrt.f32 %v1230_v22  ;;  %vm1286_vm9 = vmor %vm1284_vm8, %vm1285_vm7  ;;  %vm1238_vm14 = vweird.f32 %v1230_v22 }
 0x437   : > { %v1280_v13 = vmul.f32 %v1983_v18, %v1279_v24 }
 0x438   : > { %v1040_v28 = vpop.xlane.xlu0 %1039 }
 0x439   : > { %v1281_v29 = vmul.f32 0.5, %v1280_v13  ;;  %v1042_v30 = vadd.f32 1e-12, %v1040_v28  ;;  %v1887_v28 = vld [vmem:[%s2507_s6] sm:$0xff] }
 0x43b   : > { %v1282_v32 = vsub.f32 1.5, %v1281_v29  ;;  %1986 = vrsqrt.f32 %v1042_v30  ;;  %v1229_v34 = vpop.xlane.xlu1 %1228  ;;  %vm1059_vm3 = vweird.f32 %v1042_v30 }
 0x43c   : > { %v1985_v35 = vpop.eup %1984  ;;  %v1231_v37 = vadd.f32 1e-12, %v1229_v34 }
 0x43d   : > { %v1283_v39 = vmul.f32 %v1983_v18, %v1282_v32  ;;  %v1233_v40 = vmul.f32 %v1985_v35, %v1230_v22  ;;  %vm1239_vm13 = vweird.f32 %v1985_v35 }
 0x43e   : > { %1988 = vrsqrt.f32 %v1231_v37  ;;  %vm1240_vm15 = vmor %vm1238_vm14, %vm1239_vm13  ;;  %vm1248_vm6 = vweird.f32 %v1231_v37  ;;  %v813_v32 = vpop.f32.mrf.mxu3 }
 0x43f   : > { %v1234_v41 = vmul.f32 %v1985_v35, %v1233_v40  ;;  %v1287_v42 = vsel %vm1286_vm9, %v1983_v18, %v1283_v39  ;;  %v1109_v18 = vunpack.c.l.b16 %v1103_v11  ;;  %v1923_v40 = vld [vmem:[%s2505_s4 + $0x8] sm:$0xff]  }
 0x440   : > { %v1289_v44 = vmul.f32 %v1287_v42, %v2192_v20 }
 0x441   : > { %v1987_v46 = vpop.eup %1986  ;;  %v1235_v47 = vmul.f32 0.5, %v1234_v41  ;;  %v1909_v41 = vunpack.c.l.bf16 %v1923_v40 }
 0x442   : > { %v1054_v48 = vmul.f32 %v1987_v46, %v1042_v30  ;;  %v1295_v49 = vpack.c.bf16 %v1289_v44, %v1289_v44  ;;  %vm1060_vm2 = vweird.f32 %v1987_v46 }
 0x443   : > { %v1236_v51 = vsub.f32 1.5, %v1235_v47  ;;  %vm1061_vm4 = vmor %vm1059_vm3, %vm1060_vm2 }
 0x444   : > { %v1989_v52 = vpop.eup %1988  ;;  %v1055_v54 = vmul.f32 %v1987_v46, %v1054_v48  ;;  %v1306_v56 = vunpack.c.l.b16 %v1295_v49 }
 0x445   : > { %v1237_v57 = vmul.f32 %v1985_v35, %v1236_v51  ;;  %v1243_v58 = vmul.f32 %v1989_v52, %v1231_v37  ;;  %vm1249_vm5 = vweird.f32 %v1989_v52 }
 0x446   : > { %v1056_v59 = vmul.f32 0.5, %v1055_v54  ;;  %v1307_v60 = vpack.c.b16 %v1306_v56, %v1305_v55  ;;  %vm1250_vm7 = vmor %vm1248_vm6, %vm1249_vm5  ;;  %v815_v34 = vpop.f32.mrf.mxu3  ;;  %v1913_v54 = vunpack.c.l.bf16 %v1924_v53  ;;  %vm1693_vm5 = vcmask 519168  }
 0x447   : > { %v1241_v61 = vsel %vm1240_vm15, %v1985_v35, %v1237_v57  ;;  %v1244_v12 = vmul.f32 %v1989_v52, %v1243_v58  ;;  %v818_v35 = vpack.c.bf16 %v815_v34, %v813_v32 }
 0x448   : > { %v1057_v63 = vsub.f32 1.5, %v1056_v59  ;;  %1308 = vrot.lane.b32.xlu0 %v1307_v60, %s2040_s20  ;;  %v1252_v2 = vmul.f32 %v1241_v61, %v2182_v16  ;;  %v1925_v59 = vld [vmem:[%s2505_s4 + $0x18] sm:$0xff]  }
 0x449   : > { %v1245_v0 = vmul.f32 0.5, %v1244_v12  ;;  %v1917_v60 = vunpack.c.l.bf16 %v1925_v59  ;;  %v1914_v12 = vunpack.c.h.bf16 %v1924_v53 }
 0x44a   : > { %v1058_v1 = vmul.f32 %v1987_v46, %v1057_v63  ;;  %v1290_v7 = vmul.f32 %v2212_v8, %v1252_v2 }
 0x44b   : > { %v1246_v3 = vsub.f32 1.5, %v1245_v0 }
 0x44c   : > { %v1062_v5 = vsel %vm1061_vm4, %v1987_v46, %v1058_v1  ;;  %v1292_v15 = vpack.c.bf16 %v1290_v7, %v1290_v7  ;;  %v1910_v46 = vunpack.c.h.bf16 %v1923_v40 }
 0x44d   : > { %v1247_v6 = vmul.f32 %v1989_v52, %v1246_v3  ;;  %v1064_v17 = vmul.f32 %v1062_v5, %v2192_v20  ;;  %v1918_v3 = vunpack.c.h.bf16 %v1925_v59 }
 0x44e   : > { %v1298_v24 = vunpack.c.l.b16 %v1292_v15 }
 0x44f   : > { %v1251_v9 = vsel %vm1250_vm7, %v1989_v52, %v1247_v6  ;;  %v1102_v10 = vmul.f32 %v2212_v8, %v1064_v17 }
 0x450   : > { %v1253_v21 = vmul.f32 %v1251_v9, %v2192_v20 }
 0x451   : > { %v1104_v16 = vpack.c.bf16 %v1102_v10, %v1102_v10 }
 0x452   : > { %v1291_v14 = vmul.f32 %v2212_v8, %v1253_v21 }
 0x453   : > { %v1110_v19 = vunpack.c.l.b16 %v1104_v16 }
 0x454   : > { %v1293_v22 = vpack.c.bf16 %v1291_v14, %v1291_v14 }
 0x455   : > { %v1111_v23 = vpack.c.b16 %v1110_v19, %v1109_v18 }
 0x456   : > { %v1299_v13 = vunpack.c.l.b16 %v1293_v22 }
 0x457   : > { %1112 = vrot.lane.b32.xlu2 %v1111_v23, %s2041_s23 }
 0x458   : > { %v1300_v26 = vpack.c.b16 %v1299_v13, %v1298_v24 }
 0x45a   : > { %1301 = vrot.lane.b32.xlu0 %v1300_v26, %s2042_s17 }
 0x46a   : > { %v903_v8 = vpop.permute.xlu2 %902 }
 0x47d   : > { %v910_v20 = vpop.permute.xlu0 %909 }
 0x47e   : > { %v915_v29 = vsel %vm652_vm1, %v910_v20, 0 }
 0x47f   : > { %924 = vmatpush.bf16.xpose.msrb.mxu3 %v915_v29 }
 0x485   : > { %v1120_v30 = vpop.permute.xlu1 %1119 }
 0x486   : > { %v1125_v31 = vsel %vm652_vm1, %v1120_v30, 0  ;;  %1801 = vmatmul.msk.bf16.vlgmr.msrb.gmra.mxu3 %vm652_vm1, %v903_v8 }
 0x487   : > { %1022 = vmatpush.bf16.msra.mxu3 %v1887_v28 }
 0x48b   : > { %1134 = vmatpush.bf16.xpose.msrb.mxu3 %v1125_v31 }
 0x496   : > { %1812 = vmatmul.msk.bf16.vlgmr.msra.gmra.mxu3 %vm652_vm1, %v818_v35 }
 0x4b1   : > { %v1113_v36 = vpop.permute.xlu2 %1112 }
 0x4b2   : > { %1813 = vmatmul.msk.bf16.vlgmr.msrb.gmra.mxu3 %vm652_vm1, %v1113_v36 }
 0x4ba   : > { %v1309_v37 = vpop.permute.xlu0 %1308 }
 0x4bb   : > { %v1314_v38 = vsel %vm652_vm1, %v1309_v37, 0 }
 0x4bc   : > { %1323 = vmatpush.bf16.xpose.msrb.mxu1 %v1314_v38 }
 0x4cc   : > { %v1302_v39 = vpop.permute.xlu0 %1301 }
 0x4cd   : > { %1820 = vmatmul.msk.bf16.vlgmr.msrb.gmra.mxu1 %vm652_vm1, %v1302_v39 }
 0x509   : > { %v926_v42 = vpop.f32.mrf.mxu3 }
 0x50a   : > { %v927_v43 = vadd.f32 %v1909_v41, %v926_v42 }
 0x50c   : > { %v931_v44 = vadd.f32 %v2224_v27, %v927_v43 }
 0x50e   : > { %v933_v45 = vsel %vm652_vm1, %v931_v44, -inf }
 0x50f   : > { %934 = vmax.xlane.f32.xlu1 %v933_v45 }
 0x511   : > { %v928_v47 = vpop.f32.mrf.mxu3 }
 0x512   : > { %v929_v48 = vadd.f32 %v1910_v46, %v928_v47 }
 0x514   : > { %v932_v49 = vadd.f32 %v2228_v33, %v929_v48 }
 0x516   : > { %v936_v50 = vsel %vm652_vm1, %v932_v49, -inf }
 0x517   : > { %937 = vmax.xlane.f32.xlu2 %v936_v50 }
 0x519   : > { %v2361_v51 = vpop.f32.mrf.mxu3 }
 0x521   : > { %v2363_v52 = vpop.f32.mrf.mxu3 }
 0x535   : > { %v1136_v55 = vpop.f32.mrf.mxu3 }
 0x536   : > { %v1137_v56 = vadd.f32 %v1913_v54, %v1136_v55 }
 0x538   : > { %v1141_v57 = vadd.f32 %v2224_v27, %v1137_v56 }
 0x53a   : > { %v1143_v58 = vsel %vm652_vm1, %v1141_v57, -inf }
 0x53b   : > { %1144 = vmax.xlane.f32.xlu2 %v1143_v58 }
 0x53d   : > { %v1138_v63 = vpop.f32.mrf.mxu3 }
 0x53e   : > { %v1139_v1 = vadd.f32 %v1914_v12, %v1138_v63 }
 0x540   : > { %v1142_v6 = vadd.f32 %v2228_v33, %v1139_v1 }
 0x542   : > { %v1146_v9 = vsel %vm652_vm1, %v1142_v6, -inf }
 0x54a   : > { %v1325_v61 = vpop.f32.mrf.mxu1 }
 0x54b   : > { %v1326_v62 = vadd.f32 %v1917_v60, %v1325_v61 }
 0x54d   : > { %v1330_v0 = vadd.f32 %v2224_v27, %v1326_v62 }
 0x54f   : > { %v1332_v2 = vsel %vm652_vm1, %v1330_v0, -inf }
 0x550   : > { %1333 = vmax.xlane.f32.xlu0 %v1332_v2 }
 0x552   : > { %v1327_v4 = vpop.f32.mrf.mxu1 }
 0x553   : > { %v1328_v5 = vadd.f32 %v1918_v3, %v1327_v4 }
 0x555   : > { %v1331_v17 = vadd.f32 %v2228_v33, %v1328_v5 }
 0x557   : > { %v1335_v7 = vsel %vm652_vm1, %v1331_v17, -inf }
 0x558   : > { %1336 = vmax.xlane.f32.xlu1 %v1335_v7  ;;  %1147 = vmax.xlane.f32.xlu0 %v1146_v9 }
 0x582   : > { %v935_v10 = vpop.xlane.xlu1 %934 }
 0x583   : > { %v939_v11 = vsub.f32 %v931_v44, %v935_v10 }
 0x585   : > { %v941_v27 = vmul.f32 1.442695, %v939_v11 }
 0x587   : > { %1990 = vpow2.f32 %v941_v27 }
 0x58a   : > { %v938_v21 = vpop.xlane.xlu2 %937 }
 0x58b   : > { %v940_v16 = vsub.f32 %v932_v49, %v938_v21 }
 0x58d   : > { %v1991_v14 = vpop.eup %1990  ;;  %v943_v15 = vmul.f32 1.442695, %v940_v16  ;;  %v1888_v16 = vld [vmem:[%s2507_s6 + $0x8] sm:$0xff] }
 0x58e   : > { %v945_v18 = vsel %vm652_vm1, %v1991_v14, 0.0  ;;  %999 = vmatpush.bf16.msrb.mxu0 %v1888_v16 }
 0x58f   : > { %1992 = vpow2.f32 %v943_v15  ;;  %946 = vadd.xlane.f32.xlu1 %v945_v18 }
 0x595   : > { %v1993_v19 = vpop.eup %1992 }
 0x596   : > { %v948_v33 = vsel %vm652_vm1, %v1993_v19, 0.0 }
 0x597   : > { %949 = vadd.xlane.f32.xlu2 %v948_v33  ;;  %v1889_v33 = vld [vmem:[%s2507_s6 + $0x10] sm:$0xff] }
 0x598   : > { %1209 = vmatpush.bf16.msra.mxu0 %v1889_v33 }
 0x5ae   : > { %v1145_v22 = vpop.xlane.xlu2 %1144 }
 0x5af   : > { %962 = vrot.lane.b32.xlu2 %v2293_v25, %s2039_s19  ;;  %v1149_v13 = vsub.f32 %v1141_v57, %v1145_v22 }
 0x5b1   : > { %v1151_v28 = vmul.f32 1.442695, %v1149_v13 }
 0x5c3   : > { %v1334_v23 = vpop.xlane.xlu0 %1333 }
 0x5c4   : > { %v1338_v24 = vsub.f32 %v1330_v0, %v1334_v23 }
 0x5c6   : > { %v1340_v26 = vmul.f32 1.442695, %v1338_v24 }
 0x5c8   : > { %1994 = vpow2.f32 %v1340_v26 }
 0x5c9   : > { %1996 = vpow2.f32 %v1151_v28 }
 0x5cb   : > { %v1337_v20 = vpop.xlane.xlu1 %1336  ;;  %v1148_v29 = vpop.xlane.xlu0 %1147 }
 0x5cc   : > { %v1339_v8 = vsub.f32 %v1331_v17, %v1337_v20  ;;  %v1150_v32 = vsub.f32 %v1142_v6, %v1148_v29 }
 0x5ce   : > { %v1995_v30 = vpop.eup %1994  ;;  %v1342_v31 = vmul.f32 1.442695, %v1339_v8  ;;  %v1153_v35 = vmul.f32 1.442695, %v1150_v32 }
 0x5cf   : > { %v1344_v34 = vsel %vm652_vm1, %v1995_v30, 0.0  ;;  %v1997_v36 = vpop.eup %1996 }
 0x5d0   : > { %1345 = vadd.xlane.f32.xlu0 %v1344_v34  ;;  %1998 = vpow2.f32 %v1342_v31  ;;  %v1155_v38 = vsel %vm652_vm1, %v1997_v36, 0.0  ;;  %v1943_v34 = vld [vmem:[%s2508_s7] ss:$0 sm:$0xff] }
 0x5d1   : > { %2000 = vpow2.f32 %v1153_v35 }
 0x5d6   : > { %v1999_v37 = vpop.eup %1998 }
 0x5d7   : > { %v1347_v39 = vsel %vm652_vm1, %v1999_v37, 0.0  ;;  %v2001_v40 = vpop.eup %2000 }
 0x5d8   : > { %1156 = vadd.xlane.f32.xlu0 %v1155_v38  ;;  %1348 = vadd.xlane.f32.xlu1 %v1347_v39  ;;  %v1158_v41 = vsel %vm652_vm1, %v2001_v40, 0.0 }
 0x5e0   : > { %1159 = vadd.xlane.f32.xlu1 %v1158_v41 }
 0x5ec   : > { %1361 = vrot.lane.b32.xlu0 %v2293_v25, %s2042_s17 }
 0x5f9   : > { %1172 = vrot.lane.b32.xlu1 %v2293_v25, %s2041_s23 }
 0x602   : > { %v947_v42 = vpop.xlane.xlu1 %946 }
 0x603   : > { %2002 = vrcp.f32 %v947_v42 }
 0x609   : > { %v2003_v44 = vpop.eup %2002 }
 0x60a   : > { %v950_v43 = vpop.xlane.xlu2 %949  ;;  %v953_v45 = vmul.f32 %v2003_v44, %v1991_v14  ;;  %v2043_v44 = vmov 64.0  }
 0x60b   : > { %2004 = vrcp.f32 %v950_v43 }
 0x60c   : > { %v955_v47 = vpack.c.bf16 %v953_v45, %v953_v45 }
 0x60e   : > { %v959_v53 = vunpack.c.l.b16 %v955_v47 }
 0x611   : > { %v2005_v46 = vpop.eup %2004 }
 0x612   : > { %v954_v48 = vmul.f32 %v2005_v46, %v1993_v19  ;;  %v963_v49 = vpop.permute.xlu2 %962  ;;  %v1890_v19 = vld [vmem:[%s2507_s6 + $0x18] sm:$0xff] }
 0x613   : > { %975 = vmatpush.bf16.msrb.mxu2 %v963_v49 }
 0x614   : > { %v956_v50 = vpack.c.bf16 %v954_v48, %v954_v48 }
 0x616   : > { %v960_v54 = vunpack.c.l.b16 %v956_v50 }
 0x618   : > { %v961_v55 = vpack.c.b16 %v960_v54, %v959_v53 }
 0x61a   : > { %1802 = vmatmul.msk.bf16.vlgmr.msrb.gmra.mxu2 %vm652_vm1, %v961_v55 }
 0x643   : > { %v1346_v56 = vpop.xlane.xlu0 %1345 }
 0x644   : > { %2006 = vrcp.f32 %v1346_v56 }
 0x64a   : > { %v2007_v57 = vpop.eup %2006 }
 0x64b   : > { %v1349_v25 = vpop.xlane.xlu1 %1348  ;;  %v1352_v60 = vmul.f32 %v2007_v57, %v1995_v30  ;;  %v1157_v61 = vpop.xlane.xlu0 %1156 }
 0x64c   : > { %2008 = vrcp.f32 %v1349_v25 }
 0x64d   : > { %v1354_v63 = vpack.c.bf16 %v1352_v60, %v1352_v60 }
 0x64f   : > { %v1358_v1 = vunpack.c.l.b16 %v1354_v63  ;;  %v1892_v63 = vld [vmem:[%s2511_s10 + $0x8] sm:$0xff] }
 0x652   : > { %v2009_v58 = vpop.eup %2008 }
 0x653   : > { %v1353_v59 = vmul.f32 %v2009_v58, %v1999_v37  ;;  %v1160_v12 = vpop.xlane.xlu1 %1159 }
 0x654   : > { %2010 = vrcp.f32 %v1160_v12  ;;  %v1893_v12 = vld [vmem:[%s2511_s10 + $0x10] sm:$0xff] }
 0x655   : > { %v1355_v62 = vpack.c.bf16 %v1353_v59, %v1353_v59  ;;  %2012 = vrcp.f32 %v1157_v61  ;;  %v1894_v61 = vld [vmem:[%s2511_s10 + $0x18] sm:$0xff] }
 0x656   : > { %2014 = vrcp.f32 %v2043_v44 }
 0x657   : > { %v1359_v0 = vunpack.c.l.b16 %v1355_v62 }
 0x659   : > { %v1360_v4 = vpack.c.b16 %v1359_v0, %v1358_v1 }
 0x65a   : > { %v2011_v3 = vpop.eup %2010 }
 0x65b   : > { %v2013_v5 = vpop.eup %2012  ;;  %v1164_v6 = vmul.f32 %v2011_v3, %v2001_v40 }
 0x65c   : > { %v1163_v17 = vmul.f32 %v2013_v5, %v1997_v36  ;;  %v2015_v45 = vpop.eup %2014 }
 0x65d   : > { %v1166_v7 = vpack.c.bf16 %v1164_v6, %v1164_v6  ;;  %v1422_v46 = vmul.f32 64.0, %v2015_v45 }
 0x65e   : > { %v1362_v2 = vpop.permute.xlu0 %1361  ;;  %v1165_v9 = vpack.c.bf16 %v1163_v17, %v1163_v17 }
 0x65f   : > { %1374 = vmatpush.bf16.msra.mxu3 %v1362_v2  ;;  %v1170_v10 = vunpack.c.l.b16 %v1166_v7  ;;  %v1423_v47 = vsub.f32 1.0, %v1422_v46  ;;  %v1891_v2 = vld [vmem:[%s2511_s10] sm:$0xff] }
 0x660   : > { %v1169_v11 = vunpack.c.l.b16 %v1165_v9 }
 0x661   : > { %v1424_v48 = vmul.f32 %v2015_v45, %v1423_v47 }
 0x662   : > { %1821 = vmatmul.msk.bf16.vlgmr.msra.gmra.mxu3 %vm652_vm1, %v1360_v4  ;;  %v1171_v21 = vpack.c.b16 %v1170_v10, %v1169_v11 }
 0x663   : > { %v1425_v49 = vadd.f32 %v2015_v45, %v1424_v48 }
 0x66b   : > { %v1173_v27 = vpop.permute.xlu1 %1172 }
 0x66c   : > { %1185 = vmatpush.bf16.msra.mxu2 %v1173_v27 }
 0x66f   : > { %1814 = vmatmul.msk.bf16.vlgmr.msra.gmra.mxu2 %vm652_vm1, %v1171_v21 }
 0x670   : > { %1398 = vmatpush.bf16.msrb.mxu2 %v1890_v19 }
 0x69d   : > { %v977_v14 = vpop.f32.mrf.mxu2 }
 0x6a5   : > { %v979_v15 = vpop.f32.mrf.mxu2 }
 0x6a6   : > { %v982_v18 = vpack.c.bf16 %v979_v15, %v977_v14 }
 0x6a8   : > { %1807 = vmatmul.msk.bf16.vlgmr.msrb.gmra.mxu0 %vm652_vm1, %v982_v18  ;;  %v1944_v18 = vld [vmem:[%s2509_s8] ss:$0 sm:$0xff] }
 0x6a9   : > { %1522 = vmatpush.bf16.msrb.mxu0 %v1894_v61 }
 0x6ad   : > { %1523 = vmatpush.bf16.msrb.mxu0 %v1893_v12 }
 0x6b1   : > { %1524 = vmatpush.bf16.msrb.mxu0 %v1892_v63 }
 0x6b5   : > { %1525 = vmatpush.bf16.msrb.mxu0 %v1891_v2 }
 0x6e5   : > { %v1376_v22 = vpop.f32.mrf.mxu3 }
 0x6ed   : > { %v1378_v23 = vpop.f32.mrf.mxu3 }
 0x6ee   : > { %v1381_v24 = vpack.c.bf16 %v1378_v23, %v1376_v22  ;;  %v1945_v23 = vld [vmem:[%s2510_s9] ss:$0 sm:$0xff] }
 0x6f0   : > { %1826 = vmatmul.msk.bf16.vlgmr.msrb.gmra.mxu2 %vm652_vm1, %v1381_v24 }
 0x6f2   : > { %v1187_v13 = vpop.f32.mrf.mxu2 }
 0x6fa   : > { %v1189_v26 = vpop.f32.mrf.mxu2 }
 0x6fb   : > { %v1192_v28 = vpack.c.bf16 %v1189_v26, %v1187_v13  ;;  %v526_v13 = vld [vmem:[%s2169_s30] sm:$0xff]   ;;  %s523_s30 = scalar_lea.vmem %s2517_s16, %s1758_s26 }
 0x6fd   : > { %1819 = vmatmul.msk.bf16.vlgmr.msra.gmra.mxu0 %vm652_vm1, %v1192_v28  ;;  %vm1426_vm1 = vweird.f32 %v2015_v45 }
 0x725   : > { %v1001_v20 = vpop.f32.mrf.mxu0 }
 0x726   : > { %v1025_v8 = vadd.f32 %v2361_v51, %v1001_v20  ;;  %v528_v20 = vunpack.c.l.bf16 %v526_v13 }
 0x72d   : > { %v1003_v29 = vpop.f32.mrf.mxu0 }
 0x72e   : > { %v1027_v37 = vadd.f32 %v2363_v52, %v1003_v29  ;;  %v2413_v52 = vsel %vm1426_vm1, %v2015_v45, %v1425_v49  ;;  %v529_v29 = vunpack.c.h.bf16 %v526_v13 }
 0x773   : > { %v1400_v30 = vpop.f32.mrf.mxu2 }
 0x77a   : > { %v1211_v31 = vpop.f32.mrf.mxu0 }
 0x77b   : > { %v1216_v32 = vadd.f32 %v1211_v31, %v1025_v8  ;;  %v1402_v41 = vpop.f32.mrf.mxu2 }
 0x77d   : > { %v1405_v35 = vadd.f32 %v1400_v30, %v1216_v32 }
 0x77f   : > { %v1411_v36 = vadd.f32 %v1943_v34, %v1405_v35 }
 0x781   : > { %v1415_v38 = vsel %vm589_vm0, %v1411_v36, 0.0 }
 0x782   : > { %1416 = vadd.xlane.f32.xlu2 %v1415_v38  ;;  %v1213_v39 = vpop.f32.mrf.mxu0  ;;  %v1900_v38 = vld [vmem:[%s2513_s12 + $0x28] sm:$0xff] }
 0x783   : > { %v1217_v40 = vadd.f32 %v1213_v39, %v1027_v37  ;;  %v1901_v37 = vld [vmem:[%s2513_s12 + $0x30] sm:$0xff]  ;;  %v1899_v39 = vld [vmem:[%s2513_s12 + $0x20] sm:$0xff] }
 0x785   : > { %v1406_v42 = vadd.f32 %v1402_v41, %v1217_v40  ;;  %v1898_v40 = vld [vmem:[%s2513_s12 + $0x18] sm:$0xff]  ;;  %v1897_v41 = vld [vmem:[%s2513_s12 + $0x10] sm:$0xff] }
 0x787   : > { %v1412_v43 = vadd.f32 %v1943_v34, %v1406_v42  ;;  %v1896_v42 = vld [vmem:[%s2513_s12 + $0x8] sm:$0xff] }
 0x789   : > { %v1418_v51 = vsel %vm589_vm0, %v1412_v43, 0.0 }
 0x78a   : > { %1419 = vadd.xlane.f32.xlu0 %v1418_v51  ;;  %v1895_v51 = vld [vmem:[%s2513_s12] sm:$0xff] }
 0x7f5   : > { %v1417_v50 = vpop.xlane.xlu2 %1416 }
 0x7f6   : > { %v1428_v53 = vmul.f32 %v2413_v52, %v1417_v50 }
 0x7f8   : > { %v1430_v54 = vsub.f32 %v1411_v36, %v1428_v53  ;;  %v1902_v36 = vld [vmem:[%s2513_s12 + $0x38] sm:$0xff] }
 0x7f9   : > { %1619 = vmatpush.bf16.msra.mxu1 %v1902_v36 }
 0x7fa   : > { %v1432_v55 = vmul.f32 %v1430_v54, %v1430_v54 }
 0x7fc   : > { %v1434_v56 = vsel %vm589_vm0, %v1432_v55, 0.0 }
 0x7fd   : > { %1435 = vadd.xlane.f32.xlu1 %v1434_v56  ;;  %v1420_v25 = vpop.xlane.xlu0 %1419  ;;  %1620 = vmatpush.bf16.msra.mxu1 %v1901_v37 }
 0x7fe   : > { %v1429_v57 = vmul.f32 %v2413_v52, %v1420_v25 }
 0x800   : > { %v1431_v58 = vsub.f32 %v1412_v43, %v1429_v57  ;;  %v1946_v43 = vld [vmem:[%s2512_s11] ss:$0 sm:$0xff] }
 0x801   : > { %1621 = vmatpush.bf16.msra.mxu1 %v1900_v38  ;;  %v1948_v38 = vld [vmem:[%s2515_s14] ss:$0 sm:$0xff] }
 0x802   : > { %v1433_v59 = vmul.f32 %v1431_v58, %v1431_v58 }
 0x804   : > { %v1437_v60 = vsel %vm589_vm0, %v1433_v59, 0.0 }
 0x805   : > { %1438 = vadd.xlane.f32.xlu2 %v1437_v60  ;;  %1622 = vmatpush.bf16.msra.mxu1 %v1899_v39 }
 0x809   : > { %1623 = vmatpush.bf16.msra.mxu1 %v1898_v40  ;;  %v1949_v40 = vld [vmem:[%s2516_s15] ss:$0 sm:$0xff] }
 0x80d   : > { %1624 = vmatpush.bf16.msra.mxu1 %v1897_v41 }
 0x811   : > { %1625 = vmatpush.bf16.msra.mxu1 %v1896_v42 }
 0x815   : > { %1626 = vmatpush.bf16.msra.mxu1 %v1895_v51 }
 0x870   : > { %v1436_v62 = vpop.xlane.xlu1 %1435 }
 0x871   : > { %v1440_v0 = vmul.f32 %v1436_v62, %v2413_v52 }
 0x873   : > { %v1442_v1 = vadd.f32 1e-05, %v1440_v0 }
 0x875   : > { %2016 = vrsqrt.f32 %v1442_v1  ;;  %vm1450_vm9 = vweird.f32 %v1442_v1 }
 0x878   : > { %v1439_v3 = vpop.xlane.xlu2 %1438 }
 0x879   : > { %v1441_v4 = vmul.f32 %v1439_v3, %v2413_v52  ;;  %v1947_v3 = vld [vmem:[%s2514_s13] ss:$0 sm:$0xff] }
 0x87b   : > { %v2017_v5 = vpop.eup %2016  ;;  %v1443_v6 = vadd.f32 1e-05, %v1441_v4 }
 0x87c   : > { %v1445_v17 = vmul.f32 %v2017_v5, %v1442_v1  ;;  %vm1451_vm8 = vweird.f32 %v2017_v5 }
 0x87d   : > { %2018 = vrsqrt.f32 %v1443_v6  ;;  %vm1452_vm10 = vmor %vm1450_vm9, %vm1451_vm8  ;;  %vm1460_vm12 = vweird.f32 %v1443_v6 }
 0x87e   : > { %v1446_v7 = vmul.f32 %v2017_v5, %v1445_v17 }
 0x880   : > { %v1447_v9 = vmul.f32 0.5, %v1446_v7 }
 0x882   : > { %v1448_v10 = vsub.f32 1.5, %v1447_v9 }
 0x883   : > { %v2019_v11 = vpop.eup %2018 }
 0x884   : > { %v1449_v27 = vmul.f32 %v2017_v5, %v1448_v10  ;;  %v1455_v21 = vmul.f32 %v2019_v11, %v1443_v6  ;;  %vm1461_vm11 = vweird.f32 %v2019_v11 }
 0x885   : > { %vm1462_vm13 = vmor %vm1460_vm12, %vm1461_vm11 }
 0x886   : > { %v1453_v16 = vsel %vm1452_vm10, %v2017_v5, %v1449_v27  ;;  %v1456_v14 = vmul.f32 %v2019_v11, %v1455_v21 }
 0x887   : > { %v1464_v19 = vmul.f32 %v1453_v16, %v1430_v54 }
 0x888   : > { %v1457_v15 = vmul.f32 0.5, %v1456_v14 }
 0x889   : > { %v1469_v24 = vmul.f32 %v1944_v18, %v1464_v19 }
 0x88a   : > { %v1458_v33 = vsub.f32 1.5, %v1457_v15 }
 0x88b   : > { %v1474_v8 = vadd.f32 %v1945_v23, %v1469_v24 }
 0x88c   : > { %v1459_v22 = vmul.f32 %v2019_v11, %v1458_v33 }
 0x88d   : > { %v2440_v32 = vadd.f32 %v1474_v8, %v528_v20 }
 0x88e   : > { %v1463_v26 = vsel %vm1462_vm13, %v2019_v11, %v1459_v22 }
 0x88f   : > { %v1465_v28 = vmul.f32 %v1463_v26, %v1431_v58 }
 0x891   : > { %v1470_v30 = vmul.f32 %v1944_v18, %v1465_v28 }
 0x893   : > { %v1475_v31 = vadd.f32 %v1945_v23, %v1470_v30 }
 0x895   : > { %v2442_v34 = vadd.f32 %v1475_v31, %v529_v29 }
 0x897   : > { %v1478_v35 = vpack.c.bf16 %v2442_v34, %v2440_v32 }
 0x899   : > { %1843 = vmatmul.msk.bf16.vlgmr.msrb.gmra.mxu0 %vm589_vm0, %v1478_v35 }
 0x916   : > { %v1527_v44 = vpop.f32.mrf.mxu0 }
 0x917   : > { %v1528_v45 = vadd.f32 %v1946_v43, %v1527_v44 }
 0x919   : > { %v1532_v46 = vmul.f32 %v1528_v45, %v1528_v45 }
 0x91b   : > { %v1534_v47 = vmul.f32 %v1532_v46, %v1528_v45 }
 0x91d   : > { %v1536_v48 = vmul.f32 0.044715, %v1534_v47 }
 0x91e   : > { %v1529_v49 = vpop.f32.mrf.mxu0 }
 0x91f   : > { %v1538_v50 = vadd.f32 %v1536_v48, %v1528_v45  ;;  %v1530_v53 = vadd.f32 %v1946_v43, %v1529_v49 }
 0x921   : > { %v1540_v54 = vmul.f32 0.7978846, %v1538_v50  ;;  %v1533_v55 = vmul.f32 %v1530_v53, %v1530_v53 }
 0x923   : > { %v1535_v56 = vmul.f32 %v1533_v55, %v1530_v53  ;;  %2020 = vtanh.f32 %v1540_v54 }
 0x925   : > { %v1537_v25 = vmul.f32 0.044715, %v1535_v56 }
 0x927   : > { %v1539_v57 = vadd.f32 %v1537_v25, %v1530_v53 }
 0x929   : > { %v1541_v58 = vmul.f32 0.7978846, %v1539_v57  ;;  %v2021_v59 = vpop.eup %2020 }
 0x92a   : > { %v1544_v60 = vadd.f32 1.0, %v2021_v59 }
 0x92b   : > { %2022 = vtanh.f32 %v1541_v58 }
 0x92c   : > { %v1546_v12 = vmul.f32 0.5, %v1544_v60 }
 0x92e   : > { %v1548_v0 = vmul.f32 %v1546_v12, %v1528_v45 }
 0x931   : > { %v2023_v61 = vpop.eup %2022 }
 0x932   : > { %v1545_v62 = vadd.f32 1.0, %v2023_v61 }
 0x934   : > { %v1547_v63 = vmul.f32 0.5, %v1545_v62 }
 0x936   : > { %v1549_v1 = vmul.f32 %v1547_v63, %v1530_v53 }
 0x938   : > { %v1550_v2 = vpack.c.bf16 %v1549_v1, %v1548_v0 }
 0x93a   : > { %1627 = vmatmul.bf16.vlgmr.msra.gmra.mxu1 %v1550_v2 }
 0x9b7   : > { %v1628_v4 = vpop.f32.mrf.mxu1 }
 0x9b8   : > { %v1629_v5 = vadd.f32 %v1947_v3, %v1628_v4 }
 0x9ba   : > { %v1635_v6 = vsel %vm589_vm0, %v1629_v5, 0.0 }
 0x9bb   : > { %1636 = vadd.xlane.f32.xlu2 %v1635_v6 }
 0x9bf   : > { %v1630_v17 = vpop.f32.mrf.mxu1 }
 0x9c0   : > { %v1631_v7 = vadd.f32 %v1947_v3, %v1630_v17 }
 0x9c2   : > { %v1638_v9 = vsel %vm589_vm0, %v1631_v7, 0.0 }
 0x9c3   : > { %1639 = vadd.xlane.f32.xlu0 %v1638_v9 }
 0xa2e   : > { %v1637_v10 = vpop.xlane.xlu2 %1636 }
 0xa2f   : > { %v1641_v11 = vmul.f32 %v1637_v10, %v2413_v52 }
 0xa31   : > { %v1643_v27 = vsub.f32 %v1629_v5, %v1641_v11 }
 0xa33   : > { %v1645_v21 = vmul.f32 %v1643_v27, %v1643_v27 }
 0xa35   : > { %v1647_v16 = vsel %vm589_vm0, %v1645_v21, 0.0 }
 0xa36   : > { %v1640_v14 = vpop.xlane.xlu0 %1639  ;;  %1648 = vadd.xlane.f32.xlu1 %v1647_v16 }
 0xa37   : > { %v1642_v15 = vmul.f32 %v1640_v14, %v2413_v52 }
 0xa39   : > { %v1644_v18 = vsub.f32 %v1631_v7, %v1642_v15 }
 0xa3b   : > { %v1646_v19 = vmul.f32 %v1644_v18, %v1644_v18 }
 0xa3d   : > { %v1650_v33 = vsel %vm589_vm0, %v1646_v19, 0.0 }
 0xa3e   : > { %1651 = vadd.xlane.f32.xlu2 %v1650_v33 }
 0xaa9   : > { %v1649_v22 = vpop.xlane.xlu1 %1648 }
 0xaaa   : > { %v1653_v23 = vmul.f32 %v1649_v22, %v2413_v52 }
 0xaac   : > { %v1655_v24 = vadd.f32 1e-05, %v1653_v23 }
 0xaae   : > { %2024 = vrsqrt.f32 %v1655_v24  ;;  %vm1663_vm0 = vweird.f32 %v1655_v24 }
 0xab1   : > { %v1652_v13 = vpop.xlane.xlu2 %1651 }
 0xab2   : > { %v1654_v26 = vmul.f32 %v1652_v13, %v2413_v52 }
 0xab4   : > { %v2025_v28 = vpop.eup %2024  ;;  %v1656_v20 = vadd.f32 1e-05, %v1654_v26 }
 0xab5   : > { %v1658_v29 = vmul.f32 %v2025_v28, %v1655_v24  ;;  %vm1664_vm14 = vweird.f32 %v2025_v28 }
 0xab6   : > { %2026 = vrsqrt.f32 %v1656_v20  ;;  %vm1665_vm15 = vmor %vm1663_vm0, %vm1664_vm14  ;;  %vm1673_vm3 = vweird.f32 %v1656_v20 }
 0xab7   : > { %v1659_v8 = vmul.f32 %v2025_v28, %v1658_v29 }
 0xab9   : > { %v1660_v30 = vmul.f32 0.5, %v1659_v8 }
 0xabb   : > { %v1661_v31 = vsub.f32 1.5, %v1660_v30 }
 0xabc   : > { %v2027_v35 = vpop.eup %2026 }
 0xabd   : > { %v1662_v36 = vmul.f32 %v2025_v28, %v1661_v31  ;;  %v1668_v37 = vmul.f32 %v2027_v35, %v1656_v20  ;;  %vm1674_vm2 = vweird.f32 %v2027_v35 }
 0xabe   : > { %vm1675_vm4 = vmor %vm1673_vm3, %vm1674_vm2 }
 0xabf   : > { %v1666_v39 = vsel %vm1665_vm15, %v2025_v28, %v1662_v36  ;;  %v1669_v52 = vmul.f32 %v2027_v35, %v1668_v37 }
 0xac0   : > { %v1677_v41 = vmul.f32 %v1666_v39, %v1643_v27 }
 0xac1   : > { %v1670_v42 = vmul.f32 0.5, %v1669_v52 }
 0xac2   : > { %v1682_v43 = vmul.f32 %v1948_v38, %v1677_v41 }
 0xac3   : > { %v1671_v51 = vsub.f32 1.5, %v1670_v42 }
 0xac4   : > { %v1687_v44 = vadd.f32 %v1949_v40, %v1682_v43 }
 0xac5   : > { %v1672_v45 = vmul.f32 %v2027_v35, %v1671_v51 }
 0xac6   : > { %v1689_v46 = vadd.f32 %v1687_v44, %v2440_v32 }
 0xac7   : > { %v1676_v47 = vsel %vm1675_vm4, %v2027_v35, %v1672_v45 }
 0xac8   : > { %v1691_v48 = vpack.c.bf16 %v1689_v46, %v1689_v46  ;;  %v1678_v49 = vmul.f32 %v1676_v47, %v1644_v18 }
 0xaca   : > { %1694 = vst.msk [vmem:[%s523_s30] sm:$0xf] %vm1693_vm5, %v1691_v48  ;;  %v1683_v50 = vmul.f32 %v1948_v38, %v1678_v49 }
 0xacc   : > { %v1688_v53 = vadd.f32 %v1949_v40, %v1683_v50 }
 0xace   : > { %v1690_v54 = vadd.f32 %v1688_v53, %v2442_v34 }
 0xad0   : > { %v1692_v55 = vpack.c.bf16 %v1690_v54, %v1690_v54 }
 0xad2   : > { %1695 = vst.msk [vmem:[%s523_s30 + $0x4] sm:$0xf] %vm1693_vm5, %v1692_v55 }
 0xad3 PF: > { %s26_s21 = sadd.s32 1, %s2034_s21  }
 0xad4   : > { %p23_p4 = scmp.ge.s32.totalorder %s26_s21, 4  }
 0xad6   :  { %25 = sbr.rel (!%p23_p4) target bundleno = 2 (0x2), region = 114 }

</bundles_post_ra>
